<compile_context>
chip_gen: v5e
topology: v5e:2x2
jax: 0.10.0
libtpu: 0.0.40
codegen_flags: <defaults>
</compile_context>

<pallas_src>
import functools

import jax
import jax.numpy as jnp
from jax.experimental import pallas as pl
from jax.experimental.pallas import tpu as pltpu


def _round_up(x, m):
    return (x + m - 1) // m * m


# ----------------------------- Pallas kernel --------------------------------
def _bigru_dir_kernel(lens_ref, gi_ref, whh_ref, bhn_ref, y_ref, hf_ref):
    """One GRU direction x one batch tile. grid = (direction, batch_tile).

    Shapes seen by the kernel (direction axis squeezed away by BlockSpec):
      lens_ref: (Bt, 1)      int32 sequence lengths (0 for padded batch rows)
      gi_ref:   (T, Bt, 3Hp) bf16  precomputed x @ W_ih^T + (b_ih [+ b_hr/b_hz])
      whh_ref:  (Hp, 3Hp)    bf16  W_hh^T (gate-padded, lane aligned)
      bhn_ref:  (1, Hp)      f32   n-gate hidden bias (added inside r*(...))
      y_ref:    (T, Bt, Hp)  f32   per-step outputs (padded positions zeroed)
      hf_ref:   (Bt, Hp)     f32   final hidden state
    """
    d = pl.program_id(0)
    T, Bt, G3 = gi_ref.shape
    Hp = G3 // 3

    whh = whh_ref[...]        # (Hp, 3Hp) bf16, resident, loaded once
    bhn = bhn_ref[...]        # (1, Hp)   f32
    lens = lens_ref[...]      # (Bt, 1)   int32

    def step(t, h):
        gi = gi_ref[t].astype(jnp.float32)                       # (Bt, 3Hp)
        gh = jnp.dot(h.astype(jnp.bfloat16), whh,
                     preferred_element_type=jnp.float32)         # (Bt, 3Hp) f32 acc
        # PyTorch gate order [r, z, n]; slices are 128-lane aligned (Hp % 128 == 0)
        r = jax.nn.sigmoid(gi[:, 0 * Hp:1 * Hp] + gh[:, 0 * Hp:1 * Hp])
        z = jax.nn.sigmoid(gi[:, 1 * Hp:2 * Hp] + gh[:, 1 * Hp:2 * Hp])
        n = jnp.tanh(gi[:, 2 * Hp:3 * Hp] + r * (gh[:, 2 * Hp:3 * Hp] + bhn))
        h_new = (1.0 - z) * n + z * h
        valid = t < lens                                         # (Bt, 1) bool
        y_ref[t] = jnp.where(valid, h_new, 0.0).astype(y_ref.dtype)
        return jnp.where(valid, h_new, h)                        # freeze h past length

    def run(reverse):
        h = jnp.zeros((Bt, Hp), jnp.float32)
        if T <= 32:
            # Fully static time indices -> immediate-addressed loads/stores.
            for s in range(T):
                t = (T - 1 - s) if reverse else s
                h = step(t, h)
        else:
            body = (lambda s, hh: step(T - 1 - s, hh)) if reverse else step
            h = jax.lax.fori_loop(0, T, body, h, unroll=8)
        hf_ref[...] = h.astype(hf_ref.dtype)

    @pl.when(d == 0)   # forward in time
    def _():
        run(False)

    @pl.when(d == 1)   # backward in time == packed backward semantics
    def _():
        run(True)


def _pick_batch_tile(Bp):
    if Bp <= 256:
        return Bp
    for cand in (256, 128, 64, 32, 16):      # >=16 keeps bf16 sublane tiling happy
        if Bp % cand == 0:
            return cand
    return Bp


def bigru_layer(x, lens_col, wih_t, whh_t, bih, bhn):
    """One bidirectional GRU layer.

    x:        (T, Bp, I)   f32
    lens_col: (Bp, 1)      int32
    wih_t:    (2, I, 3Hp)  bf16, whh_t: (2, Hp, 3Hp) bf16,
    bih:      (2, 3Hp)     f32 (b_hr/b_hz folded in), bhn: (2, 1, Hp) f32
    Returns y: (2, T, Bp, Hp) f32, h_final: (2, Bp, Hp) f32.
    """
    T, Bp, _ = x.shape
    Hp = whh_t.shape[1]
    G3 = 3 * Hp
    Bt = _pick_batch_tile(Bp)
    nb = Bp // Bt

    # Hoisted input projection: one big bf16 MXU matmul for all timesteps and
    # both directions (plain XLA before the recurrent kernel), stored bf16.
    gi = jnp.einsum('tbi,dig->dtbg', x.astype(jnp.bfloat16), wih_t,
                    preferred_element_type=jnp.float32)
    gi = (gi + bih[:, None, None, :]).astype(jnp.bfloat16)        # (2,T,Bp,3Hp)

    # Scoped VMEM sized to the double-buffered slabs (+ headroom), capped safely
    # under the v7x 64 MiB/TC physical VMEM.
    vmem_need = (2 * (T * Bt * G3 * 2 + T * Bt * Hp * 4)          # gi + y, x2 buffers
                 + 2 * (Hp * G3 * 2) + (1 << 20))                 # weights + slack
    vmem_limit = int(min(max(2 * vmem_need, 32 << 20), 48 << 20))

    y, h_final = pl.pallas_call(
        _bigru_dir_kernel,
        out_shape=(jax.ShapeDtypeStruct((2, T, Bp, Hp), jnp.float32),
                   jax.ShapeDtypeStruct((2, Bp, Hp), jnp.float32)),
        grid_spec=pltpu.PrefetchScalarGridSpec(
            num_scalar_prefetch=0,
            grid=(2, nb),                                          # (direction, batch tile)
            in_specs=[
                pl.BlockSpec((Bt, 1), lambda d, b: (b, 0)),         # lengths
                pl.BlockSpec((None, T, Bt, G3), lambda d, b: (d, 0, b, 0)),  # gi slab
                pl.BlockSpec((None, Hp, G3), lambda d, b: (d, 0, 0)),        # W_hh^T
                pl.BlockSpec((None, 1, Hp), lambda d, b: (d, 0, 0)),         # b_hn
            ],
            out_specs=[
                pl.BlockSpec((None, T, Bt, Hp), lambda d, b: (d, 0, b, 0)),  # y
                pl.BlockSpec((None, Bt, Hp), lambda d, b: (d, b, 0)),        # h_final
            ],
        ),
        compiler_params=pltpu.CompilerParams(
            # Directions / batch tiles are independent -> megacore-parallel on v7x.
            dimension_semantics=("parallel", "parallel"),
            vmem_limit_bytes=vmem_limit),
    )(lens_col, gi, whh_t, bhn)
    return y, h_final


# ------------------------------ JAX glue -------------------------------------
def encoder_forward(params, input_seq, input_lengths):
    """input_seq: (T, B) int32 token ids, input_lengths: (B,) int32.
       Returns (outputs (T, B, H), hidden (n_layers*2, B, H))."""
    T, B = input_seq.shape
    H = params["hidden_size"]

    embedded = params["embedding"][input_seq]                    # (T, B, H)

    # Pad batch to a sublane multiple; padded rows get length 0 (always masked).
    Bp = _round_up(B, 8)
    pad_b = Bp - B
    x = jnp.pad(embedded, ((0, 0), (0, pad_b), (0, 0)))
    lens_col = jnp.pad(input_lengths, (0, pad_b)).astype(jnp.int32).reshape(Bp, 1)

    layer_in = x
    finals = []
    y2 = None
    n_layers = params["n_layers"]
    for li, lp in enumerate(params["gru"]):
        y2, hf2 = bigru_layer(layer_in, lens_col,
                              lp["wih_t"], lp["whh_t"], lp["bih"], lp["bhn"])
        finals.append(hf2[0, :B, :H])                            # forward final hidden
        finals.append(hf2[1, :B, :H])                            # backward final hidden
        if li + 1 < n_layers:
            # Padded-layout handoff: next layer's W_ih was built against a
            # 2*Hp-wide input, and padded hidden columns are exactly zero, so
            # no slicing/re-layout is needed. (Inference: dropout = identity.)
            layer_in = jnp.concatenate([y2[0], y2[1]], axis=-1)   # (T, Bp, 2Hp)

    # outputs[:, :, :H] + outputs[:, :, H:]  (sum of the two directions)
    outputs = y2[0, :, :B, :H] + y2[1, :, :B, :H]                # (T, B, H)
    hidden = jnp.stack(finals, axis=0)                           # (2*n_layers, B, H)
    return outputs, hidden


# --------------------------- parameter init / prep ---------------------------
def init_params(key, vocab_size, hidden_size, n_layers=2):
    """Raw parameters in PyTorch nn.GRU layout."""
    k_emb, key = jax.random.split(key)
    params = {
        "n_layers": n_layers,
        "hidden_size": hidden_size,
        "embedding": jax.random.normal(k_emb, (vocab_size, hidden_size), jnp.float32),
        "gru": [],
    }
    bound = 1.0 / float(jnp.sqrt(hidden_size))
    for layer in range(n_layers):
        in_size = hidden_size if layer == 0 else 2 * hidden_size
        layer_p = {}
        for direction in ("fwd", "bwd"):
            ks = jax.random.split(key, 5)
            key = ks[0]
            w_ih = jax.random.uniform(ks[1], (3 * hidden_size, in_size),
                                      jnp.float32, -bound, bound)
            w_hh = jax.random.uniform(ks[2], (3 * hidden_size, hidden_size),
                                      jnp.float32, -bound, bound)
            b_ih = jax.random.uniform(ks[3], (3 * hidden_size,),
                                      jnp.float32, -bound, bound)
            b_hh = jax.random.uniform(ks[4], (3 * hidden_size,),
                                      jnp.float32, -bound, bound)
            layer_p[direction] = (w_ih, w_hh, b_ih, b_hh)
        params["gru"].append(layer_p)
    return params


def _prepare_layer(layer_raw, H, Hp, first_layer):
    """Transpose PyTorch-layout GRU weights, pad each gate to Hp (128-lane
    aligned) columns, fold b_hr/b_hz into b_ih, and cast matmul operands to
    bf16. Zero padding is inert: padded hidden columns / batch rows stay 0."""
    in_w = H if first_layer else 2 * Hp          # layer>=1 consumes padded concat
    src_dst = [(0, 0)] if first_layer else [(0, 0), (H, Hp)]
    wihs, whhs, bihs, bhns = [], [], [], []
    for direction in ("fwd", "bwd"):
        w_ih, w_hh, b_ih, b_hh = layer_raw[direction]
        wih_t = jnp.zeros((in_w, 3 * Hp), jnp.float32)
        whh_t = jnp.zeros((Hp, 3 * Hp), jnp.float32)
        bih = jnp.zeros((3 * Hp,), jnp.float32)
        bhn = jnp.zeros((Hp,), jnp.float32)
        for g in range(3):                                        # [r, z, n]
            for (src, dst) in src_dst:
                wih_t = wih_t.at[dst:dst + H, g * Hp:g * Hp + H].set(
                    w_ih[g * H:(g + 1) * H, src:src + H].T)
            whh_t = whh_t.at[:H, g * Hp:g * Hp + H].set(w_hh[g * H:(g + 1) * H, :].T)
            if g < 2:   # fold b_hr / b_hz into the (hoisted) input bias
                bih = bih.at[g * Hp:g * Hp + H].set(
                    b_ih[g * H:(g + 1) * H] + b_hh[g * H:(g + 1) * H])
            else:       # b_hn must stay inside r*(...) -> kept separate
                bih = bih.at[g * Hp:g * Hp + H].set(b_ih[g * H:(g + 1) * H])
                bhn = bhn.at[:H].set(b_hh[g * H:(g + 1) * H])
        wihs.append(wih_t.astype(jnp.bfloat16))
        whhs.append(whh_t.astype(jnp.bfloat16))
        bihs.append(bih)
        bhns.append(bhn)
    return {
        "wih_t": jnp.stack(wihs),               # (2, in_w, 3Hp) bf16
        "whh_t": jnp.stack(whhs),               # (2, Hp, 3Hp)   bf16
        "bih": jnp.stack(bihs),                 # (2, 3Hp)       f32
        "bhn": jnp.stack(bhns)[:, None, :],     # (2, 1, Hp)     f32
    }


def prepare_params(raw):
    """Pad gate dims to a 128 multiple and stack fwd/bwd weights per layer."""
    H = raw["hidden_size"]
    Hp = _round_up(H, 128)
    prepared = {
        "n_layers": raw["n_layers"],
        "hidden_size": H,
        "embedding": raw["embedding"],
        "gru": [],
    }
    for li, layer_p in enumerate(raw["gru"]):
        prepared["gru"].append(_prepare_layer(layer_p, H, Hp, first_layer=(li == 0)))
    return prepared


# --------------------------------- main ---------------------------------------
if __name__ == "__main__":
    T, B, H, V = 8, 4, 32, 20      # seq_len, batch, hidden_size, vocab
    key = jax.random.PRNGKey(0)
    k_par, k_tok = jax.random.split(key)

    params = prepare_params(init_params(k_par, V, H, n_layers=2))
    input_seq = jax.random.randint(k_tok, (T, B), 0, V, dtype=jnp.int32)
    # pack_padded_sequence requires lengths sorted in decreasing order
    input_lengths = jnp.array([8, 7, 5, 3], dtype=jnp.int32)

    fwd = jax.jit(functools.partial(encoder_forward, params))
    outputs, hidden = fwd(input_seq, input_lengths)
    jax.block_until_ready((outputs, hidden))

    assert outputs.shape == (T, B, H)
    assert hidden.shape == (2 * 2, B, H)
    assert bool(jnp.all(jnp.isfinite(outputs))) and bool(jnp.all(jnp.isfinite(hidden)))
    # padded positions must be zero (pad_packed_sequence semantics)
    pad_mask = (jnp.arange(T)[:, None] >= input_lengths[None, :])
    assert bool(jnp.all(jnp.where(pad_mask[:, :, None], outputs, 0.0) == 0.0))

    print("KERNEL_OK")
</pallas_src>

<mosaic_0001>
module attributes {stable_mosaic.version = 11 : i64} {
  func.func @_bigru_dir_kernel(%arg0: i32, %arg1: i32, %arg2: memref<8x1xi32, #tpu.memory_space<vmem>>, %arg3: memref<1x8x8x384xbf16, #tpu.memory_space<vmem>>, %arg4: memref<1x128x384xbf16, #tpu.memory_space<vmem>>, %arg5: memref<1x1x128xf32, #tpu.memory_space<vmem>>, %arg6: memref<1x8x8x128xf32, #tpu.memory_space<vmem>>, %arg7: memref<1x8x128xf32, #tpu.memory_space<vmem>>) attributes {dimension_semantics = [#tpu.dimension_semantics<parallel>, #tpu.dimension_semantics<parallel>], iteration_bounds = array<i64: 2, 1>, scalar_prefetch = 0 : i64, scratch_operands = 0 : i64, tpu.core_type = #tpu.core_type<tc>, window_params = [{transform_indices = @transform_0, window_bounds = array<i64: 8, 1>}, {transform_indices = @transform_1, window_bounds = array<i64: 1, 8, 8, 384>}, {transform_indices = @transform_2, window_bounds = array<i64: 1, 128, 384>}, {transform_indices = @transform_3, window_bounds = array<i64: 1, 1, 128>}, {transform_indices = @transform_4, window_bounds = array<i64: 1, 8, 8, 128>}, {transform_indices = @transform_5, window_bounds = array<i64: 1, 8, 128>}]} {
    %c0 = arith.constant 0 : index
    %c0_0 = arith.constant 0 : index
    %c0_1 = arith.constant 0 : index
    %0 = vector.load %arg4[%c0, %c0_0, %c0_1] : memref<1x128x384xbf16, #tpu.memory_space<vmem>>, vector<1x128x384xbf16>
    %1 = vector.shape_cast %0 : vector<1x128x384xbf16> to vector<128x384xbf16>
    %c0_2 = arith.constant 0 : index
    %c0_3 = arith.constant 0 : index
    %c0_4 = arith.constant 0 : index
    %2 = vector.load %arg5[%c0_2, %c0_3, %c0_4] : memref<1x1x128xf32, #tpu.memory_space<vmem>>, vector<1x1x128xf32>
    %3 = vector.shape_cast %2 : vector<1x1x128xf32> to vector<1x128xf32>
    %c0_5 = arith.constant 0 : index
    %c0_6 = arith.constant 0 : index
    %4 = vector.load %arg2[%c0_5, %c0_6] : memref<8x1xi32, #tpu.memory_space<vmem>>, vector<8x1xi32>
    %c0_i32 = arith.constant 0 : i32
    %5 = arith.cmpi eq, %arg0, %c0_i32 : i32
    %6 = arith.extui %5 : i1 to i32
    %c0_i32_7 = arith.constant 0 : i32
    %7 = arith.cmpi ne, %6, %c0_i32_7 : i32
    scf.if %7 {
      %cst = arith.constant 0.000000e+00 : f32
      %11 = vector.broadcast %cst : f32 to vector<8x128xf32>
      %c0_9 = arith.constant 0 : index
      %c0_10 = arith.constant 0 : index
      %c0_11 = arith.constant 0 : index
      %c0_12 = arith.constant 0 : index
      %12 = vector.load %arg3[%c0_9, %c0_10, %c0_11, %c0_12] : memref<1x8x8x384xbf16, #tpu.memory_space<vmem>>, vector<1x1x8x384xbf16>
      %13 = vector.shape_cast %12 : vector<1x1x8x384xbf16> to vector<8x384xbf16>
      %14 = arith.extf %13 : vector<8x384xbf16> to vector<8x384xf32>
      %15 = arith.truncf %11 : vector<8x128xf32> to vector<8x128xbf16>
      %cst_13 = arith.constant dense<0.000000e+00> : vector<8x384xf32>
      %16 = tpu.matmul %15, %1, %cst_13 {dimension_numbers = #tpu.dot_dimension_numbers<[1], [0], [0], [1], [0, 0, 1, 1], [], []>} : vector<8x128xbf16>, vector<128x384xbf16>, vector<8x384xf32> -> vector<8x384xf32>
      %17 = vector.extract_strided_slice %14 {offsets = [0, 0], sizes = [8, 128], strides = [1, 1]} : vector<8x384xf32> to vector<8x128xf32>
      %18 = vector.extract_strided_slice %16 {offsets = [0, 0], sizes = [8, 128], strides = [1, 1]} : vector<8x384xf32> to vector<8x128xf32>
      %19 = arith.addf %17, %18 : vector<8x128xf32>
      %20 = arith.negf %19 : vector<8x128xf32>
      %21 = math.exp %20 : vector<8x128xf32>
      %cst_14 = arith.constant 1.000000e+00 : f32
      %22 = vector.broadcast %cst_14 : f32 to vector<8x128xf32>
      %23 = arith.addf %22, %21 : vector<8x128xf32>
      %24 = arith.divf %22, %23 : vector<8x128xf32>
      %25 = vector.extract_strided_slice %14 {offsets = [0, 128], sizes = [8, 128], strides = [1, 1]} : vector<8x384xf32> to vector<8x128xf32>
      %26 = vector.extract_strided_slice %16 {offsets = [0, 128], sizes = [8, 128], strides = [1, 1]} : vector<8x384xf32> to vector<8x128xf32>
      %27 = arith.addf %25, %26 : vector<8x128xf32>
      %28 = arith.negf %27 : vector<8x128xf32>
      %29 = math.exp %28 : vector<8x128xf32>
      %cst_15 = arith.constant 1.000000e+00 : f32
      %30 = vector.broadcast %cst_15 : f32 to vector<8x128xf32>
      %31 = arith.addf %30, %29 : vector<8x128xf32>
      %32 = arith.divf %30, %31 : vector<8x128xf32>
      %33 = vector.extract_strided_slice %14 {offsets = [0, 256], sizes = [8, 128], strides = [1, 1]} : vector<8x384xf32> to vector<8x128xf32>
      %34 = vector.extract_strided_slice %16 {offsets = [0, 256], sizes = [8, 128], strides = [1, 1]} : vector<8x384xf32> to vector<8x128xf32>
      %35 = vector.broadcast %3 : vector<1x128xf32> to vector<8x128xf32>
      %36 = arith.addf %34, %35 : vector<8x128xf32>
      %37 = arith.mulf %24, %36 : vector<8x128xf32>
      %38 = arith.addf %33, %37 : vector<8x128xf32>
      %39 = math.tanh %38 : vector<8x128xf32>
      %cst_16 = arith.constant 1.000000e+00 : f32
      %40 = vector.broadcast %cst_16 : f32 to vector<8x128xf32>
      %41 = arith.subf %40, %32 : vector<8x128xf32>
      %42 = arith.mulf %41, %39 : vector<8x128xf32>
      %43 = arith.mulf %32, %11 : vector<8x128xf32>
      %44 = arith.addf %42, %43 : vector<8x128xf32>
      %c0_i32_17 = arith.constant 0 : i32
      %45 = vector.broadcast %c0_i32_17 : i32 to vector<8x1xi32>
      %46 = arith.cmpi sgt, %4, %45 : vector<8x1xi32>
      %cst_18 = arith.constant 0.000000e+00 : f32
      %47 = vector.shape_cast %46 : vector<8x1xi1> to vector<8x1xi1>
      %48 = vector.broadcast %47 : vector<8x1xi1> to vector<8x128xi1>
      %49 = vector.broadcast %cst_18 : f32 to vector<8x128xf32>
      %50 = arith.select %48, %44, %49 : vector<8x128xi1>, vector<8x128xf32>
      %c0_19 = arith.constant 0 : index
      %c0_20 = arith.constant 0 : index
      %c0_21 = arith.constant 0 : index
      %c0_22 = arith.constant 0 : index
      %51 = vector.load %arg6[%c0_19, %c0_20, %c0_21, %c0_22] : memref<1x8x8x128xf32, #tpu.memory_space<vmem>>, vector<1x1x8x128xf32>
      %52 = vector.shape_cast %51 : vector<1x1x8x128xf32> to vector<8x128xf32>
      %53 = vector.shape_cast %50 : vector<8x128xf32> to vector<1x1x8x128xf32>
      tpu.vector_store %arg6[%c0_19, %c0_20, %c0_21, %c0_22], %53 {strides = array<i32>} : memref<1x8x8x128xf32, #tpu.memory_space<vmem>>, vector<1x1x8x128xf32>,
      %54 = vector.shape_cast %46 : vector<8x1xi1> to vector<8x1xi1>
      %55 = vector.broadcast %54 : vector<8x1xi1> to vector<8x128xi1>
      %56 = arith.select %55, %44, %11 : vector<8x128xi1>, vector<8x128xf32>
      %c0_23 = arith.constant 0 : index
      %c1 = arith.constant 1 : index
      %c0_24 = arith.constant 0 : index
      %c0_25 = arith.constant 0 : index
      %57 = vector.load %arg3[%c0_23, %c1, %c0_24, %c0_25] : memref<1x8x8x384xbf16, #tpu.memory_space<vmem>>, vector<1x1x8x384xbf16>
      %58 = vector.shape_cast %57 : vector<1x1x8x384xbf16> to vector<8x384xbf16>
      %59 = arith.extf %58 : vector<8x384xbf16> to vector<8x384xf32>
      %60 = arith.truncf %56 : vector<8x128xf32> to vector<8x128xbf16>
      %cst_26 = arith.constant dense<0.000000e+00> : vector<8x384xf32>
      %61 = tpu.matmul %60, %1, %cst_26 {dimension_numbers = #tpu.dot_dimension_numbers<[1], [0], [0], [1], [0, 0, 1, 1], [], []>} : vector<8x128xbf16>, vector<128x384xbf16>, vector<8x384xf32> -> vector<8x384xf32>
      %62 = vector.extract_strided_slice %59 {offsets = [0, 0], sizes = [8, 128], strides = [1, 1]} : vector<8x384xf32> to vector<8x128xf32>
      %63 = vector.extract_strided_slice %61 {offsets = [0, 0], sizes = [8, 128], strides = [1, 1]} : vector<8x384xf32> to vector<8x128xf32>
      %64 = arith.addf %62, %63 : vector<8x128xf32>
      %65 = arith.negf %64 : vector<8x128xf32>
      %66 = math.exp %65 : vector<8x128xf32>
      %cst_27 = arith.constant 1.000000e+00 : f32
      %67 = vector.broadcast %cst_27 : f32 to vector<8x128xf32>
      %68 = arith.addf %67, %66 : vector<8x128xf32>
      %69 = arith.divf %67, %68 : vector<8x128xf32>
      %70 = vector.extract_strided_slice %59 {offsets = [0, 128], sizes = [8, 128], strides = [1, 1]} : vector<8x384xf32> to vector<8x128xf32>
      %71 = vector.extract_strided_slice %61 {offsets = [0, 128], sizes = [8, 128], strides = [1, 1]} : vector<8x384xf32> to vector<8x128xf32>
      %72 = arith.addf %70, %71 : vector<8x128xf32>
      %73 = arith.negf %72 : vector<8x128xf32>
      %74 = math.exp %73 : vector<8x128xf32>
      %cst_28 = arith.constant 1.000000e+00 : f32
      %75 = vector.broadcast %cst_28 : f32 to vector<8x128xf32>
      %76 = arith.addf %75, %74 : vector<8x128xf32>
      %77 = arith.divf %75, %76 : vector<8x128xf32>
      %78 = vector.extract_strided_slice %59 {offsets = [0, 256], sizes = [8, 128], strides = [1, 1]} : vector<8x384xf32> to vector<8x128xf32>
      %79 = vector.extract_strided_slice %61 {offsets = [0, 256], sizes = [8, 128], strides = [1, 1]} : vector<8x384xf32> to vector<8x128xf32>
      %80 = vector.broadcast %3 : vector<1x128xf32> to vector<8x128xf32>
      %81 = arith.addf %79, %80 : vector<8x128xf32>
      %82 = arith.mulf %69, %81 : vector<8x128xf32>
      %83 = arith.addf %78, %82 : vector<8x128xf32>
      %84 = math.tanh %83 : vector<8x128xf32>
      %cst_29 = arith.constant 1.000000e+00 : f32
      %85 = vector.broadcast %cst_29 : f32 to vector<8x128xf32>
      %86 = arith.subf %85, %77 : vector<8x128xf32>
      %87 = arith.mulf %86, %84 : vector<8x128xf32>
      %88 = arith.mulf %77, %56 : vector<8x128xf32>
      %89 = arith.addf %87, %88 : vector<8x128xf32>
      %c1_i32_30 = arith.constant 1 : i32
      %90 = vector.broadcast %c1_i32_30 : i32 to vector<8x1xi32>
      %91 = arith.cmpi sgt, %4, %90 : vector<8x1xi32>
      %cst_31 = arith.constant 0.000000e+00 : f32
      %92 = vector.shape_cast %91 : vector<8x1xi1> to vector<8x1xi1>
      %93 = vector.broadcast %92 : vector<8x1xi1> to vector<8x128xi1>
      %94 = vector.broadcast %cst_31 : f32 to vector<8x128xf32>
      %95 = arith.select %93, %89, %94 : vector<8x128xi1>, vector<8x128xf32>
      %c0_32 = arith.constant 0 : index
      %c1_33 = arith.constant 1 : index
      %c0_34 = arith.constant 0 : index
      %c0_35 = arith.constant 0 : index
      %96 = vector.load %arg6[%c0_32, %c1_33, %c0_34, %c0_35] : memref<1x8x8x128xf32, #tpu.memory_space<vmem>>, vector<1x1x8x128xf32>
      %97 = vector.shape_cast %96 : vector<1x1x8x128xf32> to vector<8x128xf32>
      %98 = vector.shape_cast %95 : vector<8x128xf32> to vector<1x1x8x128xf32>
      tpu.vector_store %arg6[%c0_32, %c1_33, %c0_34, %c0_35], %98 {strides = array<i32>} : memref<1x8x8x128xf32, #tpu.memory_space<vmem>>, vector<1x1x8x128xf32>,
      %99 = vector.shape_cast %91 : vector<8x1xi1> to vector<8x1xi1>
      %100 = vector.broadcast %99 : vector<8x1xi1> to vector<8x128xi1>
      %101 = arith.select %100, %89, %56 : vector<8x128xi1>, vector<8x128xf32>
      %c0_36 = arith.constant 0 : index
      %c2 = arith.constant 2 : index
      %c0_37 = arith.constant 0 : index
      %c0_38 = arith.constant 0 : index
      %102 = vector.load %arg3[%c0_36, %c2, %c0_37, %c0_38] : memref<1x8x8x384xbf16, #tpu.memory_space<vmem>>, vector<1x1x8x384xbf16>
      %103 = vector.shape_cast %102 : vector<1x1x8x384xbf16> to vector<8x384xbf16>
      %104 = arith.extf %103 : vector<8x384xbf16> to vector<8x384xf32>
      %105 = arith.truncf %101 : vector<8x128xf32> to vector<8x128xbf16>
      %cst_39 = arith.constant dense<0.000000e+00> : vector<8x384xf32>
      %106 = tpu.matmul %105, %1, %cst_39 {dimension_numbers = #tpu.dot_dimension_numbers<[1], [0], [0], [1], [0, 0, 1, 1], [], []>} : vector<8x128xbf16>, vector<128x384xbf16>, vector<8x384xf32> -> vector<8x384xf32>
      %107 = vector.extract_strided_slice %104 {offsets = [0, 0], sizes = [8, 128], strides = [1, 1]} : vector<8x384xf32> to vector<8x128xf32>
      %108 = vector.extract_strided_slice %106 {offsets = [0, 0], sizes = [8, 128], strides = [1, 1]} : vector<8x384xf32> to vector<8x128xf32>
      %109 = arith.addf %107, %108 : vector<8x128xf32>
      %110 = arith.negf %109 : vector<8x128xf32>
      %111 = math.exp %110 : vector<8x128xf32>
      %cst_40 = arith.constant 1.000000e+00 : f32
      %112 = vector.broadcast %cst_40 : f32 to vector<8x128xf32>
      %113 = arith.addf %112, %111 : vector<8x128xf32>
      %114 = arith.divf %112, %113 : vector<8x128xf32>
      %115 = vector.extract_strided_slice %104 {offsets = [0, 128], sizes = [8, 128], strides = [1, 1]} : vector<8x384xf32> to vector<8x128xf32>
      %116 = vector.extract_strided_slice %106 {offsets = [0, 128], sizes = [8, 128], strides = [1, 1]} : vector<8x384xf32> to vector<8x128xf32>
      %117 = arith.addf %115, %116 : vector<8x128xf32>
      %118 = arith.negf %117 : vector<8x128xf32>
      %119 = math.exp %118 : vector<8x128xf32>
      %cst_41 = arith.constant 1.000000e+00 : f32
      %120 = vector.broadcast %cst_41 : f32 to vector<8x128xf32>
      %121 = arith.addf %120, %119 : vector<8x128xf32>
      %122 = arith.divf %120, %121 : vector<8x128xf32>
      %123 = vector.extract_strided_slice %104 {offsets = [0, 256], sizes = [8, 128], strides = [1, 1]} : vector<8x384xf32> to vector<8x128xf32>
      %124 = vector.extract_strided_slice %106 {offsets = [0, 256], sizes = [8, 128], strides = [1, 1]} : vector<8x384xf32> to vector<8x128xf32>
      %125 = vector.broadcast %3 : vector<1x128xf32> to vector<8x128xf32>
      %126 = arith.addf %124, %125 : vector<8x128xf32>
      %127 = arith.mulf %114, %126 : vector<8x128xf32>
      %128 = arith.addf %123, %127 : vector<8x128xf32>
      %129 = math.tanh %128 : vector<8x128xf32>
      %cst_42 = arith.constant 1.000000e+00 : f32
      %130 = vector.broadcast %cst_42 : f32 to vector<8x128xf32>
      %131 = arith.subf %130, %122 : vector<8x128xf32>
      %132 = arith.mulf %131, %129 : vector<8x128xf32>
      %133 = arith.mulf %122, %101 : vector<8x128xf32>
      %134 = arith.addf %132, %133 : vector<8x128xf32>
      %c2_i32 = arith.constant 2 : i32
      %135 = vector.broadcast %c2_i32 : i32 to vector<8x1xi32>
      %136 = arith.cmpi sgt, %4, %135 : vector<8x1xi32>
      %cst_43 = arith.constant 0.000000e+00 : f32
      %137 = vector.shape_cast %136 : vector<8x1xi1> to vector<8x1xi1>
      %138 = vector.broadcast %137 : vector<8x1xi1> to vector<8x128xi1>
      %139 = vector.broadcast %cst_43 : f32 to vector<8x128xf32>
      %140 = arith.select %138, %134, %139 : vector<8x128xi1>, vector<8x128xf32>
      %c0_44 = arith.constant 0 : index
      %c2_45 = arith.constant 2 : index
      %c0_46 = arith.constant 0 : index
      %c0_47 = arith.constant 0 : index
      %141 = vector.load %arg6[%c0_44, %c2_45, %c0_46, %c0_47] : memref<1x8x8x128xf32, #tpu.memory_space<vmem>>, vector<1x1x8x128xf32>
      %142 = vector.shape_cast %141 : vector<1x1x8x128xf32> to vector<8x128xf32>
      %143 = vector.shape_cast %140 : vector<8x128xf32> to vector<1x1x8x128xf32>
      tpu.vector_store %arg6[%c0_44, %c2_45, %c0_46, %c0_47], %143 {strides = array<i32>} : memref<1x8x8x128xf32, #tpu.memory_space<vmem>>, vector<1x1x8x128xf32>,
      %144 = vector.shape_cast %136 : vector<8x1xi1> to vector<8x1xi1>
      %145 = vector.broadcast %144 : vector<8x1xi1> to vector<8x128xi1>
      %146 = arith.select %145, %134, %101 : vector<8x128xi1>, vector<8x128xf32>
      %c0_48 = arith.constant 0 : index
      %c3 = arith.constant 3 : index
      %c0_49 = arith.constant 0 : index
      %c0_50 = arith.constant 0 : index
      %147 = vector.load %arg3[%c0_48, %c3, %c0_49, %c0_50] : memref<1x8x8x384xbf16, #tpu.memory_space<vmem>>, vector<1x1x8x384xbf16>
      %148 = vector.shape_cast %147 : vector<1x1x8x384xbf16> to vector<8x384xbf16>
      %149 = arith.extf %148 : vector<8x384xbf16> to vector<8x384xf32>
      %150 = arith.truncf %146 : vector<8x128xf32> to vector<8x128xbf16>
      %cst_51 = arith.constant dense<0.000000e+00> : vector<8x384xf32>
      %151 = tpu.matmul %150, %1, %cst_51 {dimension_numbers = #tpu.dot_dimension_numbers<[1], [0], [0], [1], [0, 0, 1, 1], [], []>} : vector<8x128xbf16>, vector<128x384xbf16>, vector<8x384xf32> -> vector<8x384xf32>
      %152 = vector.extract_strided_slice %149 {offsets = [0, 0], sizes = [8, 128], strides = [1, 1]} : vector<8x384xf32> to vector<8x128xf32>
      %153 = vector.extract_strided_slice %151 {offsets = [0, 0], sizes = [8, 128], strides = [1, 1]} : vector<8x384xf32> to vector<8x128xf32>
      %154 = arith.addf %152, %153 : vector<8x128xf32>
      %155 = arith.negf %154 : vector<8x128xf32>
      %156 = math.exp %155 : vector<8x128xf32>
      %cst_52 = arith.constant 1.000000e+00 : f32
      %157 = vector.broadcast %cst_52 : f32 to vector<8x128xf32>
      %158 = arith.addf %157, %156 : vector<8x128xf32>
      %159 = arith.divf %157, %158 : vector<8x128xf32>
      %160 = vector.extract_strided_slice %149 {offsets = [0, 128], sizes = [8, 128], strides = [1, 1]} : vector<8x384xf32> to vector<8x128xf32>
      %161 = vector.extract_strided_slice %151 {offsets = [0, 128], sizes = [8, 128], strides = [1, 1]} : vector<8x384xf32> to vector<8x128xf32>
      %162 = arith.addf %160, %161 : vector<8x128xf32>
      %163 = arith.negf %162 : vector<8x128xf32>
      %164 = math.exp %163 : vector<8x128xf32>
      %cst_53 = arith.constant 1.000000e+00 : f32
      %165 = vector.broadcast %cst_53 : f32 to vector<8x128xf32>
      %166 = arith.addf %165, %164 : vector<8x128xf32>
      %167 = arith.divf %165, %166 : vector<8x128xf32>
      %168 = vector.extract_strided_slice %149 {offsets = [0, 256], sizes = [8, 128], strides = [1, 1]} : vector<8x384xf32> to vector<8x128xf32>
      %169 = vector.extract_strided_slice %151 {offsets = [0, 256], sizes = [8, 128], strides = [1, 1]} : vector<8x384xf32> to vector<8x128xf32>
      %170 = vector.broadcast %3 : vector<1x128xf32> to vector<8x128xf32>
      %171 = arith.addf %169, %170 : vector<8x128xf32>
      %172 = arith.mulf %159, %171 : vector<8x128xf32>
      %173 = arith.addf %168, %172 : vector<8x128xf32>
      %174 = math.tanh %173 : vector<8x128xf32>
      %cst_54 = arith.constant 1.000000e+00 : f32
      %175 = vector.broadcast %cst_54 : f32 to vector<8x128xf32>
      %176 = arith.subf %175, %167 : vector<8x128xf32>
      %177 = arith.mulf %176, %174 : vector<8x128xf32>
      %178 = arith.mulf %167, %146 : vector<8x128xf32>
      %179 = arith.addf %177, %178 : vector<8x128xf32>
      %c3_i32 = arith.constant 3 : i32
      %180 = vector.broadcast %c3_i32 : i32 to vector<8x1xi32>
      %181 = arith.cmpi sgt, %4, %180 : vector<8x1xi32>
      %cst_55 = arith.constant 0.000000e+00 : f32
      %182 = vector.shape_cast %181 : vector<8x1xi1> to vector<8x1xi1>
      %183 = vector.broadcast %182 : vector<8x1xi1> to vector<8x128xi1>
      %184 = vector.broadcast %cst_55 : f32 to vector<8x128xf32>
      %185 = arith.select %183, %179, %184 : vector<8x128xi1>, vector<8x128xf32>
      %c0_56 = arith.constant 0 : index
      %c3_57 = arith.constant 3 : index
      %c0_58 = arith.constant 0 : index
      %c0_59 = arith.constant 0 : index
      %186 = vector.load %arg6[%c0_56, %c3_57, %c0_58, %c0_59] : memref<1x8x8x128xf32, #tpu.memory_space<vmem>>, vector<1x1x8x128xf32>
      %187 = vector.shape_cast %186 : vector<1x1x8x128xf32> to vector<8x128xf32>
      %188 = vector.shape_cast %185 : vector<8x128xf32> to vector<1x1x8x128xf32>
      tpu.vector_store %arg6[%c0_56, %c3_57, %c0_58, %c0_59], %188 {strides = array<i32>} : memref<1x8x8x128xf32, #tpu.memory_space<vmem>>, vector<1x1x8x128xf32>,
      %189 = vector.shape_cast %181 : vector<8x1xi1> to vector<8x1xi1>
      %190 = vector.broadcast %189 : vector<8x1xi1> to vector<8x128xi1>
      %191 = arith.select %190, %179, %146 : vector<8x128xi1>, vector<8x128xf32>
      %c0_60 = arith.constant 0 : index
      %c4 = arith.constant 4 : index
      %c0_61 = arith.constant 0 : index
      %c0_62 = arith.constant 0 : index
      %192 = vector.load %arg3[%c0_60, %c4, %c0_61, %c0_62] : memref<1x8x8x384xbf16, #tpu.memory_space<vmem>>, vector<1x1x8x384xbf16>
      %193 = vector.shape_cast %192 : vector<1x1x8x384xbf16> to vector<8x384xbf16>
      %194 = arith.extf %193 : vector<8x384xbf16> to vector<8x384xf32>
      %195 = arith.truncf %191 : vector<8x128xf32> to vector<8x128xbf16>
      %cst_63 = arith.constant dense<0.000000e+00> : vector<8x384xf32>
      %196 = tpu.matmul %195, %1, %cst_63 {dimension_numbers = #tpu.dot_dimension_numbers<[1], [0], [0], [1], [0, 0, 1, 1], [], []>} : vector<8x128xbf16>, vector<128x384xbf16>, vector<8x384xf32> -> vector<8x384xf32>
      %197 = vector.extract_strided_slice %194 {offsets = [0, 0], sizes = [8, 128], strides = [1, 1]} : vector<8x384xf32> to vector<8x128xf32>
      %198 = vector.extract_strided_slice %196 {offsets = [0, 0], sizes = [8, 128], strides = [1, 1]} : vector<8x384xf32> to vector<8x128xf32>
      %199 = arith.addf %197, %198 : vector<8x128xf32>
      %200 = arith.negf %199 : vector<8x128xf32>
      %201 = math.exp %200 : vector<8x128xf32>
      %cst_64 = arith.constant 1.000000e+00 : f32
      %202 = vector.broadcast %cst_64 : f32 to vector<8x128xf32>
      %203 = arith.addf %202, %201 : vector<8x128xf32>
      %204 = arith.divf %202, %203 : vector<8x128xf32>
      %205 = vector.extract_strided_slice %194 {offsets = [0, 128], sizes = [8, 128], strides = [1, 1]} : vector<8x384xf32> to vector<8x128xf32>
      %206 = vector.extract_strided_slice %196 {offsets = [0, 128], sizes = [8, 128], strides = [1, 1]} : vector<8x384xf32> to vector<8x128xf32>
      %207 = arith.addf %205, %206 : vector<8x128xf32>
      %208 = arith.negf %207 : vector<8x128xf32>
      %209 = math.exp %208 : vector<8x128xf32>
      %cst_65 = arith.constant 1.000000e+00 : f32
      %210 = vector.broadcast %cst_65 : f32 to vector<8x128xf32>
      %211 = arith.addf %210, %209 : vector<8x128xf32>
      %212 = arith.divf %210, %211 : vector<8x128xf32>
      %213 = vector.extract_strided_slice %194 {offsets = [0, 256], sizes = [8, 128], strides = [1, 1]} : vector<8x384xf32> to vector<8x128xf32>
      %214 = vector.extract_strided_slice %196 {offsets = [0, 256], sizes = [8, 128], strides = [1, 1]} : vector<8x384xf32> to vector<8x128xf32>
      %215 = vector.broadcast %3 : vector<1x128xf32> to vector<8x128xf32>
      %216 = arith.addf %214, %215 : vector<8x128xf32>
      %217 = arith.mulf %204, %216 : vector<8x128xf32>
      %218 = arith.addf %213, %217 : vector<8x128xf32>
      %219 = math.tanh %218 : vector<8x128xf32>
      %cst_66 = arith.constant 1.000000e+00 : f32
      %220 = vector.broadcast %cst_66 : f32 to vector<8x128xf32>
      %221 = arith.subf %220, %212 : vector<8x128xf32>
      %222 = arith.mulf %221, %219 : vector<8x128xf32>
      %223 = arith.mulf %212, %191 : vector<8x128xf32>
      %224 = arith.addf %222, %223 : vector<8x128xf32>
      %c4_i32 = arith.constant 4 : i32
      %225 = vector.broadcast %c4_i32 : i32 to vector<8x1xi32>
      %226 = arith.cmpi sgt, %4, %225 : vector<8x1xi32>
      %cst_67 = arith.constant 0.000000e+00 : f32
      %227 = vector.shape_cast %226 : vector<8x1xi1> to vector<8x1xi1>
      %228 = vector.broadcast %227 : vector<8x1xi1> to vector<8x128xi1>
      %229 = vector.broadcast %cst_67 : f32 to vector<8x128xf32>
      %230 = arith.select %228, %224, %229 : vector<8x128xi1>, vector<8x128xf32>
      %c0_68 = arith.constant 0 : index
      %c4_69 = arith.constant 4 : index
      %c0_70 = arith.constant 0 : index
      %c0_71 = arith.constant 0 : index
      %231 = vector.load %arg6[%c0_68, %c4_69, %c0_70, %c0_71] : memref<1x8x8x128xf32, #tpu.memory_space<vmem>>, vector<1x1x8x128xf32>
      %232 = vector.shape_cast %231 : vector<1x1x8x128xf32> to vector<8x128xf32>
      %233 = vector.shape_cast %230 : vector<8x128xf32> to vector<1x1x8x128xf32>
      tpu.vector_store %arg6[%c0_68, %c4_69, %c0_70, %c0_71], %233 {strides = array<i32>} : memref<1x8x8x128xf32, #tpu.memory_space<vmem>>, vector<1x1x8x128xf32>,
      %234 = vector.shape_cast %226 : vector<8x1xi1> to vector<8x1xi1>
      %235 = vector.broadcast %234 : vector<8x1xi1> to vector<8x128xi1>
      %236 = arith.select %235, %224, %191 : vector<8x128xi1>, vector<8x128xf32>
      %c0_72 = arith.constant 0 : index
      %c5 = arith.constant 5 : index
      %c0_73 = arith.constant 0 : index
      %c0_74 = arith.constant 0 : index
      %237 = vector.load %arg3[%c0_72, %c5, %c0_73, %c0_74] : memref<1x8x8x384xbf16, #tpu.memory_space<vmem>>, vector<1x1x8x384xbf16>
      %238 = vector.shape_cast %237 : vector<1x1x8x384xbf16> to vector<8x384xbf16>
      %239 = arith.extf %238 : vector<8x384xbf16> to vector<8x384xf32>
      %240 = arith.truncf %236 : vector<8x128xf32> to vector<8x128xbf16>
      %cst_75 = arith.constant dense<0.000000e+00> : vector<8x384xf32>
      %241 = tpu.matmul %240, %1, %cst_75 {dimension_numbers = #tpu.dot_dimension_numbers<[1], [0], [0], [1], [0, 0, 1, 1], [], []>} : vector<8x128xbf16>, vector<128x384xbf16>, vector<8x384xf32> -> vector<8x384xf32>
      %242 = vector.extract_strided_slice %239 {offsets = [0, 0], sizes = [8, 128], strides = [1, 1]} : vector<8x384xf32> to vector<8x128xf32>
      %243 = vector.extract_strided_slice %241 {offsets = [0, 0], sizes = [8, 128], strides = [1, 1]} : vector<8x384xf32> to vector<8x128xf32>
      %244 = arith.addf %242, %243 : vector<8x128xf32>
      %245 = arith.negf %244 : vector<8x128xf32>
      %246 = math.exp %245 : vector<8x128xf32>
      %cst_76 = arith.constant 1.000000e+00 : f32
      %247 = vector.broadcast %cst_76 : f32 to vector<8x128xf32>
      %248 = arith.addf %247, %246 : vector<8x128xf32>
      %249 = arith.divf %247, %248 : vector<8x128xf32>
      %250 = vector.extract_strided_slice %239 {offsets = [0, 128], sizes = [8, 128], strides = [1, 1]} : vector<8x384xf32> to vector<8x128xf32>
      %251 = vector.extract_strided_slice %241 {offsets = [0, 128], sizes = [8, 128], strides = [1, 1]} : vector<8x384xf32> to vector<8x128xf32>
      %252 = arith.addf %250, %251 : vector<8x128xf32>
      %253 = arith.negf %252 : vector<8x128xf32>
      %254 = math.exp %253 : vector<8x128xf32>
      %cst_77 = arith.constant 1.000000e+00 : f32
      %255 = vector.broadcast %cst_77 : f32 to vector<8x128xf32>
      %256 = arith.addf %255, %254 : vector<8x128xf32>
      %257 = arith.divf %255, %256 : vector<8x128xf32>
      %258 = vector.extract_strided_slice %239 {offsets = [0, 256], sizes = [8, 128], strides = [1, 1]} : vector<8x384xf32> to vector<8x128xf32>
      %259 = vector.extract_strided_slice %241 {offsets = [0, 256], sizes = [8, 128], strides = [1, 1]} : vector<8x384xf32> to vector<8x128xf32>
      %260 = vector.broadcast %3 : vector<1x128xf32> to vector<8x128xf32>
      %261 = arith.addf %259, %260 : vector<8x128xf32>
      %262 = arith.mulf %249, %261 : vector<8x128xf32>
      %263 = arith.addf %258, %262 : vector<8x128xf32>
      %264 = math.tanh %263 : vector<8x128xf32>
      %cst_78 = arith.constant 1.000000e+00 : f32
      %265 = vector.broadcast %cst_78 : f32 to vector<8x128xf32>
      %266 = arith.subf %265, %257 : vector<8x128xf32>
      %267 = arith.mulf %266, %264 : vector<8x128xf32>
      %268 = arith.mulf %257, %236 : vector<8x128xf32>
      %269 = arith.addf %267, %268 : vector<8x128xf32>
      %c5_i32 = arith.constant 5 : i32
      %270 = vector.broadcast %c5_i32 : i32 to vector<8x1xi32>
      %271 = arith.cmpi sgt, %4, %270 : vector<8x1xi32>
      %cst_79 = arith.constant 0.000000e+00 : f32
      %272 = vector.shape_cast %271 : vector<8x1xi1> to vector<8x1xi1>
      %273 = vector.broadcast %272 : vector<8x1xi1> to vector<8x128xi1>
      %274 = vector.broadcast %cst_79 : f32 to vector<8x128xf32>
      %275 = arith.select %273, %269, %274 : vector<8x128xi1>, vector<8x128xf32>
      %c0_80 = arith.constant 0 : index
      %c5_81 = arith.constant 5 : index
      %c0_82 = arith.constant 0 : index
      %c0_83 = arith.constant 0 : index
      %276 = vector.load %arg6[%c0_80, %c5_81, %c0_82, %c0_83] : memref<1x8x8x128xf32, #tpu.memory_space<vmem>>, vector<1x1x8x128xf32>
      %277 = vector.shape_cast %276 : vector<1x1x8x128xf32> to vector<8x128xf32>
      %278 = vector.shape_cast %275 : vector<8x128xf32> to vector<1x1x8x128xf32>
      tpu.vector_store %arg6[%c0_80, %c5_81, %c0_82, %c0_83], %278 {strides = array<i32>} : memref<1x8x8x128xf32, #tpu.memory_space<vmem>>, vector<1x1x8x128xf32>,
      %279 = vector.shape_cast %271 : vector<8x1xi1> to vector<8x1xi1>
      %280 = vector.broadcast %279 : vector<8x1xi1> to vector<8x128xi1>
      %281 = arith.select %280, %269, %236 : vector<8x128xi1>, vector<8x128xf32>
      %c0_84 = arith.constant 0 : index
      %c6 = arith.constant 6 : index
      %c0_85 = arith.constant 0 : index
      %c0_86 = arith.constant 0 : index
      %282 = vector.load %arg3[%c0_84, %c6, %c0_85, %c0_86] : memref<1x8x8x384xbf16, #tpu.memory_space<vmem>>, vector<1x1x8x384xbf16>
      %283 = vector.shape_cast %282 : vector<1x1x8x384xbf16> to vector<8x384xbf16>
      %284 = arith.extf %283 : vector<8x384xbf16> to vector<8x384xf32>
      %285 = arith.truncf %281 : vector<8x128xf32> to vector<8x128xbf16>
      %cst_87 = arith.constant dense<0.000000e+00> : vector<8x384xf32>
      %286 = tpu.matmul %285, %1, %cst_87 {dimension_numbers = #tpu.dot_dimension_numbers<[1], [0], [0], [1], [0, 0, 1, 1], [], []>} : vector<8x128xbf16>, vector<128x384xbf16>, vector<8x384xf32> -> vector<8x384xf32>
      %287 = vector.extract_strided_slice %284 {offsets = [0, 0], sizes = [8, 128], strides = [1, 1]} : vector<8x384xf32> to vector<8x128xf32>
      %288 = vector.extract_strided_slice %286 {offsets = [0, 0], sizes = [8, 128], strides = [1, 1]} : vector<8x384xf32> to vector<8x128xf32>
      %289 = arith.addf %287, %288 : vector<8x128xf32>
      %290 = arith.negf %289 : vector<8x128xf32>
      %291 = math.exp %290 : vector<8x128xf32>
      %cst_88 = arith.constant 1.000000e+00 : f32
      %292 = vector.broadcast %cst_88 : f32 to vector<8x128xf32>
      %293 = arith.addf %292, %291 : vector<8x128xf32>
      %294 = arith.divf %292, %293 : vector<8x128xf32>
      %295 = vector.extract_strided_slice %284 {offsets = [0, 128], sizes = [8, 128], strides = [1, 1]} : vector<8x384xf32> to vector<8x128xf32>
      %296 = vector.extract_strided_slice %286 {offsets = [0, 128], sizes = [8, 128], strides = [1, 1]} : vector<8x384xf32> to vector<8x128xf32>
      %297 = arith.addf %295, %296 : vector<8x128xf32>
      %298 = arith.negf %297 : vector<8x128xf32>
      %299 = math.exp %298 : vector<8x128xf32>
      %cst_89 = arith.constant 1.000000e+00 : f32
      %300 = vector.broadcast %cst_89 : f32 to vector<8x128xf32>
      %301 = arith.addf %300, %299 : vector<8x128xf32>
      %302 = arith.divf %300, %301 : vector<8x128xf32>
      %303 = vector.extract_strided_slice %284 {offsets = [0, 256], sizes = [8, 128], strides = [1, 1]} : vector<8x384xf32> to vector<8x128xf32>
      %304 = vector.extract_strided_slice %286 {offsets = [0, 256], sizes = [8, 128], strides = [1, 1]} : vector<8x384xf32> to vector<8x128xf32>
      %305 = vector.broadcast %3 : vector<1x128xf32> to vector<8x128xf32>
      %306 = arith.addf %304, %305 : vector<8x128xf32>
      %307 = arith.mulf %294, %306 : vector<8x128xf32>
      %308 = arith.addf %303, %307 : vector<8x128xf32>
      %309 = math.tanh %308 : vector<8x128xf32>
      %cst_90 = arith.constant 1.000000e+00 : f32
      %310 = vector.broadcast %cst_90 : f32 to vector<8x128xf32>
      %311 = arith.subf %310, %302 : vector<8x128xf32>
      %312 = arith.mulf %311, %309 : vector<8x128xf32>
      %313 = arith.mulf %302, %281 : vector<8x128xf32>
      %314 = arith.addf %312, %313 : vector<8x128xf32>
      %c6_i32 = arith.constant 6 : i32
      %315 = vector.broadcast %c6_i32 : i32 to vector<8x1xi32>
      %316 = arith.cmpi sgt, %4, %315 : vector<8x1xi32>
      %cst_91 = arith.constant 0.000000e+00 : f32
      %317 = vector.shape_cast %316 : vector<8x1xi1> to vector<8x1xi1>
      %318 = vector.broadcast %317 : vector<8x1xi1> to vector<8x128xi1>
      %319 = vector.broadcast %cst_91 : f32 to vector<8x128xf32>
      %320 = arith.select %318, %314, %319 : vector<8x128xi1>, vector<8x128xf32>
      %c0_92 = arith.constant 0 : index
      %c6_93 = arith.constant 6 : index
      %c0_94 = arith.constant 0 : index
      %c0_95 = arith.constant 0 : index
      %321 = vector.load %arg6[%c0_92, %c6_93, %c0_94, %c0_95] : memref<1x8x8x128xf32, #tpu.memory_space<vmem>>, vector<1x1x8x128xf32>
      %322 = vector.shape_cast %321 : vector<1x1x8x128xf32> to vector<8x128xf32>
      %323 = vector.shape_cast %320 : vector<8x128xf32> to vector<1x1x8x128xf32>
      tpu.vector_store %arg6[%c0_92, %c6_93, %c0_94, %c0_95], %323 {strides = array<i32>} : memref<1x8x8x128xf32, #tpu.memory_space<vmem>>, vector<1x1x8x128xf32>,
      %324 = vector.shape_cast %316 : vector<8x1xi1> to vector<8x1xi1>
      %325 = vector.broadcast %324 : vector<8x1xi1> to vector<8x128xi1>
      %326 = arith.select %325, %314, %281 : vector<8x128xi1>, vector<8x128xf32>
      %c0_96 = arith.constant 0 : index
      %c7 = arith.constant 7 : index
      %c0_97 = arith.constant 0 : index
      %c0_98 = arith.constant 0 : index
      %327 = vector.load %arg3[%c0_96, %c7, %c0_97, %c0_98] : memref<1x8x8x384xbf16, #tpu.memory_space<vmem>>, vector<1x1x8x384xbf16>
      %328 = vector.shape_cast %327 : vector<1x1x8x384xbf16> to vector<8x384xbf16>
      %329 = arith.extf %328 : vector<8x384xbf16> to vector<8x384xf32>
      %330 = arith.truncf %326 : vector<8x128xf32> to vector<8x128xbf16>
      %cst_99 = arith.constant dense<0.000000e+00> : vector<8x384xf32>
      %331 = tpu.matmul %330, %1, %cst_99 {dimension_numbers = #tpu.dot_dimension_numbers<[1], [0], [0], [1], [0, 0, 1, 1], [], []>} : vector<8x128xbf16>, vector<128x384xbf16>, vector<8x384xf32> -> vector<8x384xf32>
      %332 = vector.extract_strided_slice %329 {offsets = [0, 0], sizes = [8, 128], strides = [1, 1]} : vector<8x384xf32> to vector<8x128xf32>
      %333 = vector.extract_strided_slice %331 {offsets = [0, 0], sizes = [8, 128], strides = [1, 1]} : vector<8x384xf32> to vector<8x128xf32>
      %334 = arith.addf %332, %333 : vector<8x128xf32>
      %335 = arith.negf %334 : vector<8x128xf32>
      %336 = math.exp %335 : vector<8x128xf32>
      %cst_100 = arith.constant 1.000000e+00 : f32
      %337 = vector.broadcast %cst_100 : f32 to vector<8x128xf32>
      %338 = arith.addf %337, %336 : vector<8x128xf32>
      %339 = arith.divf %337, %338 : vector<8x128xf32>
      %340 = vector.extract_strided_slice %329 {offsets = [0, 128], sizes = [8, 128], strides = [1, 1]} : vector<8x384xf32> to vector<8x128xf32>
      %341 = vector.extract_strided_slice %331 {offsets = [0, 128], sizes = [8, 128], strides = [1, 1]} : vector<8x384xf32> to vector<8x128xf32>
      %342 = arith.addf %340, %341 : vector<8x128xf32>
      %343 = arith.negf %342 : vector<8x128xf32>
      %344 = math.exp %343 : vector<8x128xf32>
      %cst_101 = arith.constant 1.000000e+00 : f32
      %345 = vector.broadcast %cst_101 : f32 to vector<8x128xf32>
      %346 = arith.addf %345, %344 : vector<8x128xf32>
      %347 = arith.divf %345, %346 : vector<8x128xf32>
      %348 = vector.extract_strided_slice %329 {offsets = [0, 256], sizes = [8, 128], strides = [1, 1]} : vector<8x384xf32> to vector<8x128xf32>
      %349 = vector.extract_strided_slice %331 {offsets = [0, 256], sizes = [8, 128], strides = [1, 1]} : vector<8x384xf32> to vector<8x128xf32>
      %350 = vector.broadcast %3 : vector<1x128xf32> to vector<8x128xf32>
      %351 = arith.addf %349, %350 : vector<8x128xf32>
      %352 = arith.mulf %339, %351 : vector<8x128xf32>
      %353 = arith.addf %348, %352 : vector<8x128xf32>
      %354 = math.tanh %353 : vector<8x128xf32>
      %cst_102 = arith.constant 1.000000e+00 : f32
      %355 = vector.broadcast %cst_102 : f32 to vector<8x128xf32>
      %356 = arith.subf %355, %347 : vector<8x128xf32>
      %357 = arith.mulf %356, %354 : vector<8x128xf32>
      %358 = arith.mulf %347, %326 : vector<8x128xf32>
      %359 = arith.addf %357, %358 : vector<8x128xf32>
      %c7_i32 = arith.constant 7 : i32
      %360 = vector.broadcast %c7_i32 : i32 to vector<8x1xi32>
      %361 = arith.cmpi sgt, %4, %360 : vector<8x1xi32>
      %cst_103 = arith.constant 0.000000e+00 : f32
      %362 = vector.shape_cast %361 : vector<8x1xi1> to vector<8x1xi1>
      %363 = vector.broadcast %362 : vector<8x1xi1> to vector<8x128xi1>
      %364 = vector.broadcast %cst_103 : f32 to vector<8x128xf32>
      %365 = arith.select %363, %359, %364 : vector<8x128xi1>, vector<8x128xf32>
      %c0_104 = arith.constant 0 : index
      %c7_105 = arith.constant 7 : index
      %c0_106 = arith.constant 0 : index
      %c0_107 = arith.constant 0 : index
      %366 = vector.load %arg6[%c0_104, %c7_105, %c0_106, %c0_107] : memref<1x8x8x128xf32, #tpu.memory_space<vmem>>, vector<1x1x8x128xf32>
      %367 = vector.shape_cast %366 : vector<1x1x8x128xf32> to vector<8x128xf32>
      %368 = vector.shape_cast %365 : vector<8x128xf32> to vector<1x1x8x128xf32>
      tpu.vector_store %arg6[%c0_104, %c7_105, %c0_106, %c0_107], %368 {strides = array<i32>} : memref<1x8x8x128xf32, #tpu.memory_space<vmem>>, vector<1x1x8x128xf32>,
      %369 = vector.shape_cast %361 : vector<8x1xi1> to vector<8x1xi1>
      %370 = vector.broadcast %369 : vector<8x1xi1> to vector<8x128xi1>
      %371 = arith.select %370, %359, %326 : vector<8x128xi1>, vector<8x128xf32>
      %c0_108 = arith.constant 0 : index
      %c0_109 = arith.constant 0 : index
      %c0_110 = arith.constant 0 : index
      %372 = vector.load %arg7[%c0_108, %c0_109, %c0_110] : memref<1x8x128xf32, #tpu.memory_space<vmem>>, vector<1x8x128xf32>
      %373 = vector.shape_cast %372 : vector<1x8x128xf32> to vector<8x128xf32>
      %374 = vector.shape_cast %371 : vector<8x128xf32> to vector<1x8x128xf32>
      tpu.vector_store %arg7[%c0_108, %c0_109, %c0_110], %374 {strides = array<i32>} : memref<1x8x128xf32, #tpu.memory_space<vmem>>, vector<1x8x128xf32>,
    } else {
    }
    %c1_i32 = arith.constant 1 : i32
    %8 = arith.cmpi eq, %arg0, %c1_i32 : i32
    %9 = arith.extui %8 : i1 to i32
    %c0_i32_8 = arith.constant 0 : i32
    %10 = arith.cmpi ne, %9, %c0_i32_8 : i32
    scf.if %10 {
      %cst = arith.constant 0.000000e+00 : f32
      %11 = vector.broadcast %cst : f32 to vector<8x128xf32>
      %c0_9 = arith.constant 0 : index
      %c7 = arith.constant 7 : index
      %c0_10 = arith.constant 0 : index
      %c0_11 = arith.constant 0 : index
      %12 = vector.load %arg3[%c0_9, %c7, %c0_10, %c0_11] : memref<1x8x8x384xbf16, #tpu.memory_space<vmem>>, vector<1x1x8x384xbf16>
      %13 = vector.shape_cast %12 : vector<1x1x8x384xbf16> to vector<8x384xbf16>
      %14 = arith.extf %13 : vector<8x384xbf16> to vector<8x384xf32>
      %15 = arith.truncf %11 : vector<8x128xf32> to vector<8x128xbf16>
      %cst_12 = arith.constant dense<0.000000e+00> : vector<8x384xf32>
      %16 = tpu.matmul %15, %1, %cst_12 {dimension_numbers = #tpu.dot_dimension_numbers<[1], [0], [0], [1], [0, 0, 1, 1], [], []>} : vector<8x128xbf16>, vector<128x384xbf16>, vector<8x384xf32> -> vector<8x384xf32>
      %17 = vector.extract_strided_slice %14 {offsets = [0, 0], sizes = [8, 128], strides = [1, 1]} : vector<8x384xf32> to vector<8x128xf32>
      %18 = vector.extract_strided_slice %16 {offsets = [0, 0], sizes = [8, 128], strides = [1, 1]} : vector<8x384xf32> to vector<8x128xf32>
      %19 = arith.addf %17, %18 : vector<8x128xf32>
      %20 = arith.negf %19 : vector<8x128xf32>
      %21 = math.exp %20 : vector<8x128xf32>
      %cst_13 = arith.constant 1.000000e+00 : f32
      %22 = vector.broadcast %cst_13 : f32 to vector<8x128xf32>
      %23 = arith.addf %22, %21 : vector<8x128xf32>
      %24 = arith.divf %22, %23 : vector<8x128xf32>
      %25 = vector.extract_strided_slice %14 {offsets = [0, 128], sizes = [8, 128], strides = [1, 1]} : vector<8x384xf32> to vector<8x128xf32>
      %26 = vector.extract_strided_slice %16 {offsets = [0, 128], sizes = [8, 128], strides = [1, 1]} : vector<8x384xf32> to vector<8x128xf32>
      %27 = arith.addf %25, %26 : vector<8x128xf32>
      %28 = arith.negf %27 : vector<8x128xf32>
      %29 = math.exp %28 : vector<8x128xf32>
      %cst_14 = arith.constant 1.000000e+00 : f32
      %30 = vector.broadcast %cst_14 : f32 to vector<8x128xf32>
      %31 = arith.addf %30, %29 : vector<8x128xf32>
      %32 = arith.divf %30, %31 : vector<8x128xf32>
      %33 = vector.extract_strided_slice %14 {offsets = [0, 256], sizes = [8, 128], strides = [1, 1]} : vector<8x384xf32> to vector<8x128xf32>
      %34 = vector.extract_strided_slice %16 {offsets = [0, 256], sizes = [8, 128], strides = [1, 1]} : vector<8x384xf32> to vector<8x128xf32>
      %35 = vector.broadcast %3 : vector<1x128xf32> to vector<8x128xf32>
      %36 = arith.addf %34, %35 : vector<8x128xf32>
      %37 = arith.mulf %24, %36 : vector<8x128xf32>
      %38 = arith.addf %33, %37 : vector<8x128xf32>
      %39 = math.tanh %38 : vector<8x128xf32>
      %cst_15 = arith.constant 1.000000e+00 : f32
      %40 = vector.broadcast %cst_15 : f32 to vector<8x128xf32>
      %41 = arith.subf %40, %32 : vector<8x128xf32>
      %42 = arith.mulf %41, %39 : vector<8x128xf32>
      %43 = arith.mulf %32, %11 : vector<8x128xf32>
      %44 = arith.addf %42, %43 : vector<8x128xf32>
      %c7_i32 = arith.constant 7 : i32
      %45 = vector.broadcast %c7_i32 : i32 to vector<8x1xi32>
      %46 = arith.cmpi sgt, %4, %45 : vector<8x1xi32>
      %cst_16 = arith.constant 0.000000e+00 : f32
      %47 = vector.shape_cast %46 : vector<8x1xi1> to vector<8x1xi1>
      %48 = vector.broadcast %47 : vector<8x1xi1> to vector<8x128xi1>
      %49 = vector.broadcast %cst_16 : f32 to vector<8x128xf32>
      %50 = arith.select %48, %44, %49 : vector<8x128xi1>, vector<8x128xf32>
      %c0_17 = arith.constant 0 : index
      %c7_18 = arith.constant 7 : index
      %c0_19 = arith.constant 0 : index
      %c0_20 = arith.constant 0 : index
      %51 = vector.load %arg6[%c0_17, %c7_18, %c0_19, %c0_20] : memref<1x8x8x128xf32, #tpu.memory_space<vmem>>, vector<1x1x8x128xf32>
      %52 = vector.shape_cast %51 : vector<1x1x8x128xf32> to vector<8x128xf32>
      %53 = vector.shape_cast %50 : vector<8x128xf32> to vector<1x1x8x128xf32>
      tpu.vector_store %arg6[%c0_17, %c7_18, %c0_19, %c0_20], %53 {strides = array<i32>} : memref<1x8x8x128xf32, #tpu.memory_space<vmem>>, vector<1x1x8x128xf32>,
      %54 = vector.shape_cast %46 : vector<8x1xi1> to vector<8x1xi1>
      %55 = vector.broadcast %54 : vector<8x1xi1> to vector<8x128xi1>
      %56 = arith.select %55, %44, %11 : vector<8x128xi1>, vector<8x128xf32>
      %c0_21 = arith.constant 0 : index
      %c6 = arith.constant 6 : index
      %c0_22 = arith.constant 0 : index
      %c0_23 = arith.constant 0 : index
      %57 = vector.load %arg3[%c0_21, %c6, %c0_22, %c0_23] : memref<1x8x8x384xbf16, #tpu.memory_space<vmem>>, vector<1x1x8x384xbf16>
      %58 = vector.shape_cast %57 : vector<1x1x8x384xbf16> to vector<8x384xbf16>
      %59 = arith.extf %58 : vector<8x384xbf16> to vector<8x384xf32>
      %60 = arith.truncf %56 : vector<8x128xf32> to vector<8x128xbf16>
      %cst_24 = arith.constant dense<0.000000e+00> : vector<8x384xf32>
      %61 = tpu.matmul %60, %1, %cst_24 {dimension_numbers = #tpu.dot_dimension_numbers<[1], [0], [0], [1], [0, 0, 1, 1], [], []>} : vector<8x128xbf16>, vector<128x384xbf16>, vector<8x384xf32> -> vector<8x384xf32>
      %62 = vector.extract_strided_slice %59 {offsets = [0, 0], sizes = [8, 128], strides = [1, 1]} : vector<8x384xf32> to vector<8x128xf32>
      %63 = vector.extract_strided_slice %61 {offsets = [0, 0], sizes = [8, 128], strides = [1, 1]} : vector<8x384xf32> to vector<8x128xf32>
      %64 = arith.addf %62, %63 : vector<8x128xf32>
      %65 = arith.negf %64 : vector<8x128xf32>
      %66 = math.exp %65 : vector<8x128xf32>
      %cst_25 = arith.constant 1.000000e+00 : f32
      %67 = vector.broadcast %cst_25 : f32 to vector<8x128xf32>
      %68 = arith.addf %67, %66 : vector<8x128xf32>
      %69 = arith.divf %67, %68 : vector<8x128xf32>
      %70 = vector.extract_strided_slice %59 {offsets = [0, 128], sizes = [8, 128], strides = [1, 1]} : vector<8x384xf32> to vector<8x128xf32>
      %71 = vector.extract_strided_slice %61 {offsets = [0, 128], sizes = [8, 128], strides = [1, 1]} : vector<8x384xf32> to vector<8x128xf32>
      %72 = arith.addf %70, %71 : vector<8x128xf32>
      %73 = arith.negf %72 : vector<8x128xf32>
      %74 = math.exp %73 : vector<8x128xf32>
      %cst_26 = arith.constant 1.000000e+00 : f32
      %75 = vector.broadcast %cst_26 : f32 to vector<8x128xf32>
      %76 = arith.addf %75, %74 : vector<8x128xf32>
      %77 = arith.divf %75, %76 : vector<8x128xf32>
      %78 = vector.extract_strided_slice %59 {offsets = [0, 256], sizes = [8, 128], strides = [1, 1]} : vector<8x384xf32> to vector<8x128xf32>
      %79 = vector.extract_strided_slice %61 {offsets = [0, 256], sizes = [8, 128], strides = [1, 1]} : vector<8x384xf32> to vector<8x128xf32>
      %80 = vector.broadcast %3 : vector<1x128xf32> to vector<8x128xf32>
      %81 = arith.addf %79, %80 : vector<8x128xf32>
      %82 = arith.mulf %69, %81 : vector<8x128xf32>
      %83 = arith.addf %78, %82 : vector<8x128xf32>
      %84 = math.tanh %83 : vector<8x128xf32>
      %cst_27 = arith.constant 1.000000e+00 : f32
      %85 = vector.broadcast %cst_27 : f32 to vector<8x128xf32>
      %86 = arith.subf %85, %77 : vector<8x128xf32>
      %87 = arith.mulf %86, %84 : vector<8x128xf32>
      %88 = arith.mulf %77, %56 : vector<8x128xf32>
      %89 = arith.addf %87, %88 : vector<8x128xf32>
      %c6_i32 = arith.constant 6 : i32
      %90 = vector.broadcast %c6_i32 : i32 to vector<8x1xi32>
      %91 = arith.cmpi sgt, %4, %90 : vector<8x1xi32>
      %cst_28 = arith.constant 0.000000e+00 : f32
      %92 = vector.shape_cast %91 : vector<8x1xi1> to vector<8x1xi1>
      %93 = vector.broadcast %92 : vector<8x1xi1> to vector<8x128xi1>
      %94 = vector.broadcast %cst_28 : f32 to vector<8x128xf32>
      %95 = arith.select %93, %89, %94 : vector<8x128xi1>, vector<8x128xf32>
      %c0_29 = arith.constant 0 : index
      %c6_30 = arith.constant 6 : index
      %c0_31 = arith.constant 0 : index
      %c0_32 = arith.constant 0 : index
      %96 = vector.load %arg6[%c0_29, %c6_30, %c0_31, %c0_32] : memref<1x8x8x128xf32, #tpu.memory_space<vmem>>, vector<1x1x8x128xf32>
      %97 = vector.shape_cast %96 : vector<1x1x8x128xf32> to vector<8x128xf32>
      %98 = vector.shape_cast %95 : vector<8x128xf32> to vector<1x1x8x128xf32>
      tpu.vector_store %arg6[%c0_29, %c6_30, %c0_31, %c0_32], %98 {strides = array<i32>} : memref<1x8x8x128xf32, #tpu.memory_space<vmem>>, vector<1x1x8x128xf32>,
      %99 = vector.shape_cast %91 : vector<8x1xi1> to vector<8x1xi1>
      %100 = vector.broadcast %99 : vector<8x1xi1> to vector<8x128xi1>
      %101 = arith.select %100, %89, %56 : vector<8x128xi1>, vector<8x128xf32>
      %c0_33 = arith.constant 0 : index
      %c5 = arith.constant 5 : index
      %c0_34 = arith.constant 0 : index
      %c0_35 = arith.constant 0 : index
      %102 = vector.load %arg3[%c0_33, %c5, %c0_34, %c0_35] : memref<1x8x8x384xbf16, #tpu.memory_space<vmem>>, vector<1x1x8x384xbf16>
      %103 = vector.shape_cast %102 : vector<1x1x8x384xbf16> to vector<8x384xbf16>
      %104 = arith.extf %103 : vector<8x384xbf16> to vector<8x384xf32>
      %105 = arith.truncf %101 : vector<8x128xf32> to vector<8x128xbf16>
      %cst_36 = arith.constant dense<0.000000e+00> : vector<8x384xf32>
      %106 = tpu.matmul %105, %1, %cst_36 {dimension_numbers = #tpu.dot_dimension_numbers<[1], [0], [0], [1], [0, 0, 1, 1], [], []>} : vector<8x128xbf16>, vector<128x384xbf16>, vector<8x384xf32> -> vector<8x384xf32>
      %107 = vector.extract_strided_slice %104 {offsets = [0, 0], sizes = [8, 128], strides = [1, 1]} : vector<8x384xf32> to vector<8x128xf32>
      %108 = vector.extract_strided_slice %106 {offsets = [0, 0], sizes = [8, 128], strides = [1, 1]} : vector<8x384xf32> to vector<8x128xf32>
      %109 = arith.addf %107, %108 : vector<8x128xf32>
      %110 = arith.negf %109 : vector<8x128xf32>
      %111 = math.exp %110 : vector<8x128xf32>
      %cst_37 = arith.constant 1.000000e+00 : f32
      %112 = vector.broadcast %cst_37 : f32 to vector<8x128xf32>
      %113 = arith.addf %112, %111 : vector<8x128xf32>
      %114 = arith.divf %112, %113 : vector<8x128xf32>
      %115 = vector.extract_strided_slice %104 {offsets = [0, 128], sizes = [8, 128], strides = [1, 1]} : vector<8x384xf32> to vector<8x128xf32>
      %116 = vector.extract_strided_slice %106 {offsets = [0, 128], sizes = [8, 128], strides = [1, 1]} : vector<8x384xf32> to vector<8x128xf32>
      %117 = arith.addf %115, %116 : vector<8x128xf32>
      %118 = arith.negf %117 : vector<8x128xf32>
      %119 = math.exp %118 : vector<8x128xf32>
      %cst_38 = arith.constant 1.000000e+00 : f32
      %120 = vector.broadcast %cst_38 : f32 to vector<8x128xf32>
      %121 = arith.addf %120, %119 : vector<8x128xf32>
      %122 = arith.divf %120, %121 : vector<8x128xf32>
      %123 = vector.extract_strided_slice %104 {offsets = [0, 256], sizes = [8, 128], strides = [1, 1]} : vector<8x384xf32> to vector<8x128xf32>
      %124 = vector.extract_strided_slice %106 {offsets = [0, 256], sizes = [8, 128], strides = [1, 1]} : vector<8x384xf32> to vector<8x128xf32>
      %125 = vector.broadcast %3 : vector<1x128xf32> to vector<8x128xf32>
      %126 = arith.addf %124, %125 : vector<8x128xf32>
      %127 = arith.mulf %114, %126 : vector<8x128xf32>
      %128 = arith.addf %123, %127 : vector<8x128xf32>
      %129 = math.tanh %128 : vector<8x128xf32>
      %cst_39 = arith.constant 1.000000e+00 : f32
      %130 = vector.broadcast %cst_39 : f32 to vector<8x128xf32>
      %131 = arith.subf %130, %122 : vector<8x128xf32>
      %132 = arith.mulf %131, %129 : vector<8x128xf32>
      %133 = arith.mulf %122, %101 : vector<8x128xf32>
      %134 = arith.addf %132, %133 : vector<8x128xf32>
      %c5_i32 = arith.constant 5 : i32
      %135 = vector.broadcast %c5_i32 : i32 to vector<8x1xi32>
      %136 = arith.cmpi sgt, %4, %135 : vector<8x1xi32>
      %cst_40 = arith.constant 0.000000e+00 : f32
      %137 = vector.shape_cast %136 : vector<8x1xi1> to vector<8x1xi1>
      %138 = vector.broadcast %137 : vector<8x1xi1> to vector<8x128xi1>
      %139 = vector.broadcast %cst_40 : f32 to vector<8x128xf32>
      %140 = arith.select %138, %134, %139 : vector<8x128xi1>, vector<8x128xf32>
      %c0_41 = arith.constant 0 : index
      %c5_42 = arith.constant 5 : index
      %c0_43 = arith.constant 0 : index
      %c0_44 = arith.constant 0 : index
      %141 = vector.load %arg6[%c0_41, %c5_42, %c0_43, %c0_44] : memref<1x8x8x128xf32, #tpu.memory_space<vmem>>, vector<1x1x8x128xf32>
      %142 = vector.shape_cast %141 : vector<1x1x8x128xf32> to vector<8x128xf32>
      %143 = vector.shape_cast %140 : vector<8x128xf32> to vector<1x1x8x128xf32>
      tpu.vector_store %arg6[%c0_41, %c5_42, %c0_43, %c0_44], %143 {strides = array<i32>} : memref<1x8x8x128xf32, #tpu.memory_space<vmem>>, vector<1x1x8x128xf32>,
      %144 = vector.shape_cast %136 : vector<8x1xi1> to vector<8x1xi1>
      %145 = vector.broadcast %144 : vector<8x1xi1> to vector<8x128xi1>
      %146 = arith.select %145, %134, %101 : vector<8x128xi1>, vector<8x128xf32>
      %c0_45 = arith.constant 0 : index
      %c4 = arith.constant 4 : index
      %c0_46 = arith.constant 0 : index
      %c0_47 = arith.constant 0 : index
      %147 = vector.load %arg3[%c0_45, %c4, %c0_46, %c0_47] : memref<1x8x8x384xbf16, #tpu.memory_space<vmem>>, vector<1x1x8x384xbf16>
      %148 = vector.shape_cast %147 : vector<1x1x8x384xbf16> to vector<8x384xbf16>
      %149 = arith.extf %148 : vector<8x384xbf16> to vector<8x384xf32>
      %150 = arith.truncf %146 : vector<8x128xf32> to vector<8x128xbf16>
      %cst_48 = arith.constant dense<0.000000e+00> : vector<8x384xf32>
      %151 = tpu.matmul %150, %1, %cst_48 {dimension_numbers = #tpu.dot_dimension_numbers<[1], [0], [0], [1], [0, 0, 1, 1], [], []>} : vector<8x128xbf16>, vector<128x384xbf16>, vector<8x384xf32> -> vector<8x384xf32>
      %152 = vector.extract_strided_slice %149 {offsets = [0, 0], sizes = [8, 128], strides = [1, 1]} : vector<8x384xf32> to vector<8x128xf32>
      %153 = vector.extract_strided_slice %151 {offsets = [0, 0], sizes = [8, 128], strides = [1, 1]} : vector<8x384xf32> to vector<8x128xf32>
      %154 = arith.addf %152, %153 : vector<8x128xf32>
      %155 = arith.negf %154 : vector<8x128xf32>
      %156 = math.exp %155 : vector<8x128xf32>
      %cst_49 = arith.constant 1.000000e+00 : f32
      %157 = vector.broadcast %cst_49 : f32 to vector<8x128xf32>
      %158 = arith.addf %157, %156 : vector<8x128xf32>
      %159 = arith.divf %157, %158 : vector<8x128xf32>
      %160 = vector.extract_strided_slice %149 {offsets = [0, 128], sizes = [8, 128], strides = [1, 1]} : vector<8x384xf32> to vector<8x128xf32>
      %161 = vector.extract_strided_slice %151 {offsets = [0, 128], sizes = [8, 128], strides = [1, 1]} : vector<8x384xf32> to vector<8x128xf32>
      %162 = arith.addf %160, %161 : vector<8x128xf32>
      %163 = arith.negf %162 : vector<8x128xf32>
      %164 = math.exp %163 : vector<8x128xf32>
      %cst_50 = arith.constant 1.000000e+00 : f32
      %165 = vector.broadcast %cst_50 : f32 to vector<8x128xf32>
      %166 = arith.addf %165, %164 : vector<8x128xf32>
      %167 = arith.divf %165, %166 : vector<8x128xf32>
      %168 = vector.extract_strided_slice %149 {offsets = [0, 256], sizes = [8, 128], strides = [1, 1]} : vector<8x384xf32> to vector<8x128xf32>
      %169 = vector.extract_strided_slice %151 {offsets = [0, 256], sizes = [8, 128], strides = [1, 1]} : vector<8x384xf32> to vector<8x128xf32>
      %170 = vector.broadcast %3 : vector<1x128xf32> to vector<8x128xf32>
      %171 = arith.addf %169, %170 : vector<8x128xf32>
      %172 = arith.mulf %159, %171 : vector<8x128xf32>
      %173 = arith.addf %168, %172 : vector<8x128xf32>
      %174 = math.tanh %173 : vector<8x128xf32>
      %cst_51 = arith.constant 1.000000e+00 : f32
      %175 = vector.broadcast %cst_51 : f32 to vector<8x128xf32>
      %176 = arith.subf %175, %167 : vector<8x128xf32>
      %177 = arith.mulf %176, %174 : vector<8x128xf32>
      %178 = arith.mulf %167, %146 : vector<8x128xf32>
      %179 = arith.addf %177, %178 : vector<8x128xf32>
      %c4_i32 = arith.constant 4 : i32
      %180 = vector.broadcast %c4_i32 : i32 to vector<8x1xi32>
      %181 = arith.cmpi sgt, %4, %180 : vector<8x1xi32>
      %cst_52 = arith.constant 0.000000e+00 : f32
      %182 = vector.shape_cast %181 : vector<8x1xi1> to vector<8x1xi1>
      %183 = vector.broadcast %182 : vector<8x1xi1> to vector<8x128xi1>
      %184 = vector.broadcast %cst_52 : f32 to vector<8x128xf32>
      %185 = arith.select %183, %179, %184 : vector<8x128xi1>, vector<8x128xf32>
      %c0_53 = arith.constant 0 : index
      %c4_54 = arith.constant 4 : index
      %c0_55 = arith.constant 0 : index
      %c0_56 = arith.constant 0 : index
      %186 = vector.load %arg6[%c0_53, %c4_54, %c0_55, %c0_56] : memref<1x8x8x128xf32, #tpu.memory_space<vmem>>, vector<1x1x8x128xf32>
      %187 = vector.shape_cast %186 : vector<1x1x8x128xf32> to vector<8x128xf32>
      %188 = vector.shape_cast %185 : vector<8x128xf32> to vector<1x1x8x128xf32>
      tpu.vector_store %arg6[%c0_53, %c4_54, %c0_55, %c0_56], %188 {strides = array<i32>} : memref<1x8x8x128xf32, #tpu.memory_space<vmem>>, vector<1x1x8x128xf32>,
      %189 = vector.shape_cast %181 : vector<8x1xi1> to vector<8x1xi1>
      %190 = vector.broadcast %189 : vector<8x1xi1> to vector<8x128xi1>
      %191 = arith.select %190, %179, %146 : vector<8x128xi1>, vector<8x128xf32>
      %c0_57 = arith.constant 0 : index
      %c3 = arith.constant 3 : index
      %c0_58 = arith.constant 0 : index
      %c0_59 = arith.constant 0 : index
      %192 = vector.load %arg3[%c0_57, %c3, %c0_58, %c0_59] : memref<1x8x8x384xbf16, #tpu.memory_space<vmem>>, vector<1x1x8x384xbf16>
      %193 = vector.shape_cast %192 : vector<1x1x8x384xbf16> to vector<8x384xbf16>
      %194 = arith.extf %193 : vector<8x384xbf16> to vector<8x384xf32>
      %195 = arith.truncf %191 : vector<8x128xf32> to vector<8x128xbf16>
      %cst_60 = arith.constant dense<0.000000e+00> : vector<8x384xf32>
      %196 = tpu.matmul %195, %1, %cst_60 {dimension_numbers = #tpu.dot_dimension_numbers<[1], [0], [0], [1], [0, 0, 1, 1], [], []>} : vector<8x128xbf16>, vector<128x384xbf16>, vector<8x384xf32> -> vector<8x384xf32>
      %197 = vector.extract_strided_slice %194 {offsets = [0, 0], sizes = [8, 128], strides = [1, 1]} : vector<8x384xf32> to vector<8x128xf32>
      %198 = vector.extract_strided_slice %196 {offsets = [0, 0], sizes = [8, 128], strides = [1, 1]} : vector<8x384xf32> to vector<8x128xf32>
      %199 = arith.addf %197, %198 : vector<8x128xf32>
      %200 = arith.negf %199 : vector<8x128xf32>
      %201 = math.exp %200 : vector<8x128xf32>
      %cst_61 = arith.constant 1.000000e+00 : f32
      %202 = vector.broadcast %cst_61 : f32 to vector<8x128xf32>
      %203 = arith.addf %202, %201 : vector<8x128xf32>
      %204 = arith.divf %202, %203 : vector<8x128xf32>
      %205 = vector.extract_strided_slice %194 {offsets = [0, 128], sizes = [8, 128], strides = [1, 1]} : vector<8x384xf32> to vector<8x128xf32>
      %206 = vector.extract_strided_slice %196 {offsets = [0, 128], sizes = [8, 128], strides = [1, 1]} : vector<8x384xf32> to vector<8x128xf32>
      %207 = arith.addf %205, %206 : vector<8x128xf32>
      %208 = arith.negf %207 : vector<8x128xf32>
      %209 = math.exp %208 : vector<8x128xf32>
      %cst_62 = arith.constant 1.000000e+00 : f32
      %210 = vector.broadcast %cst_62 : f32 to vector<8x128xf32>
      %211 = arith.addf %210, %209 : vector<8x128xf32>
      %212 = arith.divf %210, %211 : vector<8x128xf32>
      %213 = vector.extract_strided_slice %194 {offsets = [0, 256], sizes = [8, 128], strides = [1, 1]} : vector<8x384xf32> to vector<8x128xf32>
      %214 = vector.extract_strided_slice %196 {offsets = [0, 256], sizes = [8, 128], strides = [1, 1]} : vector<8x384xf32> to vector<8x128xf32>
      %215 = vector.broadcast %3 : vector<1x128xf32> to vector<8x128xf32>
      %216 = arith.addf %214, %215 : vector<8x128xf32>
      %217 = arith.mulf %204, %216 : vector<8x128xf32>
      %218 = arith.addf %213, %217 : vector<8x128xf32>
      %219 = math.tanh %218 : vector<8x128xf32>
      %cst_63 = arith.constant 1.000000e+00 : f32
      %220 = vector.broadcast %cst_63 : f32 to vector<8x128xf32>
      %221 = arith.subf %220, %212 : vector<8x128xf32>
      %222 = arith.mulf %221, %219 : vector<8x128xf32>
      %223 = arith.mulf %212, %191 : vector<8x128xf32>
      %224 = arith.addf %222, %223 : vector<8x128xf32>
      %c3_i32 = arith.constant 3 : i32
      %225 = vector.broadcast %c3_i32 : i32 to vector<8x1xi32>
      %226 = arith.cmpi sgt, %4, %225 : vector<8x1xi32>
      %cst_64 = arith.constant 0.000000e+00 : f32
      %227 = vector.shape_cast %226 : vector<8x1xi1> to vector<8x1xi1>
      %228 = vector.broadcast %227 : vector<8x1xi1> to vector<8x128xi1>
      %229 = vector.broadcast %cst_64 : f32 to vector<8x128xf32>
      %230 = arith.select %228, %224, %229 : vector<8x128xi1>, vector<8x128xf32>
      %c0_65 = arith.constant 0 : index
      %c3_66 = arith.constant 3 : index
      %c0_67 = arith.constant 0 : index
      %c0_68 = arith.constant 0 : index
      %231 = vector.load %arg6[%c0_65, %c3_66, %c0_67, %c0_68] : memref<1x8x8x128xf32, #tpu.memory_space<vmem>>, vector<1x1x8x128xf32>
      %232 = vector.shape_cast %231 : vector<1x1x8x128xf32> to vector<8x128xf32>
      %233 = vector.shape_cast %230 : vector<8x128xf32> to vector<1x1x8x128xf32>
      tpu.vector_store %arg6[%c0_65, %c3_66, %c0_67, %c0_68], %233 {strides = array<i32>} : memref<1x8x8x128xf32, #tpu.memory_space<vmem>>, vector<1x1x8x128xf32>,
      %234 = vector.shape_cast %226 : vector<8x1xi1> to vector<8x1xi1>
      %235 = vector.broadcast %234 : vector<8x1xi1> to vector<8x128xi1>
      %236 = arith.select %235, %224, %191 : vector<8x128xi1>, vector<8x128xf32>
      %c0_69 = arith.constant 0 : index
      %c2 = arith.constant 2 : index
      %c0_70 = arith.constant 0 : index
      %c0_71 = arith.constant 0 : index
      %237 = vector.load %arg3[%c0_69, %c2, %c0_70, %c0_71] : memref<1x8x8x384xbf16, #tpu.memory_space<vmem>>, vector<1x1x8x384xbf16>
      %238 = vector.shape_cast %237 : vector<1x1x8x384xbf16> to vector<8x384xbf16>
      %239 = arith.extf %238 : vector<8x384xbf16> to vector<8x384xf32>
      %240 = arith.truncf %236 : vector<8x128xf32> to vector<8x128xbf16>
      %cst_72 = arith.constant dense<0.000000e+00> : vector<8x384xf32>
      %241 = tpu.matmul %240, %1, %cst_72 {dimension_numbers = #tpu.dot_dimension_numbers<[1], [0], [0], [1], [0, 0, 1, 1], [], []>} : vector<8x128xbf16>, vector<128x384xbf16>, vector<8x384xf32> -> vector<8x384xf32>
      %242 = vector.extract_strided_slice %239 {offsets = [0, 0], sizes = [8, 128], strides = [1, 1]} : vector<8x384xf32> to vector<8x128xf32>
      %243 = vector.extract_strided_slice %241 {offsets = [0, 0], sizes = [8, 128], strides = [1, 1]} : vector<8x384xf32> to vector<8x128xf32>
      %244 = arith.addf %242, %243 : vector<8x128xf32>
      %245 = arith.negf %244 : vector<8x128xf32>
      %246 = math.exp %245 : vector<8x128xf32>
      %cst_73 = arith.constant 1.000000e+00 : f32
      %247 = vector.broadcast %cst_73 : f32 to vector<8x128xf32>
      %248 = arith.addf %247, %246 : vector<8x128xf32>
      %249 = arith.divf %247, %248 : vector<8x128xf32>
      %250 = vector.extract_strided_slice %239 {offsets = [0, 128], sizes = [8, 128], strides = [1, 1]} : vector<8x384xf32> to vector<8x128xf32>
      %251 = vector.extract_strided_slice %241 {offsets = [0, 128], sizes = [8, 128], strides = [1, 1]} : vector<8x384xf32> to vector<8x128xf32>
      %252 = arith.addf %250, %251 : vector<8x128xf32>
      %253 = arith.negf %252 : vector<8x128xf32>
      %254 = math.exp %253 : vector<8x128xf32>
      %cst_74 = arith.constant 1.000000e+00 : f32
      %255 = vector.broadcast %cst_74 : f32 to vector<8x128xf32>
      %256 = arith.addf %255, %254 : vector<8x128xf32>
      %257 = arith.divf %255, %256 : vector<8x128xf32>
      %258 = vector.extract_strided_slice %239 {offsets = [0, 256], sizes = [8, 128], strides = [1, 1]} : vector<8x384xf32> to vector<8x128xf32>
      %259 = vector.extract_strided_slice %241 {offsets = [0, 256], sizes = [8, 128], strides = [1, 1]} : vector<8x384xf32> to vector<8x128xf32>
      %260 = vector.broadcast %3 : vector<1x128xf32> to vector<8x128xf32>
      %261 = arith.addf %259, %260 : vector<8x128xf32>
      %262 = arith.mulf %249, %261 : vector<8x128xf32>
      %263 = arith.addf %258, %262 : vector<8x128xf32>
      %264 = math.tanh %263 : vector<8x128xf32>
      %cst_75 = arith.constant 1.000000e+00 : f32
      %265 = vector.broadcast %cst_75 : f32 to vector<8x128xf32>
      %266 = arith.subf %265, %257 : vector<8x128xf32>
      %267 = arith.mulf %266, %264 : vector<8x128xf32>
      %268 = arith.mulf %257, %236 : vector<8x128xf32>
      %269 = arith.addf %267, %268 : vector<8x128xf32>
      %c2_i32 = arith.constant 2 : i32
      %270 = vector.broadcast %c2_i32 : i32 to vector<8x1xi32>
      %271 = arith.cmpi sgt, %4, %270 : vector<8x1xi32>
      %cst_76 = arith.constant 0.000000e+00 : f32
      %272 = vector.shape_cast %271 : vector<8x1xi1> to vector<8x1xi1>
      %273 = vector.broadcast %272 : vector<8x1xi1> to vector<8x128xi1>
      %274 = vector.broadcast %cst_76 : f32 to vector<8x128xf32>
      %275 = arith.select %273, %269, %274 : vector<8x128xi1>, vector<8x128xf32>
      %c0_77 = arith.constant 0 : index
      %c2_78 = arith.constant 2 : index
      %c0_79 = arith.constant 0 : index
      %c0_80 = arith.constant 0 : index
      %276 = vector.load %arg6[%c0_77, %c2_78, %c0_79, %c0_80] : memref<1x8x8x128xf32, #tpu.memory_space<vmem>>, vector<1x1x8x128xf32>
      %277 = vector.shape_cast %276 : vector<1x1x8x128xf32> to vector<8x128xf32>
      %278 = vector.shape_cast %275 : vector<8x128xf32> to vector<1x1x8x128xf32>
      tpu.vector_store %arg6[%c0_77, %c2_78, %c0_79, %c0_80], %278 {strides = array<i32>} : memref<1x8x8x128xf32, #tpu.memory_space<vmem>>, vector<1x1x8x128xf32>,
      %279 = vector.shape_cast %271 : vector<8x1xi1> to vector<8x1xi1>
      %280 = vector.broadcast %279 : vector<8x1xi1> to vector<8x128xi1>
      %281 = arith.select %280, %269, %236 : vector<8x128xi1>, vector<8x128xf32>
      %c0_81 = arith.constant 0 : index
      %c1 = arith.constant 1 : index
      %c0_82 = arith.constant 0 : index
      %c0_83 = arith.constant 0 : index
      %282 = vector.load %arg3[%c0_81, %c1, %c0_82, %c0_83] : memref<1x8x8x384xbf16, #tpu.memory_space<vmem>>, vector<1x1x8x384xbf16>
      %283 = vector.shape_cast %282 : vector<1x1x8x384xbf16> to vector<8x384xbf16>
      %284 = arith.extf %283 : vector<8x384xbf16> to vector<8x384xf32>
      %285 = arith.truncf %281 : vector<8x128xf32> to vector<8x128xbf16>
      %cst_84 = arith.constant dense<0.000000e+00> : vector<8x384xf32>
      %286 = tpu.matmul %285, %1, %cst_84 {dimension_numbers = #tpu.dot_dimension_numbers<[1], [0], [0], [1], [0, 0, 1, 1], [], []>} : vector<8x128xbf16>, vector<128x384xbf16>, vector<8x384xf32> -> vector<8x384xf32>
      %287 = vector.extract_strided_slice %284 {offsets = [0, 0], sizes = [8, 128], strides = [1, 1]} : vector<8x384xf32> to vector<8x128xf32>
      %288 = vector.extract_strided_slice %286 {offsets = [0, 0], sizes = [8, 128], strides = [1, 1]} : vector<8x384xf32> to vector<8x128xf32>
      %289 = arith.addf %287, %288 : vector<8x128xf32>
      %290 = arith.negf %289 : vector<8x128xf32>
      %291 = math.exp %290 : vector<8x128xf32>
      %cst_85 = arith.constant 1.000000e+00 : f32
      %292 = vector.broadcast %cst_85 : f32 to vector<8x128xf32>
      %293 = arith.addf %292, %291 : vector<8x128xf32>
      %294 = arith.divf %292, %293 : vector<8x128xf32>
      %295 = vector.extract_strided_slice %284 {offsets = [0, 128], sizes = [8, 128], strides = [1, 1]} : vector<8x384xf32> to vector<8x128xf32>
      %296 = vector.extract_strided_slice %286 {offsets = [0, 128], sizes = [8, 128], strides = [1, 1]} : vector<8x384xf32> to vector<8x128xf32>
      %297 = arith.addf %295, %296 : vector<8x128xf32>
      %298 = arith.negf %297 : vector<8x128xf32>
      %299 = math.exp %298 : vector<8x128xf32>
      %cst_86 = arith.constant 1.000000e+00 : f32
      %300 = vector.broadcast %cst_86 : f32 to vector<8x128xf32>
      %301 = arith.addf %300, %299 : vector<8x128xf32>
      %302 = arith.divf %300, %301 : vector<8x128xf32>
      %303 = vector.extract_strided_slice %284 {offsets = [0, 256], sizes = [8, 128], strides = [1, 1]} : vector<8x384xf32> to vector<8x128xf32>
      %304 = vector.extract_strided_slice %286 {offsets = [0, 256], sizes = [8, 128], strides = [1, 1]} : vector<8x384xf32> to vector<8x128xf32>
      %305 = vector.broadcast %3 : vector<1x128xf32> to vector<8x128xf32>
      %306 = arith.addf %304, %305 : vector<8x128xf32>
      %307 = arith.mulf %294, %306 : vector<8x128xf32>
      %308 = arith.addf %303, %307 : vector<8x128xf32>
      %309 = math.tanh %308 : vector<8x128xf32>
      %cst_87 = arith.constant 1.000000e+00 : f32
      %310 = vector.broadcast %cst_87 : f32 to vector<8x128xf32>
      %311 = arith.subf %310, %302 : vector<8x128xf32>
      %312 = arith.mulf %311, %309 : vector<8x128xf32>
      %313 = arith.mulf %302, %281 : vector<8x128xf32>
      %314 = arith.addf %312, %313 : vector<8x128xf32>
      %c1_i32_88 = arith.constant 1 : i32
      %315 = vector.broadcast %c1_i32_88 : i32 to vector<8x1xi32>
      %316 = arith.cmpi sgt, %4, %315 : vector<8x1xi32>
      %cst_89 = arith.constant 0.000000e+00 : f32
      %317 = vector.shape_cast %316 : vector<8x1xi1> to vector<8x1xi1>
      %318 = vector.broadcast %317 : vector<8x1xi1> to vector<8x128xi1>
      %319 = vector.broadcast %cst_89 : f32 to vector<8x128xf32>
      %320 = arith.select %318, %314, %319 : vector<8x128xi1>, vector<8x128xf32>
      %c0_90 = arith.constant 0 : index
      %c1_91 = arith.constant 1 : index
      %c0_92 = arith.constant 0 : index
      %c0_93 = arith.constant 0 : index
      %321 = vector.load %arg6[%c0_90, %c1_91, %c0_92, %c0_93] : memref<1x8x8x128xf32, #tpu.memory_space<vmem>>, vector<1x1x8x128xf32>
      %322 = vector.shape_cast %321 : vector<1x1x8x128xf32> to vector<8x128xf32>
      %323 = vector.shape_cast %320 : vector<8x128xf32> to vector<1x1x8x128xf32>
      tpu.vector_store %arg6[%c0_90, %c1_91, %c0_92, %c0_93], %323 {strides = array<i32>} : memref<1x8x8x128xf32, #tpu.memory_space<vmem>>, vector<1x1x8x128xf32>,
      %324 = vector.shape_cast %316 : vector<8x1xi1> to vector<8x1xi1>
      %325 = vector.broadcast %324 : vector<8x1xi1> to vector<8x128xi1>
      %326 = arith.select %325, %314, %281 : vector<8x128xi1>, vector<8x128xf32>
      %c0_94 = arith.constant 0 : index
      %c0_95 = arith.constant 0 : index
      %c0_96 = arith.constant 0 : index
      %c0_97 = arith.constant 0 : index
      %327 = vector.load %arg3[%c0_94, %c0_95, %c0_96, %c0_97] : memref<1x8x8x384xbf16, #tpu.memory_space<vmem>>, vector<1x1x8x384xbf16>
      %328 = vector.shape_cast %327 : vector<1x1x8x384xbf16> to vector<8x384xbf16>
      %329 = arith.extf %328 : vector<8x384xbf16> to vector<8x384xf32>
      %330 = arith.truncf %326 : vector<8x128xf32> to vector<8x128xbf16>
      %cst_98 = arith.constant dense<0.000000e+00> : vector<8x384xf32>
      %331 = tpu.matmul %330, %1, %cst_98 {dimension_numbers = #tpu.dot_dimension_numbers<[1], [0], [0], [1], [0, 0, 1, 1], [], []>} : vector<8x128xbf16>, vector<128x384xbf16>, vector<8x384xf32> -> vector<8x384xf32>
      %332 = vector.extract_strided_slice %329 {offsets = [0, 0], sizes = [8, 128], strides = [1, 1]} : vector<8x384xf32> to vector<8x128xf32>
      %333 = vector.extract_strided_slice %331 {offsets = [0, 0], sizes = [8, 128], strides = [1, 1]} : vector<8x384xf32> to vector<8x128xf32>
      %334 = arith.addf %332, %333 : vector<8x128xf32>
      %335 = arith.negf %334 : vector<8x128xf32>
      %336 = math.exp %335 : vector<8x128xf32>
      %cst_99 = arith.constant 1.000000e+00 : f32
      %337 = vector.broadcast %cst_99 : f32 to vector<8x128xf32>
      %338 = arith.addf %337, %336 : vector<8x128xf32>
      %339 = arith.divf %337, %338 : vector<8x128xf32>
      %340 = vector.extract_strided_slice %329 {offsets = [0, 128], sizes = [8, 128], strides = [1, 1]} : vector<8x384xf32> to vector<8x128xf32>
      %341 = vector.extract_strided_slice %331 {offsets = [0, 128], sizes = [8, 128], strides = [1, 1]} : vector<8x384xf32> to vector<8x128xf32>
      %342 = arith.addf %340, %341 : vector<8x128xf32>
      %343 = arith.negf %342 : vector<8x128xf32>
      %344 = math.exp %343 : vector<8x128xf32>
      %cst_100 = arith.constant 1.000000e+00 : f32
      %345 = vector.broadcast %cst_100 : f32 to vector<8x128xf32>
      %346 = arith.addf %345, %344 : vector<8x128xf32>
      %347 = arith.divf %345, %346 : vector<8x128xf32>
      %348 = vector.extract_strided_slice %329 {offsets = [0, 256], sizes = [8, 128], strides = [1, 1]} : vector<8x384xf32> to vector<8x128xf32>
      %349 = vector.extract_strided_slice %331 {offsets = [0, 256], sizes = [8, 128], strides = [1, 1]} : vector<8x384xf32> to vector<8x128xf32>
      %350 = vector.broadcast %3 : vector<1x128xf32> to vector<8x128xf32>
      %351 = arith.addf %349, %350 : vector<8x128xf32>
      %352 = arith.mulf %339, %351 : vector<8x128xf32>
      %353 = arith.addf %348, %352 : vector<8x128xf32>
      %354 = math.tanh %353 : vector<8x128xf32>
      %cst_101 = arith.constant 1.000000e+00 : f32
      %355 = vector.broadcast %cst_101 : f32 to vector<8x128xf32>
      %356 = arith.subf %355, %347 : vector<8x128xf32>
      %357 = arith.mulf %356, %354 : vector<8x128xf32>
      %358 = arith.mulf %347, %326 : vector<8x128xf32>
      %359 = arith.addf %357, %358 : vector<8x128xf32>
      %c0_i32_102 = arith.constant 0 : i32
      %360 = vector.broadcast %c0_i32_102 : i32 to vector<8x1xi32>
      %361 = arith.cmpi sgt, %4, %360 : vector<8x1xi32>
      %cst_103 = arith.constant 0.000000e+00 : f32
      %362 = vector.shape_cast %361 : vector<8x1xi1> to vector<8x1xi1>
      %363 = vector.broadcast %362 : vector<8x1xi1> to vector<8x128xi1>
      %364 = vector.broadcast %cst_103 : f32 to vector<8x128xf32>
      %365 = arith.select %363, %359, %364 : vector<8x128xi1>, vector<8x128xf32>
      %c0_104 = arith.constant 0 : index
      %c0_105 = arith.constant 0 : index
      %c0_106 = arith.constant 0 : index
      %c0_107 = arith.constant 0 : index
      %366 = vector.load %arg6[%c0_104, %c0_105, %c0_106, %c0_107] : memref<1x8x8x128xf32, #tpu.memory_space<vmem>>, vector<1x1x8x128xf32>
      %367 = vector.shape_cast %366 : vector<1x1x8x128xf32> to vector<8x128xf32>
      %368 = vector.shape_cast %365 : vector<8x128xf32> to vector<1x1x8x128xf32>
      tpu.vector_store %arg6[%c0_104, %c0_105, %c0_106, %c0_107], %368 {strides = array<i32>} : memref<1x8x8x128xf32, #tpu.memory_space<vmem>>, vector<1x1x8x128xf32>,
      %369 = vector.shape_cast %361 : vector<8x1xi1> to vector<8x1xi1>
      %370 = vector.broadcast %369 : vector<8x1xi1> to vector<8x128xi1>
      %371 = arith.select %370, %359, %326 : vector<8x128xi1>, vector<8x128xf32>
      %c0_108 = arith.constant 0 : index
      %c0_109 = arith.constant 0 : index
      %c0_110 = arith.constant 0 : index
      %372 = vector.load %arg7[%c0_108, %c0_109, %c0_110] : memref<1x8x128xf32, #tpu.memory_space<vmem>>, vector<1x8x128xf32>
      %373 = vector.shape_cast %372 : vector<1x8x128xf32> to vector<8x128xf32>
      %374 = vector.shape_cast %371 : vector<8x128xf32> to vector<1x8x128xf32>
      tpu.vector_store %arg7[%c0_108, %c0_109, %c0_110], %374 {strides = array<i32>} : memref<1x8x128xf32, #tpu.memory_space<vmem>>, vector<1x8x128xf32>,
    } else {
    }
    return
  }
  func.func @transform_0(%arg0: i32, %arg1: i32) -> (i32, i32) {
    %c0_i32 = arith.constant 0 : i32
    %c0_i32_0 = arith.constant 0 : i32
    return %arg1, %c0_i32 : i32, i32
  }
  func.func @transform_1(%arg0: i32, %arg1: i32) -> (i32, i32, i32, i32) {
    %c0_i32 = arith.constant 0 : i32
    %c0_i32_0 = arith.constant 0 : i32
    %c0_i32_1 = arith.constant 0 : i32
    return %arg0, %c0_i32, %arg1, %c0_i32_0 : i32, i32, i32, i32
  }
  func.func @transform_2(%arg0: i32, %arg1: i32) -> (i32, i32, i32) {
    %c0_i32 = arith.constant 0 : i32
    %c0_i32_0 = arith.constant 0 : i32
    %c0_i32_1 = arith.constant 0 : i32
    return %arg0, %c0_i32, %c0_i32_0 : i32, i32, i32
  }
  func.func @transform_3(%arg0: i32, %arg1: i32) -> (i32, i32, i32) {
    %c0_i32 = arith.constant 0 : i32
    %c0_i32_0 = arith.constant 0 : i32
    %c0_i32_1 = arith.constant 0 : i32
    return %arg0, %c0_i32, %c0_i32_0 : i32, i32, i32
  }
  func.func @transform_4(%arg0: i32, %arg1: i32) -> (i32, i32, i32, i32) {
    %c0_i32 = arith.constant 0 : i32
    %c0_i32_0 = arith.constant 0 : i32
    %c0_i32_1 = arith.constant 0 : i32
    return %arg0, %c0_i32, %arg1, %c0_i32_0 : i32, i32, i32, i32
  }
  func.func @transform_5(%arg0: i32, %arg1: i32) -> (i32, i32, i32) {
    %c0_i32 = arith.constant 0 : i32
    %c0_i32_0 = arith.constant 0 : i32
    return %arg0, %arg1, %c0_i32 : i32, i32, i32
  }
}

module attributes {stable_mosaic.version = 11 : i64} {
  func.func @_bigru_dir_kernel(%arg0: i32, %arg1: i32, %arg2: memref<8x1xi32, #tpu.memory_space<vmem>>, %arg3: memref<1x8x8x384xbf16, #tpu.memory_space<vmem>>, %arg4: memref<1x128x384xbf16, #tpu.memory_space<vmem>>, %arg5: memref<1x1x128xf32, #tpu.memory_space<vmem>>, %arg6: memref<1x8x8x128xf32, #tpu.memory_space<vmem>>, %arg7: memref<1x8x128xf32, #tpu.memory_space<vmem>>) attributes {dimension_semantics = [#tpu.dimension_semantics<parallel>, #tpu.dimension_semantics<parallel>], iteration_bounds = array<i64: 2, 1>, scalar_prefetch = 0 : i64, scratch_operands = 0 : i64, tpu.core_type = #tpu.core_type<tc>, window_params = [{transform_indices = @transform_0, window_bounds = array<i64: 8, 1>}, {transform_indices = @transform_1, window_bounds = array<i64: 1, 8, 8, 384>}, {transform_indices = @transform_2, window_bounds = array<i64: 1, 128, 384>}, {transform_indices = @transform_3, window_bounds = array<i64: 1, 1, 128>}, {transform_indices = @transform_4, window_bounds = array<i64: 1, 8, 8, 128>}, {transform_indices = @transform_5, window_bounds = array<i64: 1, 8, 128>}]} {
    %c0 = arith.constant 0 : index
    %c0_0 = arith.constant 0 : index
    %c0_1 = arith.constant 0 : index
    %0 = vector.load %arg4[%c0, %c0_0, %c0_1] : memref<1x128x384xbf16, #tpu.memory_space<vmem>>, vector<1x128x384xbf16>
    %1 = vector.shape_cast %0 : vector<1x128x384xbf16> to vector<128x384xbf16>
    %c0_2 = arith.constant 0 : index
    %c0_3 = arith.constant 0 : index
    %c0_4 = arith.constant 0 : index
    %2 = vector.load %arg5[%c0_2, %c0_3, %c0_4] : memref<1x1x128xf32, #tpu.memory_space<vmem>>, vector<1x1x128xf32>
    %3 = vector.shape_cast %2 : vector<1x1x128xf32> to vector<1x128xf32>
    %c0_5 = arith.constant 0 : index
    %c0_6 = arith.constant 0 : index
    %4 = vector.load %arg2[%c0_5, %c0_6] : memref<8x1xi32, #tpu.memory_space<vmem>>, vector<8x1xi32>
    %c0_i32 = arith.constant 0 : i32
    %5 = arith.cmpi eq, %arg0, %c0_i32 : i32
    %6 = arith.extui %5 : i1 to i32
    %c0_i32_7 = arith.constant 0 : i32
    %7 = arith.cmpi ne, %6, %c0_i32_7 : i32
    scf.if %7 {
      %cst = arith.constant 0.000000e+00 : f32
      %11 = vector.broadcast %cst : f32 to vector<8x128xf32>
      %c0_9 = arith.constant 0 : index
      %c0_10 = arith.constant 0 : index
      %c0_11 = arith.constant 0 : index
      %c0_12 = arith.constant 0 : index
      %12 = vector.load %arg3[%c0_9, %c0_10, %c0_11, %c0_12] : memref<1x8x8x384xbf16, #tpu.memory_space<vmem>>, vector<1x1x8x384xbf16>
      %13 = vector.shape_cast %12 : vector<1x1x8x384xbf16> to vector<8x384xbf16>
      %14 = arith.extf %13 : vector<8x384xbf16> to vector<8x384xf32>
      %15 = arith.truncf %11 : vector<8x128xf32> to vector<8x128xbf16>
      %cst_13 = arith.constant dense<0.000000e+00> : vector<8x384xf32>
      %16 = tpu.matmul %15, %1, %cst_13 {dimension_numbers = #tpu.dot_dimension_numbers<[1], [0], [0], [1], [0, 0, 1, 1], [], []>} : vector<8x128xbf16>, vector<128x384xbf16>, vector<8x384xf32> -> vector<8x384xf32>
      %17 = vector.extract_strided_slice %14 {offsets = [0, 0], sizes = [8, 128], strides = [1, 1]} : vector<8x384xf32> to vector<8x128xf32>
      %18 = vector.extract_strided_slice %16 {offsets = [0, 0], sizes = [8, 128], strides = [1, 1]} : vector<8x384xf32> to vector<8x128xf32>
      %19 = arith.addf %17, %18 : vector<8x128xf32>
      %20 = arith.negf %19 : vector<8x128xf32>
      %21 = math.exp %20 : vector<8x128xf32>
      %cst_14 = arith.constant 1.000000e+00 : f32
      %22 = vector.broadcast %cst_14 : f32 to vector<8x128xf32>
      %23 = arith.addf %22, %21 : vector<8x128xf32>
      %24 = arith.divf %22, %23 : vector<8x128xf32>
      %25 = vector.extract_strided_slice %14 {offsets = [0, 128], sizes = [8, 128], strides = [1, 1]} : vector<8x384xf32> to vector<8x128xf32>
      %26 = vector.extract_strided_slice %16 {offsets = [0, 128], sizes = [8, 128], strides = [1, 1]} : vector<8x384xf32> to vector<8x128xf32>
      %27 = arith.addf %25, %26 : vector<8x128xf32>
      %28 = arith.negf %27 : vector<8x128xf32>
      %29 = math.exp %28 : vector<8x128xf32>
      %cst_15 = arith.constant 1.000000e+00 : f32
      %30 = vector.broadcast %cst_15 : f32 to vector<8x128xf32>
      %31 = arith.addf %30, %29 : vector<8x128xf32>
      %32 = arith.divf %30, %31 : vector<8x128xf32>
      %33 = vector.extract_strided_slice %14 {offsets = [0, 256], sizes = [8, 128], strides = [1, 1]} : vector<8x384xf32> to vector<8x128xf32>
      %34 = vector.extract_strided_slice %16 {offsets = [0, 256], sizes = [8, 128], strides = [1, 1]} : vector<8x384xf32> to vector<8x128xf32>
      %35 = vector.broadcast %3 : vector<1x128xf32> to vector<8x128xf32>
      %36 = arith.addf %34, %35 : vector<8x128xf32>
      %37 = arith.mulf %24, %36 : vector<8x128xf32>
      %38 = arith.addf %33, %37 : vector<8x128xf32>
      %39 = math.tanh %38 : vector<8x128xf32>
      %cst_16 = arith.constant 1.000000e+00 : f32
      %40 = vector.broadcast %cst_16 : f32 to vector<8x128xf32>
      %41 = arith.subf %40, %32 : vector<8x128xf32>
      %42 = arith.mulf %41, %39 : vector<8x128xf32>
      %43 = arith.mulf %32, %11 : vector<8x128xf32>
      %44 = arith.addf %42, %43 : vector<8x128xf32>
      %c0_i32_17 = arith.constant 0 : i32
      %45 = vector.broadcast %c0_i32_17 : i32 to vector<8x1xi32>
      %46 = arith.cmpi sgt, %4, %45 : vector<8x1xi32>
      %cst_18 = arith.constant 0.000000e+00 : f32
      %47 = vector.shape_cast %46 : vector<8x1xi1> to vector<8x1xi1>
      %48 = vector.broadcast %47 : vector<8x1xi1> to vector<8x128xi1>
      %49 = vector.broadcast %cst_18 : f32 to vector<8x128xf32>
      %50 = arith.select %48, %44, %49 : vector<8x128xi1>, vector<8x128xf32>
      %c0_19 = arith.constant 0 : index
      %c0_20 = arith.constant 0 : index
      %c0_21 = arith.constant 0 : index
      %c0_22 = arith.constant 0 : index
      %51 = vector.load %arg6[%c0_19, %c0_20, %c0_21, %c0_22] : memref<1x8x8x128xf32, #tpu.memory_space<vmem>>, vector<1x1x8x128xf32>
      %52 = vector.shape_cast %51 : vector<1x1x8x128xf32> to vector<8x128xf32>
      %53 = vector.shape_cast %50 : vector<8x128xf32> to vector<1x1x8x128xf32>
      tpu.vector_store %arg6[%c0_19, %c0_20, %c0_21, %c0_22], %53 {strides = array<i32>} : memref<1x8x8x128xf32, #tpu.memory_space<vmem>>, vector<1x1x8x128xf32>,
      %54 = vector.shape_cast %46 : vector<8x1xi1> to vector<8x1xi1>
      %55 = vector.broadcast %54 : vector<8x1xi1> to vector<8x128xi1>
      %56 = arith.select %55, %44, %11 : vector<8x128xi1>, vector<8x128xf32>
      %c0_23 = arith.constant 0 : index
      %c1 = arith.constant 1 : index
      %c0_24 = arith.constant 0 : index
      %c0_25 = arith.constant 0 : index
      %57 = vector.load %arg3[%c0_23, %c1, %c0_24, %c0_25] : memref<1x8x8x384xbf16, #tpu.memory_space<vmem>>, vector<1x1x8x384xbf16>
      %58 = vector.shape_cast %57 : vector<1x1x8x384xbf16> to vector<8x384xbf16>
      %59 = arith.extf %58 : vector<8x384xbf16> to vector<8x384xf32>
      %60 = arith.truncf %56 : vector<8x128xf32> to vector<8x128xbf16>
      %cst_26 = arith.constant dense<0.000000e+00> : vector<8x384xf32>
      %61 = tpu.matmul %60, %1, %cst_26 {dimension_numbers = #tpu.dot_dimension_numbers<[1], [0], [0], [1], [0, 0, 1, 1], [], []>} : vector<8x128xbf16>, vector<128x384xbf16>, vector<8x384xf32> -> vector<8x384xf32>
      %62 = vector.extract_strided_slice %59 {offsets = [0, 0], sizes = [8, 128], strides = [1, 1]} : vector<8x384xf32> to vector<8x128xf32>
      %63 = vector.extract_strided_slice %61 {offsets = [0, 0], sizes = [8, 128], strides = [1, 1]} : vector<8x384xf32> to vector<8x128xf32>
      %64 = arith.addf %62, %63 : vector<8x128xf32>
      %65 = arith.negf %64 : vector<8x128xf32>
      %66 = math.exp %65 : vector<8x128xf32>
      %cst_27 = arith.constant 1.000000e+00 : f32
      %67 = vector.broadcast %cst_27 : f32 to vector<8x128xf32>
      %68 = arith.addf %67, %66 : vector<8x128xf32>
      %69 = arith.divf %67, %68 : vector<8x128xf32>
      %70 = vector.extract_strided_slice %59 {offsets = [0, 128], sizes = [8, 128], strides = [1, 1]} : vector<8x384xf32> to vector<8x128xf32>
      %71 = vector.extract_strided_slice %61 {offsets = [0, 128], sizes = [8, 128], strides = [1, 1]} : vector<8x384xf32> to vector<8x128xf32>
      %72 = arith.addf %70, %71 : vector<8x128xf32>
      %73 = arith.negf %72 : vector<8x128xf32>
      %74 = math.exp %73 : vector<8x128xf32>
      %cst_28 = arith.constant 1.000000e+00 : f32
      %75 = vector.broadcast %cst_28 : f32 to vector<8x128xf32>
      %76 = arith.addf %75, %74 : vector<8x128xf32>
      %77 = arith.divf %75, %76 : vector<8x128xf32>
      %78 = vector.extract_strided_slice %59 {offsets = [0, 256], sizes = [8, 128], strides = [1, 1]} : vector<8x384xf32> to vector<8x128xf32>
      %79 = vector.extract_strided_slice %61 {offsets = [0, 256], sizes = [8, 128], strides = [1, 1]} : vector<8x384xf32> to vector<8x128xf32>
      %80 = vector.broadcast %3 : vector<1x128xf32> to vector<8x128xf32>
      %81 = arith.addf %79, %80 : vector<8x128xf32>
      %82 = arith.mulf %69, %81 : vector<8x128xf32>
      %83 = arith.addf %78, %82 : vector<8x128xf32>
      %84 = math.tanh %83 : vector<8x128xf32>
      %cst_29 = arith.constant 1.000000e+00 : f32
      %85 = vector.broadcast %cst_29 : f32 to vector<8x128xf32>
      %86 = arith.subf %85, %77 : vector<8x128xf32>
      %87 = arith.mulf %86, %84 : vector<8x128xf32>
      %88 = arith.mulf %77, %56 : vector<8x128xf32>
      %89 = arith.addf %87, %88 : vector<8x128xf32>
      %c1_i32_30 = arith.constant 1 : i32
      %90 = vector.broadcast %c1_i32_30 : i32 to vector<8x1xi32>
      %91 = arith.cmpi sgt, %4, %90 : vector<8x1xi32>
      %cst_31 = arith.constant 0.000000e+00 : f32
      %92 = vector.shape_cast %91 : vector<8x1xi1> to vector<8x1xi1>
      %93 = vector.broadcast %92 : vector<8x1xi1> to vector<8x128xi1>
      %94 = vector.broadcast %cst_31 : f32 to vector<8x128xf32>
      %95 = arith.select %93, %89, %94 : vector<8x128xi1>, vector<8x128xf32>
      %c0_32 = arith.constant 0 : index
      %c1_33 = arith.constant 1 : index
      %c0_34 = arith.constant 0 : index
      %c0_35 = arith.constant 0 : index
      %96 = vector.load %arg6[%c0_32, %c1_33, %c0_34, %c0_35] : memref<1x8x8x128xf32, #tpu.memory_space<vmem>>, vector<1x1x8x128xf32>
      %97 = vector.shape_cast %96 : vector<1x1x8x128xf32> to vector<8x128xf32>
      %98 = vector.shape_cast %95 : vector<8x128xf32> to vector<1x1x8x128xf32>
      tpu.vector_store %arg6[%c0_32, %c1_33, %c0_34, %c0_35], %98 {strides = array<i32>} : memref<1x8x8x128xf32, #tpu.memory_space<vmem>>, vector<1x1x8x128xf32>,
      %99 = vector.shape_cast %91 : vector<8x1xi1> to vector<8x1xi1>
      %100 = vector.broadcast %99 : vector<8x1xi1> to vector<8x128xi1>
      %101 = arith.select %100, %89, %56 : vector<8x128xi1>, vector<8x128xf32>
      %c0_36 = arith.constant 0 : index
      %c2 = arith.constant 2 : index
      %c0_37 = arith.constant 0 : index
      %c0_38 = arith.constant 0 : index
      %102 = vector.load %arg3[%c0_36, %c2, %c0_37, %c0_38] : memref<1x8x8x384xbf16, #tpu.memory_space<vmem>>, vector<1x1x8x384xbf16>
      %103 = vector.shape_cast %102 : vector<1x1x8x384xbf16> to vector<8x384xbf16>
      %104 = arith.extf %103 : vector<8x384xbf16> to vector<8x384xf32>
      %105 = arith.truncf %101 : vector<8x128xf32> to vector<8x128xbf16>
      %cst_39 = arith.constant dense<0.000000e+00> : vector<8x384xf32>
      %106 = tpu.matmul %105, %1, %cst_39 {dimension_numbers = #tpu.dot_dimension_numbers<[1], [0], [0], [1], [0, 0, 1, 1], [], []>} : vector<8x128xbf16>, vector<128x384xbf16>, vector<8x384xf32> -> vector<8x384xf32>
      %107 = vector.extract_strided_slice %104 {offsets = [0, 0], sizes = [8, 128], strides = [1, 1]} : vector<8x384xf32> to vector<8x128xf32>
      %108 = vector.extract_strided_slice %106 {offsets = [0, 0], sizes = [8, 128], strides = [1, 1]} : vector<8x384xf32> to vector<8x128xf32>
      %109 = arith.addf %107, %108 : vector<8x128xf32>
      %110 = arith.negf %109 : vector<8x128xf32>
      %111 = math.exp %110 : vector<8x128xf32>
      %cst_40 = arith.constant 1.000000e+00 : f32
      %112 = vector.broadcast %cst_40 : f32 to vector<8x128xf32>
      %113 = arith.addf %112, %111 : vector<8x128xf32>
      %114 = arith.divf %112, %113 : vector<8x128xf32>
      %115 = vector.extract_strided_slice %104 {offsets = [0, 128], sizes = [8, 128], strides = [1, 1]} : vector<8x384xf32> to vector<8x128xf32>
      %116 = vector.extract_strided_slice %106 {offsets = [0, 128], sizes = [8, 128], strides = [1, 1]} : vector<8x384xf32> to vector<8x128xf32>
      %117 = arith.addf %115, %116 : vector<8x128xf32>
      %118 = arith.negf %117 : vector<8x128xf32>
      %119 = math.exp %118 : vector<8x128xf32>
      %cst_41 = arith.constant 1.000000e+00 : f32
      %120 = vector.broadcast %cst_41 : f32 to vector<8x128xf32>
      %121 = arith.addf %120, %119 : vector<8x128xf32>
      %122 = arith.divf %120, %121 : vector<8x128xf32>
      %123 = vector.extract_strided_slice %104 {offsets = [0, 256], sizes = [8, 128], strides = [1, 1]} : vector<8x384xf32> to vector<8x128xf32>
      %124 = vector.extract_strided_slice %106 {offsets = [0, 256], sizes = [8, 128], strides = [1, 1]} : vector<8x384xf32> to vector<8x128xf32>
      %125 = vector.broadcast %3 : vector<1x128xf32> to vector<8x128xf32>
      %126 = arith.addf %124, %125 : vector<8x128xf32>
      %127 = arith.mulf %114, %126 : vector<8x128xf32>
      %128 = arith.addf %123, %127 : vector<8x128xf32>
      %129 = math.tanh %128 : vector<8x128xf32>
      %cst_42 = arith.constant 1.000000e+00 : f32
      %130 = vector.broadcast %cst_42 : f32 to vector<8x128xf32>
      %131 = arith.subf %130, %122 : vector<8x128xf32>
      %132 = arith.mulf %131, %129 : vector<8x128xf32>
      %133 = arith.mulf %122, %101 : vector<8x128xf32>
      %134 = arith.addf %132, %133 : vector<8x128xf32>
      %c2_i32 = arith.constant 2 : i32
      %135 = vector.broadcast %c2_i32 : i32 to vector<8x1xi32>
      %136 = arith.cmpi sgt, %4, %135 : vector<8x1xi32>
      %cst_43 = arith.constant 0.000000e+00 : f32
      %137 = vector.shape_cast %136 : vector<8x1xi1> to vector<8x1xi1>
      %138 = vector.broadcast %137 : vector<8x1xi1> to vector<8x128xi1>
      %139 = vector.broadcast %cst_43 : f32 to vector<8x128xf32>
      %140 = arith.select %138, %134, %139 : vector<8x128xi1>, vector<8x128xf32>
      %c0_44 = arith.constant 0 : index
      %c2_45 = arith.constant 2 : index
      %c0_46 = arith.constant 0 : index
      %c0_47 = arith.constant 0 : index
      %141 = vector.load %arg6[%c0_44, %c2_45, %c0_46, %c0_47] : memref<1x8x8x128xf32, #tpu.memory_space<vmem>>, vector<1x1x8x128xf32>
      %142 = vector.shape_cast %141 : vector<1x1x8x128xf32> to vector<8x128xf32>
      %143 = vector.shape_cast %140 : vector<8x128xf32> to vector<1x1x8x128xf32>
      tpu.vector_store %arg6[%c0_44, %c2_45, %c0_46, %c0_47], %143 {strides = array<i32>} : memref<1x8x8x128xf32, #tpu.memory_space<vmem>>, vector<1x1x8x128xf32>,
      %144 = vector.shape_cast %136 : vector<8x1xi1> to vector<8x1xi1>
      %145 = vector.broadcast %144 : vector<8x1xi1> to vector<8x128xi1>
      %146 = arith.select %145, %134, %101 : vector<8x128xi1>, vector<8x128xf32>
      %c0_48 = arith.constant 0 : index
      %c3 = arith.constant 3 : index
      %c0_49 = arith.constant 0 : index
      %c0_50 = arith.constant 0 : index
      %147 = vector.load %arg3[%c0_48, %c3, %c0_49, %c0_50] : memref<1x8x8x384xbf16, #tpu.memory_space<vmem>>, vector<1x1x8x384xbf16>
      %148 = vector.shape_cast %147 : vector<1x1x8x384xbf16> to vector<8x384xbf16>
      %149 = arith.extf %148 : vector<8x384xbf16> to vector<8x384xf32>
      %150 = arith.truncf %146 : vector<8x128xf32> to vector<8x128xbf16>
      %cst_51 = arith.constant dense<0.000000e+00> : vector<8x384xf32>
      %151 = tpu.matmul %150, %1, %cst_51 {dimension_numbers = #tpu.dot_dimension_numbers<[1], [0], [0], [1], [0, 0, 1, 1], [], []>} : vector<8x128xbf16>, vector<128x384xbf16>, vector<8x384xf32> -> vector<8x384xf32>
      %152 = vector.extract_strided_slice %149 {offsets = [0, 0], sizes = [8, 128], strides = [1, 1]} : vector<8x384xf32> to vector<8x128xf32>
      %153 = vector.extract_strided_slice %151 {offsets = [0, 0], sizes = [8, 128], strides = [1, 1]} : vector<8x384xf32> to vector<8x128xf32>
      %154 = arith.addf %152, %153 : vector<8x128xf32>
      %155 = arith.negf %154 : vector<8x128xf32>
      %156 = math.exp %155 : vector<8x128xf32>
      %cst_52 = arith.constant 1.000000e+00 : f32
      %157 = vector.broadcast %cst_52 : f32 to vector<8x128xf32>
      %158 = arith.addf %157, %156 : vector<8x128xf32>
      %159 = arith.divf %157, %158 : vector<8x128xf32>
      %160 = vector.extract_strided_slice %149 {offsets = [0, 128], sizes = [8, 128], strides = [1, 1]} : vector<8x384xf32> to vector<8x128xf32>
      %161 = vector.extract_strided_slice %151 {offsets = [0, 128], sizes = [8, 128], strides = [1, 1]} : vector<8x384xf32> to vector<8x128xf32>
      %162 = arith.addf %160, %161 : vector<8x128xf32>
      %163 = arith.negf %162 : vector<8x128xf32>
      %164 = math.exp %163 : vector<8x128xf32>
      %cst_53 = arith.constant 1.000000e+00 : f32
      %165 = vector.broadcast %cst_53 : f32 to vector<8x128xf32>
      %166 = arith.addf %165, %164 : vector<8x128xf32>
      %167 = arith.divf %165, %166 : vector<8x128xf32>
      %168 = vector.extract_strided_slice %149 {offsets = [0, 256], sizes = [8, 128], strides = [1, 1]} : vector<8x384xf32> to vector<8x128xf32>
      %169 = vector.extract_strided_slice %151 {offsets = [0, 256], sizes = [8, 128], strides = [1, 1]} : vector<8x384xf32> to vector<8x128xf32>
      %170 = vector.broadcast %3 : vector<1x128xf32> to vector<8x128xf32>
      %171 = arith.addf %169, %170 : vector<8x128xf32>
      %172 = arith.mulf %159, %171 : vector<8x128xf32>
      %173 = arith.addf %168, %172 : vector<8x128xf32>
      %174 = math.tanh %173 : vector<8x128xf32>
      %cst_54 = arith.constant 1.000000e+00 : f32
      %175 = vector.broadcast %cst_54 : f32 to vector<8x128xf32>
      %176 = arith.subf %175, %167 : vector<8x128xf32>
      %177 = arith.mulf %176, %174 : vector<8x128xf32>
      %178 = arith.mulf %167, %146 : vector<8x128xf32>
      %179 = arith.addf %177, %178 : vector<8x128xf32>
      %c3_i32 = arith.constant 3 : i32
      %180 = vector.broadcast %c3_i32 : i32 to vector<8x1xi32>
      %181 = arith.cmpi sgt, %4, %180 : vector<8x1xi32>
      %cst_55 = arith.constant 0.000000e+00 : f32
      %182 = vector.shape_cast %181 : vector<8x1xi1> to vector<8x1xi1>
      %183 = vector.broadcast %182 : vector<8x1xi1> to vector<8x128xi1>
      %184 = vector.broadcast %cst_55 : f32 to vector<8x128xf32>
      %185 = arith.select %183, %179, %184 : vector<8x128xi1>, vector<8x128xf32>
      %c0_56 = arith.constant 0 : index
      %c3_57 = arith.constant 3 : index
      %c0_58 = arith.constant 0 : index
      %c0_59 = arith.constant 0 : index
      %186 = vector.load %arg6[%c0_56, %c3_57, %c0_58, %c0_59] : memref<1x8x8x128xf32, #tpu.memory_space<vmem>>, vector<1x1x8x128xf32>
      %187 = vector.shape_cast %186 : vector<1x1x8x128xf32> to vector<8x128xf32>
      %188 = vector.shape_cast %185 : vector<8x128xf32> to vector<1x1x8x128xf32>
      tpu.vector_store %arg6[%c0_56, %c3_57, %c0_58, %c0_59], %188 {strides = array<i32>} : memref<1x8x8x128xf32, #tpu.memory_space<vmem>>, vector<1x1x8x128xf32>,
      %189 = vector.shape_cast %181 : vector<8x1xi1> to vector<8x1xi1>
      %190 = vector.broadcast %189 : vector<8x1xi1> to vector<8x128xi1>
      %191 = arith.select %190, %179, %146 : vector<8x128xi1>, vector<8x128xf32>
      %c0_60 = arith.constant 0 : index
      %c4 = arith.constant 4 : index
      %c0_61 = arith.constant 0 : index
      %c0_62 = arith.constant 0 : index
      %192 = vector.load %arg3[%c0_60, %c4, %c0_61, %c0_62] : memref<1x8x8x384xbf16, #tpu.memory_space<vmem>>, vector<1x1x8x384xbf16>
      %193 = vector.shape_cast %192 : vector<1x1x8x384xbf16> to vector<8x384xbf16>
      %194 = arith.extf %193 : vector<8x384xbf16> to vector<8x384xf32>
      %195 = arith.truncf %191 : vector<8x128xf32> to vector<8x128xbf16>
      %cst_63 = arith.constant dense<0.000000e+00> : vector<8x384xf32>
      %196 = tpu.matmul %195, %1, %cst_63 {dimension_numbers = #tpu.dot_dimension_numbers<[1], [0], [0], [1], [0, 0, 1, 1], [], []>} : vector<8x128xbf16>, vector<128x384xbf16>, vector<8x384xf32> -> vector<8x384xf32>
      %197 = vector.extract_strided_slice %194 {offsets = [0, 0], sizes = [8, 128], strides = [1, 1]} : vector<8x384xf32> to vector<8x128xf32>
      %198 = vector.extract_strided_slice %196 {offsets = [0, 0], sizes = [8, 128], strides = [1, 1]} : vector<8x384xf32> to vector<8x128xf32>
      %199 = arith.addf %197, %198 : vector<8x128xf32>
      %200 = arith.negf %199 : vector<8x128xf32>
      %201 = math.exp %200 : vector<8x128xf32>
      %cst_64 = arith.constant 1.000000e+00 : f32
      %202 = vector.broadcast %cst_64 : f32 to vector<8x128xf32>
      %203 = arith.addf %202, %201 : vector<8x128xf32>
      %204 = arith.divf %202, %203 : vector<8x128xf32>
      %205 = vector.extract_strided_slice %194 {offsets = [0, 128], sizes = [8, 128], strides = [1, 1]} : vector<8x384xf32> to vector<8x128xf32>
      %206 = vector.extract_strided_slice %196 {offsets = [0, 128], sizes = [8, 128], strides = [1, 1]} : vector<8x384xf32> to vector<8x128xf32>
      %207 = arith.addf %205, %206 : vector<8x128xf32>
      %208 = arith.negf %207 : vector<8x128xf32>
      %209 = math.exp %208 : vector<8x128xf32>
      %cst_65 = arith.constant 1.000000e+00 : f32
      %210 = vector.broadcast %cst_65 : f32 to vector<8x128xf32>
      %211 = arith.addf %210, %209 : vector<8x128xf32>
      %212 = arith.divf %210, %211 : vector<8x128xf32>
      %213 = vector.extract_strided_slice %194 {offsets = [0, 256], sizes = [8, 128], strides = [1, 1]} : vector<8x384xf32> to vector<8x128xf32>
      %214 = vector.extract_strided_slice %196 {offsets = [0, 256], sizes = [8, 128], strides = [1, 1]} : vector<8x384xf32> to vector<8x128xf32>
      %215 = vector.broadcast %3 : vector<1x128xf32> to vector<8x128xf32>
      %216 = arith.addf %214, %215 : vector<8x128xf32>
      %217 = arith.mulf %204, %216 : vector<8x128xf32>
      %218 = arith.addf %213, %217 : vector<8x128xf32>
      %219 = math.tanh %218 : vector<8x128xf32>
      %cst_66 = arith.constant 1.000000e+00 : f32
      %220 = vector.broadcast %cst_66 : f32 to vector<8x128xf32>
      %221 = arith.subf %220, %212 : vector<8x128xf32>
      %222 = arith.mulf %221, %219 : vector<8x128xf32>
      %223 = arith.mulf %212, %191 : vector<8x128xf32>
      %224 = arith.addf %222, %223 : vector<8x128xf32>
      %c4_i32 = arith.constant 4 : i32
      %225 = vector.broadcast %c4_i32 : i32 to vector<8x1xi32>
      %226 = arith.cmpi sgt, %4, %225 : vector<8x1xi32>
      %cst_67 = arith.constant 0.000000e+00 : f32
      %227 = vector.shape_cast %226 : vector<8x1xi1> to vector<8x1xi1>
      %228 = vector.broadcast %227 : vector<8x1xi1> to vector<8x128xi1>
      %229 = vector.broadcast %cst_67 : f32 to vector<8x128xf32>
      %230 = arith.select %228, %224, %229 : vector<8x128xi1>, vector<8x128xf32>
      %c0_68 = arith.constant 0 : index
      %c4_69 = arith.constant 4 : index
      %c0_70 = arith.constant 0 : index
      %c0_71 = arith.constant 0 : index
      %231 = vector.load %arg6[%c0_68, %c4_69, %c0_70, %c0_71] : memref<1x8x8x128xf32, #tpu.memory_space<vmem>>, vector<1x1x8x128xf32>
      %232 = vector.shape_cast %231 : vector<1x1x8x128xf32> to vector<8x128xf32>
      %233 = vector.shape_cast %230 : vector<8x128xf32> to vector<1x1x8x128xf32>
      tpu.vector_store %arg6[%c0_68, %c4_69, %c0_70, %c0_71], %233 {strides = array<i32>} : memref<1x8x8x128xf32, #tpu.memory_space<vmem>>, vector<1x1x8x128xf32>,
      %234 = vector.shape_cast %226 : vector<8x1xi1> to vector<8x1xi1>
      %235 = vector.broadcast %234 : vector<8x1xi1> to vector<8x128xi1>
      %236 = arith.select %235, %224, %191 : vector<8x128xi1>, vector<8x128xf32>
      %c0_72 = arith.constant 0 : index
      %c5 = arith.constant 5 : index
      %c0_73 = arith.constant 0 : index
      %c0_74 = arith.constant 0 : index
      %237 = vector.load %arg3[%c0_72, %c5, %c0_73, %c0_74] : memref<1x8x8x384xbf16, #tpu.memory_space<vmem>>, vector<1x1x8x384xbf16>
      %238 = vector.shape_cast %237 : vector<1x1x8x384xbf16> to vector<8x384xbf16>
      %239 = arith.extf %238 : vector<8x384xbf16> to vector<8x384xf32>
      %240 = arith.truncf %236 : vector<8x128xf32> to vector<8x128xbf16>
      %cst_75 = arith.constant dense<0.000000e+00> : vector<8x384xf32>
      %241 = tpu.matmul %240, %1, %cst_75 {dimension_numbers = #tpu.dot_dimension_numbers<[1], [0], [0], [1], [0, 0, 1, 1], [], []>} : vector<8x128xbf16>, vector<128x384xbf16>, vector<8x384xf32> -> vector<8x384xf32>
      %242 = vector.extract_strided_slice %239 {offsets = [0, 0], sizes = [8, 128], strides = [1, 1]} : vector<8x384xf32> to vector<8x128xf32>
      %243 = vector.extract_strided_slice %241 {offsets = [0, 0], sizes = [8, 128], strides = [1, 1]} : vector<8x384xf32> to vector<8x128xf32>
      %244 = arith.addf %242, %243 : vector<8x128xf32>
      %245 = arith.negf %244 : vector<8x128xf32>
      %246 = math.exp %245 : vector<8x128xf32>
      %cst_76 = arith.constant 1.000000e+00 : f32
      %247 = vector.broadcast %cst_76 : f32 to vector<8x128xf32>
      %248 = arith.addf %247, %246 : vector<8x128xf32>
      %249 = arith.divf %247, %248 : vector<8x128xf32>
      %250 = vector.extract_strided_slice %239 {offsets = [0, 128], sizes = [8, 128], strides = [1, 1]} : vector<8x384xf32> to vector<8x128xf32>
      %251 = vector.extract_strided_slice %241 {offsets = [0, 128], sizes = [8, 128], strides = [1, 1]} : vector<8x384xf32> to vector<8x128xf32>
      %252 = arith.addf %250, %251 : vector<8x128xf32>
      %253 = arith.negf %252 : vector<8x128xf32>
      %254 = math.exp %253 : vector<8x128xf32>
      %cst_77 = arith.constant 1.000000e+00 : f32
      %255 = vector.broadcast %cst_77 : f32 to vector<8x128xf32>
      %256 = arith.addf %255, %254 : vector<8x128xf32>
      %257 = arith.divf %255, %256 : vector<8x128xf32>
      %258 = vector.extract_strided_slice %239 {offsets = [0, 256], sizes = [8, 128], strides = [1, 1]} : vector<8x384xf32> to vector<8x128xf32>
      %259 = vector.extract_strided_slice %241 {offsets = [0, 256], sizes = [8, 128], strides = [1, 1]} : vector<8x384xf32> to vector<8x128xf32>
      %260 = vector.broadcast %3 : vector<1x128xf32> to vector<8x128xf32>
      %261 = arith.addf %259, %260 : vector<8x128xf32>
      %262 = arith.mulf %249, %261 : vector<8x128xf32>
      %263 = arith.addf %258, %262 : vector<8x128xf32>
      %264 = math.tanh %263 : vector<8x128xf32>
      %cst_78 = arith.constant 1.000000e+00 : f32
      %265 = vector.broadcast %cst_78 : f32 to vector<8x128xf32>
      %266 = arith.subf %265, %257 : vector<8x128xf32>
      %267 = arith.mulf %266, %264 : vector<8x128xf32>
      %268 = arith.mulf %257, %236 : vector<8x128xf32>
      %269 = arith.addf %267, %268 : vector<8x128xf32>
      %c5_i32 = arith.constant 5 : i32
      %270 = vector.broadcast %c5_i32 : i32 to vector<8x1xi32>
      %271 = arith.cmpi sgt, %4, %270 : vector<8x1xi32>
      %cst_79 = arith.constant 0.000000e+00 : f32
      %272 = vector.shape_cast %271 : vector<8x1xi1> to vector<8x1xi1>
      %273 = vector.broadcast %272 : vector<8x1xi1> to vector<8x128xi1>
      %274 = vector.broadcast %cst_79 : f32 to vector<8x128xf32>
      %275 = arith.select %273, %269, %274 : vector<8x128xi1>, vector<8x128xf32>
      %c0_80 = arith.constant 0 : index
      %c5_81 = arith.constant 5 : index
      %c0_82 = arith.constant 0 : index
      %c0_83 = arith.constant 0 : index
      %276 = vector.load %arg6[%c0_80, %c5_81, %c0_82, %c0_83] : memref<1x8x8x128xf32, #tpu.memory_space<vmem>>, vector<1x1x8x128xf32>
      %277 = vector.shape_cast %276 : vector<1x1x8x128xf32> to vector<8x128xf32>
      %278 = vector.shape_cast %275 : vector<8x128xf32> to vector<1x1x8x128xf32>
      tpu.vector_store %arg6[%c0_80, %c5_81, %c0_82, %c0_83], %278 {strides = array<i32>} : memref<1x8x8x128xf32, #tpu.memory_space<vmem>>, vector<1x1x8x128xf32>,
      %279 = vector.shape_cast %271 : vector<8x1xi1> to vector<8x1xi1>
      %280 = vector.broadcast %279 : vector<8x1xi1> to vector<8x128xi1>
      %281 = arith.select %280, %269, %236 : vector<8x128xi1>, vector<8x128xf32>
      %c0_84 = arith.constant 0 : index
      %c6 = arith.constant 6 : index
      %c0_85 = arith.constant 0 : index
      %c0_86 = arith.constant 0 : index
      %282 = vector.load %arg3[%c0_84, %c6, %c0_85, %c0_86] : memref<1x8x8x384xbf16, #tpu.memory_space<vmem>>, vector<1x1x8x384xbf16>
      %283 = vector.shape_cast %282 : vector<1x1x8x384xbf16> to vector<8x384xbf16>
      %284 = arith.extf %283 : vector<8x384xbf16> to vector<8x384xf32>
      %285 = arith.truncf %281 : vector<8x128xf32> to vector<8x128xbf16>
      %cst_87 = arith.constant dense<0.000000e+00> : vector<8x384xf32>
      %286 = tpu.matmul %285, %1, %cst_87 {dimension_numbers = #tpu.dot_dimension_numbers<[1], [0], [0], [1], [0, 0, 1, 1], [], []>} : vector<8x128xbf16>, vector<128x384xbf16>, vector<8x384xf32> -> vector<8x384xf32>
      %287 = vector.extract_strided_slice %284 {offsets = [0, 0], sizes = [8, 128], strides = [1, 1]} : vector<8x384xf32> to vector<8x128xf32>
      %288 = vector.extract_strided_slice %286 {offsets = [0, 0], sizes = [8, 128], strides = [1, 1]} : vector<8x384xf32> to vector<8x128xf32>
      %289 = arith.addf %287, %288 : vector<8x128xf32>
      %290 = arith.negf %289 : vector<8x128xf32>
      %291 = math.exp %290 : vector<8x128xf32>
      %cst_88 = arith.constant 1.000000e+00 : f32
      %292 = vector.broadcast %cst_88 : f32 to vector<8x128xf32>
      %293 = arith.addf %292, %291 : vector<8x128xf32>
      %294 = arith.divf %292, %293 : vector<8x128xf32>
      %295 = vector.extract_strided_slice %284 {offsets = [0, 128], sizes = [8, 128], strides = [1, 1]} : vector<8x384xf32> to vector<8x128xf32>
      %296 = vector.extract_strided_slice %286 {offsets = [0, 128], sizes = [8, 128], strides = [1, 1]} : vector<8x384xf32> to vector<8x128xf32>
      %297 = arith.addf %295, %296 : vector<8x128xf32>
      %298 = arith.negf %297 : vector<8x128xf32>
      %299 = math.exp %298 : vector<8x128xf32>
      %cst_89 = arith.constant 1.000000e+00 : f32
      %300 = vector.broadcast %cst_89 : f32 to vector<8x128xf32>
      %301 = arith.addf %300, %299 : vector<8x128xf32>
      %302 = arith.divf %300, %301 : vector<8x128xf32>
      %303 = vector.extract_strided_slice %284 {offsets = [0, 256], sizes = [8, 128], strides = [1, 1]} : vector<8x384xf32> to vector<8x128xf32>
      %304 = vector.extract_strided_slice %286 {offsets = [0, 256], sizes = [8, 128], strides = [1, 1]} : vector<8x384xf32> to vector<8x128xf32>
      %305 = vector.broadcast %3 : vector<1x128xf32> to vector<8x128xf32>
      %306 = arith.addf %304, %305 : vector<8x128xf32>
      %307 = arith.mulf %294, %306 : vector<8x128xf32>
      %308 = arith.addf %303, %307 : vector<8x128xf32>
      %309 = math.tanh %308 : vector<8x128xf32>
      %cst_90 = arith.constant 1.000000e+00 : f32
      %310 = vector.broadcast %cst_90 : f32 to vector<8x128xf32>
      %311 = arith.subf %310, %302 : vector<8x128xf32>
      %312 = arith.mulf %311, %309 : vector<8x128xf32>
      %313 = arith.mulf %302, %281 : vector<8x128xf32>
      %314 = arith.addf %312, %313 : vector<8x128xf32>
      %c6_i32 = arith.constant 6 : i32
      %315 = vector.broadcast %c6_i32 : i32 to vector<8x1xi32>
      %316 = arith.cmpi sgt, %4, %315 : vector<8x1xi32>
      %cst_91 = arith.constant 0.000000e+00 : f32
      %317 = vector.shape_cast %316 : vector<8x1xi1> to vector<8x1xi1>
      %318 = vector.broadcast %317 : vector<8x1xi1> to vector<8x128xi1>
      %319 = vector.broadcast %cst_91 : f32 to vector<8x128xf32>
      %320 = arith.select %318, %314, %319 : vector<8x128xi1>, vector<8x128xf32>
      %c0_92 = arith.constant 0 : index
      %c6_93 = arith.constant 6 : index
      %c0_94 = arith.constant 0 : index
      %c0_95 = arith.constant 0 : index
      %321 = vector.load %arg6[%c0_92, %c6_93, %c0_94, %c0_95] : memref<1x8x8x128xf32, #tpu.memory_space<vmem>>, vector<1x1x8x128xf32>
      %322 = vector.shape_cast %321 : vector<1x1x8x128xf32> to vector<8x128xf32>
      %323 = vector.shape_cast %320 : vector<8x128xf32> to vector<1x1x8x128xf32>
      tpu.vector_store %arg6[%c0_92, %c6_93, %c0_94, %c0_95], %323 {strides = array<i32>} : memref<1x8x8x128xf32, #tpu.memory_space<vmem>>, vector<1x1x8x128xf32>,
      %324 = vector.shape_cast %316 : vector<8x1xi1> to vector<8x1xi1>
      %325 = vector.broadcast %324 : vector<8x1xi1> to vector<8x128xi1>
      %326 = arith.select %325, %314, %281 : vector<8x128xi1>, vector<8x128xf32>
      %c0_96 = arith.constant 0 : index
      %c7 = arith.constant 7 : index
      %c0_97 = arith.constant 0 : index
      %c0_98 = arith.constant 0 : index
      %327 = vector.load %arg3[%c0_96, %c7, %c0_97, %c0_98] : memref<1x8x8x384xbf16, #tpu.memory_space<vmem>>, vector<1x1x8x384xbf16>
      %328 = vector.shape_cast %327 : vector<1x1x8x384xbf16> to vector<8x384xbf16>
      %329 = arith.extf %328 : vector<8x384xbf16> to vector<8x384xf32>
      %330 = arith.truncf %326 : vector<8x128xf32> to vector<8x128xbf16>
      %cst_99 = arith.constant dense<0.000000e+00> : vector<8x384xf32>
      %331 = tpu.matmul %330, %1, %cst_99 {dimension_numbers = #tpu.dot_dimension_numbers<[1], [0], [0], [1], [0, 0, 1, 1], [], []>} : vector<8x128xbf16>, vector<128x384xbf16>, vector<8x384xf32> -> vector<8x384xf32>
      %332 = vector.extract_strided_slice %329 {offsets = [0, 0], sizes = [8, 128], strides = [1, 1]} : vector<8x384xf32> to vector<8x128xf32>
      %333 = vector.extract_strided_slice %331 {offsets = [0, 0], sizes = [8, 128], strides = [1, 1]} : vector<8x384xf32> to vector<8x128xf32>
      %334 = arith.addf %332, %333 : vector<8x128xf32>
      %335 = arith.negf %334 : vector<8x128xf32>
      %336 = math.exp %335 : vector<8x128xf32>
      %cst_100 = arith.constant 1.000000e+00 : f32
      %337 = vector.broadcast %cst_100 : f32 to vector<8x128xf32>
      %338 = arith.addf %337, %336 : vector<8x128xf32>
      %339 = arith.divf %337, %338 : vector<8x128xf32>
      %340 = vector.extract_strided_slice %329 {offsets = [0, 128], sizes = [8, 128], strides = [1, 1]} : vector<8x384xf32> to vector<8x128xf32>
      %341 = vector.extract_strided_slice %331 {offsets = [0, 128], sizes = [8, 128], strides = [1, 1]} : vector<8x384xf32> to vector<8x128xf32>
      %342 = arith.addf %340, %341 : vector<8x128xf32>
      %343 = arith.negf %342 : vector<8x128xf32>
      %344 = math.exp %343 : vector<8x128xf32>
      %cst_101 = arith.constant 1.000000e+00 : f32
      %345 = vector.broadcast %cst_101 : f32 to vector<8x128xf32>
      %346 = arith.addf %345, %344 : vector<8x128xf32>
      %347 = arith.divf %345, %346 : vector<8x128xf32>
      %348 = vector.extract_strided_slice %329 {offsets = [0, 256], sizes = [8, 128], strides = [1, 1]} : vector<8x384xf32> to vector<8x128xf32>
      %349 = vector.extract_strided_slice %331 {offsets = [0, 256], sizes = [8, 128], strides = [1, 1]} : vector<8x384xf32> to vector<8x128xf32>
      %350 = vector.broadcast %3 : vector<1x128xf32> to vector<8x128xf32>
      %351 = arith.addf %349, %350 : vector<8x128xf32>
      %352 = arith.mulf %339, %351 : vector<8x128xf32>
      %353 = arith.addf %348, %352 : vector<8x128xf32>
      %354 = math.tanh %353 : vector<8x128xf32>
      %cst_102 = arith.constant 1.000000e+00 : f32
      %355 = vector.broadcast %cst_102 : f32 to vector<8x128xf32>
      %356 = arith.subf %355, %347 : vector<8x128xf32>
      %357 = arith.mulf %356, %354 : vector<8x128xf32>
      %358 = arith.mulf %347, %326 : vector<8x128xf32>
      %359 = arith.addf %357, %358 : vector<8x128xf32>
      %c7_i32 = arith.constant 7 : i32
      %360 = vector.broadcast %c7_i32 : i32 to vector<8x1xi32>
      %361 = arith.cmpi sgt, %4, %360 : vector<8x1xi32>
      %cst_103 = arith.constant 0.000000e+00 : f32
      %362 = vector.shape_cast %361 : vector<8x1xi1> to vector<8x1xi1>
      %363 = vector.broadcast %362 : vector<8x1xi1> to vector<8x128xi1>
      %364 = vector.broadcast %cst_103 : f32 to vector<8x128xf32>
      %365 = arith.select %363, %359, %364 : vector<8x128xi1>, vector<8x128xf32>
      %c0_104 = arith.constant 0 : index
      %c7_105 = arith.constant 7 : index
      %c0_106 = arith.constant 0 : index
      %c0_107 = arith.constant 0 : index
      %366 = vector.load %arg6[%c0_104, %c7_105, %c0_106, %c0_107] : memref<1x8x8x128xf32, #tpu.memory_space<vmem>>, vector<1x1x8x128xf32>
      %367 = vector.shape_cast %366 : vector<1x1x8x128xf32> to vector<8x128xf32>
      %368 = vector.shape_cast %365 : vector<8x128xf32> to vector<1x1x8x128xf32>
      tpu.vector_store %arg6[%c0_104, %c7_105, %c0_106, %c0_107], %368 {strides = array<i32>} : memref<1x8x8x128xf32, #tpu.memory_space<vmem>>, vector<1x1x8x128xf32>,
      %369 = vector.shape_cast %361 : vector<8x1xi1> to vector<8x1xi1>
      %370 = vector.broadcast %369 : vector<8x1xi1> to vector<8x128xi1>
      %371 = arith.select %370, %359, %326 : vector<8x128xi1>, vector<8x128xf32>
      %c0_108 = arith.constant 0 : index
      %c0_109 = arith.constant 0 : index
      %c0_110 = arith.constant 0 : index
      %372 = vector.load %arg7[%c0_108, %c0_109, %c0_110] : memref<1x8x128xf32, #tpu.memory_space<vmem>>, vector<1x8x128xf32>
      %373 = vector.shape_cast %372 : vector<1x8x128xf32> to vector<8x128xf32>
      %374 = vector.shape_cast %371 : vector<8x128xf32> to vector<1x8x128xf32>
      tpu.vector_store %arg7[%c0_108, %c0_109, %c0_110], %374 {strides = array<i32>} : memref<1x8x128xf32, #tpu.memory_space<vmem>>, vector<1x8x128xf32>,
    } else {
    }
    %c1_i32 = arith.constant 1 : i32
    %8 = arith.cmpi eq, %arg0, %c1_i32 : i32
    %9 = arith.extui %8 : i1 to i32
    %c0_i32_8 = arith.constant 0 : i32
    %10 = arith.cmpi ne, %9, %c0_i32_8 : i32
    scf.if %10 {
      %cst = arith.constant 0.000000e+00 : f32
      %11 = vector.broadcast %cst : f32 to vector<8x128xf32>
      %c0_9 = arith.constant 0 : index
      %c7 = arith.constant 7 : index
      %c0_10 = arith.constant 0 : index
      %c0_11 = arith.constant 0 : index
      %12 = vector.load %arg3[%c0_9, %c7, %c0_10, %c0_11] : memref<1x8x8x384xbf16, #tpu.memory_space<vmem>>, vector<1x1x8x384xbf16>
      %13 = vector.shape_cast %12 : vector<1x1x8x384xbf16> to vector<8x384xbf16>
      %14 = arith.extf %13 : vector<8x384xbf16> to vector<8x384xf32>
      %15 = arith.truncf %11 : vector<8x128xf32> to vector<8x128xbf16>
      %cst_12 = arith.constant dense<0.000000e+00> : vector<8x384xf32>
      %16 = tpu.matmul %15, %1, %cst_12 {dimension_numbers = #tpu.dot_dimension_numbers<[1], [0], [0], [1], [0, 0, 1, 1], [], []>} : vector<8x128xbf16>, vector<128x384xbf16>, vector<8x384xf32> -> vector<8x384xf32>
      %17 = vector.extract_strided_slice %14 {offsets = [0, 0], sizes = [8, 128], strides = [1, 1]} : vector<8x384xf32> to vector<8x128xf32>
      %18 = vector.extract_strided_slice %16 {offsets = [0, 0], sizes = [8, 128], strides = [1, 1]} : vector<8x384xf32> to vector<8x128xf32>
      %19 = arith.addf %17, %18 : vector<8x128xf32>
      %20 = arith.negf %19 : vector<8x128xf32>
      %21 = math.exp %20 : vector<8x128xf32>
      %cst_13 = arith.constant 1.000000e+00 : f32
      %22 = vector.broadcast %cst_13 : f32 to vector<8x128xf32>
      %23 = arith.addf %22, %21 : vector<8x128xf32>
      %24 = arith.divf %22, %23 : vector<8x128xf32>
      %25 = vector.extract_strided_slice %14 {offsets = [0, 128], sizes = [8, 128], strides = [1, 1]} : vector<8x384xf32> to vector<8x128xf32>
      %26 = vector.extract_strided_slice %16 {offsets = [0, 128], sizes = [8, 128], strides = [1, 1]} : vector<8x384xf32> to vector<8x128xf32>
      %27 = arith.addf %25, %26 : vector<8x128xf32>
      %28 = arith.negf %27 : vector<8x128xf32>
      %29 = math.exp %28 : vector<8x128xf32>
      %cst_14 = arith.constant 1.000000e+00 : f32
      %30 = vector.broadcast %cst_14 : f32 to vector<8x128xf32>
      %31 = arith.addf %30, %29 : vector<8x128xf32>
      %32 = arith.divf %30, %31 : vector<8x128xf32>
      %33 = vector.extract_strided_slice %14 {offsets = [0, 256], sizes = [8, 128], strides = [1, 1]} : vector<8x384xf32> to vector<8x128xf32>
      %34 = vector.extract_strided_slice %16 {offsets = [0, 256], sizes = [8, 128], strides = [1, 1]} : vector<8x384xf32> to vector<8x128xf32>
      %35 = vector.broadcast %3 : vector<1x128xf32> to vector<8x128xf32>
      %36 = arith.addf %34, %35 : vector<8x128xf32>
      %37 = arith.mulf %24, %36 : vector<8x128xf32>
      %38 = arith.addf %33, %37 : vector<8x128xf32>
      %39 = math.tanh %38 : vector<8x128xf32>
      %cst_15 = arith.constant 1.000000e+00 : f32
      %40 = vector.broadcast %cst_15 : f32 to vector<8x128xf32>
      %41 = arith.subf %40, %32 : vector<8x128xf32>
      %42 = arith.mulf %41, %39 : vector<8x128xf32>
      %43 = arith.mulf %32, %11 : vector<8x128xf32>
      %44 = arith.addf %42, %43 : vector<8x128xf32>
      %c7_i32 = arith.constant 7 : i32
      %45 = vector.broadcast %c7_i32 : i32 to vector<8x1xi32>
      %46 = arith.cmpi sgt, %4, %45 : vector<8x1xi32>
      %cst_16 = arith.constant 0.000000e+00 : f32
      %47 = vector.shape_cast %46 : vector<8x1xi1> to vector<8x1xi1>
      %48 = vector.broadcast %47 : vector<8x1xi1> to vector<8x128xi1>
      %49 = vector.broadcast %cst_16 : f32 to vector<8x128xf32>
      %50 = arith.select %48, %44, %49 : vector<8x128xi1>, vector<8x128xf32>
      %c0_17 = arith.constant 0 : index
      %c7_18 = arith.constant 7 : index
      %c0_19 = arith.constant 0 : index
      %c0_20 = arith.constant 0 : index
      %51 = vector.load %arg6[%c0_17, %c7_18, %c0_19, %c0_20] : memref<1x8x8x128xf32, #tpu.memory_space<vmem>>, vector<1x1x8x128xf32>
      %52 = vector.shape_cast %51 : vector<1x1x8x128xf32> to vector<8x128xf32>
      %53 = vector.shape_cast %50 : vector<8x128xf32> to vector<1x1x8x128xf32>
      tpu.vector_store %arg6[%c0_17, %c7_18, %c0_19, %c0_20], %53 {strides = array<i32>} : memref<1x8x8x128xf32, #tpu.memory_space<vmem>>, vector<1x1x8x128xf32>,
      %54 = vector.shape_cast %46 : vector<8x1xi1> to vector<8x1xi1>
      %55 = vector.broadcast %54 : vector<8x1xi1> to vector<8x128xi1>
      %56 = arith.select %55, %44, %11 : vector<8x128xi1>, vector<8x128xf32>
      %c0_21 = arith.constant 0 : index
      %c6 = arith.constant 6 : index
      %c0_22 = arith.constant 0 : index
      %c0_23 = arith.constant 0 : index
      %57 = vector.load %arg3[%c0_21, %c6, %c0_22, %c0_23] : memref<1x8x8x384xbf16, #tpu.memory_space<vmem>>, vector<1x1x8x384xbf16>
      %58 = vector.shape_cast %57 : vector<1x1x8x384xbf16> to vector<8x384xbf16>
      %59 = arith.extf %58 : vector<8x384xbf16> to vector<8x384xf32>
      %60 = arith.truncf %56 : vector<8x128xf32> to vector<8x128xbf16>
      %cst_24 = arith.constant dense<0.000000e+00> : vector<8x384xf32>
      %61 = tpu.matmul %60, %1, %cst_24 {dimension_numbers = #tpu.dot_dimension_numbers<[1], [0], [0], [1], [0, 0, 1, 1], [], []>} : vector<8x128xbf16>, vector<128x384xbf16>, vector<8x384xf32> -> vector<8x384xf32>
      %62 = vector.extract_strided_slice %59 {offsets = [0, 0], sizes = [8, 128], strides = [1, 1]} : vector<8x384xf32> to vector<8x128xf32>
      %63 = vector.extract_strided_slice %61 {offsets = [0, 0], sizes = [8, 128], strides = [1, 1]} : vector<8x384xf32> to vector<8x128xf32>
      %64 = arith.addf %62, %63 : vector<8x128xf32>
      %65 = arith.negf %64 : vector<8x128xf32>
      %66 = math.exp %65 : vector<8x128xf32>
      %cst_25 = arith.constant 1.000000e+00 : f32
      %67 = vector.broadcast %cst_25 : f32 to vector<8x128xf32>
      %68 = arith.addf %67, %66 : vector<8x128xf32>
      %69 = arith.divf %67, %68 : vector<8x128xf32>
      %70 = vector.extract_strided_slice %59 {offsets = [0, 128], sizes = [8, 128], strides = [1, 1]} : vector<8x384xf32> to vector<8x128xf32>
      %71 = vector.extract_strided_slice %61 {offsets = [0, 128], sizes = [8, 128], strides = [1, 1]} : vector<8x384xf32> to vector<8x128xf32>
      %72 = arith.addf %70, %71 : vector<8x128xf32>
      %73 = arith.negf %72 : vector<8x128xf32>
      %74 = math.exp %73 : vector<8x128xf32>
      %cst_26 = arith.constant 1.000000e+00 : f32
      %75 = vector.broadcast %cst_26 : f32 to vector<8x128xf32>
      %76 = arith.addf %75, %74 : vector<8x128xf32>
      %77 = arith.divf %75, %76 : vector<8x128xf32>
      %78 = vector.extract_strided_slice %59 {offsets = [0, 256], sizes = [8, 128], strides = [1, 1]} : vector<8x384xf32> to vector<8x128xf32>
      %79 = vector.extract_strided_slice %61 {offsets = [0, 256], sizes = [8, 128], strides = [1, 1]} : vector<8x384xf32> to vector<8x128xf32>
      %80 = vector.broadcast %3 : vector<1x128xf32> to vector<8x128xf32>
      %81 = arith.addf %79, %80 : vector<8x128xf32>
      %82 = arith.mulf %69, %81 : vector<8x128xf32>
      %83 = arith.addf %78, %82 : vector<8x128xf32>
      %84 = math.tanh %83 : vector<8x128xf32>
      %cst_27 = arith.constant 1.000000e+00 : f32
      %85 = vector.broadcast %cst_27 : f32 to vector<8x128xf32>
      %86 = arith.subf %85, %77 : vector<8x128xf32>
      %87 = arith.mulf %86, %84 : vector<8x128xf32>
      %88 = arith.mulf %77, %56 : vector<8x128xf32>
      %89 = arith.addf %87, %88 : vector<8x128xf32>
      %c6_i32 = arith.constant 6 : i32
      %90 = vector.broadcast %c6_i32 : i32 to vector<8x1xi32>
      %91 = arith.cmpi sgt, %4, %90 : vector<8x1xi32>
      %cst_28 = arith.constant 0.000000e+00 : f32
      %92 = vector.shape_cast %91 : vector<8x1xi1> to vector<8x1xi1>
      %93 = vector.broadcast %92 : vector<8x1xi1> to vector<8x128xi1>
      %94 = vector.broadcast %cst_28 : f32 to vector<8x128xf32>
      %95 = arith.select %93, %89, %94 : vector<8x128xi1>, vector<8x128xf32>
      %c0_29 = arith.constant 0 : index
      %c6_30 = arith.constant 6 : index
      %c0_31 = arith.constant 0 : index
      %c0_32 = arith.constant 0 : index
      %96 = vector.load %arg6[%c0_29, %c6_30, %c0_31, %c0_32] : memref<1x8x8x128xf32, #tpu.memory_space<vmem>>, vector<1x1x8x128xf32>
      %97 = vector.shape_cast %96 : vector<1x1x8x128xf32> to vector<8x128xf32>
      %98 = vector.shape_cast %95 : vector<8x128xf32> to vector<1x1x8x128xf32>
      tpu.vector_store %arg6[%c0_29, %c6_30, %c0_31, %c0_32], %98 {strides = array<i32>} : memref<1x8x8x128xf32, #tpu.memory_space<vmem>>, vector<1x1x8x128xf32>,
      %99 = vector.shape_cast %91 : vector<8x1xi1> to vector<8x1xi1>
      %100 = vector.broadcast %99 : vector<8x1xi1> to vector<8x128xi1>
      %101 = arith.select %100, %89, %56 : vector<8x128xi1>, vector<8x128xf32>
      %c0_33 = arith.constant 0 : index
      %c5 = arith.constant 5 : index
      %c0_34 = arith.constant 0 : index
      %c0_35 = arith.constant 0 : index
      %102 = vector.load %arg3[%c0_33, %c5, %c0_34, %c0_35] : memref<1x8x8x384xbf16, #tpu.memory_space<vmem>>, vector<1x1x8x384xbf16>
      %103 = vector.shape_cast %102 : vector<1x1x8x384xbf16> to vector<8x384xbf16>
      %104 = arith.extf %103 : vector<8x384xbf16> to vector<8x384xf32>
      %105 = arith.truncf %101 : vector<8x128xf32> to vector<8x128xbf16>
      %cst_36 = arith.constant dense<0.000000e+00> : vector<8x384xf32>
      %106 = tpu.matmul %105, %1, %cst_36 {dimension_numbers = #tpu.dot_dimension_numbers<[1], [0], [0], [1], [0, 0, 1, 1], [], []>} : vector<8x128xbf16>, vector<128x384xbf16>, vector<8x384xf32> -> vector<8x384xf32>
      %107 = vector.extract_strided_slice %104 {offsets = [0, 0], sizes = [8, 128], strides = [1, 1]} : vector<8x384xf32> to vector<8x128xf32>
      %108 = vector.extract_strided_slice %106 {offsets = [0, 0], sizes = [8, 128], strides = [1, 1]} : vector<8x384xf32> to vector<8x128xf32>
      %109 = arith.addf %107, %108 : vector<8x128xf32>
      %110 = arith.negf %109 : vector<8x128xf32>
      %111 = math.exp %110 : vector<8x128xf32>
      %cst_37 = arith.constant 1.000000e+00 : f32
      %112 = vector.broadcast %cst_37 : f32 to vector<8x128xf32>
      %113 = arith.addf %112, %111 : vector<8x128xf32>
      %114 = arith.divf %112, %113 : vector<8x128xf32>
      %115 = vector.extract_strided_slice %104 {offsets = [0, 128], sizes = [8, 128], strides = [1, 1]} : vector<8x384xf32> to vector<8x128xf32>
      %116 = vector.extract_strided_slice %106 {offsets = [0, 128], sizes = [8, 128], strides = [1, 1]} : vector<8x384xf32> to vector<8x128xf32>
      %117 = arith.addf %115, %116 : vector<8x128xf32>
      %118 = arith.negf %117 : vector<8x128xf32>
      %119 = math.exp %118 : vector<8x128xf32>
      %cst_38 = arith.constant 1.000000e+00 : f32
      %120 = vector.broadcast %cst_38 : f32 to vector<8x128xf32>
      %121 = arith.addf %120, %119 : vector<8x128xf32>
      %122 = arith.divf %120, %121 : vector<8x128xf32>
      %123 = vector.extract_strided_slice %104 {offsets = [0, 256], sizes = [8, 128], strides = [1, 1]} : vector<8x384xf32> to vector<8x128xf32>
      %124 = vector.extract_strided_slice %106 {offsets = [0, 256], sizes = [8, 128], strides = [1, 1]} : vector<8x384xf32> to vector<8x128xf32>
      %125 = vector.broadcast %3 : vector<1x128xf32> to vector<8x128xf32>
      %126 = arith.addf %124, %125 : vector<8x128xf32>
      %127 = arith.mulf %114, %126 : vector<8x128xf32>
      %128 = arith.addf %123, %127 : vector<8x128xf32>
      %129 = math.tanh %128 : vector<8x128xf32>
      %cst_39 = arith.constant 1.000000e+00 : f32
      %130 = vector.broadcast %cst_39 : f32 to vector<8x128xf32>
      %131 = arith.subf %130, %122 : vector<8x128xf32>
      %132 = arith.mulf %131, %129 : vector<8x128xf32>
      %133 = arith.mulf %122, %101 : vector<8x128xf32>
      %134 = arith.addf %132, %133 : vector<8x128xf32>
      %c5_i32 = arith.constant 5 : i32
      %135 = vector.broadcast %c5_i32 : i32 to vector<8x1xi32>
      %136 = arith.cmpi sgt, %4, %135 : vector<8x1xi32>
      %cst_40 = arith.constant 0.000000e+00 : f32
      %137 = vector.shape_cast %136 : vector<8x1xi1> to vector<8x1xi1>
      %138 = vector.broadcast %137 : vector<8x1xi1> to vector<8x128xi1>
      %139 = vector.broadcast %cst_40 : f32 to vector<8x128xf32>
      %140 = arith.select %138, %134, %139 : vector<8x128xi1>, vector<8x128xf32>
      %c0_41 = arith.constant 0 : index
      %c5_42 = arith.constant 5 : index
      %c0_43 = arith.constant 0 : index
      %c0_44 = arith.constant 0 : index
      %141 = vector.load %arg6[%c0_41, %c5_42, %c0_43, %c0_44] : memref<1x8x8x128xf32, #tpu.memory_space<vmem>>, vector<1x1x8x128xf32>
      %142 = vector.shape_cast %141 : vector<1x1x8x128xf32> to vector<8x128xf32>
      %143 = vector.shape_cast %140 : vector<8x128xf32> to vector<1x1x8x128xf32>
      tpu.vector_store %arg6[%c0_41, %c5_42, %c0_43, %c0_44], %143 {strides = array<i32>} : memref<1x8x8x128xf32, #tpu.memory_space<vmem>>, vector<1x1x8x128xf32>,
      %144 = vector.shape_cast %136 : vector<8x1xi1> to vector<8x1xi1>
      %145 = vector.broadcast %144 : vector<8x1xi1> to vector<8x128xi1>
      %146 = arith.select %145, %134, %101 : vector<8x128xi1>, vector<8x128xf32>
      %c0_45 = arith.constant 0 : index
      %c4 = arith.constant 4 : index
      %c0_46 = arith.constant 0 : index
      %c0_47 = arith.constant 0 : index
      %147 = vector.load %arg3[%c0_45, %c4, %c0_46, %c0_47] : memref<1x8x8x384xbf16, #tpu.memory_space<vmem>>, vector<1x1x8x384xbf16>
      %148 = vector.shape_cast %147 : vector<1x1x8x384xbf16> to vector<8x384xbf16>
      %149 = arith.extf %148 : vector<8x384xbf16> to vector<8x384xf32>
      %150 = arith.truncf %146 : vector<8x128xf32> to vector<8x128xbf16>
      %cst_48 = arith.constant dense<0.000000e+00> : vector<8x384xf32>
      %151 = tpu.matmul %150, %1, %cst_48 {dimension_numbers = #tpu.dot_dimension_numbers<[1], [0], [0], [1], [0, 0, 1, 1], [], []>} : vector<8x128xbf16>, vector<128x384xbf16>, vector<8x384xf32> -> vector<8x384xf32>
      %152 = vector.extract_strided_slice %149 {offsets = [0, 0], sizes = [8, 128], strides = [1, 1]} : vector<8x384xf32> to vector<8x128xf32>
      %153 = vector.extract_strided_slice %151 {offsets = [0, 0], sizes = [8, 128], strides = [1, 1]} : vector<8x384xf32> to vector<8x128xf32>
      %154 = arith.addf %152, %153 : vector<8x128xf32>
      %155 = arith.negf %154 : vector<8x128xf32>
      %156 = math.exp %155 : vector<8x128xf32>
      %cst_49 = arith.constant 1.000000e+00 : f32
      %157 = vector.broadcast %cst_49 : f32 to vector<8x128xf32>
      %158 = arith.addf %157, %156 : vector<8x128xf32>
      %159 = arith.divf %157, %158 : vector<8x128xf32>
      %160 = vector.extract_strided_slice %149 {offsets = [0, 128], sizes = [8, 128], strides = [1, 1]} : vector<8x384xf32> to vector<8x128xf32>
      %161 = vector.extract_strided_slice %151 {offsets = [0, 128], sizes = [8, 128], strides = [1, 1]} : vector<8x384xf32> to vector<8x128xf32>
      %162 = arith.addf %160, %161 : vector<8x128xf32>
      %163 = arith.negf %162 : vector<8x128xf32>
      %164 = math.exp %163 : vector<8x128xf32>
      %cst_50 = arith.constant 1.000000e+00 : f32
      %165 = vector.broadcast %cst_50 : f32 to vector<8x128xf32>
      %166 = arith.addf %165, %164 : vector<8x128xf32>
      %167 = arith.divf %165, %166 : vector<8x128xf32>
      %168 = vector.extract_strided_slice %149 {offsets = [0, 256], sizes = [8, 128], strides = [1, 1]} : vector<8x384xf32> to vector<8x128xf32>
      %169 = vector.extract_strided_slice %151 {offsets = [0, 256], sizes = [8, 128], strides = [1, 1]} : vector<8x384xf32> to vector<8x128xf32>
      %170 = vector.broadcast %3 : vector<1x128xf32> to vector<8x128xf32>
      %171 = arith.addf %169, %170 : vector<8x128xf32>
      %172 = arith.mulf %159, %171 : vector<8x128xf32>
      %173 = arith.addf %168, %172 : vector<8x128xf32>
      %174 = math.tanh %173 : vector<8x128xf32>
      %cst_51 = arith.constant 1.000000e+00 : f32
      %175 = vector.broadcast %cst_51 : f32 to vector<8x128xf32>
      %176 = arith.subf %175, %167 : vector<8x128xf32>
      %177 = arith.mulf %176, %174 : vector<8x128xf32>
      %178 = arith.mulf %167, %146 : vector<8x128xf32>
      %179 = arith.addf %177, %178 : vector<8x128xf32>
      %c4_i32 = arith.constant 4 : i32
      %180 = vector.broadcast %c4_i32 : i32 to vector<8x1xi32>
      %181 = arith.cmpi sgt, %4, %180 : vector<8x1xi32>
      %cst_52 = arith.constant 0.000000e+00 : f32
      %182 = vector.shape_cast %181 : vector<8x1xi1> to vector<8x1xi1>
      %183 = vector.broadcast %182 : vector<8x1xi1> to vector<8x128xi1>
      %184 = vector.broadcast %cst_52 : f32 to vector<8x128xf32>
      %185 = arith.select %183, %179, %184 : vector<8x128xi1>, vector<8x128xf32>
      %c0_53 = arith.constant 0 : index
      %c4_54 = arith.constant 4 : index
      %c0_55 = arith.constant 0 : index
      %c0_56 = arith.constant 0 : index
      %186 = vector.load %arg6[%c0_53, %c4_54, %c0_55, %c0_56] : memref<1x8x8x128xf32, #tpu.memory_space<vmem>>, vector<1x1x8x128xf32>
      %187 = vector.shape_cast %186 : vector<1x1x8x128xf32> to vector<8x128xf32>
      %188 = vector.shape_cast %185 : vector<8x128xf32> to vector<1x1x8x128xf32>
      tpu.vector_store %arg6[%c0_53, %c4_54, %c0_55, %c0_56], %188 {strides = array<i32>} : memref<1x8x8x128xf32, #tpu.memory_space<vmem>>, vector<1x1x8x128xf32>,
      %189 = vector.shape_cast %181 : vector<8x1xi1> to vector<8x1xi1>
      %190 = vector.broadcast %189 : vector<8x1xi1> to vector<8x128xi1>
      %191 = arith.select %190, %179, %146 : vector<8x128xi1>, vector<8x128xf32>
      %c0_57 = arith.constant 0 : index
      %c3 = arith.constant 3 : index
      %c0_58 = arith.constant 0 : index
      %c0_59 = arith.constant 0 : index
      %192 = vector.load %arg3[%c0_57, %c3, %c0_58, %c0_59] : memref<1x8x8x384xbf16, #tpu.memory_space<vmem>>, vector<1x1x8x384xbf16>
      %193 = vector.shape_cast %192 : vector<1x1x8x384xbf16> to vector<8x384xbf16>
      %194 = arith.extf %193 : vector<8x384xbf16> to vector<8x384xf32>
      %195 = arith.truncf %191 : vector<8x128xf32> to vector<8x128xbf16>
      %cst_60 = arith.constant dense<0.000000e+00> : vector<8x384xf32>
      %196 = tpu.matmul %195, %1, %cst_60 {dimension_numbers = #tpu.dot_dimension_numbers<[1], [0], [0], [1], [0, 0, 1, 1], [], []>} : vector<8x128xbf16>, vector<128x384xbf16>, vector<8x384xf32> -> vector<8x384xf32>
      %197 = vector.extract_strided_slice %194 {offsets = [0, 0], sizes = [8, 128], strides = [1, 1]} : vector<8x384xf32> to vector<8x128xf32>
      %198 = vector.extract_strided_slice %196 {offsets = [0, 0], sizes = [8, 128], strides = [1, 1]} : vector<8x384xf32> to vector<8x128xf32>
      %199 = arith.addf %197, %198 : vector<8x128xf32>
      %200 = arith.negf %199 : vector<8x128xf32>
      %201 = math.exp %200 : vector<8x128xf32>
      %cst_61 = arith.constant 1.000000e+00 : f32
      %202 = vector.broadcast %cst_61 : f32 to vector<8x128xf32>
      %203 = arith.addf %202, %201 : vector<8x128xf32>
      %204 = arith.divf %202, %203 : vector<8x128xf32>
      %205 = vector.extract_strided_slice %194 {offsets = [0, 128], sizes = [8, 128], strides = [1, 1]} : vector<8x384xf32> to vector<8x128xf32>
      %206 = vector.extract_strided_slice %196 {offsets = [0, 128], sizes = [8, 128], strides = [1, 1]} : vector<8x384xf32> to vector<8x128xf32>
      %207 = arith.addf %205, %206 : vector<8x128xf32>
      %208 = arith.negf %207 : vector<8x128xf32>
      %209 = math.exp %208 : vector<8x128xf32>
      %cst_62 = arith.constant 1.000000e+00 : f32
      %210 = vector.broadcast %cst_62 : f32 to vector<8x128xf32>
      %211 = arith.addf %210, %209 : vector<8x128xf32>
      %212 = arith.divf %210, %211 : vector<8x128xf32>
      %213 = vector.extract_strided_slice %194 {offsets = [0, 256], sizes = [8, 128], strides = [1, 1]} : vector<8x384xf32> to vector<8x128xf32>
      %214 = vector.extract_strided_slice %196 {offsets = [0, 256], sizes = [8, 128], strides = [1, 1]} : vector<8x384xf32> to vector<8x128xf32>
      %215 = vector.broadcast %3 : vector<1x128xf32> to vector<8x128xf32>
      %216 = arith.addf %214, %215 : vector<8x128xf32>
      %217 = arith.mulf %204, %216 : vector<8x128xf32>
      %218 = arith.addf %213, %217 : vector<8x128xf32>
      %219 = math.tanh %218 : vector<8x128xf32>
      %cst_63 = arith.constant 1.000000e+00 : f32
      %220 = vector.broadcast %cst_63 : f32 to vector<8x128xf32>
      %221 = arith.subf %220, %212 : vector<8x128xf32>
      %222 = arith.mulf %221, %219 : vector<8x128xf32>
      %223 = arith.mulf %212, %191 : vector<8x128xf32>
      %224 = arith.addf %222, %223 : vector<8x128xf32>
      %c3_i32 = arith.constant 3 : i32
      %225 = vector.broadcast %c3_i32 : i32 to vector<8x1xi32>
      %226 = arith.cmpi sgt, %4, %225 : vector<8x1xi32>
      %cst_64 = arith.constant 0.000000e+00 : f32
      %227 = vector.shape_cast %226 : vector<8x1xi1> to vector<8x1xi1>
      %228 = vector.broadcast %227 : vector<8x1xi1> to vector<8x128xi1>
      %229 = vector.broadcast %cst_64 : f32 to vector<8x128xf32>
      %230 = arith.select %228, %224, %229 : vector<8x128xi1>, vector<8x128xf32>
      %c0_65 = arith.constant 0 : index
      %c3_66 = arith.constant 3 : index
      %c0_67 = arith.constant 0 : index
      %c0_68 = arith.constant 0 : index
      %231 = vector.load %arg6[%c0_65, %c3_66, %c0_67, %c0_68] : memref<1x8x8x128xf32, #tpu.memory_space<vmem>>, vector<1x1x8x128xf32>
      %232 = vector.shape_cast %231 : vector<1x1x8x128xf32> to vector<8x128xf32>
      %233 = vector.shape_cast %230 : vector<8x128xf32> to vector<1x1x8x128xf32>
      tpu.vector_store %arg6[%c0_65, %c3_66, %c0_67, %c0_68], %233 {strides = array<i32>} : memref<1x8x8x128xf32, #tpu.memory_space<vmem>>, vector<1x1x8x128xf32>,
      %234 = vector.shape_cast %226 : vector<8x1xi1> to vector<8x1xi1>
      %235 = vector.broadcast %234 : vector<8x1xi1> to vector<8x128xi1>
      %236 = arith.select %235, %224, %191 : vector<8x128xi1>, vector<8x128xf32>
      %c0_69 = arith.constant 0 : index
      %c2 = arith.constant 2 : index
      %c0_70 = arith.constant 0 : index
      %c0_71 = arith.constant 0 : index
      %237 = vector.load %arg3[%c0_69, %c2, %c0_70, %c0_71] : memref<1x8x8x384xbf16, #tpu.memory_space<vmem>>, vector<1x1x8x384xbf16>
      %238 = vector.shape_cast %237 : vector<1x1x8x384xbf16> to vector<8x384xbf16>
      %239 = arith.extf %238 : vector<8x384xbf16> to vector<8x384xf32>
      %240 = arith.truncf %236 : vector<8x128xf32> to vector<8x128xbf16>
      %cst_72 = arith.constant dense<0.000000e+00> : vector<8x384xf32>
      %241 = tpu.matmul %240, %1, %cst_72 {dimension_numbers = #tpu.dot_dimension_numbers<[1], [0], [0], [1], [0, 0, 1, 1], [], []>} : vector<8x128xbf16>, vector<128x384xbf16>, vector<8x384xf32> -> vector<8x384xf32>
      %242 = vector.extract_strided_slice %239 {offsets = [0, 0], sizes = [8, 128], strides = [1, 1]} : vector<8x384xf32> to vector<8x128xf32>
      %243 = vector.extract_strided_slice %241 {offsets = [0, 0], sizes = [8, 128], strides = [1, 1]} : vector<8x384xf32> to vector<8x128xf32>
      %244 = arith.addf %242, %243 : vector<8x128xf32>
      %245 = arith.negf %244 : vector<8x128xf32>
      %246 = math.exp %245 : vector<8x128xf32>
      %cst_73 = arith.constant 1.000000e+00 : f32
      %247 = vector.broadcast %cst_73 : f32 to vector<8x128xf32>
      %248 = arith.addf %247, %246 : vector<8x128xf32>
      %249 = arith.divf %247, %248 : vector<8x128xf32>
      %250 = vector.extract_strided_slice %239 {offsets = [0, 128], sizes = [8, 128], strides = [1, 1]} : vector<8x384xf32> to vector<8x128xf32>
      %251 = vector.extract_strided_slice %241 {offsets = [0, 128], sizes = [8, 128], strides = [1, 1]} : vector<8x384xf32> to vector<8x128xf32>
      %252 = arith.addf %250, %251 : vector<8x128xf32>
      %253 = arith.negf %252 : vector<8x128xf32>
      %254 = math.exp %253 : vector<8x128xf32>
      %cst_74 = arith.constant 1.000000e+00 : f32
      %255 = vector.broadcast %cst_74 : f32 to vector<8x128xf32>
      %256 = arith.addf %255, %254 : vector<8x128xf32>
      %257 = arith.divf %255, %256 : vector<8x128xf32>
      %258 = vector.extract_strided_slice %239 {offsets = [0, 256], sizes = [8, 128], strides = [1, 1]} : vector<8x384xf32> to vector<8x128xf32>
      %259 = vector.extract_strided_slice %241 {offsets = [0, 256], sizes = [8, 128], strides = [1, 1]} : vector<8x384xf32> to vector<8x128xf32>
      %260 = vector.broadcast %3 : vector<1x128xf32> to vector<8x128xf32>
      %261 = arith.addf %259, %260 : vector<8x128xf32>
      %262 = arith.mulf %249, %261 : vector<8x128xf32>
      %263 = arith.addf %258, %262 : vector<8x128xf32>
      %264 = math.tanh %263 : vector<8x128xf32>
      %cst_75 = arith.constant 1.000000e+00 : f32
      %265 = vector.broadcast %cst_75 : f32 to vector<8x128xf32>
      %266 = arith.subf %265, %257 : vector<8x128xf32>
      %267 = arith.mulf %266, %264 : vector<8x128xf32>
      %268 = arith.mulf %257, %236 : vector<8x128xf32>
      %269 = arith.addf %267, %268 : vector<8x128xf32>
      %c2_i32 = arith.constant 2 : i32
      %270 = vector.broadcast %c2_i32 : i32 to vector<8x1xi32>
      %271 = arith.cmpi sgt, %4, %270 : vector<8x1xi32>
      %cst_76 = arith.constant 0.000000e+00 : f32
      %272 = vector.shape_cast %271 : vector<8x1xi1> to vector<8x1xi1>
      %273 = vector.broadcast %272 : vector<8x1xi1> to vector<8x128xi1>
      %274 = vector.broadcast %cst_76 : f32 to vector<8x128xf32>
      %275 = arith.select %273, %269, %274 : vector<8x128xi1>, vector<8x128xf32>
      %c0_77 = arith.constant 0 : index
      %c2_78 = arith.constant 2 : index
      %c0_79 = arith.constant 0 : index
      %c0_80 = arith.constant 0 : index
      %276 = vector.load %arg6[%c0_77, %c2_78, %c0_79, %c0_80] : memref<1x8x8x128xf32, #tpu.memory_space<vmem>>, vector<1x1x8x128xf32>
      %277 = vector.shape_cast %276 : vector<1x1x8x128xf32> to vector<8x128xf32>
      %278 = vector.shape_cast %275 : vector<8x128xf32> to vector<1x1x8x128xf32>
      tpu.vector_store %arg6[%c0_77, %c2_78, %c0_79, %c0_80], %278 {strides = array<i32>} : memref<1x8x8x128xf32, #tpu.memory_space<vmem>>, vector<1x1x8x128xf32>,
      %279 = vector.shape_cast %271 : vector<8x1xi1> to vector<8x1xi1>
      %280 = vector.broadcast %279 : vector<8x1xi1> to vector<8x128xi1>
      %281 = arith.select %280, %269, %236 : vector<8x128xi1>, vector<8x128xf32>
      %c0_81 = arith.constant 0 : index
      %c1 = arith.constant 1 : index
      %c0_82 = arith.constant 0 : index
      %c0_83 = arith.constant 0 : index
      %282 = vector.load %arg3[%c0_81, %c1, %c0_82, %c0_83] : memref<1x8x8x384xbf16, #tpu.memory_space<vmem>>, vector<1x1x8x384xbf16>
      %283 = vector.shape_cast %282 : vector<1x1x8x384xbf16> to vector<8x384xbf16>
      %284 = arith.extf %283 : vector<8x384xbf16> to vector<8x384xf32>
      %285 = arith.truncf %281 : vector<8x128xf32> to vector<8x128xbf16>
      %cst_84 = arith.constant dense<0.000000e+00> : vector<8x384xf32>
      %286 = tpu.matmul %285, %1, %cst_84 {dimension_numbers = #tpu.dot_dimension_numbers<[1], [0], [0], [1], [0, 0, 1, 1], [], []>} : vector<8x128xbf16>, vector<128x384xbf16>, vector<8x384xf32> -> vector<8x384xf32>
      %287 = vector.extract_strided_slice %284 {offsets = [0, 0], sizes = [8, 128], strides = [1, 1]} : vector<8x384xf32> to vector<8x128xf32>
      %288 = vector.extract_strided_slice %286 {offsets = [0, 0], sizes = [8, 128], strides = [1, 1]} : vector<8x384xf32> to vector<8x128xf32>
      %289 = arith.addf %287, %288 : vector<8x128xf32>
      %290 = arith.negf %289 : vector<8x128xf32>
      %291 = math.exp %290 : vector<8x128xf32>
      %cst_85 = arith.constant 1.000000e+00 : f32
      %292 = vector.broadcast %cst_85 : f32 to vector<8x128xf32>
      %293 = arith.addf %292, %291 : vector<8x128xf32>
      %294 = arith.divf %292, %293 : vector<8x128xf32>
      %295 = vector.extract_strided_slice %284 {offsets = [0, 128], sizes = [8, 128], strides = [1, 1]} : vector<8x384xf32> to vector<8x128xf32>
      %296 = vector.extract_strided_slice %286 {offsets = [0, 128], sizes = [8, 128], strides = [1, 1]} : vector<8x384xf32> to vector<8x128xf32>
      %297 = arith.addf %295, %296 : vector<8x128xf32>
      %298 = arith.negf %297 : vector<8x128xf32>
      %299 = math.exp %298 : vector<8x128xf32>
      %cst_86 = arith.constant 1.000000e+00 : f32
      %300 = vector.broadcast %cst_86 : f32 to vector<8x128xf32>
      %301 = arith.addf %300, %299 : vector<8x128xf32>
      %302 = arith.divf %300, %301 : vector<8x128xf32>
      %303 = vector.extract_strided_slice %284 {offsets = [0, 256], sizes = [8, 128], strides = [1, 1]} : vector<8x384xf32> to vector<8x128xf32>
      %304 = vector.extract_strided_slice %286 {offsets = [0, 256], sizes = [8, 128], strides = [1, 1]} : vector<8x384xf32> to vector<8x128xf32>
      %305 = vector.broadcast %3 : vector<1x128xf32> to vector<8x128xf32>
      %306 = arith.addf %304, %305 : vector<8x128xf32>
      %307 = arith.mulf %294, %306 : vector<8x128xf32>
      %308 = arith.addf %303, %307 : vector<8x128xf32>
      %309 = math.tanh %308 : vector<8x128xf32>
      %cst_87 = arith.constant 1.000000e+00 : f32
      %310 = vector.broadcast %cst_87 : f32 to vector<8x128xf32>
      %311 = arith.subf %310, %302 : vector<8x128xf32>
      %312 = arith.mulf %311, %309 : vector<8x128xf32>
      %313 = arith.mulf %302, %281 : vector<8x128xf32>
      %314 = arith.addf %312, %313 : vector<8x128xf32>
      %c1_i32_88 = arith.constant 1 : i32
      %315 = vector.broadcast %c1_i32_88 : i32 to vector<8x1xi32>
      %316 = arith.cmpi sgt, %4, %315 : vector<8x1xi32>
      %cst_89 = arith.constant 0.000000e+00 : f32
      %317 = vector.shape_cast %316 : vector<8x1xi1> to vector<8x1xi1>
      %318 = vector.broadcast %317 : vector<8x1xi1> to vector<8x128xi1>
      %319 = vector.broadcast %cst_89 : f32 to vector<8x128xf32>
      %320 = arith.select %318, %314, %319 : vector<8x128xi1>, vector<8x128xf32>
      %c0_90 = arith.constant 0 : index
      %c1_91 = arith.constant 1 : index
      %c0_92 = arith.constant 0 : index
      %c0_93 = arith.constant 0 : index
      %321 = vector.load %arg6[%c0_90, %c1_91, %c0_92, %c0_93] : memref<1x8x8x128xf32, #tpu.memory_space<vmem>>, vector<1x1x8x128xf32>
      %322 = vector.shape_cast %321 : vector<1x1x8x128xf32> to vector<8x128xf32>
      %323 = vector.shape_cast %320 : vector<8x128xf32> to vector<1x1x8x128xf32>
      tpu.vector_store %arg6[%c0_90, %c1_91, %c0_92, %c0_93], %323 {strides = array<i32>} : memref<1x8x8x128xf32, #tpu.memory_space<vmem>>, vector<1x1x8x128xf32>,
      %324 = vector.shape_cast %316 : vector<8x1xi1> to vector<8x1xi1>
      %325 = vector.broadcast %324 : vector<8x1xi1> to vector<8x128xi1>
      %326 = arith.select %325, %314, %281 : vector<8x128xi1>, vector<8x128xf32>
      %c0_94 = arith.constant 0 : index
      %c0_95 = arith.constant 0 : index
      %c0_96 = arith.constant 0 : index
      %c0_97 = arith.constant 0 : index
      %327 = vector.load %arg3[%c0_94, %c0_95, %c0_96, %c0_97] : memref<1x8x8x384xbf16, #tpu.memory_space<vmem>>, vector<1x1x8x384xbf16>
      %328 = vector.shape_cast %327 : vector<1x1x8x384xbf16> to vector<8x384xbf16>
      %329 = arith.extf %328 : vector<8x384xbf16> to vector<8x384xf32>
      %330 = arith.truncf %326 : vector<8x128xf32> to vector<8x128xbf16>
      %cst_98 = arith.constant dense<0.000000e+00> : vector<8x384xf32>
      %331 = tpu.matmul %330, %1, %cst_98 {dimension_numbers = #tpu.dot_dimension_numbers<[1], [0], [0], [1], [0, 0, 1, 1], [], []>} : vector<8x128xbf16>, vector<128x384xbf16>, vector<8x384xf32> -> vector<8x384xf32>
      %332 = vector.extract_strided_slice %329 {offsets = [0, 0], sizes = [8, 128], strides = [1, 1]} : vector<8x384xf32> to vector<8x128xf32>
      %333 = vector.extract_strided_slice %331 {offsets = [0, 0], sizes = [8, 128], strides = [1, 1]} : vector<8x384xf32> to vector<8x128xf32>
      %334 = arith.addf %332, %333 : vector<8x128xf32>
      %335 = arith.negf %334 : vector<8x128xf32>
      %336 = math.exp %335 : vector<8x128xf32>
      %cst_99 = arith.constant 1.000000e+00 : f32
      %337 = vector.broadcast %cst_99 : f32 to vector<8x128xf32>
      %338 = arith.addf %337, %336 : vector<8x128xf32>
      %339 = arith.divf %337, %338 : vector<8x128xf32>
      %340 = vector.extract_strided_slice %329 {offsets = [0, 128], sizes = [8, 128], strides = [1, 1]} : vector<8x384xf32> to vector<8x128xf32>
      %341 = vector.extract_strided_slice %331 {offsets = [0, 128], sizes = [8, 128], strides = [1, 1]} : vector<8x384xf32> to vector<8x128xf32>
      %342 = arith.addf %340, %341 : vector<8x128xf32>
      %343 = arith.negf %342 : vector<8x128xf32>
      %344 = math.exp %343 : vector<8x128xf32>
      %cst_100 = arith.constant 1.000000e+00 : f32
      %345 = vector.broadcast %cst_100 : f32 to vector<8x128xf32>
      %346 = arith.addf %345, %344 : vector<8x128xf32>
      %347 = arith.divf %345, %346 : vector<8x128xf32>
      %348 = vector.extract_strided_slice %329 {offsets = [0, 256], sizes = [8, 128], strides = [1, 1]} : vector<8x384xf32> to vector<8x128xf32>
      %349 = vector.extract_strided_slice %331 {offsets = [0, 256], sizes = [8, 128], strides = [1, 1]} : vector<8x384xf32> to vector<8x128xf32>
      %350 = vector.broadcast %3 : vector<1x128xf32> to vector<8x128xf32>
      %351 = arith.addf %349, %350 : vector<8x128xf32>
      %352 = arith.mulf %339, %351 : vector<8x128xf32>
      %353 = arith.addf %348, %352 : vector<8x128xf32>
      %354 = math.tanh %353 : vector<8x128xf32>
      %cst_101 = arith.constant 1.000000e+00 : f32
      %355 = vector.broadcast %cst_101 : f32 to vector<8x128xf32>
      %356 = arith.subf %355, %347 : vector<8x128xf32>
      %357 = arith.mulf %356, %354 : vector<8x128xf32>
      %358 = arith.mulf %347, %326 : vector<8x128xf32>
      %359 = arith.addf %357, %358 : vector<8x128xf32>
      %c0_i32_102 = arith.constant 0 : i32
      %360 = vector.broadcast %c0_i32_102 : i32 to vector<8x1xi32>
      %361 = arith.cmpi sgt, %4, %360 : vector<8x1xi32>
      %cst_103 = arith.constant 0.000000e+00 : f32
      %362 = vector.shape_cast %361 : vector<8x1xi1> to vector<8x1xi1>
      %363 = vector.broadcast %362 : vector<8x1xi1> to vector<8x128xi1>
      %364 = vector.broadcast %cst_103 : f32 to vector<8x128xf32>
      %365 = arith.select %363, %359, %364 : vector<8x128xi1>, vector<8x128xf32>
      %c0_104 = arith.constant 0 : index
      %c0_105 = arith.constant 0 : index
      %c0_106 = arith.constant 0 : index
      %c0_107 = arith.constant 0 : index
      %366 = vector.load %arg6[%c0_104, %c0_105, %c0_106, %c0_107] : memref<1x8x8x128xf32, #tpu.memory_space<vmem>>, vector<1x1x8x128xf32>
      %367 = vector.shape_cast %366 : vector<1x1x8x128xf32> to vector<8x128xf32>
      %368 = vector.shape_cast %365 : vector<8x128xf32> to vector<1x1x8x128xf32>
      tpu.vector_store %arg6[%c0_104, %c0_105, %c0_106, %c0_107], %368 {strides = array<i32>} : memref<1x8x8x128xf32, #tpu.memory_space<vmem>>, vector<1x1x8x128xf32>,
      %369 = vector.shape_cast %361 : vector<8x1xi1> to vector<8x1xi1>
      %370 = vector.broadcast %369 : vector<8x1xi1> to vector<8x128xi1>
      %371 = arith.select %370, %359, %326 : vector<8x128xi1>, vector<8x128xf32>
      %c0_108 = arith.constant 0 : index
      %c0_109 = arith.constant 0 : index
      %c0_110 = arith.constant 0 : index
      %372 = vector.load %arg7[%c0_108, %c0_109, %c0_110] : memref<1x8x128xf32, #tpu.memory_space<vmem>>, vector<1x8x128xf32>
      %373 = vector.shape_cast %372 : vector<1x8x128xf32> to vector<8x128xf32>
      %374 = vector.shape_cast %371 : vector<8x128xf32> to vector<1x8x128xf32>
      tpu.vector_store %arg7[%c0_108, %c0_109, %c0_110], %374 {strides = array<i32>} : memref<1x8x128xf32, #tpu.memory_space<vmem>>, vector<1x8x128xf32>,
    } else {
    }
    return
  }
  func.func @transform_0(%arg0: i32, %arg1: i32) -> (i32, i32) {
    %c0_i32 = arith.constant 0 : i32
    %c0_i32_0 = arith.constant 0 : i32
    return %arg1, %c0_i32 : i32, i32
  }
  func.func @transform_1(%arg0: i32, %arg1: i32) -> (i32, i32, i32, i32) {
    %c0_i32 = arith.constant 0 : i32
    %c0_i32_0 = arith.constant 0 : i32
    %c0_i32_1 = arith.constant 0 : i32
    return %arg0, %c0_i32, %arg1, %c0_i32_0 : i32, i32, i32, i32
  }
  func.func @transform_2(%arg0: i32, %arg1: i32) -> (i32, i32, i32) {
    %c0_i32 = arith.constant 0 : i32
    %c0_i32_0 = arith.constant 0 : i32
    %c0_i32_1 = arith.constant 0 : i32
    return %arg0, %c0_i32, %c0_i32_0 : i32, i32, i32
  }
  func.func @transform_3(%arg0: i32, %arg1: i32) -> (i32, i32, i32) {
    %c0_i32 = arith.constant 0 : i32
    %c0_i32_0 = arith.constant 0 : i32
    %c0_i32_1 = arith.constant 0 : i32
    return %arg0, %c0_i32, %c0_i32_0 : i32, i32, i32
  }
  func.func @transform_4(%arg0: i32, %arg1: i32) -> (i32, i32, i32, i32) {
    %c0_i32 = arith.constant 0 : i32
    %c0_i32_0 = arith.constant 0 : i32
    %c0_i32_1 = arith.constant 0 : i32
    return %arg0, %c0_i32, %arg1, %c0_i32_0 : i32, i32, i32, i32
  }
  func.func @transform_5(%arg0: i32, %arg1: i32) -> (i32, i32, i32) {
    %c0_i32 = arith.constant 0 : i32
    %c0_i32_0 = arith.constant 0 : i32
    return %arg0, %arg1, %c0_i32 : i32, i32, i32
  }
}

</mosaic_0001>

<bundles_post_ra>
// kernel: encoder_forward.3
= control target key start
LH: loop header
LB: loop body
LE: loop exit
PB: predicated region body
PF: predicated region fallthrough
CT: control target
= control target key end

     0   :  { %s3054_s18 = smov 0   ;;  %s3056_s19 = smov 0   ;;  %s4125_s0 = inlined_call_operand.vmem [shape: s32[8,1], index: 0, kind: input, shape index: {}]   ;;  %s4126_s1 = inlined_call_operand.vmem [shape: bf16[2,8,8,384], index: 1, kind: input, shape index: {}]   ;;  %s4127_s2 = inlined_call_operand.vmem [shape: bf16[2,128,384], index: 2, kind: input, shape index: {}]   ;;  %s4128_s3 = inlined_call_operand.vmem [shape: f32[2,1,128], index: 3, kind: input, shape index: {}]   ;;  %s4129_s4 = inlined_call_operand.vmem [shape: f32[2,8,8,128], index: 4, kind: output, shape index: {0}]   ;;  %s4130_s5 = inlined_call_operand.vmem [shape: f32[2,8,128], index: 5, kind: output, shape index: {1}]  }
   0x1   :  { %s3058_s20 = smov 0  }
   0x2 LB: > { %s28_s21 = sadd.s32 1, %s3016_s19  ;;  %p2461_p0 = scmp.ge.s32.totalorder %s3020_s20, 1  ;;  %s3020_s20 = sphi %s3058_s20, %s16_s20   ;;  %s3016_s19 = sphi %s3056_s19, %s4214_s19   ;;  %s3012_s18 = sphi %s3054_s18, %s4213_s18  }
   0x3   : > { %p30_p1 = scmp.ge.s32.totalorder %s28_s21, 2  ;;  %p239_p2 = scmp.lt.s32.totalorder %s3020_s20, 3 }
   0x5   : > { %s4216_s21 = smov (%p30_p1, %s28_s21), 0  ;;  %p240_p3 = pnand %p2461_p0, %p239_p2 }
   0x7   : > { %243 = sbr.rel (%p240_p3) target bundleno = 2970 (0xb9a), region = 36 }
   0xc   : > { %p297_p4 = scmp.lt.s32.totalorder %s3012_s18, 1  ;;  %v3099_v1 = vld [vmem:[%s4125_s0] sm:$0xff]  ;;  %p2467_p5 = scmp.ne.s32.totalorder %s3012_s18, 0 }
   0xe   : > { %s298_s22 = scalar_select %p297_p4, %s3012_s18, 1 }
  0x10   : > { %s2804_s23 = smul.u32 96, %s298_s22  ;;  %s313_s26 = scalar_lea.vmem %s4128_s3, %s298_s22 }
  0x11   : > { %s2805_s27 = smul.u32 192, %s298_s22  ;;  %s2755_s28 = sshll.u32 %s298_s22, 6  ;;  %v3094_v0 = vld [vmem:[%s313_s26] sm:$0x1] }
  0x12   : > { %s3082_s6 = scalar_lea.vmem %s4126_s1, %s2804_s23  ;;  %s3087_s9 = scalar_lea.vmem %s4129_s4, %s2755_s28 }
  0x13   : > { %s3092_s12 = scalar_lea.vmem %s4127_s2, %s2805_s27  ;;  %s2466_s13 = sshll.u32 %s298_s22, 3 }
  0x14   : > { %s3104_s23 = scalar_lea.vmem %s4130_s5, %s2466_s13  ;;  %v3107_v2 = vld [vmem:[%s3092_s12 + $0x4] sm:$0xf]  ;;  %v3110_v3 = vld [vmem:[%s3092_s12] sm:$0xf]  ;;  %v3119_v6 = vld [vmem:[%s3092_s12 + $0x8] sm:$0xf] }
  0x15   : > { %4131 = vst [vmem:[#allocation2_spill] sm:$0xff] %v3107_v2  ;;  %v3113_v4 = vld [vmem:[%s3092_s12 + $0x4] sm:$0xf]  ;;  %v3116_v5 = vld [vmem:[%s3092_s12] sm:$0xf] }
  0x16   : > { %4132 = vst [vmem:[#allocation3_spill] sm:$0xff] %v3110_v3  ;;  %v3122_v7 = vld [vmem:[%s3092_s12 + $0x8] sm:$0xf]  ;;  %v3125_v8 = vld [vmem:[%s3092_s12 + $0xc] sm:$0xf0] }
  0x17   : > { %4133 = vst [vmem:[#allocation4_spill] sm:$0xff] %v3119_v6  ;;  %v3128_v9 = vld [vmem:[%s3092_s12 + $0x8] sm:$0xf0]  ;;  %v3131_v10 = vld [vmem:[%s3092_s12 + $0xc] sm:$0xf0] }
  0x18   : > { %4134 = vst [vmem:[#allocation5_spill] sm:$0xff] %v3125_v8  ;;  %v3134_v11 = vld [vmem:[%s3092_s12 + $0x8] sm:$0xf0]  ;;  %v3137_v12 = vld [vmem:[%s3092_s12 + $0x10] sm:$0xf0] }
  0x19   : > { %4135 = vst [vmem:[#allocation6_spill] sm:$0xff] %v3128_v9  ;;  %v3140_v13 = vld [vmem:[%s3092_s12 + $0x10] sm:$0xf0]  ;;  %v3143_v14 = vld [vmem:[%s3092_s12 + $0x1c] sm:$0xf] }
  0x1a   : > { %4136 = vst [vmem:[#allocation7_spill] sm:$0xff] %v3137_v12  ;;  %v3146_v15 = vld [vmem:[%s3092_s12 + $0x18] sm:$0xf]  ;;  %v3149_v16 = vld [vmem:[%s3092_s12 + $0x1c] sm:$0xf] }
  0x1b   : > { %4137 = vst [vmem:[#allocation8_spill] sm:$0xff] %v3143_v14  ;;  %v3152_v17 = vld [vmem:[%s3092_s12 + $0x18] sm:$0xf]  ;;  %v3155_v18 = vld [vmem:[%s3092_s12 + $0x20] sm:$0xf] }
  0x1c   : > { %4138 = vst [vmem:[#allocation9_spill] sm:$0xff] %v3146_v15  ;;  %v3158_v19 = vld [vmem:[%s3092_s12 + $0x20] sm:$0xf]  ;;  %v3161_v20 = vld [vmem:[%s3092_s12 + $0x24] sm:$0xf0] }
  0x1d   : > { %4139 = vst [vmem:[#allocation10_spill] sm:$0xff] %v3155_v18  ;;  %v3164_v21 = vld [vmem:[%s3092_s12 + $0x20] sm:$0xf0]  ;;  %v3167_v22 = vld [vmem:[%s3092_s12 + $0x24] sm:$0xf0] }
  0x1e   : > { %4140 = vst [vmem:[#allocation11_spill] sm:$0xff] %v3161_v20  ;;  %v3170_v23 = vld [vmem:[%s3092_s12 + $0x20] sm:$0xf0]  ;;  %v3173_v24 = vld [vmem:[%s3092_s12 + $0x28] sm:$0xf0] }
  0x1f   : > { %4141 = vst [vmem:[#allocation12_spill] sm:$0xff] %v3164_v21  ;;  %v3176_v25 = vld [vmem:[%s3092_s12 + $0x28] sm:$0xf0]  ;;  %v3179_v26 = vld [vmem:[%s3092_s12 + $0x34] sm:$0xf] }
  0x20   : > { %4142 = vst [vmem:[#allocation13_spill] sm:$0xff] %v3173_v24  ;;  %v3182_v27 = vld [vmem:[%s3092_s12 + $0x30] sm:$0xf]  ;;  %v3185_v28 = vld [vmem:[%s3092_s12 + $0x34] sm:$0xf] }
  0x21   : > { %4143 = vst [vmem:[#allocation14_spill] sm:$0xff] %v3179_v26  ;;  %v3188_v29 = vld [vmem:[%s3092_s12 + $0x30] sm:$0xf]  ;;  %v3191_v30 = vld [vmem:[%s3092_s12 + $0x38] sm:$0xf] }
  0x22   : > { %4144 = vst [vmem:[#allocation15_spill] sm:$0xff] %v3182_v27  ;;  %v3194_v31 = vld [vmem:[%s3092_s12 + $0x38] sm:$0xf]  ;;  %v3197_v32 = vld [vmem:[%s3092_s12 + $0x3c] sm:$0xf0] }
  0x23   : > { %4145 = vst [vmem:[#allocation16_spill] sm:$0xff] %v3191_v30  ;;  %v3200_v33 = vld [vmem:[%s3092_s12 + $0x38] sm:$0xf0]  ;;  %v3203_v34 = vld [vmem:[%s3092_s12 + $0x3c] sm:$0xf0] }
  0x24   : > { %4146 = vst [vmem:[#allocation17_spill] sm:$0xff] %v3197_v32  ;;  %v3206_v35 = vld [vmem:[%s3092_s12 + $0x38] sm:$0xf0]  ;;  %v3209_v36 = vld [vmem:[%s3092_s12 + $0x40] sm:$0xf0] }
  0x25   : > { %4147 = vst [vmem:[#allocation18_spill] sm:$0xff] %v3200_v33  ;;  %v3212_v37 = vld [vmem:[%s3092_s12 + $0x40] sm:$0xf0]  ;;  %v3215_v38 = vld [vmem:[%s3092_s12 + $0x4c] sm:$0xf] }
  0x26   : > { %4148 = vst [vmem:[#allocation19_spill] sm:$0xff] %v3209_v36  ;;  %v3218_v39 = vld [vmem:[%s3092_s12 + $0x48] sm:$0xf]  ;;  %v3221_v40 = vld [vmem:[%s3092_s12 + $0x4c] sm:$0xf] }
  0x27   : > { %4149 = vst [vmem:[#allocation20_spill] sm:$0xff] %v3215_v38  ;;  %v3224_v41 = vld [vmem:[%s3092_s12 + $0x48] sm:$0xf]  ;;  %v3227_v42 = vld [vmem:[%s3092_s12 + $0x50] sm:$0xf] }
  0x28   : > { %4150 = vst [vmem:[#allocation21_spill] sm:$0xff] %v3218_v39  ;;  %v3230_v43 = vld [vmem:[%s3092_s12 + $0x50] sm:$0xf]  ;;  %v3233_v44 = vld [vmem:[%s3092_s12 + $0x54] sm:$0xf0] }
  0x29   : > { %4151 = vst [vmem:[#allocation22_spill] sm:$0xff] %v3227_v42  ;;  %v3236_v45 = vld [vmem:[%s3092_s12 + $0x50] sm:$0xf0]  ;;  %v3239_v46 = vld [vmem:[%s3092_s12 + $0x54] sm:$0xf0] }
  0x2a   : > { %4152 = vst [vmem:[#allocation23_spill] sm:$0xff] %v3233_v44  ;;  %v3242_v47 = vld [vmem:[%s3092_s12 + $0x50] sm:$0xf0]  ;;  %v3245_v48 = vld [vmem:[%s3092_s12 + $0x58] sm:$0xf0] }
  0x2b   : > { %4153 = vst [vmem:[#allocation24_spill] sm:$0xff] %v3236_v45  ;;  %v3248_v49 = vld [vmem:[%s3092_s12 + $0x58] sm:$0xf0]  ;;  %v3251_v50 = vld [vmem:[%s3092_s12 + $0x64] sm:$0xf] }
  0x2c   : > { %4154 = vst [vmem:[#allocation25_spill] sm:$0xff] %v3245_v48  ;;  %v3254_v51 = vld [vmem:[%s3092_s12 + $0x60] sm:$0xf]  ;;  %v3257_v52 = vld [vmem:[%s3092_s12 + $0x64] sm:$0xf] }
  0x2d   : > { %4155 = vst [vmem:[#allocation26_spill] sm:$0xff] %v3251_v50  ;;  %v3260_v53 = vld [vmem:[%s3092_s12 + $0x60] sm:$0xf]  ;;  %v3263_v54 = vld [vmem:[%s3092_s12 + $0x68] sm:$0xf] }
  0x2e   : > { %4156 = vst [vmem:[#allocation27_spill] sm:$0xff] %v3254_v51  ;;  %v3266_v55 = vld [vmem:[%s3092_s12 + $0x68] sm:$0xf]  ;;  %v3269_v56 = vld [vmem:[%s3092_s12 + $0x6c] sm:$0xf0] }
  0x2f   : > { %4157 = vst [vmem:[#allocation28_spill] sm:$0xff] %v3263_v54  ;;  %v3272_v57 = vld [vmem:[%s3092_s12 + $0x68] sm:$0xf0]  ;;  %v3275_v58 = vld [vmem:[%s3092_s12 + $0x6c] sm:$0xf0] }
  0x30   : > { %4158 = vst [vmem:[#allocation29_spill] sm:$0xff] %v3269_v56  ;;  %v3278_v59 = vld [vmem:[%s3092_s12 + $0x68] sm:$0xf0]  ;;  %v3281_v60 = vld [vmem:[%s3092_s12 + $0x70] sm:$0xf0] }
  0x31   : > { %4159 = vst [vmem:[#allocation30_spill] sm:$0xff] %v3272_v57  ;;  %v3284_v61 = vld [vmem:[%s3092_s12 + $0x70] sm:$0xf0]  ;;  %v3287_v62 = vld [vmem:[%s3092_s12 + $0x7c] sm:$0xf] }
  0x32   : > { %4160 = vst [vmem:[#allocation31_spill] sm:$0xff] %v3281_v60  ;;  %v3290_v63 = vld [vmem:[%s3092_s12 + $0x78] sm:$0xf]  ;;  %v2787_v12 = vld [vmem:[%s3092_s12 + $0x7c] sm:$0xf] }
  0x33   : > { %4161 = vst [vmem:[#allocation32_spill] sm:$0xff] %v3287_v62  ;;  %v2530_v6 = vld [vmem:[%s3092_s12 + $0x78] sm:$0xf]  ;;  %v3295_v2 = vld [vmem:[%s3092_s12 + $0x80] sm:$0xf] }
  0x34   : > { %4162 = vst [vmem:[#allocation33_spill] sm:$0xff] %v3290_v63  ;;  %v2538_v8 = vld [vmem:[%s3092_s12 + $0x80] sm:$0xf]  ;;  %v3299_v9 = vld [vmem:[%s3092_s12 + $0x84] sm:$0xf0] }
  0x35   : > { %4163 = vst [vmem:[#allocation34_spill] sm:$0xff] %v3295_v2  ;;  %v3302_v3 = vld [vmem:[%s3092_s12 + $0x80] sm:$0xf0]  ;;  %v2532_v24 = vld [vmem:[%s3092_s12 + $0x84] sm:$0xf0] }
  0x36   : > { %4164 = vst [vmem:[#allocation35_spill] sm:$0xff] %v3299_v9  ;;  %v2789_v18 = vld [vmem:[%s3092_s12 + $0x80] sm:$0xf0]  ;;  %v3307_v14 = vld [vmem:[%s3092_s12 + $0x88] sm:$0xf0] }
  0x37   : > { %4165 = vst [vmem:[#allocation36_spill] sm:$0xff] %v3302_v3  ;;  %v2791_v20 = vld [vmem:[%s3092_s12 + $0x88] sm:$0xf0]  ;;  %v3311_v21 = vld [vmem:[%s3092_s12 + $0x94] sm:$0xf] }
  0x38   : > { %4166 = vst [vmem:[#allocation37_spill] sm:$0xff] %v3307_v14  ;;  %v3314_v15 = vld [vmem:[%s3092_s12 + $0x90] sm:$0xf]  ;;  %v2793_v36 = vld [vmem:[%s3092_s12 + $0x94] sm:$0xf] }
  0x39   : > { %4167 = vst [vmem:[#allocation38_spill] sm:$0xff] %v3311_v21  ;;  %v2542_v30 = vld [vmem:[%s3092_s12 + $0x90] sm:$0xf]  ;;  %v3319_v26 = vld [vmem:[%s3092_s12 + $0x98] sm:$0xf] }
  0x3a   : > { %4168 = vst [vmem:[#allocation39_spill] sm:$0xff] %v3319_v26  ;;  %v2550_v32 = vld [vmem:[%s3092_s12 + $0x98] sm:$0xf]  ;;  %v3323_v33 = vld [vmem:[%s3092_s12 + $0x9c] sm:$0xf0] }
  0x3b   : > { %v3326_v27 = vld [vmem:[%s3092_s12 + $0x98] sm:$0xf0]  ;;  %v2544_v48 = vld [vmem:[%s3092_s12 + $0x9c] sm:$0xf0]  ;;  %v3331_v38 = vld [vmem:[%s3092_s12 + $0xa0] sm:$0xf0] }
  0x3c   : > { %v2795_v42 = vld [vmem:[%s3092_s12 + $0x98] sm:$0xf0]  ;;  %4169 = vst [vmem:[#allocation40_spill] sm:$0xff] %v3331_v38  ;;  %v2797_v44 = vld [vmem:[%s3092_s12 + $0xa0] sm:$0xf0] }
  0x3d   : > { %v3335_v45 = vld [vmem:[%s3092_s12 + $0xac] sm:$0xf]  ;;  %v3338_v39 = vld [vmem:[%s3092_s12 + $0xa8] sm:$0xf]  ;;  %v3343_v50 = vld [vmem:[%s3092_s12 + $0xb0] sm:$0xf] }
  0x3e   : > { %v2799_v60 = vld [vmem:[%s3092_s12 + $0xac] sm:$0xf]  ;;  %v2554_v54 = vld [vmem:[%s3092_s12 + $0xa8] sm:$0xf]  ;;  %4170 = vst [vmem:[#allocation41_spill] sm:$0xff] %v3343_v50  ;;  %367 = sbr.rel (%p2467_p5) target bundleno = 1515 (0x5eb), region = 40 }
  0x3f   : > { %v2562_v56 = vld [vmem:[%s3092_s12 + $0xb0] sm:$0xf]  ;;  %v3347_v57 = vld [vmem:[%s3092_s12 + $0xb4] sm:$0xf0]  ;;  %v3350_v51 = vld [vmem:[%s3092_s12 + $0xb0] sm:$0xf0] }
  0x40   : > { %v2556_v14 = vld [vmem:[%s3092_s12 + $0xb4] sm:$0xf0]  ;;  %v2801_v2 = vld [vmem:[%s3092_s12 + $0xb0] sm:$0xf0]  ;;  %v3355_v62 = vld [vmem:[%s3092_s12 + $0xb8] sm:$0xf0] }
  0x41   : > { %4171 = vst [vmem:[#allocation42_spill] sm:$0xff] %v3355_v62  ;;  %v2803_v9 = vld [vmem:[%s3092_s12 + $0xb8] sm:$0xf0] }
  0x43   : > { %v3359_v3 = vor.u32 %v2801_v2, %v2554_v54  ;;  %v3361_v63 = vor.u32 %v2799_v60, %v2556_v14  ;;  %v3365_v38 = vor.u32 %v2795_v42, %v2542_v30  ;;  %v3367_v26 = vor.u32 %v2793_v36, %v2544_v48 }
  0x44   : > { %v3369_v50 = vor.u32 %v2803_v9, %v2562_v56  ;;  %v3022_v21 = vmov 0   ;;  %v3373_v62 = vor.u32 %v2797_v44, %v2550_v32  ;;  %v3378_v2 = vor.u32 %v2789_v18, %v2530_v6 }
  0x45   : > { %501 = vmatpush.bf16.msra.mxu0 %v3359_v3  ;;  %514 = vmatpush.bf16.msra.mxu1 %v3361_v63  ;;  %v3380_v14 = vor.u32 %v2787_v12, %v2532_v24  ;;  %vm591_vm0 = vcmp.gt.s32.totalorder %v3099_v1, 0  ;;  %v3387_v30 = vor.u32 %v2791_v20, %v2538_v8  ;;  %v3394_v6 = vor.u32 %v3278_v59, %v3260_v53 }
  0x46   : > { %2832 = vset.pattern.permute.xlu0 %v3022_v21  ;;  %527 = vmatpush.bf16.msra.mxu2 %v3369_v50  ;;  %v592_v9 = vsel %vm591_vm0, 1, %v3022_v21  ;;  %v3398_v12 = vor.u32 %v3257_v52, %v3275_v58  ;;  %vm693_vm1 = vcmp.gt.s32.totalorder %v3099_v1, 1  ;;  %v3404_v8 = vor.u32 %v3284_v61, %v3266_v55 }
  0x47   : > { %606 = vmatpush.bf16.msra.mxu3 %v3359_v3  ;;  %2833 = vset.pattern.permute.xlu1 %v3022_v21  ;;  %v694_v18 = vsel %vm693_vm1, 1, %v3022_v21  ;;  %v3412_v20 = vor.u32 %v3242_v47, %v3224_v41  ;;  %v3416_v24 = vor.u32 %v3221_v40, %v3239_v46  ;;  %v3421_v32 = vor.u32 %v3248_v49, %v3230_v43 }
  0x48   : > { %2834 = vset.pattern.permute.xlu2 %v3022_v21  ;;  %594 = vperm.xlu0 %2832, %v592_v9   ;;  %v3428_v36 = vor.u32 %v3206_v35, %v3188_v29  ;;  %v3432_v40 = vor.u32 %v3185_v28, %v3203_v34  ;;  %vm1213_vm2 = vcmp.gt.s32.totalorder %v3099_v1, 6  ;;  %v3438_v41 = vor.u32 %v3212_v37, %v3194_v31  ;;  %v369_v9 = vld [vmem:[%s3082_s6 + $0x8] sm:$0xf] }
  0x49   : > { %502 = vmatpush.bf16.msra.mxu0 %v3365_v38  ;;  %515 = vmatpush.bf16.msra.mxu1 %v3367_v26  ;;  %v1214_v42 = vsel %vm1213_vm2, 1, %v3022_v21  ;;  %v3446_v28 = vor.u32 %v3170_v23, %v3152_v17  ;;  %v3450_v29 = vor.u32 %v3149_v16, %v3167_v22  ;;  %v3455_v31 = vor.u32 %v3176_v25, %v3158_v19 }
  0x4a   : > { %528 = vmatpush.bf16.msra.mxu2 %v3373_v62  ;;  %v3462_v17 = vor.u32 %v3134_v11, %v3116_v5  ;;  %v3466_v16 = vor.u32 %v3113_v4, %v3131_v10  ;;  %v3471_v19 = vor.u32 %v3140_v13, %v3122_v7  ;;  %v368_v4 = vld [vmem:[%s3082_s6] sm:$0xff]  ;;  %v3539_v56 = vperm.slane %v3094_v0, 0 }
  0x4b   : > { %607 = vmatpush.bf16.msra.mxu3 %v3365_v38  ;;  %v370_v5 = vunpack.c.l.bf16 %v368_v4  ;;  %v371_v7 = vunpack.c.h.bf16 %v368_v4  ;;  %vm797_vm13 = vcmp.gt.s32.totalorder %v3099_v1, 2  ;;  %vm901_vm14 = vcmp.gt.s32.totalorder %v3099_v1, 3 }
  0x4d   : > { %503 = vmatpush.bf16.msra.mxu0 %v3378_v2  ;;  %516 = vmatpush.bf16.msra.mxu1 %v3380_v14 }
  0x4e   : > { %529 = vmatpush.bf16.msra.mxu2 %v3387_v30 }
  0x4f   : > { %608 = vmatpush.bf16.msra.mxu3 %v3378_v2 }
  0x50   : > { %696 = vperm.xlu0 %2832, %v694_v18  }
  0x51   : > { %504 = vmatpush.bf16.msra.mxu0 %v3394_v6  ;;  %517 = vmatpush.bf16.msra.mxu1 %v3398_v12 }
  0x52   : > { %530 = vmatpush.bf16.msra.mxu2 %v3404_v8 }
  0x53   : > { %609 = vmatpush.bf16.msra.mxu3 %v3394_v6 }
  0x55   : > { %505 = vmatpush.bf16.msra.mxu0 %v3412_v20  ;;  %518 = vmatpush.bf16.msra.mxu1 %v3416_v24 }
  0x56   : > { %531 = vmatpush.bf16.msra.mxu2 %v3421_v32 }
  0x57   : > { %610 = vmatpush.bf16.msra.mxu3 %v3412_v20 }
  0x58   : > { %1216 = vperm.xlu0 %2832, %v1214_v42  }
  0x59   : > { %506 = vmatpush.bf16.msra.mxu0 %v3428_v36  ;;  %519 = vmatpush.bf16.msra.mxu1 %v3432_v40 }
  0x5a   : > { %532 = vmatpush.bf16.msra.mxu2 %v3438_v41 }
  0x5b   : > { %611 = vmatpush.bf16.msra.mxu3 %v3428_v36 }
  0x5d   : > { %507 = vmatpush.bf16.msra.mxu0 %v3446_v28  ;;  %520 = vmatpush.bf16.msra.mxu1 %v3450_v29 }
  0x5e   : > { %533 = vmatpush.bf16.msra.mxu2 %v3455_v31 }
  0x5f   : > { %612 = vmatpush.bf16.msra.mxu3 %v3446_v28 }
  0x61   : > { %508 = vmatpush.bf16.msra.mxu0 %v3462_v17  ;;  %521 = vmatpush.bf16.msra.mxu1 %v3466_v16 }
  0x62   : > { %534 = vmatpush.bf16.msra.mxu2 %v3471_v19 }
  0x63   : > { %613 = vmatpush.bf16.msra.mxu3 %v3462_v17 }
  0x64   : > { %509 = vmatmul.bf16.vlgmr.msra.gmra.mxu0 %v3022_v21  ;;  %522 = vmatmul.bf16.vlgmr.msra.gmra.mxu1 %v3022_v21 }
  0x65   : > { %619 = vmatpush.bf16.msrb.mxu0 %v3361_v63  ;;  %632 = vmatpush.bf16.msrb.mxu1 %v3369_v50 }
  0x66   : > { %710 = vmatpush.bf16.msrb.mxu2 %v3359_v3 }
  0x67   : > { %535 = vmatmul.bf16.vlgmr.msra.gmra.mxu2 %v3022_v21  ;;  %723 = vmatpush.bf16.msrb.mxu3 %v3361_v63 }
  0x69   : > { %620 = vmatpush.bf16.msrb.mxu0 %v3367_v26  ;;  %633 = vmatpush.bf16.msrb.mxu1 %v3373_v62 }
  0x6a   : > { %711 = vmatpush.bf16.msrb.mxu2 %v3365_v38 }
  0x6b   : > { %724 = vmatpush.bf16.msrb.mxu3 %v3367_v26 }
  0x6d   : > { %621 = vmatpush.bf16.msrb.mxu0 %v3380_v14  ;;  %634 = vmatpush.bf16.msrb.mxu1 %v3387_v30 }
  0x6e   : > { %712 = vmatpush.bf16.msrb.mxu2 %v3378_v2 }
  0x6f   : > { %725 = vmatpush.bf16.msrb.mxu3 %v3380_v14 }
  0x71   : > { %622 = vmatpush.bf16.msrb.mxu0 %v3398_v12  ;;  %635 = vmatpush.bf16.msrb.mxu1 %v3404_v8 }
  0x72   : > { %713 = vmatpush.bf16.msrb.mxu2 %v3394_v6 }
  0x73   : > { %726 = vmatpush.bf16.msrb.mxu3 %v3398_v12 }
  0x75   : > { %623 = vmatpush.bf16.msrb.mxu0 %v3416_v24  ;;  %636 = vmatpush.bf16.msrb.mxu1 %v3421_v32 }
  0x76   : > { %714 = vmatpush.bf16.msrb.mxu2 %v3412_v20 }
  0x77   : > { %727 = vmatpush.bf16.msrb.mxu3 %v3416_v24 }
  0x79   : > { %624 = vmatpush.bf16.msrb.mxu0 %v3432_v40  ;;  %637 = vmatpush.bf16.msrb.mxu1 %v3438_v41 }
  0x7a   : > { %715 = vmatpush.bf16.msrb.mxu2 %v3428_v36 }
  0x7b   : > { %728 = vmatpush.bf16.msrb.mxu3 %v3432_v40 }
  0x7d   : > { %625 = vmatpush.bf16.msrb.mxu0 %v3450_v29  ;;  %638 = vmatpush.bf16.msrb.mxu1 %v3455_v31 }
  0x7e   : > { %716 = vmatpush.bf16.msrb.mxu2 %v3446_v28 }
  0x7f   : > { %729 = vmatpush.bf16.msrb.mxu3 %v3450_v29 }
  0x81   : > { %626 = vmatpush.bf16.msrb.mxu0 %v3466_v16  ;;  %639 = vmatpush.bf16.msrb.mxu1 %v3471_v19 }
  0x82   : > { %717 = vmatpush.bf16.msrb.mxu2 %v3462_v17 }
  0x83   : > { %730 = vmatpush.bf16.msrb.mxu3 %v3466_v16 }
  0x85   : > { %736 = vmatpush.bf16.msra.mxu0 %v3369_v50  ;;  %814 = vmatpush.bf16.msra.mxu1 %v3359_v3 }
  0x86   : > { %827 = vmatpush.bf16.msra.mxu2 %v3361_v63 }
  0x89   : > { %737 = vmatpush.bf16.msra.mxu0 %v3373_v62  ;;  %815 = vmatpush.bf16.msra.mxu1 %v3365_v38 }
  0x8a   : > { %828 = vmatpush.bf16.msra.mxu2 %v3367_v26 }
  0x8d   : > { %738 = vmatpush.bf16.msra.mxu0 %v3387_v30  ;;  %816 = vmatpush.bf16.msra.mxu1 %v3378_v2 }
  0x8e   : > { %829 = vmatpush.bf16.msra.mxu2 %v3380_v14 }
  0x91   : > { %739 = vmatpush.bf16.msra.mxu0 %v3404_v8  ;;  %817 = vmatpush.bf16.msra.mxu1 %v3394_v6 }
  0x92   : > { %830 = vmatpush.bf16.msra.mxu2 %v3398_v12 }
  0x95   : > { %740 = vmatpush.bf16.msra.mxu0 %v3421_v32  ;;  %818 = vmatpush.bf16.msra.mxu1 %v3412_v20 }
  0x96   : > { %831 = vmatpush.bf16.msra.mxu2 %v3416_v24 }
  0x99   : > { %741 = vmatpush.bf16.msra.mxu0 %v3438_v41  ;;  %819 = vmatpush.bf16.msra.mxu1 %v3428_v36 }
  0x9a   : > { %832 = vmatpush.bf16.msra.mxu2 %v3432_v40 }
  0x9d   : > { %742 = vmatpush.bf16.msra.mxu0 %v3455_v31  ;;  %820 = vmatpush.bf16.msra.mxu1 %v3446_v28 }
  0x9e   : > { %833 = vmatpush.bf16.msra.mxu2 %v3450_v29 }
  0xa1   : > { %743 = vmatpush.bf16.msra.mxu0 %v3471_v19  ;;  %821 = vmatpush.bf16.msra.mxu1 %v3462_v17 }
  0xa2   : > { %834 = vmatpush.bf16.msra.mxu2 %v3466_v16 }
  0xe1   : > { %v510_v10 = vpop.f32.mrf.mxu0  ;;  %v523_v11 = vpop.f32.mrf.mxu1 }
  0xe2   : > { %v540_v13 = vadd.f32 %v510_v10, %v370_v5  ;;  %v560_v22 = vadd.f32 %v523_v11, %v371_v7  ;;  %v372_v7 = vunpack.c.l.bf16 %v369_v9 }
  0xe4   : > { %v2564_v23 = vmul.f32 -1.442695, %v540_v13  ;;  %v2565_v25 = vmul.f32 -1.442695, %v560_v22 }
  0xe6   : > { %2835 = vpow2.f32 %v2564_v23 }
  0xe7   : > { %2837 = vpow2.f32 %v2565_v25 }
  0xe9   : > { %v512_v34 = vpop.f32.mrf.mxu0  ;;  %v525_v35 = vpop.f32.mrf.mxu1 }
  0xea   : > { %v536_v37 = vpop.f32.mrf.mxu2 }
  0xeb   : > { %v583_v4 = vadd.f32 %v3539_v56, %v536_v37 }
  0xec   : > { %v2836_v43 = vpop.eup %2835 }
  0xed   : > { %v2838_v44 = vpop.eup %2837  ;;  %v544_v46 = vadd.f32 1.0, %v2836_v43 }
  0xee   : > { %v564_v47 = vadd.f32 1.0, %v2838_v44 }
  0xef   : > { %2839 = vrcp.f32 %v544_v46  ;;  %v556_v59 = vand.u32 2147483648, %v544_v46  ;;  %v554_v61 = vand.u32 2147483647, %v544_v46  ;;  %vm550_vm4 = vweird.f32 %v544_v46 }
  0xf0   : > { %2841 = vrcp.f32 %v564_v47  ;;  %vm570_vm7 = vweird.f32 %v564_v47  ;;  %v576_v23 = vand.u32 2147483648, %v564_v47  ;;  %v574_v25 = vand.u32 2147483647, %v564_v47 }
  0xf1   : > { %v557_v5 = vor.u32 1.1754944e-38, %v556_v59  ;;  %vm555_vm6 = vcmp.eq.f32.partialorder %v554_v61, 8.507059e+37 }
  0xf2   : > { %v538_v48 = vpop.f32.mrf.mxu2  ;;  %v577_v43 = vor.u32 1.1754944e-38, %v576_v23  ;;  %vm575_vm10 = vcmp.eq.f32.partialorder %v574_v25, 8.507059e+37 }
  0xf3   : > { %v595_v48 = vpop.permute.xlu0 %594 }
  0xf4   : > { %vm596_vm11 = vcmp.eq.s32.totalorder %v595_v48, 1 }
  0xf5   : > { %v2840_v49 = vpop.eup %2839  ;;  %vm2568_vm12 = vmpackc.low %vm596_vm11, %vm596_vm11 }
  0xf6   : > { %v2842_v52 = vpop.eup %2841  ;;  %v546_v53 = vmul.f32 %v2840_v49, %v544_v46  ;;  %vm551_vm3 = vweird.f32 %v2840_v49 }
  0xf7   : > { %v566_v54 = vmul.f32 %v2842_v52, %v564_v47  ;;  %vm552_vm5 = vmor %vm550_vm4, %vm551_vm3  ;;  %vm571_vm8 = vweird.f32 %v2842_v52  ;;  %v2566_v47 = vld [vmem:[%s3082_s6 + $0xc] sm:$0xff]  ;;  %vm1317_vm4 = vcmp.gt.s32.totalorder %v3099_v1, 7 }
  0xf8   : > { %v547_v55 = vsub.f32 1.0, %v546_v53  ;;  %vm572_vm9 = vmor %vm570_vm7, %vm571_vm8 }
  0xf9   : > { %v567_v58 = vsub.f32 1.0, %v566_v54 }
  0xfa   : > { %v548_v60 = vmul.f32 %v2840_v49, %v547_v55 }
  0xfb   : > { %v568_v18 = vmul.f32 %v2842_v52, %v567_v58 }
  0xfc   : > { %v549_v42 = vadd.f32 %v2840_v49, %v548_v60 }
  0xfd   : > { %v569_v13 = vadd.f32 %v2842_v52, %v568_v18  ;;  %v602_v18 = vunpack.c.l.bf16 %v2566_v47 }
  0xfe   : > { %v553_v10 = vsel %vm552_vm5, %v2840_v49, %v549_v42 }
  0xff   : > { %v558_v11 = vsel %vm555_vm6, %v557_v5, %v553_v10  ;;  %v573_v35 = vsel %vm572_vm9, %v2842_v52, %v569_v13  ;;  %v603_v52 = vunpack.c.h.bf16 %v2566_v47 }
 0x100   : > { %v584_v22 = vmul.f32 %v583_v4, %v558_v11  ;;  %v578_v37 = vsel %vm575_vm10, %v577_v43, %v573_v35  ;;  %v798_v43 = vsel %vm797_vm13, 1, %v3022_v21 }
 0x101   : > { %v587_v44 = vsub.f32 1.0, %v578_v37  ;;  %v589_v53 = vmul.f32 0.0, %v578_v37  ;;  %800 = vperm.xlu1 %2833, %v798_v43  }
 0x102   : > { %v585_v34 = vadd.f32 %v584_v22, %v372_v7 }
 0x104   : > { %2843 = vtanh.f32 %v585_v34 }
 0x10a   : > { %v2844_v46 = vpop.eup %2843 }
 0x10b   : > { %v588_v49 = vmul.f32 %v2844_v46, %v587_v44 }
 0x10d   : > { %v590_v54 = vadd.f32 %v589_v53, %v588_v49 }
 0x10f   : > { %v3543_v55 = vsel %vm596_vm11, %v590_v54, 0.0  ;;  %v2569_v58 = vpack.c.bf16 %v590_v54, %v590_v54 }
 0x110   : > { %598 = vst [vmem:[%s3087_s9] sm:$0xff] %v3543_v55 }
 0x111   : > { %2570 = vmatmul.msk.bf16.vlgmr.msra.gmra.mxu3 %vm2568_vm12, %v2569_v58  ;;  %2573 = vmatmul.msk.bf16.vlgmr.msrb.gmra.mxu0 %vm2568_vm12, %v2569_v58 }
 0x112   : > { %2576 = vmatmul.msk.bf16.vlgmr.msrb.gmra.mxu1 %vm2568_vm12, %v2569_v58  ;;  %840 = vmatpush.bf16.msra.mxu3 %v3369_v50  ;;  %v902_v58 = vsel %vm901_vm14, 1, %v3022_v21 }
 0x113   : > { %918 = vmatpush.bf16.msrb.mxu0 %v3359_v3  ;;  %931 = vmatpush.bf16.msrb.mxu1 %v3361_v63 }
 0x114   : > { %904 = vperm.xlu1 %2833, %v902_v58  }
 0x116   : > { %841 = vmatpush.bf16.msra.mxu3 %v3373_v62 }
 0x117   : > { %919 = vmatpush.bf16.msrb.mxu0 %v3365_v38  ;;  %932 = vmatpush.bf16.msrb.mxu1 %v3367_v26 }
 0x11a   : > { %842 = vmatpush.bf16.msra.mxu3 %v3387_v30 }
 0x11b   : > { %920 = vmatpush.bf16.msrb.mxu0 %v3378_v2  ;;  %933 = vmatpush.bf16.msrb.mxu1 %v3380_v14 }
 0x11e   : > { %843 = vmatpush.bf16.msra.mxu3 %v3404_v8 }
 0x11f   : > { %921 = vmatpush.bf16.msrb.mxu0 %v3394_v6  ;;  %934 = vmatpush.bf16.msrb.mxu1 %v3398_v12 }
 0x122   : > { %844 = vmatpush.bf16.msra.mxu3 %v3421_v32 }
 0x123   : > { %922 = vmatpush.bf16.msrb.mxu0 %v3412_v20  ;;  %935 = vmatpush.bf16.msrb.mxu1 %v3416_v24 }
 0x126   : > { %845 = vmatpush.bf16.msra.mxu3 %v3438_v41 }
 0x127   : > { %923 = vmatpush.bf16.msrb.mxu0 %v3428_v36  ;;  %936 = vmatpush.bf16.msrb.mxu1 %v3432_v40 }
 0x12a   : > { %846 = vmatpush.bf16.msra.mxu3 %v3455_v31 }
 0x12b   : > { %924 = vmatpush.bf16.msrb.mxu0 %v3446_v28  ;;  %937 = vmatpush.bf16.msrb.mxu1 %v3450_v29 }
 0x12e   : > { %847 = vmatpush.bf16.msra.mxu3 %v3471_v19 }
 0x12f   : > { %925 = vmatpush.bf16.msrb.mxu0 %v3462_v17  ;;  %938 = vmatpush.bf16.msrb.mxu1 %v3466_v16 }
 0x18e   : > { %v628_v59 = vpop.f32.mrf.mxu0 }
 0x18f   : > { %v665_v60 = vadd.f32 %v628_v59, %v603_v52  ;;  %v641_v61 = vpop.f32.mrf.mxu1  ;;  %v2567_v52 = vld [vmem:[%s3082_s6 + $0x14] sm:$0xf] }
 0x191   : > { %v2578_v9 = vmul.f32 -1.442695, %v665_v60 }
 0x193   : > { %2845 = vpow2.f32 %v2578_v9  ;;  %v685_v9 = vadd.f32 %v641_v61, %v3539_v56 }
 0x194   : > { %v615_v42 = vpop.f32.mrf.mxu3 }
 0x195   : > { %v645_v4 = vadd.f32 %v615_v42, %v602_v18  ;;  %v604_v42 = vunpack.c.l.bf16 %v2567_v52 }
 0x196   : > { %v630_v5 = vpop.f32.mrf.mxu0 }
 0x197   : > { %v2577_v7 = vmul.f32 -1.442695, %v645_v4  ;;  %v643_v10 = vpop.f32.mrf.mxu1 }
 0x199   : > { %v2846_v11 = vpop.eup %2845  ;;  %2847 = vpow2.f32 %v2577_v7 }
 0x19a   : > { %v669_v13 = vadd.f32 1.0, %v2846_v11 }
 0x19c   : > { %v617_v22 = vpop.f32.mrf.mxu3  ;;  %2849 = vrcp.f32 %v669_v13  ;;  %v681_v7 = vand.u32 2147483648, %v669_v13  ;;  %vm675_vm5 = vweird.f32 %v669_v13  ;;  %v679_v11 = vand.u32 2147483647, %v669_v13 }
 0x19e   : > { %vm680_vm7 = vcmp.eq.f32.partialorder %v679_v11, 8.507059e+37 }
 0x19f   : > { %v2848_v23 = vpop.eup %2847 }
 0x1a0   : > { %v649_v25 = vadd.f32 1.0, %v2848_v23  ;;  %v1318_v23 = vsel %vm1317_vm4, 1, %v3022_v21 }
 0x1a1   : > { %1320 = vperm.xlu1 %2833, %v1318_v23  }
 0x1a2   : > { %2851 = vrcp.f32 %v649_v25  ;;  %v2850_v34 = vpop.eup %2849  ;;  %v661_v49 = vand.u32 2147483648, %v649_v25  ;;  %v659_v54 = vand.u32 2147483647, %v649_v25  ;;  %vm655_vm0 = vweird.f32 %v649_v25 }
 0x1a3   : > { %v671_v35 = vmul.f32 %v2850_v34, %v669_v13  ;;  %vm676_vm3 = vweird.f32 %v2850_v34 }
 0x1a4   : > { %v662_v60 = vor.u32 1.1754944e-38, %v661_v49  ;;  %vm660_vm2 = vcmp.eq.f32.partialorder %v659_v54, 8.507059e+37  ;;  %vm677_vm6 = vmor %vm675_vm5, %vm676_vm3  ;;  %vm1109_vm3 = vcmp.gt.s32.totalorder %v3099_v1, 5 }
 0x1a5   : > { %v672_v46 = vsub.f32 1.0, %v671_v35  ;;  %v682_v35 = vor.u32 1.1754944e-38, %v681_v7 }
 0x1a7   : > { %v673_v47 = vmul.f32 %v2850_v34, %v672_v46 }
 0x1a8   : > { %v2852_v37 = vpop.eup %2851 }
 0x1a9   : > { %v651_v44 = vmul.f32 %v2852_v37, %v649_v25  ;;  %vm656_vm15 = vweird.f32 %v2852_v37  ;;  %v674_v4 = vadd.f32 %v2850_v34, %v673_v47 }
 0x1aa   : > { %vm657_vm1 = vmor %vm655_vm0, %vm656_vm15 }
 0x1ab   : > { %v652_v48 = vsub.f32 1.0, %v651_v44  ;;  %v678_v25 = vsel %vm677_vm6, %v2850_v34, %v674_v4 }
 0x1ac   : > { %v683_v61 = vsel %vm680_vm7, %v682_v35, %v678_v25 }
 0x1ad   : > { %v653_v53 = vmul.f32 %v2852_v37, %v652_v48  ;;  %v689_v43 = vsub.f32 1.0, %v683_v61  ;;  %v691_v46 = vmul.f32 %v683_v61, %v3543_v55  ;;  %v697_v48 = vpop.permute.xlu0 %696 }
 0x1ae   : > { %vm698_vm8 = vcmp.eq.s32.totalorder %v697_v48, 1 }
 0x1af   : > { %v654_v59 = vadd.f32 %v2852_v37, %v653_v53 }
 0x1b1   : > { %v658_v18 = vsel %vm657_vm1, %v2852_v37, %v654_v59 }
 0x1b2   : > { %v663_v5 = vsel %vm660_vm2, %v662_v60, %v658_v18  ;;  %vm1005_vm2 = vcmp.gt.s32.totalorder %v3099_v1, 4 }
 0x1b3   : > { %v686_v10 = vmul.f32 %v685_v9, %v663_v5 }
 0x1b5   : > { %v687_v22 = vadd.f32 %v686_v10, %v604_v42 }
 0x1b7   : > { %2853 = vtanh.f32 %v687_v22 }
 0x1bd   : > { %v2854_v37 = vpop.eup %2853 }
 0x1be   : > { %v690_v44 = vmul.f32 %v2854_v37, %v689_v43 }
 0x1c0   : > { %v692_v49 = vadd.f32 %v691_v46, %v690_v44 }
 0x1c2   : > { %v699_v13 = vsel %vm698_vm8, %v692_v49, 0.0  ;;  %v3582_v53 = vsel %vm698_vm8, %v692_v49, %v3543_v55  ;;  %v2580_v55 = vld [vmem:[%s3082_s6 + $0x18] sm:$0xff] }
 0x1c3   : > { %2579 = vst [vmem:[%s3087_s9 + $0x8] sm:$0xff] %v699_v13  ;;  %v709_v34 = vpack.c.bf16 %v3582_v53, %v3582_v53  ;;  %v706_v58 = vunpack.c.l.bf16 %v2580_v55  ;;  %v707_v47 = vunpack.c.h.bf16 %v2580_v55  ;;  %v2581_v13 = vld [vmem:[%s3082_s6 + $0x20] sm:$0xf] }
 0x1c5   : > { %718 = vmatmul.bf16.vlgmr.msrb.gmra.mxu2 %v709_v34  ;;  %731 = vmatmul.bf16.vlgmr.msrb.gmra.mxu3 %v709_v34 }
 0x1c6   : > { %744 = vmatmul.bf16.vlgmr.msra.gmra.mxu0 %v709_v34  ;;  %944 = vmatpush.bf16.msrb.mxu2 %v3369_v50 }
 0x1c7   : > { %1022 = vmatpush.bf16.msrb.mxu3 %v3359_v3  ;;  %1035 = vmatpush.bf16.msra.mxu0 %v3361_v63 }
 0x1ca   : > { %945 = vmatpush.bf16.msrb.mxu2 %v3373_v62 }
 0x1cb   : > { %1023 = vmatpush.bf16.msrb.mxu3 %v3365_v38  ;;  %1036 = vmatpush.bf16.msra.mxu0 %v3367_v26 }
 0x1ce   : > { %946 = vmatpush.bf16.msrb.mxu2 %v3387_v30 }
 0x1cf   : > { %1024 = vmatpush.bf16.msrb.mxu3 %v3378_v2  ;;  %1037 = vmatpush.bf16.msra.mxu0 %v3380_v14 }
 0x1d2   : > { %947 = vmatpush.bf16.msrb.mxu2 %v3404_v8 }
 0x1d3   : > { %1025 = vmatpush.bf16.msrb.mxu3 %v3394_v6  ;;  %1038 = vmatpush.bf16.msra.mxu0 %v3398_v12 }
 0x1d6   : > { %948 = vmatpush.bf16.msrb.mxu2 %v3421_v32 }
 0x1d7   : > { %1026 = vmatpush.bf16.msrb.mxu3 %v3412_v20  ;;  %1039 = vmatpush.bf16.msra.mxu0 %v3416_v24 }
 0x1da   : > { %949 = vmatpush.bf16.msrb.mxu2 %v3438_v41 }
 0x1db   : > { %1027 = vmatpush.bf16.msrb.mxu3 %v3428_v36  ;;  %1040 = vmatpush.bf16.msra.mxu0 %v3432_v40 }
 0x1de   : > { %950 = vmatpush.bf16.msrb.mxu2 %v3455_v31 }
 0x1df   : > { %1028 = vmatpush.bf16.msrb.mxu3 %v3446_v28  ;;  %1041 = vmatpush.bf16.msra.mxu0 %v3450_v29 }
 0x1e2   : > { %951 = vmatpush.bf16.msrb.mxu2 %v3471_v19 }
 0x1e3   : > { %1029 = vmatpush.bf16.msrb.mxu3 %v3462_v17  ;;  %1042 = vmatpush.bf16.msra.mxu0 %v3466_v16 }
 0x243   : > { %v745_v54 = vpop.f32.mrf.mxu0 }
 0x248   : > { %v719_v52 = vpop.f32.mrf.mxu2  ;;  %v732_v59 = vpop.f32.mrf.mxu3 }
 0x249   : > { %v749_v60 = vadd.f32 %v719_v52, %v706_v58  ;;  %v769_v9 = vadd.f32 %v732_v59, %v707_v47  ;;  %v789_v47 = vadd.f32 %v745_v54, %v3539_v56  ;;  %v708_v52 = vunpack.c.l.bf16 %v2581_v13 }
 0x24b   : > { %v2582_v18 = vmul.f32 -1.442695, %v749_v60  ;;  %v2583_v42 = vmul.f32 -1.442695, %v769_v9  ;;  %v747_v4 = vpop.f32.mrf.mxu0 }
 0x24d   : > { %2855 = vpow2.f32 %v2582_v18 }
 0x24e   : > { %2857 = vpow2.f32 %v2583_v42 }
 0x250   : > { %v721_v5 = vpop.f32.mrf.mxu2  ;;  %v734_v7 = vpop.f32.mrf.mxu3 }
 0x253   : > { %v2856_v10 = vpop.eup %2855 }
 0x254   : > { %v2858_v11 = vpop.eup %2857  ;;  %v753_v22 = vadd.f32 1.0, %v2856_v10 }
 0x255   : > { %v773_v23 = vadd.f32 1.0, %v2858_v11 }
 0x256   : > { %2859 = vrcp.f32 %v753_v22  ;;  %v765_v44 = vand.u32 2147483648, %v753_v22  ;;  %v763_v49 = vand.u32 2147483647, %v753_v22  ;;  %vm759_vm10 = vweird.f32 %v753_v22 }
 0x257   : > { %2861 = vrcp.f32 %v773_v23  ;;  %v785_v18 = vand.u32 2147483648, %v773_v23  ;;  %vm779_vm14 = vweird.f32 %v773_v23  ;;  %v783_v4 = vand.u32 2147483647, %v773_v23 }
 0x258   : > { %v766_v58 = vor.u32 1.1754944e-38, %v765_v44  ;;  %vm764_vm12 = vcmp.eq.f32.partialorder %v763_v49, 8.507059e+37 }
 0x259   : > { %v786_v10 = vor.u32 1.1754944e-38, %v785_v18  ;;  %vm784_vm0 = vcmp.eq.f32.partialorder %v783_v4, 8.507059e+37 }
 0x25c   : > { %v2860_v25 = vpop.eup %2859 }
 0x25d   : > { %v2862_v35 = vpop.eup %2861  ;;  %v755_v61 = vmul.f32 %v2860_v25, %v753_v22  ;;  %vm760_vm9 = vweird.f32 %v2860_v25 }
 0x25e   : > { %v775_v43 = vmul.f32 %v2862_v35, %v773_v23  ;;  %vm761_vm11 = vmor %vm759_vm10, %vm760_vm9  ;;  %vm780_vm13 = vweird.f32 %v2862_v35 }
 0x25f   : > { %v756_v37 = vsub.f32 1.0, %v755_v61  ;;  %vm781_vm15 = vmor %vm779_vm14, %vm780_vm13  ;;  %v801_v61 = vpop.permute.xlu1 %800 }
 0x260   : > { %v776_v46 = vsub.f32 1.0, %v775_v43  ;;  %vm802_vm1 = vcmp.eq.s32.totalorder %v801_v61, 1  ;;  %v2586_v61 = vld [vmem:[%s3082_s6 + $0x2c] sm:$0xf] }
 0x261   : > { %v757_v48 = vmul.f32 %v2860_v25, %v756_v37 }
 0x262   : > { %v777_v34 = vmul.f32 %v2862_v35, %v776_v46 }
 0x263   : > { %v758_v55 = vadd.f32 %v2860_v25, %v757_v48 }
 0x264   : > { %v778_v9 = vadd.f32 %v2862_v35, %v777_v34 }
 0x265   : > { %v762_v59 = vsel %vm761_vm11, %v2860_v25, %v758_v55 }
 0x266   : > { %v767_v60 = vsel %vm764_vm12, %v766_v58, %v762_v59  ;;  %v782_v7 = vsel %vm781_vm15, %v2862_v35, %v778_v9 }
 0x267   : > { %v790_v42 = vmul.f32 %v789_v47, %v767_v60  ;;  %v787_v11 = vsel %vm784_vm0, %v786_v10, %v782_v7  ;;  %v1006_v7 = vsel %vm1005_vm2, 1, %v3022_v21 }
 0x268   : > { %v793_v22 = vsub.f32 1.0, %v787_v11  ;;  %v795_v25 = vmul.f32 %v787_v11, %v3582_v53  ;;  %1008 = vperm.xlu2 %2834, %v1006_v7  }
 0x269   : > { %v791_v5 = vadd.f32 %v790_v42, %v708_v52 }
 0x26b   : > { %2863 = vtanh.f32 %v791_v5 }
 0x271   : > { %v2864_v54 = vpop.eup %2863 }
 0x272   : > { %v794_v43 = vmul.f32 %v2864_v54, %v793_v22 }
 0x274   : > { %v796_v37 = vadd.f32 %v795_v25, %v794_v43 }
 0x276   : > { %v803_v44 = vsel %vm802_vm1, %v796_v37, 0.0  ;;  %v3616_v46 = vsel %vm802_vm1, %v796_v37, %v3582_v53  ;;  %v2585_v53 = vld [vmem:[%s3082_s6 + $0x24] sm:$0xff]  ;;  %v1110_v37 = vsel %vm1109_vm3, 1, %v3022_v21 }
 0x277   : > { %2584 = vst [vmem:[%s3087_s9 + $0x10] sm:$0xff] %v803_v44  ;;  %v813_v23 = vpack.c.bf16 %v3616_v46, %v3616_v46  ;;  %v810_v35 = vunpack.c.l.bf16 %v2585_v53  ;;  %v811_v34 = vunpack.c.h.bf16 %v2585_v53  ;;  %1112 = vperm.xlu2 %2834, %v1110_v37  }
 0x279   : > { %822 = vmatmul.bf16.vlgmr.msra.gmra.mxu1 %v813_v23  ;;  %835 = vmatmul.bf16.vlgmr.msra.gmra.mxu2 %v813_v23 }
 0x27a   : > { %848 = vmatmul.bf16.vlgmr.msra.gmra.mxu3 %v813_v23  ;;  %1048 = vmatpush.bf16.msra.mxu1 %v3369_v50 }
 0x27b   : > { %1126 = vmatpush.bf16.msra.mxu2 %v3359_v3  ;;  %1139 = vmatpush.bf16.msra.mxu3 %v3361_v63 }
 0x27e   : > { %1049 = vmatpush.bf16.msra.mxu1 %v3373_v62 }
 0x27f   : > { %1127 = vmatpush.bf16.msra.mxu2 %v3365_v38  ;;  %1140 = vmatpush.bf16.msra.mxu3 %v3367_v26 }
 0x282   : > { %1050 = vmatpush.bf16.msra.mxu1 %v3387_v30 }
 0x283   : > { %1128 = vmatpush.bf16.msra.mxu2 %v3378_v2  ;;  %1141 = vmatpush.bf16.msra.mxu3 %v3380_v14 }
 0x286   : > { %1051 = vmatpush.bf16.msra.mxu1 %v3404_v8 }
 0x287   : > { %1129 = vmatpush.bf16.msra.mxu2 %v3394_v6  ;;  %1142 = vmatpush.bf16.msra.mxu3 %v3398_v12 }
 0x28a   : > { %1052 = vmatpush.bf16.msra.mxu1 %v3421_v32 }
 0x28b   : > { %1130 = vmatpush.bf16.msra.mxu2 %v3412_v20  ;;  %1143 = vmatpush.bf16.msra.mxu3 %v3416_v24 }
 0x28e   : > { %1053 = vmatpush.bf16.msra.mxu1 %v3438_v41 }
 0x28f   : > { %1131 = vmatpush.bf16.msra.mxu2 %v3428_v36  ;;  %1144 = vmatpush.bf16.msra.mxu3 %v3432_v40 }
 0x292   : > { %1054 = vmatpush.bf16.msra.mxu1 %v3455_v31 }
 0x293   : > { %1132 = vmatpush.bf16.msra.mxu2 %v3446_v28  ;;  %1145 = vmatpush.bf16.msra.mxu3 %v3450_v29 }
 0x296   : > { %1055 = vmatpush.bf16.msra.mxu1 %v3471_v19 }
 0x297   : > { %1133 = vmatpush.bf16.msra.mxu2 %v3462_v17  ;;  %1146 = vmatpush.bf16.msra.mxu3 %v3466_v16 }
 0x2f6   : > { %v823_v48 = vpop.f32.mrf.mxu1 }
 0x2f7   : > { %v853_v49 = vadd.f32 %v823_v48, %v810_v35  ;;  %v812_v35 = vunpack.c.l.bf16 %v2586_v61 }
 0x2f9   : > { %v2587_v13 = vmul.f32 -1.442695, %v853_v49 }
 0x2fb   : > { %2865 = vpow2.f32 %v2587_v13 }
 0x2fc   : > { %v836_v55 = vpop.f32.mrf.mxu2 }
 0x2fd   : > { %v873_v58 = vadd.f32 %v836_v55, %v811_v34  ;;  %v849_v47 = vpop.f32.mrf.mxu3 }
 0x2fe   : > { %v825_v52 = vpop.f32.mrf.mxu1  ;;  %v893_v34 = vadd.f32 %v849_v47, %v3539_v56 }
 0x2ff   : > { %v2588_v59 = vmul.f32 -1.442695, %v873_v58 }
 0x301   : > { %v2866_v60 = vpop.eup %2865  ;;  %2867 = vpow2.f32 %v2588_v59 }
 0x302   : > { %v857_v9 = vadd.f32 1.0, %v2866_v60 }
 0x304   : > { %2869 = vrcp.f32 %v857_v9  ;;  %v838_v18 = vpop.f32.mrf.mxu2  ;;  %v869_v54 = vand.u32 2147483648, %v857_v9  ;;  %v867_v25 = vand.u32 2147483647, %v857_v9  ;;  %vm863_vm5 = vweird.f32 %v857_v9 }
 0x305   : > { %v851_v42 = vpop.f32.mrf.mxu3 }
 0x306   : > { %v870_v48 = vor.u32 1.1754944e-38, %v869_v54  ;;  %vm868_vm7 = vcmp.eq.f32.partialorder %v867_v25, 8.507059e+37 }
 0x307   : > { %v2868_v4 = vpop.eup %2867 }
 0x308   : > { %v877_v5 = vadd.f32 1.0, %v2868_v4 }
 0x30a   : > { %v2870_v10 = vpop.eup %2869  ;;  %2871 = vrcp.f32 %v877_v5  ;;  %v889_v52 = vand.u32 2147483648, %v877_v5  ;;  %v887_v60 = vand.u32 2147483647, %v877_v5  ;;  %vm883_vm9 = vweird.f32 %v877_v5 }
 0x30b   : > { %v859_v11 = vmul.f32 %v2870_v10, %v857_v9  ;;  %vm864_vm4 = vweird.f32 %v2870_v10 }
 0x30c   : > { %vm865_vm6 = vmor %vm863_vm5, %vm864_vm4  ;;  %v890_v9 = vor.u32 1.1754944e-38, %v889_v52  ;;  %vm888_vm11 = vcmp.eq.f32.partialorder %v887_v60, 8.507059e+37 }
 0x30d   : > { %v860_v22 = vsub.f32 1.0, %v859_v11 }
 0x30f   : > { %v861_v43 = vmul.f32 %v2870_v10, %v860_v22  ;;  %v905_v22 = vpop.permute.xlu1 %904 }
 0x310   : > { %v2872_v44 = vpop.eup %2871  ;;  %vm906_vm12 = vcmp.eq.s32.totalorder %v905_v22, 1 }
 0x311   : > { %v879_v23 = vmul.f32 %v2872_v44, %v877_v5  ;;  %v862_v53 = vadd.f32 %v2870_v10, %v861_v43  ;;  %vm884_vm8 = vweird.f32 %v2872_v44 }
 0x312   : > { %vm885_vm10 = vmor %vm883_vm9, %vm884_vm8 }
 0x313   : > { %v880_v49 = vsub.f32 1.0, %v879_v23  ;;  %v866_v13 = vsel %vm865_vm6, %v2870_v10, %v862_v53 }
 0x314   : > { %v871_v55 = vsel %vm868_vm7, %v870_v48, %v866_v13 }
 0x315   : > { %v881_v58 = vmul.f32 %v2872_v44, %v880_v49  ;;  %v894_v59 = vmul.f32 %v893_v34, %v871_v55  ;;  %v2591_v34 = vld [vmem:[%s3082_s6 + $0x38] sm:$0xf] }
 0x317   : > { %v882_v21 = vadd.f32 %v2872_v44, %v881_v58  ;;  %v895_v18 = vadd.f32 %v894_v59, %v812_v35  ;;  %v916_v59 = vunpack.c.l.bf16 %v2591_v34 }
 0x319   : > { %v886_v42 = vsel %vm885_vm10, %v2872_v44, %v882_v21  ;;  %2873 = vtanh.f32 %v895_v18 }
 0x31a   : > { %v891_v4 = vsel %vm888_vm11, %v890_v9, %v886_v42 }
 0x31b   : > { %v897_v7 = vsub.f32 1.0, %v891_v4  ;;  %v899_v47 = vmul.f32 %v891_v4, %v3616_v46 }
 0x31f   : > { %v2874_v10 = vpop.eup %2873 }
 0x320   : > { %v898_v11 = vmul.f32 %v2874_v10, %v897_v7 }
 0x322   : > { %v900_v54 = vadd.f32 %v899_v47, %v898_v11 }
 0x324   : > { %v907_v61 = vsel %vm906_vm12, %v900_v54, 0.0  ;;  %v3654_v43 = vsel %vm906_vm12, %v900_v54, %v3616_v46 }
 0x325   : > { %2589 = vst [vmem:[%s3087_s9 + $0x18] sm:$0xff] %v907_v61  ;;  %v917_v5 = vpack.c.bf16 %v3654_v43, %v3654_v43 }
 0x327   : > { %926 = vmatmul.bf16.vlgmr.msrb.gmra.mxu0 %v917_v5  ;;  %939 = vmatmul.bf16.vlgmr.msrb.gmra.mxu1 %v917_v5 }
 0x328   : > { %952 = vmatmul.bf16.vlgmr.msrb.gmra.mxu2 %v917_v5  ;;  %1152 = vmatpush.bf16.msrb.mxu0 %v3369_v50  ;;  %v1009_v5 = vpop.permute.xlu2 %1008 }
 0x329   : > { %1230 = vmatpush.bf16.msrb.mxu1 %v3359_v3  ;;  %1243 = vmatpush.bf16.msrb.mxu2 %v3361_v63  ;;  %v2590_v3 = vld [vmem:[%s3082_s6 + $0x30] sm:$0xff]  ;;  %vm1010_vm5 = vcmp.eq.s32.totalorder %v1009_v5, 1 }
 0x32c   : > { %1153 = vmatpush.bf16.msrb.mxu0 %v3373_v62 }
 0x32d   : > { %1231 = vmatpush.bf16.msrb.mxu1 %v3365_v38  ;;  %1244 = vmatpush.bf16.msrb.mxu2 %v3367_v26  ;;  %v914_v26 = vunpack.c.l.bf16 %v2590_v3  ;;  %v915_v38 = vunpack.c.h.bf16 %v2590_v3 }
 0x330   : > { %1154 = vmatpush.bf16.msrb.mxu0 %v3387_v30 }
 0x331   : > { %1232 = vmatpush.bf16.msrb.mxu1 %v3378_v2  ;;  %1245 = vmatpush.bf16.msrb.mxu2 %v3380_v14 }
 0x334   : > { %1155 = vmatpush.bf16.msrb.mxu0 %v3404_v8 }
 0x335   : > { %1233 = vmatpush.bf16.msrb.mxu1 %v3394_v6  ;;  %1246 = vmatpush.bf16.msrb.mxu2 %v3398_v12 }
 0x338   : > { %1156 = vmatpush.bf16.msrb.mxu0 %v3421_v32 }
 0x339   : > { %1234 = vmatpush.bf16.msrb.mxu1 %v3412_v20  ;;  %1247 = vmatpush.bf16.msrb.mxu2 %v3416_v24 }
 0x33c   : > { %1157 = vmatpush.bf16.msrb.mxu0 %v3438_v41 }
 0x33d   : > { %1235 = vmatpush.bf16.msrb.mxu1 %v3428_v36  ;;  %1248 = vmatpush.bf16.msrb.mxu2 %v3432_v40 }
 0x340   : > { %1158 = vmatpush.bf16.msrb.mxu0 %v3455_v31 }
 0x341   : > { %1236 = vmatpush.bf16.msrb.mxu1 %v3446_v28  ;;  %1249 = vmatpush.bf16.msrb.mxu2 %v3450_v29 }
 0x344   : > { %1159 = vmatpush.bf16.msrb.mxu0 %v3471_v19 }
 0x345   : > { %1237 = vmatpush.bf16.msrb.mxu1 %v3462_v17  ;;  %1250 = vmatpush.bf16.msrb.mxu2 %v3466_v16 }
 0x3a4   : > { %v927_v63 = vpop.f32.mrf.mxu0  ;;  %v940_v2 = vpop.f32.mrf.mxu1 }
 0x3a5   : > { %v957_v14 = vadd.f32 %v927_v63, %v914_v26  ;;  %v977_v6 = vadd.f32 %v940_v2, %v915_v38 }
 0x3a7   : > { %v2592_v12 = vmul.f32 -1.442695, %v957_v14  ;;  %v2593_v20 = vmul.f32 -1.442695, %v977_v6 }
 0x3a9   : > { %2875 = vpow2.f32 %v2592_v12 }
 0x3aa   : > { %2877 = vpow2.f32 %v2593_v20 }
 0x3ab   : > { %v953_v24 = vpop.f32.mrf.mxu2 }
 0x3ac   : > { %v929_v36 = vpop.f32.mrf.mxu0  ;;  %v942_v40 = vpop.f32.mrf.mxu1  ;;  %v997_v21 = vadd.f32 %v953_v24, %v3539_v56 }
 0x3af   : > { %v2876_v28 = vpop.eup %2875 }
 0x3b0   : > { %v2878_v29 = vpop.eup %2877  ;;  %v961_v17 = vadd.f32 1.0, %v2876_v28 }
 0x3b1   : > { %v981_v46 = vadd.f32 1.0, %v2878_v29 }
 0x3b2   : > { %2879 = vrcp.f32 %v961_v17  ;;  %v973_v48 = vand.u32 2147483648, %v961_v17  ;;  %v971_v13 = vand.u32 2147483647, %v961_v17  ;;  %vm967_vm14 = vweird.f32 %v961_v17 }
 0x3b3   : > { %2881 = vrcp.f32 %v981_v46  ;;  %v955_v16 = vpop.f32.mrf.mxu2  ;;  %v993_v4 = vand.u32 2147483648, %v981_v46  ;;  %vm987_vm2 = vweird.f32 %v981_v46  ;;  %v991_v7 = vand.u32 2147483647, %v981_v46 }
 0x3b4   : > { %v974_v52 = vor.u32 1.1754944e-38, %v973_v48  ;;  %vm972_vm0 = vcmp.eq.f32.partialorder %v971_v13, 8.507059e+37 }
 0x3b5   : > { %v994_v47 = vor.u32 1.1754944e-38, %v993_v4  ;;  %vm992_vm4 = vcmp.eq.f32.partialorder %v991_v7, 8.507059e+37 }
 0x3b8   : > { %v2880_v25 = vpop.eup %2879 }
 0x3b9   : > { %v2882_v37 = vpop.eup %2881  ;;  %v963_v44 = vmul.f32 %v2880_v25, %v961_v17  ;;  %vm968_vm13 = vweird.f32 %v2880_v25 }
 0x3ba   : > { %v983_v23 = vmul.f32 %v2882_v37, %v981_v46  ;;  %vm969_vm15 = vmor %vm967_vm14, %vm968_vm13  ;;  %vm988_vm1 = vweird.f32 %v2882_v37 }
 0x3bb   : > { %v964_v53 = vsub.f32 1.0, %v963_v44  ;;  %vm989_vm3 = vmor %vm987_vm2, %vm988_vm1 }
 0x3bc   : > { %v984_v35 = vsub.f32 1.0, %v983_v23 }
 0x3bd   : > { %v965_v49 = vmul.f32 %v2880_v25, %v964_v53 }
 0x3be   : > { %v985_v55 = vmul.f32 %v2882_v37, %v984_v35 }
 0x3bf   : > { %v966_v58 = vadd.f32 %v2880_v25, %v965_v49  ;;  %v2596_v49 = vld [vmem:[%s3082_s6 + $0x44] sm:$0xf] }
 0x3c0   : > { %v986_v9 = vadd.f32 %v2882_v37, %v985_v55 }
 0x3c1   : > { %v970_v60 = vsel %vm969_vm15, %v2880_v25, %v966_v58  ;;  %v1020_v58 = vunpack.c.l.bf16 %v2596_v49 }
 0x3c2   : > { %v975_v18 = vsel %vm972_vm0, %v974_v52, %v970_v60  ;;  %v990_v11 = vsel %vm989_vm3, %v2882_v37, %v986_v9 }
 0x3c3   : > { %v998_v42 = vmul.f32 %v997_v21, %v975_v18  ;;  %v995_v22 = vsel %vm992_vm4, %v994_v47, %v990_v11 }
 0x3c4   : > { %v1001_v54 = vsub.f32 1.0, %v995_v22  ;;  %v1003_v26 = vmul.f32 %v995_v22, %v3654_v43  ;;  %v1113_v22 = vpop.permute.xlu2 %1112 }
 0x3c5   : > { %v999_v10 = vadd.f32 %v998_v42, %v916_v59  ;;  %vm1114_vm14 = vcmp.eq.s32.totalorder %v1113_v22, 1 }
 0x3c7   : > { %2883 = vtanh.f32 %v999_v10 }
 0x3cd   : > { %v2884_v61 = vpop.eup %2883 }
 0x3ce   : > { %v1002_v3 = vmul.f32 %v2884_v61, %v1001_v54 }
 0x3d0   : > { %v1004_v38 = vadd.f32 %v1003_v26, %v1002_v3 }
 0x3d2   : > { %v1011_v63 = vsel %vm1010_vm5, %v1004_v38, 0.0  ;;  %v3688_v2 = vsel %vm1010_vm5, %v1004_v38, %v3654_v43  ;;  %v2595_v43 = vld [vmem:[%s3082_s6 + $0x3c] sm:$0xff] }
 0x3d3   : > { %2594 = vst [vmem:[%s3087_s9 + $0x20] sm:$0xff] %v1011_v63  ;;  %v1021_v14 = vpack.c.bf16 %v3688_v2, %v3688_v2  ;;  %v1019_v6 = vunpack.c.h.bf16 %v2595_v43  ;;  %v1018_v36 = vunpack.c.l.bf16 %v2595_v43  ;;  %v2600_v63 = vld [vmem:[%s3082_s6 + $0x48] sm:$0xff] }
 0x3d4   : > { %v1122_v43 = vunpack.c.l.bf16 %v2600_v63 }
 0x3d5   : > { %1030 = vmatmul.bf16.vlgmr.msrb.gmra.mxu3 %v1021_v14  ;;  %1043 = vmatmul.bf16.vlgmr.msra.gmra.mxu0 %v1021_v14 }
 0x3d6   : > { %1056 = vmatmul.bf16.vlgmr.msra.gmra.mxu1 %v1021_v14  ;;  %1256 = vmatpush.bf16.msrb.mxu3 %v3369_v50 }
 0x3da   : > { %1257 = vmatpush.bf16.msrb.mxu3 %v3373_v62 }
 0x3de   : > { %1258 = vmatpush.bf16.msrb.mxu3 %v3387_v30 }
 0x3e2   : > { %1259 = vmatpush.bf16.msrb.mxu3 %v3404_v8 }
 0x3e6   : > { %1260 = vmatpush.bf16.msrb.mxu3 %v3421_v32 }
 0x3ea   : > { %1261 = vmatpush.bf16.msrb.mxu3 %v3438_v41 }
 0x3ee   : > { %1262 = vmatpush.bf16.msrb.mxu3 %v3455_v31 }
 0x3f2   : > { %1263 = vmatpush.bf16.msrb.mxu3 %v3471_v19 }
 0x452   : > { %v1044_v12 = vpop.f32.mrf.mxu0 }
 0x453   : > { %v1081_v20 = vadd.f32 %v1044_v12, %v1019_v6  ;;  %v1057_v24 = vpop.f32.mrf.mxu1  ;;  %v1123_v6 = vunpack.c.h.bf16 %v2600_v63 }
 0x454   : > { %v1101_v55 = vadd.f32 %v1057_v24, %v3539_v56 }
 0x455   : > { %v2598_v50 = vmul.f32 -1.442695, %v1081_v20 }
 0x457   : > { %2885 = vpow2.f32 %v2598_v50 }
 0x458   : > { %v1031_v62 = vpop.f32.mrf.mxu3 }
 0x459   : > { %v1061_v30 = vadd.f32 %v1031_v62, %v1018_v36 }
 0x45a   : > { %v1046_v40 = vpop.f32.mrf.mxu0 }
 0x45b   : > { %v2597_v8 = vmul.f32 -1.442695, %v1061_v30  ;;  %v1059_v28 = vpop.f32.mrf.mxu1 }
 0x45d   : > { %v2886_v32 = vpop.eup %2885  ;;  %2887 = vpow2.f32 %v2597_v8 }
 0x45e   : > { %v1085_v41 = vadd.f32 1.0, %v2886_v32 }
 0x460   : > { %v1033_v29 = vpop.f32.mrf.mxu3  ;;  %2889 = vrcp.f32 %v1085_v41  ;;  %v1097_v21 = vand.u32 2147483648, %v1085_v41  ;;  %vm1091_vm11 = vweird.f32 %v1085_v41  ;;  %v1095_v9 = vand.u32 2147483647, %v1085_v41 }
 0x462   : > { %v1098_v7 = vor.u32 1.1754944e-38, %v1097_v21  ;;  %vm1096_vm13 = vcmp.eq.f32.partialorder %v1095_v9, 8.507059e+37 }
 0x463   : > { %v2888_v31 = vpop.eup %2887 }
 0x464   : > { %v1065_v19 = vadd.f32 1.0, %v2888_v31 }
 0x466   : > { %2891 = vrcp.f32 %v1065_v19  ;;  %v2890_v17 = vpop.eup %2889  ;;  %v1077_v23 = vand.u32 2147483648, %v1065_v19  ;;  %v1075_v35 = vand.u32 2147483647, %v1065_v19  ;;  %vm1071_vm7 = vweird.f32 %v1065_v19 }
 0x467   : > { %v1087_v46 = vmul.f32 %v2890_v17, %v1085_v41  ;;  %vm1092_vm10 = vweird.f32 %v2890_v17 }
 0x468   : > { %v1078_v34 = vor.u32 1.1754944e-38, %v1077_v23  ;;  %vm1076_vm9 = vcmp.eq.f32.partialorder %v1075_v35, 8.507059e+37  ;;  %vm1093_vm12 = vmor %vm1091_vm11, %vm1092_vm10  ;;  %v2601_v23 = vld [vmem:[%s3082_s6 + $0x50] sm:$0xf] }
 0x469   : > { %v1088_v37 = vsub.f32 1.0, %v1087_v46 }
 0x46b   : > { %v1089_v48 = vmul.f32 %v2890_v17, %v1088_v37 }
 0x46c   : > { %v2892_v16 = vpop.eup %2891 }
 0x46d   : > { %v1067_v25 = vmul.f32 %v2892_v16, %v1065_v19  ;;  %vm1072_vm6 = vweird.f32 %v2892_v16  ;;  %v1090_v59 = vadd.f32 %v2890_v17, %v1089_v48 }
 0x46e   : > { %vm1073_vm8 = vmor %vm1071_vm7, %vm1072_vm6 }
 0x46f   : > { %v1068_v44 = vsub.f32 1.0, %v1067_v25  ;;  %v1094_v4 = vsel %vm1093_vm12, %v2890_v17, %v1090_v59 }
 0x470   : > { %v1099_v10 = vsel %vm1096_vm13, %v1098_v7, %v1094_v4 }
 0x471   : > { %v1069_v53 = vmul.f32 %v2892_v16, %v1068_v44  ;;  %v1105_v11 = vsub.f32 1.0, %v1099_v10  ;;  %v1107_v61 = vmul.f32 %v1099_v10, %v3688_v2  ;;  %v1217_v10 = vpop.permute.xlu0 %1216 }
 0x472   : > { %vm1218_vm7 = vcmp.eq.s32.totalorder %v1217_v10, 1 }
 0x473   : > { %v1070_v13 = vadd.f32 %v2892_v16, %v1069_v53 }
 0x475   : > { %v1074_v52 = vsel %vm1073_vm8, %v2892_v16, %v1070_v13  ;;  %v1124_v13 = vunpack.c.l.bf16 %v2601_v23 }
 0x476   : > { %v1079_v60 = vsel %vm1076_vm9, %v1078_v34, %v1074_v52 }
 0x477   : > { %v1102_v18 = vmul.f32 %v1101_v55, %v1079_v60 }
 0x479   : > { %v1103_v42 = vadd.f32 %v1102_v18, %v1020_v58 }
 0x47b   : > { %2893 = vtanh.f32 %v1103_v42 }
 0x481   : > { %v2894_v47 = vpop.eup %2893 }
 0x482   : > { %v1106_v54 = vmul.f32 %v2894_v47, %v1105_v11 }
 0x484   : > { %v1108_v5 = vadd.f32 %v1107_v61, %v1106_v54 }
 0x486   : > { %v1115_v3 = vsel %vm1114_vm14, %v1108_v5, 0.0  ;;  %v3706_v26 = vsel %vm1114_vm14, %v1108_v5, %v3688_v2 }
 0x487   : > { %2599 = vst [vmem:[%s3087_s9 + $0x28] sm:$0xff] %v1115_v3  ;;  %v1125_v38 = vpack.c.bf16 %v3706_v26, %v3706_v26  ;;  %v2605_v3 = vld [vmem:[%s3082_s6 + $0x54] sm:$0xff] }
 0x489   : > { %1134 = vmatmul.bf16.vlgmr.msra.gmra.mxu2 %v1125_v38  ;;  %1147 = vmatmul.bf16.vlgmr.msra.gmra.mxu3 %v1125_v38 }
 0x48a   : > { %1160 = vmatmul.bf16.vlgmr.msrb.gmra.mxu0 %v1125_v38  ;;  %v1226_v38 = vunpack.c.l.bf16 %v2605_v3 }
 0x507   : > { %v1161_v14 = vpop.f32.mrf.mxu0 }
 0x508   : > { %v1205_v49 = vadd.f32 %v1161_v14, %v3539_v56 }
 0x50c   : > { %v1135_v12 = vpop.f32.mrf.mxu2  ;;  %v1148_v20 = vpop.f32.mrf.mxu3 }
 0x50d   : > { %v1165_v24 = vadd.f32 %v1135_v12, %v1122_v43  ;;  %v1185_v50 = vadd.f32 %v1148_v20, %v1123_v6  ;;  %v1227_v6 = vunpack.c.h.bf16 %v2605_v3 }
 0x50f   : > { %v2602_v36 = vmul.f32 -1.442695, %v1165_v24  ;;  %v2603_v62 = vmul.f32 -1.442695, %v1185_v50  ;;  %v1163_v30 = vpop.f32.mrf.mxu0 }
 0x511   : > { %2895 = vpow2.f32 %v2602_v36 }
 0x512   : > { %2897 = vpow2.f32 %v2603_v62 }
 0x514   : > { %v1137_v2 = vpop.f32.mrf.mxu2  ;;  %v1150_v40 = vpop.f32.mrf.mxu3 }
 0x517   : > { %v2896_v8 = vpop.eup %2895 }
 0x518   : > { %v2898_v28 = vpop.eup %2897  ;;  %v1169_v32 = vadd.f32 1.0, %v2896_v8 }
 0x519   : > { %v1189_v41 = vadd.f32 1.0, %v2898_v28 }
 0x51a   : > { %2899 = vrcp.f32 %v1169_v32  ;;  %v1181_v16 = vand.u32 2147483648, %v1169_v32  ;;  %v1179_v44 = vand.u32 2147483647, %v1169_v32  ;;  %vm1175_vm0 = vweird.f32 %v1169_v32 }
 0x51b   : > { %2901 = vrcp.f32 %v1189_v41  ;;  %v1201_v59 = vand.u32 2147483648, %v1189_v41  ;;  %vm1195_vm4 = vweird.f32 %v1189_v41  ;;  %v1199_v60 = vand.u32 2147483647, %v1189_v41 }
 0x51c   : > { %v1182_v48 = vor.u32 1.1754944e-38, %v1181_v16  ;;  %vm1180_vm2 = vcmp.eq.f32.partialorder %v1179_v44, 8.507059e+37 }
 0x51d   : > { %v1202_v9 = vor.u32 1.1754944e-38, %v1201_v59  ;;  %vm1200_vm6 = vcmp.eq.f32.partialorder %v1199_v60, 8.507059e+37 }
 0x520   : > { %v2900_v29 = vpop.eup %2899 }
 0x521   : > { %v2902_v31 = vpop.eup %2901  ;;  %v1171_v19 = vmul.f32 %v2900_v29, %v1169_v32  ;;  %vm1176_vm15 = vweird.f32 %v2900_v29 }
 0x522   : > { %v1191_v17 = vmul.f32 %v2902_v31, %v1189_v41  ;;  %vm1177_vm1 = vmor %vm1175_vm0, %vm1176_vm15  ;;  %vm1196_vm3 = vweird.f32 %v2902_v31 }
 0x523   : > { %v1172_v46 = vsub.f32 1.0, %v1171_v19  ;;  %vm1197_vm5 = vmor %vm1195_vm4, %vm1196_vm3 }
 0x524   : > { %v1192_v25 = vsub.f32 1.0, %v1191_v17 }
 0x525   : > { %v1173_v37 = vmul.f32 %v2900_v29, %v1172_v46 }
 0x526   : > { %v1193_v53 = vmul.f32 %v2902_v31, %v1192_v25 }
 0x527   : > { %v1174_v35 = vadd.f32 %v2900_v29, %v1173_v37 }
 0x528   : > { %v1194_v58 = vadd.f32 %v2902_v31, %v1193_v53 }
 0x529   : > { %v1178_v34 = vsel %vm1177_vm1, %v2900_v29, %v1174_v35 }
 0x52a   : > { %v1183_v55 = vsel %vm1180_vm2, %v1182_v48, %v1178_v34  ;;  %v1198_v18 = vsel %vm1197_vm5, %v2902_v31, %v1194_v58  ;;  %v2606_v31 = vld [vmem:[%s3082_s6 + $0x5c] sm:$0xf] }
 0x52b   : > { %v1206_v52 = vmul.f32 %v1205_v49, %v1183_v55  ;;  %v1203_v42 = vsel %vm1200_vm6, %v1202_v9, %v1198_v18  ;;  %v1228_v37 = vunpack.c.l.bf16 %v2606_v31 }
 0x52c   : > { %v1209_v4 = vsub.f32 1.0, %v1203_v42  ;;  %v1211_v47 = vmul.f32 %v1203_v42, %v3706_v26 }
 0x52d   : > { %v1207_v21 = vadd.f32 %v1206_v52, %v1124_v13 }
 0x52f   : > { %2903 = vtanh.f32 %v1207_v21 }
 0x535   : > { %v2904_v7 = vpop.eup %2903 }
 0x536   : > { %v1210_v11 = vmul.f32 %v2904_v7, %v1209_v4 }
 0x538   : > { %v1212_v22 = vadd.f32 %v1211_v47, %v1210_v11 }
 0x53a   : > { %v1219_v54 = vsel %vm1218_vm7, %v1212_v22, 0.0  ;;  %v3716_v61 = vsel %vm1218_vm7, %v1212_v22, %v3706_v26 }
 0x53b   : > { %2604 = vst [vmem:[%s3087_s9 + $0x30] sm:$0xff] %v1219_v54  ;;  %v1229_v5 = vpack.c.bf16 %v3716_v61, %v3716_v61 }
 0x53d   : > { %1238 = vmatmul.bf16.vlgmr.msrb.gmra.mxu1 %v1229_v5  ;;  %1251 = vmatmul.bf16.vlgmr.msrb.gmra.mxu2 %v1229_v5 }
 0x53e   : > { %1264 = vmatmul.bf16.vlgmr.msrb.gmra.mxu3 %v1229_v5 }
 0x5ba   : > { %v1239_v63 = vpop.f32.mrf.mxu1 }
 0x5bb   : > { %v1269_v14 = vadd.f32 %v1239_v63, %v1226_v38 }
 0x5bd   : > { %v2607_v43 = vmul.f32 -1.442695, %v1269_v14 }
 0x5bf   : > { %2905 = vpow2.f32 %v2607_v43 }
 0x5c0   : > { %v1252_v12 = vpop.f32.mrf.mxu2 }
 0x5c1   : > { %v1289_v20 = vadd.f32 %v1252_v12, %v1227_v6  ;;  %v1265_v24 = vpop.f32.mrf.mxu3 }
 0x5c2   : > { %v1241_v26 = vpop.f32.mrf.mxu1  ;;  %v1309_v35 = vadd.f32 %v1265_v24, %v3539_v56  ;;  %v1321_v56 = vpop.permute.xlu1 %1320 }
 0x5c3   : > { %v2608_v50 = vmul.f32 -1.442695, %v1289_v20  ;;  %vm1322_vm0 = vcmp.eq.s32.totalorder %v1321_v56, 1 }
 0x5c5   : > { %v2906_v36 = vpop.eup %2905  ;;  %2907 = vpow2.f32 %v2608_v50 }
 0x5c6   : > { %v1273_v62 = vadd.f32 1.0, %v2906_v36 }
 0x5c8   : > { %2909 = vrcp.f32 %v1273_v62  ;;  %v1254_v30 = vpop.f32.mrf.mxu2  ;;  %v1285_v29 = vand.u32 2147483648, %v1273_v62  ;;  %v1283_v17 = vand.u32 2147483647, %v1273_v62  ;;  %vm1279_vm9 = vweird.f32 %v1273_v62 }
 0x5c9   : > { %v1267_v2 = vpop.f32.mrf.mxu3 }
 0x5ca   : > { %v1286_v44 = vor.u32 1.1754944e-38, %v1285_v29  ;;  %vm1284_vm11 = vcmp.eq.f32.partialorder %v1283_v17, 8.507059e+37 }
 0x5cb   : > { %v2908_v40 = vpop.eup %2907 }
 0x5cc   : > { %v1293_v8 = vadd.f32 1.0, %v2908_v40 }
 0x5ce   : > { %v2910_v28 = vpop.eup %2909  ;;  %2911 = vrcp.f32 %v1293_v8  ;;  %v1305_v13 = vand.u32 2147483648, %v1293_v8  ;;  %v1303_v55 = vand.u32 2147483647, %v1293_v8  ;;  %vm1299_vm13 = vweird.f32 %v1293_v8 }
 0x5cf   : > { %v1275_v32 = vmul.f32 %v2910_v28, %v1273_v62  ;;  %vm1280_vm8 = vweird.f32 %v2910_v28 }
 0x5d0   : > { %vm1281_vm10 = vmor %vm1279_vm9, %vm1280_vm8  ;;  %v1306_v59 = vor.u32 1.1754944e-38, %v1305_v13  ;;  %vm1304_vm15 = vcmp.eq.f32.partialorder %v1303_v55, 8.507059e+37 }
 0x5d1   : > { %v1276_v41 = vsub.f32 1.0, %v1275_v32 }
 0x5d3   : > { %v1277_v19 = vmul.f32 %v2910_v28, %v1276_v41 }
 0x5d4   : > { %v2912_v46 = vpop.eup %2911 }
 0x5d5   : > { %v1295_v16 = vmul.f32 %v2912_v46, %v1293_v8  ;;  %v1278_v25 = vadd.f32 %v2910_v28, %v1277_v19  ;;  %vm1300_vm12 = vweird.f32 %v2912_v46 }
 0x5d6   : > { %vm1301_vm14 = vmor %vm1299_vm13, %vm1300_vm12 }
 0x5d7   : > { %v1296_v23 = vsub.f32 1.0, %v1295_v16  ;;  %v1282_v53 = vsel %vm1281_vm10, %v2910_v28, %v1278_v25 }
 0x5d8   : > { %v1287_v48 = vsel %vm1284_vm11, %v1286_v44, %v1282_v53 }
 0x5d9   : > { %v1297_v49 = vmul.f32 %v2912_v46, %v1296_v23  ;;  %v1310_v34 = vmul.f32 %v1309_v35, %v1287_v48 }
 0x5db   : > { %v1298_v58 = vadd.f32 %v2912_v46, %v1297_v49  ;;  %v1311_v52 = vadd.f32 %v1310_v34, %v1228_v37 }
 0x5dd   : > { %v1302_v60 = vsel %vm1301_vm14, %v2912_v46, %v1298_v58  ;;  %2913 = vtanh.f32 %v1311_v52 }
 0x5de   : > { %v1307_v21 = vsel %vm1304_vm15, %v1306_v59, %v1302_v60 }
 0x5df   : > { %v1313_v18 = vsub.f32 1.0, %v1307_v21  ;;  %v1315_v4 = vmul.f32 %v1307_v21, %v3716_v61 }
 0x5e3   : > { %v2914_v9 = vpop.eup %2913 }
 0x5e4   : > { %v1314_v42 = vmul.f32 %v2914_v9, %v1313_v18 }
 0x5e6   : > { %v1316_v7 = vadd.f32 %v1315_v4, %v1314_v42 }
 0x5e8   : > { %v1323_v10 = vsel %vm1322_vm0, %v1316_v7, 0.0  ;;  %v1326_v11 = vsel %vm1322_vm0, %v1316_v7, %v3716_v61 }
 0x5e9   : > { %2609 = vst [vmem:[%s3087_s9 + $0x38] sm:$0xff] %v1323_v10 }
 0x5ea   : > { %1327 = vst [vmem:[%s3104_s23] sm:$0xff] %v1326_v11 }
 0x5eb PF: > { %p2610_p6 = scmp.ne.s32.totalorder %s3012_s18, 1 }
 0x5ed   : > { %1331 = sbr.rel (%p2610_p6) target bundleno = 2970 (0xb9a), region = 44 }
 0x5f2   : > { %v3731_v47 = vor.u32 %v3350_v51, %v3338_v39  ;;  %v3735_v22 = vor.u32 %v3335_v45, %v3347_v57  ;;  %v3741_v54 = vor.u32 %v3326_v27, %v3314_v15  ;;  %v4172_v61 = vld [vmem:[#allocation38_spill] sm:$0xff]  ;;  %v4173_v3 = vld [vmem:[#allocation41_spill] sm:$0xff]  ;;  %v3023_v51 = vmov 0   ;;  %v4175_v45 = vld [vmem:[#allocation39_spill] sm:$0xff] }
 0x5f3   : > { %v3745_v5 = vor.u32 %v4172_v61, %v3323_v33  ;;  %v4174_v38 = vld [vmem:[#allocation42_spill] sm:$0xff]  ;;  %2915 = vset.pattern.permute.xlu0 %v3023_v51  ;;  %v4176_v57 = vld [vmem:[#allocation40_spill] sm:$0xff]  ;;  %v4177_v15 = vld [vmem:[#allocation33_spill] sm:$0xff]  ;;  %vm1556_vm1 = vcmp.gt.s32.totalorder %v3099_v1, 7  ;;  %2916 = vset.pattern.permute.xlu1 %v3023_v51  ;;  %vm1659_vm2 = vcmp.gt.s32.totalorder %v3099_v1, 6  ;;  %vm2179_vm3 = vcmp.gt.s32.totalorder %v3099_v1, 1 }
 0x5f4   : > { %1466 = vmatpush.bf16.msra.mxu0 %v3731_v47  ;;  %1479 = vmatpush.bf16.msra.mxu1 %v3735_v22  ;;  %v3749_v39 = vor.u32 %v4174_v38, %v4173_v3  ;;  %v3755_v63 = vor.u32 %v4176_v57, %v4175_v45  ;;  %v4178_v27 = vld [vmem:[#allocation36_spill] sm:$0xff]  ;;  %v4179_v14 = vld [vmem:[#allocation35_spill] sm:$0xff]  ;;  %v1557_v12 = vsel %vm1556_vm1, 1, %v3023_v51  ;;  %v4181_v20 = vld [vmem:[#allocation34_spill] sm:$0xff]  ;;  %v1660_v41 = vsel %vm1659_vm2, 1, %v3023_v51 }
 0x5f5   : > { %1572 = vmatpush.bf16.msra.mxu3 %v3731_v47  ;;  %v3762_v33 = vor.u32 %v4178_v27, %v4177_v15  ;;  %v4180_v43 = vld [vmem:[#allocation32_spill] sm:$0xff]  ;;  %2917 = vset.pattern.permute.xlu2 %v3023_v51  ;;  %v4182_v24 = vld [vmem:[#allocation37_spill] sm:$0xff]  ;;  %v4183_v50 = vld [vmem:[#allocation27_spill] sm:$0xff]  ;;  %v2180_v52 = vsel %vm2179_vm3, 1, %v3023_v51  ;;  %vm1763_vm14 = vcmp.gt.s32.totalorder %v3099_v1, 5  ;;  %vm1867_vm15 = vcmp.gt.s32.totalorder %v3099_v1, 4 }
 0x5f6   : > { %1492 = vmatpush.bf16.msra.mxu2 %v3749_v39  ;;  %v3766_v6 = vor.u32 %v4180_v43, %v4179_v14  ;;  %v3775_v26 = vor.u32 %v4182_v24, %v4181_v20  ;;  %1559 = vperm.xlu0 %2915, %v1557_v12   ;;  %v4184_v36 = vld [vmem:[#allocation30_spill] sm:$0xff]  ;;  %v4185_v30 = vld [vmem:[#allocation29_spill] sm:$0xff]  ;;  %v4187_v8 = vld [vmem:[#allocation28_spill] sm:$0xff] }
 0x5f7   : > { %v3782_v62 = vor.u32 %v4184_v36, %v4183_v50  ;;  %v4186_v2 = vld [vmem:[#allocation26_spill] sm:$0xff]  ;;  %v4188_v28 = vld [vmem:[#allocation31_spill] sm:$0xff]  ;;  %v4189_v29 = vld [vmem:[#allocation21_spill] sm:$0xff] }
 0x5f8   : > { %1467 = vmatpush.bf16.msra.mxu0 %v3741_v54  ;;  %1480 = vmatpush.bf16.msra.mxu1 %v3745_v5  ;;  %v3786_v40 = vor.u32 %v4186_v2, %v4185_v30  ;;  %v3792_v32 = vor.u32 %v4188_v28, %v4187_v8  ;;  %v4190_v31 = vld [vmem:[#allocation24_spill] sm:$0xff]  ;;  %v4191_v17 = vld [vmem:[#allocation23_spill] sm:$0xff]  ;;  %v4193_v25 = vld [vmem:[#allocation22_spill] sm:$0xff] }
 0x5f9   : > { %1573 = vmatpush.bf16.msra.mxu3 %v3741_v54  ;;  %v3800_v19 = vor.u32 %v4190_v31, %v4189_v29  ;;  %v4192_v46 = vld [vmem:[#allocation20_spill] sm:$0xff]  ;;  %v4194_v37 = vld [vmem:[#allocation25_spill] sm:$0xff]  ;;  %v4195_v23 = vld [vmem:[#allocation15_spill] sm:$0xff] }
 0x5fa   : > { %1493 = vmatpush.bf16.msra.mxu2 %v3755_v63  ;;  %v3804_v16 = vor.u32 %v4192_v46, %v4191_v17  ;;  %v3809_v44 = vor.u32 %v4194_v37, %v4193_v25  ;;  %v4196_v53 = vld [vmem:[#allocation18_spill] sm:$0xff]  ;;  %v4197_v48 = vld [vmem:[#allocation17_spill] sm:$0xff]  ;;  %v4199_v34 = vld [vmem:[#allocation16_spill] sm:$0xff] }
 0x5fb   : > { %v3816_v35 = vor.u32 %v4196_v53, %v4195_v23  ;;  %v4198_v49 = vld [vmem:[#allocation14_spill] sm:$0xff]  ;;  %v4200_v55 = vld [vmem:[#allocation19_spill] sm:$0xff]  ;;  %v4201_v59 = vld [vmem:[#allocation9_spill] sm:$0xff] }
 0x5fc   : > { %1468 = vmatpush.bf16.msra.mxu0 %v3762_v33  ;;  %1481 = vmatpush.bf16.msra.mxu1 %v3766_v6  ;;  %v3820_v13 = vor.u32 %v4198_v49, %v4197_v48  ;;  %v3826_v58 = vor.u32 %v4200_v55, %v4199_v34  ;;  %v4202_v60 = vld [vmem:[#allocation12_spill] sm:$0xff]  ;;  %v4203_v18 = vld [vmem:[#allocation11_spill] sm:$0xff]  ;;  %v4205_v42 = vld [vmem:[#allocation10_spill] sm:$0xff]  ;;  %v3927_v34 = vperm.slane %v3094_v0, 0 }
 0x5fd   : > { %1574 = vmatpush.bf16.msra.mxu3 %v3762_v33  ;;  %v3834_v21 = vor.u32 %v4202_v60, %v4201_v59  ;;  %v4204_v9 = vld [vmem:[#allocation8_spill] sm:$0xff]  ;;  %v4206_v4 = vld [vmem:[#allocation13_spill] sm:$0xff]  ;;  %v4207_v10 = vld [vmem:[#allocation3_spill] sm:$0xff] }
 0x5fe   : > { %1494 = vmatpush.bf16.msra.mxu2 %v3775_v26  ;;  %1662 = vperm.xlu0 %2915, %v1660_v41   ;;  %v3838_v56 = vor.u32 %v4204_v9, %v4203_v18  ;;  %v3843_v7 = vor.u32 %v4206_v4, %v4205_v42  ;;  %v4208_v11 = vld [vmem:[#allocation6_spill] sm:$0xff]  ;;  %v4209_v3 = vld [vmem:[#allocation5_spill] sm:$0xff]  ;;  %v4211_v57 = vld [vmem:[#allocation4_spill] sm:$0xff] }
 0x5ff   : > { %v3850_v61 = vor.u32 %v4208_v11, %v4207_v10  ;;  %v4210_v38 = vld [vmem:[#allocation2_spill] sm:$0xff]  ;;  %v4212_v15 = vld [vmem:[#allocation7_spill] sm:$0xff]  ;;  %v2611_v14 = vld [vmem:[%s3082_s6 + $0x54] sm:$0xff] }
 0x600   : > { %1469 = vmatpush.bf16.msra.mxu0 %v3782_v62  ;;  %1482 = vmatpush.bf16.msra.mxu1 %v3786_v40  ;;  %v3854_v45 = vor.u32 %v4210_v38, %v4209_v3  ;;  %v3859_v27 = vor.u32 %v4212_v15, %v4211_v57  ;;  %v1335_v43 = vunpack.c.l.bf16 %v2611_v14  ;;  %v1336_v12 = vunpack.c.h.bf16 %v2611_v14  ;;  %v2612_v18 = vld [vmem:[%s3082_s6 + $0x5c] sm:$0xf] }
 0x601   : > { %1575 = vmatpush.bf16.msra.mxu3 %v3782_v62  ;;  %v1337_v11 = vunpack.c.l.bf16 %v2612_v18 }
 0x602   : > { %1495 = vmatpush.bf16.msra.mxu2 %v3792_v32 }
 0x604   : > { %1470 = vmatpush.bf16.msra.mxu0 %v3800_v19  ;;  %1483 = vmatpush.bf16.msra.mxu1 %v3804_v16 }
 0x605   : > { %1576 = vmatpush.bf16.msra.mxu3 %v3800_v19 }
 0x606   : > { %1496 = vmatpush.bf16.msra.mxu2 %v3809_v44  ;;  %2182 = vperm.xlu0 %2915, %v2180_v52  }
 0x608   : > { %1471 = vmatpush.bf16.msra.mxu0 %v3816_v35  ;;  %1484 = vmatpush.bf16.msra.mxu1 %v3820_v13 }
 0x609   : > { %1577 = vmatpush.bf16.msra.mxu3 %v3816_v35 }
 0x60a   : > { %1497 = vmatpush.bf16.msra.mxu2 %v3826_v58 }
 0x60c   : > { %1472 = vmatpush.bf16.msra.mxu0 %v3834_v21  ;;  %1485 = vmatpush.bf16.msra.mxu1 %v3838_v56 }
 0x60d   : > { %1578 = vmatpush.bf16.msra.mxu3 %v3834_v21 }
 0x60e   : > { %1498 = vmatpush.bf16.msra.mxu2 %v3843_v7 }
 0x610   : > { %1473 = vmatpush.bf16.msra.mxu0 %v3850_v61  ;;  %1486 = vmatpush.bf16.msra.mxu1 %v3854_v45 }
 0x611   : > { %1579 = vmatpush.bf16.msra.mxu3 %v3850_v61 }
 0x612   : > { %1499 = vmatpush.bf16.msra.mxu2 %v3859_v27 }
 0x613   : > { %1474 = vmatmul.bf16.vlgmr.msra.gmra.mxu0 %v3023_v51  ;;  %1487 = vmatmul.bf16.vlgmr.msra.gmra.mxu1 %v3023_v51 }
 0x614   : > { %1585 = vmatpush.bf16.msrb.mxu0 %v3735_v22  ;;  %1598 = vmatpush.bf16.msrb.mxu1 %v3749_v39 }
 0x615   : > { %1500 = vmatmul.bf16.vlgmr.msra.gmra.mxu2 %v3023_v51  ;;  %1689 = vmatpush.bf16.msrb.mxu3 %v3735_v22 }
 0x616   : > { %1676 = vmatpush.bf16.msrb.mxu2 %v3731_v47 }
 0x618   : > { %1586 = vmatpush.bf16.msrb.mxu0 %v3745_v5  ;;  %1599 = vmatpush.bf16.msrb.mxu1 %v3755_v63 }
 0x619   : > { %1690 = vmatpush.bf16.msrb.mxu3 %v3745_v5 }
 0x61a   : > { %1677 = vmatpush.bf16.msrb.mxu2 %v3741_v54 }
 0x61c   : > { %1587 = vmatpush.bf16.msrb.mxu0 %v3766_v6  ;;  %1600 = vmatpush.bf16.msrb.mxu1 %v3775_v26 }
 0x61d   : > { %1691 = vmatpush.bf16.msrb.mxu3 %v3766_v6 }
 0x61e   : > { %1678 = vmatpush.bf16.msrb.mxu2 %v3762_v33 }
 0x620   : > { %1588 = vmatpush.bf16.msrb.mxu0 %v3786_v40  ;;  %1601 = vmatpush.bf16.msrb.mxu1 %v3792_v32 }
 0x621   : > { %1692 = vmatpush.bf16.msrb.mxu3 %v3786_v40 }
 0x622   : > { %1679 = vmatpush.bf16.msrb.mxu2 %v3782_v62 }
 0x624   : > { %1589 = vmatpush.bf16.msrb.mxu0 %v3804_v16  ;;  %1602 = vmatpush.bf16.msrb.mxu1 %v3809_v44 }
 0x625   : > { %1693 = vmatpush.bf16.msrb.mxu3 %v3804_v16 }
 0x626   : > { %1680 = vmatpush.bf16.msrb.mxu2 %v3800_v19 }
 0x628   : > { %1590 = vmatpush.bf16.msrb.mxu0 %v3820_v13  ;;  %1603 = vmatpush.bf16.msrb.mxu1 %v3826_v58 }
 0x629   : > { %1694 = vmatpush.bf16.msrb.mxu3 %v3820_v13 }
 0x62a   : > { %1681 = vmatpush.bf16.msrb.mxu2 %v3816_v35 }
 0x62c   : > { %1591 = vmatpush.bf16.msrb.mxu0 %v3838_v56  ;;  %1604 = vmatpush.bf16.msrb.mxu1 %v3843_v7 }
 0x62d   : > { %1695 = vmatpush.bf16.msrb.mxu3 %v3838_v56 }
 0x62e   : > { %1682 = vmatpush.bf16.msrb.mxu2 %v3834_v21 }
 0x630   : > { %1592 = vmatpush.bf16.msrb.mxu0 %v3854_v45  ;;  %1605 = vmatpush.bf16.msrb.mxu1 %v3859_v27 }
 0x631   : > { %1696 = vmatpush.bf16.msrb.mxu3 %v3854_v45 }
 0x632   : > { %1683 = vmatpush.bf16.msrb.mxu2 %v3850_v61 }
 0x634   : > { %1702 = vmatpush.bf16.msra.mxu0 %v3749_v39  ;;  %1780 = vmatpush.bf16.msra.mxu1 %v3731_v47 }
 0x636   : > { %1793 = vmatpush.bf16.msra.mxu2 %v3735_v22 }
 0x638   : > { %1703 = vmatpush.bf16.msra.mxu0 %v3755_v63  ;;  %1781 = vmatpush.bf16.msra.mxu1 %v3741_v54 }
 0x63a   : > { %1794 = vmatpush.bf16.msra.mxu2 %v3745_v5 }
 0x63c   : > { %1704 = vmatpush.bf16.msra.mxu0 %v3775_v26  ;;  %1782 = vmatpush.bf16.msra.mxu1 %v3762_v33 }
 0x63e   : > { %1795 = vmatpush.bf16.msra.mxu2 %v3766_v6 }
 0x640   : > { %1705 = vmatpush.bf16.msra.mxu0 %v3792_v32  ;;  %1783 = vmatpush.bf16.msra.mxu1 %v3782_v62 }
 0x642   : > { %1796 = vmatpush.bf16.msra.mxu2 %v3786_v40 }
 0x644   : > { %1706 = vmatpush.bf16.msra.mxu0 %v3809_v44  ;;  %1784 = vmatpush.bf16.msra.mxu1 %v3800_v19 }
 0x646   : > { %1797 = vmatpush.bf16.msra.mxu2 %v3804_v16 }
 0x648   : > { %1707 = vmatpush.bf16.msra.mxu0 %v3826_v58  ;;  %1785 = vmatpush.bf16.msra.mxu1 %v3816_v35 }
 0x64a   : > { %1798 = vmatpush.bf16.msra.mxu2 %v3820_v13 }
 0x64c   : > { %1708 = vmatpush.bf16.msra.mxu0 %v3843_v7  ;;  %1786 = vmatpush.bf16.msra.mxu1 %v3834_v21 }
 0x64e   : > { %1799 = vmatpush.bf16.msra.mxu2 %v3838_v56 }
 0x650   : > { %1709 = vmatpush.bf16.msra.mxu0 %v3859_v27  ;;  %1787 = vmatpush.bf16.msra.mxu1 %v3850_v61 }
 0x652   : > { %1800 = vmatpush.bf16.msra.mxu2 %v3854_v45 }
 0x690   : > { %v1475_v20 = vpop.f32.mrf.mxu0  ;;  %v1488_v24 = vpop.f32.mrf.mxu1 }
 0x691   : > { %v1505_v50 = vadd.f32 %v1475_v20, %v1335_v43  ;;  %v1525_v36 = vadd.f32 %v1488_v24, %v1336_v12 }
 0x693   : > { %v2709_v30 = vmul.f32 -1.442695, %v1505_v50  ;;  %v2710_v2 = vmul.f32 -1.442695, %v1525_v36 }
 0x695   : > { %2918 = vpow2.f32 %v2709_v30  ;;  %v1560_v30 = vpop.permute.xlu0 %1559 }
 0x696   : > { %2920 = vpow2.f32 %v2710_v2  ;;  %vm1561_vm12 = vcmp.eq.s32.totalorder %v1560_v30, 1 }
 0x697   : > { %vm2714_vm13 = vmpackc.low %vm1561_vm12, %vm1561_vm12 }
 0x698   : > { %v1477_v8 = vpop.f32.mrf.mxu0  ;;  %v1490_v28 = vpop.f32.mrf.mxu1 }
 0x699   : > { %v1501_v41 = vpop.f32.mrf.mxu2 }
 0x69a   : > { %v1548_v4 = vadd.f32 %v3927_v34, %v1501_v41 }
 0x69b   : > { %v2919_v29 = vpop.eup %2918 }
 0x69c   : > { %v2921_v31 = vpop.eup %2920  ;;  %v1509_v17 = vadd.f32 1.0, %v2919_v29 }
 0x69d   : > { %v1529_v46 = vadd.f32 1.0, %v2921_v31  ;;  %v2712_v31 = vld [vmem:[%s3082_s6 + $0x48] sm:$0xff] }
 0x69e   : > { %2922 = vrcp.f32 %v1509_v17  ;;  %v1521_v52 = vand.u32 2147483648, %v1509_v17  ;;  %v1519_v60 = vand.u32 2147483647, %v1509_v17  ;;  %vm1515_vm5 = vweird.f32 %v1509_v17 }
 0x69f   : > { %2924 = vrcp.f32 %v1529_v46  ;;  %vm1535_vm8 = vweird.f32 %v1529_v46  ;;  %v1541_v15 = vand.u32 2147483648, %v1529_v46  ;;  %v1539_v14 = vand.u32 2147483647, %v1529_v46 }
 0x6a0   : > { %v1522_v10 = vor.u32 1.1754944e-38, %v1521_v52  ;;  %vm1520_vm7 = vcmp.eq.f32.partialorder %v1519_v60, 8.507059e+37 }
 0x6a1   : > { %v1503_v25 = vpop.f32.mrf.mxu2  ;;  %v1542_v20 = vor.u32 1.1754944e-38, %v1541_v15  ;;  %vm1540_vm11 = vcmp.eq.f32.partialorder %v1539_v14, 8.507059e+37 }
 0x6a4   : > { %v2923_v37 = vpop.eup %2922 }
 0x6a5   : > { %v2925_v23 = vpop.eup %2924  ;;  %v1511_v53 = vmul.f32 %v2923_v37, %v1509_v17  ;;  %vm1516_vm4 = vweird.f32 %v2923_v37  ;;  %v1569_v17 = vunpack.c.h.bf16 %v2712_v31 }
 0x6a6   : > { %v1531_v48 = vmul.f32 %v2925_v23, %v1529_v46  ;;  %vm1517_vm6 = vmor %vm1515_vm5, %vm1516_vm4  ;;  %vm1536_vm9 = vweird.f32 %v2925_v23  ;;  %vm2282_vm5 = vcmp.gt.s32.totalorder %v3099_v1, 0 }
 0x6a7   : > { %v1512_v49 = vsub.f32 1.0, %v1511_v53  ;;  %vm1537_vm10 = vmor %vm1535_vm8, %vm1536_vm9  ;;  %v1568_v53 = vunpack.c.l.bf16 %v2712_v31 }
 0x6a8   : > { %v1532_v55 = vsub.f32 1.0, %v1531_v48 }
 0x6a9   : > { %v1513_v59 = vmul.f32 %v2923_v37, %v1512_v49 }
 0x6aa   : > { %v1533_v9 = vmul.f32 %v2925_v23, %v1532_v55 }
 0x6ab   : > { %v1514_v42 = vadd.f32 %v2923_v37, %v1513_v59 }
 0x6ac   : > { %v1534_v57 = vadd.f32 %v2925_v23, %v1533_v9 }
 0x6ad   : > { %v1518_v3 = vsel %vm1517_vm6, %v2923_v37, %v1514_v42 }
 0x6ae   : > { %v1523_v38 = vsel %vm1520_vm7, %v1522_v10, %v1518_v3  ;;  %v1538_v12 = vsel %vm1537_vm10, %v2925_v23, %v1534_v57  ;;  %v1764_v3 = vsel %vm1763_vm14, 1, %v3023_v51 }
 0x6af   : > { %v1549_v0 = vmul.f32 %v1548_v4, %v1523_v38  ;;  %v1543_v24 = vsel %vm1540_vm11, %v1542_v20, %v1538_v12  ;;  %1766 = vperm.xlu1 %2916, %v1764_v3   ;;  %v1868_v20 = vsel %vm1867_vm15, 1, %v3023_v51 }
 0x6b0   : > { %v1552_v50 = vsub.f32 1.0, %v1543_v24  ;;  %v1554_v8 = vmul.f32 0.0, %v1543_v24 }
 0x6b1   : > { %v1550_v43 = vadd.f32 %v1549_v0, %v1337_v11 }
 0x6b3   : > { %2926 = vtanh.f32 %v1550_v43 }
 0x6b7   : > { %1870 = vperm.xlu1 %2916, %v1868_v20  }
 0x6b9   : > { %v2927_v36 = vpop.eup %2926 }
 0x6ba   : > { %v1553_v2 = vmul.f32 %v2927_v36, %v1552_v50  ;;  %v2713_v50 = vld [vmem:[%s3082_s6 + $0x50] sm:$0xf] }
 0x6bc   : > { %v1555_v28 = vadd.f32 %v1554_v8, %v1553_v2 }
 0x6be   : > { %v3931_v41 = vsel %vm1561_vm12, %v1555_v28, 0.0  ;;  %v2715_v29 = vpack.c.bf16 %v1555_v28, %v1555_v28  ;;  %v1570_v28 = vunpack.c.l.bf16 %v2713_v50 }
 0x6bf   : > { %2711 = vst [vmem:[%s3087_s9 + $0x38] sm:$0xff] %v3931_v41 }
 0x6c0   : > { %2716 = vmatmul.msk.bf16.vlgmr.msra.gmra.mxu3 %vm2714_vm13, %v2715_v29  ;;  %2719 = vmatmul.msk.bf16.vlgmr.msrb.gmra.mxu0 %vm2714_vm13, %v2715_v29 }
 0x6c1   : > { %2722 = vmatmul.msk.bf16.vlgmr.msrb.gmra.mxu1 %vm2714_vm13, %v2715_v29  ;;  %1806 = vmatpush.bf16.msra.mxu3 %v3749_v39 }
 0x6c2   : > { %1884 = vmatpush.bf16.msrb.mxu0 %v3731_v47  ;;  %1897 = vmatpush.bf16.msrb.mxu1 %v3735_v22 }
 0x6c5   : > { %1807 = vmatpush.bf16.msra.mxu3 %v3755_v63 }
 0x6c6   : > { %1885 = vmatpush.bf16.msrb.mxu0 %v3741_v54  ;;  %1898 = vmatpush.bf16.msrb.mxu1 %v3745_v5 }
 0x6c9   : > { %1808 = vmatpush.bf16.msra.mxu3 %v3775_v26 }
 0x6ca   : > { %1886 = vmatpush.bf16.msrb.mxu0 %v3762_v33  ;;  %1899 = vmatpush.bf16.msrb.mxu1 %v3766_v6 }
 0x6cd   : > { %1809 = vmatpush.bf16.msra.mxu3 %v3792_v32 }
 0x6ce   : > { %1887 = vmatpush.bf16.msrb.mxu0 %v3782_v62  ;;  %1900 = vmatpush.bf16.msrb.mxu1 %v3786_v40 }
 0x6d1   : > { %1810 = vmatpush.bf16.msra.mxu3 %v3809_v44 }
 0x6d2   : > { %1888 = vmatpush.bf16.msrb.mxu0 %v3800_v19  ;;  %1901 = vmatpush.bf16.msrb.mxu1 %v3804_v16 }
 0x6d5   : > { %1811 = vmatpush.bf16.msra.mxu3 %v3826_v58 }
 0x6d6   : > { %1889 = vmatpush.bf16.msrb.mxu0 %v3816_v35  ;;  %1902 = vmatpush.bf16.msrb.mxu1 %v3820_v13 }
 0x6d9   : > { %1812 = vmatpush.bf16.msra.mxu3 %v3843_v7 }
 0x6da   : > { %1890 = vmatpush.bf16.msrb.mxu0 %v3834_v21  ;;  %1903 = vmatpush.bf16.msrb.mxu1 %v3838_v56 }
 0x6dd   : > { %1813 = vmatpush.bf16.msra.mxu3 %v3859_v27 }
 0x6de   : > { %1891 = vmatpush.bf16.msrb.mxu0 %v3850_v61  ;;  %1904 = vmatpush.bf16.msrb.mxu1 %v3854_v45 }
 0x73d   : > { %v1594_v46 = vpop.f32.mrf.mxu0 }
 0x73e   : > { %v1631_v25 = vadd.f32 %v1594_v46, %v1569_v17  ;;  %v1607_v37 = vpop.f32.mrf.mxu1 }
 0x73f   : > { %v1651_v2 = vadd.f32 %v1607_v37, %v3927_v34 }
 0x740   : > { %v2724_v23 = vmul.f32 -1.442695, %v1631_v25 }
 0x742   : > { %2928 = vpow2.f32 %v2724_v23 }
 0x743   : > { %v1581_v48 = vpop.f32.mrf.mxu3 }
 0x744   : > { %v1611_v49 = vadd.f32 %v1581_v48, %v1568_v53  ;;  %v2283_v53 = vsel %vm2282_vm5, 1, %v3023_v51 }
 0x745   : > { %v1596_v55 = vpop.f32.mrf.mxu0  ;;  %2285 = vperm.xlu1 %2916, %v2283_v53  }
 0x746   : > { %v2723_v52 = vmul.f32 -1.442695, %v1611_v49  ;;  %v1609_v59 = vpop.f32.mrf.mxu1 }
 0x748   : > { %v2929_v60 = vpop.eup %2928  ;;  %2930 = vpow2.f32 %v2723_v52 }
 0x749   : > { %v1635_v18 = vadd.f32 1.0, %v2929_v60 }
 0x74b   : > { %v1583_v9 = vpop.f32.mrf.mxu3  ;;  %2932 = vrcp.f32 %v1635_v18  ;;  %v1647_v17 = vand.u32 2147483648, %v1635_v18  ;;  %vm1641_vm6 = vweird.f32 %v1635_v18  ;;  %v1645_v25 = vand.u32 2147483647, %v1635_v18 }
 0x74c   : > { %v1663_v9 = vpop.permute.xlu0 %1662 }
 0x74d   : > { %v1648_v49 = vor.u32 1.1754944e-38, %v1647_v17  ;;  %vm1646_vm8 = vcmp.eq.f32.partialorder %v1645_v25, 8.507059e+37  ;;  %vm1664_vm9 = vcmp.eq.s32.totalorder %v1663_v9, 1 }
 0x74e   : > { %v2931_v42 = vpop.eup %2930 }
 0x74f   : > { %v1615_v4 = vadd.f32 1.0, %v2931_v42 }
 0x751   : > { %2934 = vrcp.f32 %v1615_v4  ;;  %v2933_v10 = vpop.eup %2932  ;;  %v1627_v14 = vand.u32 2147483648, %v1615_v4  ;;  %v1625_v12 = vand.u32 2147483647, %v1615_v4  ;;  %vm1621_vm1 = vweird.f32 %v1615_v4 }
 0x752   : > { %v1637_v11 = vmul.f32 %v2933_v10, %v1635_v18  ;;  %vm1642_vm4 = vweird.f32 %v2933_v10 }
 0x753   : > { %v1628_v30 = vor.u32 1.1754944e-38, %v1627_v14  ;;  %vm1626_vm3 = vcmp.eq.f32.partialorder %v1625_v12, 8.507059e+37  ;;  %vm1643_vm7 = vmor %vm1641_vm6, %vm1642_vm4  ;;  %vm2075_vm4 = vcmp.gt.s32.totalorder %v3099_v1, 2 }
 0x754   : > { %v1638_v0 = vsub.f32 1.0, %v1637_v11 }
 0x756   : > { %v1639_v24 = vmul.f32 %v2933_v10, %v1638_v0 }
 0x757   : > { %v2935_v38 = vpop.eup %2934 }
 0x758   : > { %v1617_v57 = vmul.f32 %v2935_v38, %v1615_v4  ;;  %vm1622_vm0 = vweird.f32 %v2935_v38  ;;  %v1640_v29 = vadd.f32 %v2933_v10, %v1639_v24 }
 0x759   : > { %vm1623_vm2 = vmor %vm1621_vm1, %vm1622_vm0 }
 0x75a   : > { %v1618_v15 = vsub.f32 1.0, %v1617_v57  ;;  %v1644_v48 = vsel %vm1643_vm7, %v2933_v10, %v1640_v29 }
 0x75b   : > { %v1649_v37 = vsel %vm1646_vm8, %v1648_v49, %v1644_v48  ;;  %v2727_v49 = vld [vmem:[%s3082_s6 + $0x44] sm:$0xf] }
 0x75c   : > { %v1619_v43 = vmul.f32 %v2935_v38, %v1618_v15  ;;  %v1655_v55 = vsub.f32 1.0, %v1649_v37  ;;  %v1657_v60 = vmul.f32 %v1649_v37, %v3931_v41 }
 0x75e   : > { %v1620_v36 = vadd.f32 %v2935_v38, %v1619_v43 }
 0x760   : > { %v1624_v8 = vsel %vm1623_vm2, %v2935_v38, %v1620_v36 }
 0x761   : > { %v1629_v31 = vsel %vm1626_vm3, %v1628_v30, %v1624_v8  ;;  %vm1971_vm3 = vcmp.gt.s32.totalorder %v3099_v1, 3 }
 0x762   : > { %v1652_v46 = vmul.f32 %v1651_v2, %v1629_v31 }
 0x764   : > { %v1653_v23 = vadd.f32 %v1652_v46, %v1570_v28 }
 0x766   : > { %2936 = vtanh.f32 %v1653_v23 }
 0x76c   : > { %v2937_v52 = vpop.eup %2936 }
 0x76d   : > { %v1656_v59 = vmul.f32 %v2937_v52, %v1655_v55 }
 0x76f   : > { %v1658_v42 = vadd.f32 %v1657_v60, %v1656_v59  ;;  %v1674_v60 = vunpack.c.l.bf16 %v2727_v49 }
 0x771   : > { %v1665_v18 = vsel %vm1664_vm9, %v1658_v42, 0.0  ;;  %v3970_v4 = vsel %vm1664_vm9, %v1658_v42, %v3931_v41  ;;  %v2726_v41 = vld [vmem:[%s3082_s6 + $0x3c] sm:$0xff] }
 0x772   : > { %2725 = vst [vmem:[%s3087_s9 + $0x30] sm:$0xff] %v1665_v18  ;;  %v1675_v10 = vpack.c.bf16 %v3970_v4, %v3970_v4  ;;  %v1672_v3 = vunpack.c.l.bf16 %v2726_v41  ;;  %v1673_v38 = vunpack.c.h.bf16 %v2726_v41 }
 0x774   : > { %1684 = vmatmul.bf16.vlgmr.msrb.gmra.mxu2 %v1675_v10  ;;  %1697 = vmatmul.bf16.vlgmr.msrb.gmra.mxu3 %v1675_v10 }
 0x775   : > { %1710 = vmatmul.bf16.vlgmr.msra.gmra.mxu0 %v1675_v10  ;;  %1910 = vmatpush.bf16.msrb.mxu2 %v3749_v39 }
 0x776   : > { %1988 = vmatpush.bf16.msrb.mxu3 %v3731_v47  ;;  %2001 = vmatpush.bf16.msra.mxu0 %v3735_v22 }
 0x779   : > { %1911 = vmatpush.bf16.msrb.mxu2 %v3755_v63 }
 0x77a   : > { %1989 = vmatpush.bf16.msrb.mxu3 %v3741_v54  ;;  %2002 = vmatpush.bf16.msra.mxu0 %v3745_v5 }
 0x77d   : > { %1912 = vmatpush.bf16.msrb.mxu2 %v3775_v26 }
 0x77e   : > { %1990 = vmatpush.bf16.msrb.mxu3 %v3762_v33  ;;  %2003 = vmatpush.bf16.msra.mxu0 %v3766_v6 }
 0x781   : > { %1913 = vmatpush.bf16.msrb.mxu2 %v3792_v32 }
 0x782   : > { %1991 = vmatpush.bf16.msrb.mxu3 %v3782_v62  ;;  %2004 = vmatpush.bf16.msra.mxu0 %v3786_v40 }
 0x785   : > { %1914 = vmatpush.bf16.msrb.mxu2 %v3809_v44 }
 0x786   : > { %1992 = vmatpush.bf16.msrb.mxu3 %v3800_v19  ;;  %2005 = vmatpush.bf16.msra.mxu0 %v3804_v16 }
 0x789   : > { %1915 = vmatpush.bf16.msrb.mxu2 %v3826_v58 }
 0x78a   : > { %1993 = vmatpush.bf16.msrb.mxu3 %v3816_v35  ;;  %2006 = vmatpush.bf16.msra.mxu0 %v3820_v13 }
 0x78d   : > { %1916 = vmatpush.bf16.msrb.mxu2 %v3843_v7 }
 0x78e   : > { %1994 = vmatpush.bf16.msrb.mxu3 %v3834_v21  ;;  %2007 = vmatpush.bf16.msra.mxu0 %v3838_v56 }
 0x791   : > { %1917 = vmatpush.bf16.msrb.mxu2 %v3859_v27 }
 0x792   : > { %1995 = vmatpush.bf16.msrb.mxu3 %v3850_v61  ;;  %2008 = vmatpush.bf16.msra.mxu0 %v3854_v45 }
 0x7f2   : > { %v1711_v11 = vpop.f32.mrf.mxu0 }
 0x7f3   : > { %v1755_v59 = vadd.f32 %v1711_v11, %v3927_v34 }
 0x7f7   : > { %v1685_v57 = vpop.f32.mrf.mxu2  ;;  %v1698_v0 = vpop.f32.mrf.mxu3 }
 0x7f8   : > { %v1715_v15 = vadd.f32 %v1685_v57, %v1672_v3  ;;  %v1735_v14 = vadd.f32 %v1698_v0, %v1673_v38 }
 0x7fa   : > { %v2728_v43 = vmul.f32 -1.442695, %v1715_v15  ;;  %v2729_v12 = vmul.f32 -1.442695, %v1735_v14  ;;  %v1713_v20 = vpop.f32.mrf.mxu0 }
 0x7fc   : > { %2938 = vpow2.f32 %v2728_v43  ;;  %v1767_v43 = vpop.permute.xlu1 %1766 }
 0x7fd   : > { %2940 = vpow2.f32 %v2729_v12  ;;  %vm1768_vm2 = vcmp.eq.s32.totalorder %v1767_v43, 1 }
 0x7ff   : > { %v1687_v24 = vpop.f32.mrf.mxu2  ;;  %v1700_v50 = vpop.f32.mrf.mxu3 }
 0x802   : > { %v2939_v36 = vpop.eup %2938 }
 0x803   : > { %v2941_v30 = vpop.eup %2940  ;;  %v1719_v2 = vadd.f32 1.0, %v2939_v36 }
 0x804   : > { %v1739_v8 = vadd.f32 1.0, %v2941_v30 }
 0x805   : > { %2942 = vrcp.f32 %v1719_v2  ;;  %v1731_v25 = vand.u32 2147483648, %v1719_v2  ;;  %v1729_v48 = vand.u32 2147483647, %v1719_v2  ;;  %vm1725_vm11 = vweird.f32 %v1719_v2 }
 0x806   : > { %2944 = vrcp.f32 %v1739_v8  ;;  %v1751_v10 = vand.u32 2147483648, %v1739_v8  ;;  %vm1745_vm15 = vweird.f32 %v1739_v8  ;;  %v1749_v3 = vand.u32 2147483647, %v1739_v8 }
 0x807   : > { %v1732_v52 = vor.u32 1.1754944e-38, %v1731_v25  ;;  %vm1730_vm13 = vcmp.eq.f32.partialorder %v1729_v48, 8.507059e+37 }
 0x808   : > { %v1752_v0 = vor.u32 1.1754944e-38, %v1751_v10  ;;  %vm1750_vm1 = vcmp.eq.f32.partialorder %v1749_v3, 8.507059e+37 }
 0x80b   : > { %v2943_v28 = vpop.eup %2942 }
 0x80c   : > { %v2945_v29 = vpop.eup %2944  ;;  %v1721_v31 = vmul.f32 %v2943_v28, %v1719_v2  ;;  %vm1726_vm10 = vweird.f32 %v2943_v28 }
 0x80d   : > { %v1741_v17 = vmul.f32 %v2945_v29, %v1739_v8  ;;  %vm1727_vm12 = vmor %vm1725_vm11, %vm1726_vm10  ;;  %vm1746_vm14 = vweird.f32 %v2945_v29 }
 0x80e   : > { %v1722_v46 = vsub.f32 1.0, %v1721_v31  ;;  %vm1747_vm0 = vmor %vm1745_vm15, %vm1746_vm14 }
 0x80f   : > { %v1742_v23 = vsub.f32 1.0, %v1741_v17 }
 0x810   : > { %v1723_v53 = vmul.f32 %v2943_v28, %v1722_v46 }
 0x811   : > { %v1743_v37 = vmul.f32 %v2945_v29, %v1742_v23 }
 0x812   : > { %v1724_v55 = vadd.f32 %v2943_v28, %v1723_v53 }
 0x813   : > { %v1744_v18 = vadd.f32 %v2945_v29, %v1743_v37 }
 0x814   : > { %v1728_v9 = vsel %vm1727_vm12, %v2943_v28, %v1724_v55 }
 0x815   : > { %v1733_v42 = vsel %vm1730_vm13, %v1732_v52, %v1728_v9  ;;  %v1748_v57 = vsel %vm1747_vm0, %v2945_v29, %v1744_v18 }
 0x816   : > { %v1756_v41 = vmul.f32 %v1755_v59, %v1733_v42  ;;  %v1753_v15 = vsel %vm1750_vm1, %v1752_v0, %v1748_v57  ;;  %v2076_v57 = vsel %vm2075_vm4, 1, %v3023_v51 }
 0x817   : > { %v1759_v14 = vsub.f32 1.0, %v1753_v15  ;;  %v1761_v20 = vmul.f32 %v1753_v15, %v3970_v4 }
 0x818   : > { %v1757_v38 = vadd.f32 %v1756_v41, %v1674_v60  ;;  %v1972_v60 = vsel %vm1971_vm3, 1, %v3023_v51  ;;  %v2732_v41 = vld [vmem:[%s3082_s6 + $0x38] sm:$0xf] }
 0x819   : > { %1974 = vperm.xlu2 %2917, %v1972_v60  }
 0x81a   : > { %2946 = vtanh.f32 %v1757_v38 }
 0x820   : > { %v2947_v11 = vpop.eup %2946 }
 0x821   : > { %v1760_v12 = vmul.f32 %v2947_v11, %v1759_v14  ;;  %v1778_v11 = vunpack.c.l.bf16 %v2732_v41  ;;  %2078 = vperm.xlu2 %2917, %v2076_v57  }
 0x823   : > { %v1762_v24 = vadd.f32 %v1761_v20, %v1760_v12 }
 0x825   : > { %v1769_v50 = vsel %vm1768_vm2, %v1762_v24, 0.0  ;;  %v4004_v36 = vsel %vm1768_vm2, %v1762_v24, %v3970_v4  ;;  %v2731_v4 = vld [vmem:[%s3082_s6 + $0x30] sm:$0xff] }
 0x826   : > { %2730 = vst [vmem:[%s3087_s9 + $0x28] sm:$0xff] %v1769_v50  ;;  %v1779_v30 = vpack.c.bf16 %v4004_v36, %v4004_v36  ;;  %v1776_v2 = vunpack.c.l.bf16 %v2731_v4  ;;  %v1777_v31 = vunpack.c.h.bf16 %v2731_v4 }
 0x828   : > { %1788 = vmatmul.bf16.vlgmr.msra.gmra.mxu1 %v1779_v30  ;;  %1801 = vmatmul.bf16.vlgmr.msra.gmra.mxu2 %v1779_v30 }
 0x829   : > { %1814 = vmatmul.bf16.vlgmr.msra.gmra.mxu3 %v1779_v30  ;;  %2014 = vmatpush.bf16.msra.mxu1 %v3749_v39 }
 0x82a   : > { %2092 = vmatpush.bf16.msra.mxu2 %v3731_v47  ;;  %2105 = vmatpush.bf16.msra.mxu3 %v3735_v22 }
 0x82d   : > { %2015 = vmatpush.bf16.msra.mxu1 %v3755_v63 }
 0x82e   : > { %2093 = vmatpush.bf16.msra.mxu2 %v3741_v54  ;;  %2106 = vmatpush.bf16.msra.mxu3 %v3745_v5 }
 0x831   : > { %2016 = vmatpush.bf16.msra.mxu1 %v3775_v26 }
 0x832   : > { %2094 = vmatpush.bf16.msra.mxu2 %v3762_v33  ;;  %2107 = vmatpush.bf16.msra.mxu3 %v3766_v6 }
 0x835   : > { %2017 = vmatpush.bf16.msra.mxu1 %v3792_v32 }
 0x836   : > { %2095 = vmatpush.bf16.msra.mxu2 %v3782_v62  ;;  %2108 = vmatpush.bf16.msra.mxu3 %v3786_v40 }
 0x839   : > { %2018 = vmatpush.bf16.msra.mxu1 %v3809_v44 }
 0x83a   : > { %2096 = vmatpush.bf16.msra.mxu2 %v3800_v19  ;;  %2109 = vmatpush.bf16.msra.mxu3 %v3804_v16 }
 0x83d   : > { %2019 = vmatpush.bf16.msra.mxu1 %v3826_v58 }
 0x83e   : > { %2097 = vmatpush.bf16.msra.mxu2 %v3816_v35  ;;  %2110 = vmatpush.bf16.msra.mxu3 %v3820_v13 }
 0x841   : > { %2020 = vmatpush.bf16.msra.mxu1 %v3843_v7 }
 0x842   : > { %2098 = vmatpush.bf16.msra.mxu2 %v3834_v21  ;;  %2111 = vmatpush.bf16.msra.mxu3 %v3838_v56 }
 0x845   : > { %2021 = vmatpush.bf16.msra.mxu1 %v3859_v27 }
 0x846   : > { %2099 = vmatpush.bf16.msra.mxu2 %v3850_v61  ;;  %2112 = vmatpush.bf16.msra.mxu3 %v3854_v45 }
 0x8a5   : > { %v1789_v8 = vpop.f32.mrf.mxu1 }
 0x8a6   : > { %v1819_v28 = vadd.f32 %v1789_v8, %v1776_v2 }
 0x8a8   : > { %v2733_v29 = vmul.f32 -1.442695, %v1819_v28 }
 0x8aa   : > { %2948 = vpow2.f32 %v2733_v29 }
 0x8ab   : > { %v1802_v17 = vpop.f32.mrf.mxu2 }
 0x8ac   : > { %v1839_v46 = vadd.f32 %v1802_v17, %v1777_v31  ;;  %v1815_v25 = vpop.f32.mrf.mxu3 }
 0x8ad   : > { %v1791_v23 = vpop.f32.mrf.mxu1  ;;  %v1859_v1 = vadd.f32 %v1815_v25, %v3927_v34 }
 0x8ae   : > { %v2734_v53 = vmul.f32 -1.442695, %v1839_v46 }
 0x8b0   : > { %v2949_v48 = vpop.eup %2948  ;;  %2950 = vpow2.f32 %v2734_v53  ;;  %v1871_v53 = vpop.permute.xlu1 %1870 }
 0x8b1   : > { %v1823_v49 = vadd.f32 1.0, %v2949_v48  ;;  %vm1872_vm13 = vcmp.eq.s32.totalorder %v1871_v53, 1 }
 0x8b3   : > { %2952 = vrcp.f32 %v1823_v49  ;;  %v1804_v37 = vpop.f32.mrf.mxu2  ;;  %v1835_v10 = vand.u32 2147483648, %v1823_v49  ;;  %v1833_v38 = vand.u32 2147483647, %v1823_v49  ;;  %vm1829_vm6 = vweird.f32 %v1823_v49 }
 0x8b4   : > { %v1817_v55 = vpop.f32.mrf.mxu3 }
 0x8b5   : > { %v1836_v43 = vor.u32 1.1754944e-38, %v1835_v10  ;;  %vm1834_vm8 = vcmp.eq.f32.partialorder %v1833_v38, 8.507059e+37  ;;  %v2737_v38 = vld [vmem:[%s3082_s6 + $0x2c] sm:$0xf] }
 0x8b6   : > { %v2951_v52 = vpop.eup %2950 }
 0x8b7   : > { %v1843_v59 = vadd.f32 1.0, %v2951_v52 }
 0x8b9   : > { %v2953_v9 = vpop.eup %2952  ;;  %2954 = vrcp.f32 %v1843_v59  ;;  %v1855_v30 = vand.u32 2147483648, %v1843_v59  ;;  %v1853_v2 = vand.u32 2147483647, %v1843_v59  ;;  %vm1849_vm10 = vweird.f32 %v1843_v59 }
 0x8ba   : > { %v1825_v42 = vmul.f32 %v2953_v9, %v1823_v49  ;;  %vm1830_vm5 = vweird.f32 %v2953_v9 }
 0x8bb   : > { %vm1831_vm7 = vmor %vm1829_vm6, %vm1830_vm5  ;;  %v1856_v28 = vor.u32 1.1754944e-38, %v1855_v30  ;;  %vm1854_vm12 = vcmp.eq.f32.partialorder %v1853_v2, 8.507059e+37 }
 0x8bc   : > { %v1826_v18 = vsub.f32 1.0, %v1825_v42 }
 0x8be   : > { %v1827_v3 = vmul.f32 %v2953_v9, %v1826_v18 }
 0x8bf   : > { %v2955_v0 = vpop.eup %2954 }
 0x8c0   : > { %v1845_v15 = vmul.f32 %v2955_v0, %v1843_v59  ;;  %v1828_v14 = vadd.f32 %v2953_v9, %v1827_v3  ;;  %vm1850_vm9 = vweird.f32 %v2955_v0 }
 0x8c1   : > { %vm1851_vm11 = vmor %vm1849_vm10, %vm1850_vm9 }
 0x8c2   : > { %v1846_v12 = vsub.f32 1.0, %v1845_v15  ;;  %v1832_v20 = vsel %vm1831_vm7, %v2953_v9, %v1828_v14  ;;  %v1882_v14 = vunpack.c.l.bf16 %v2737_v38 }
 0x8c3   : > { %v1837_v24 = vsel %vm1834_vm8, %v1836_v43, %v1832_v20 }
 0x8c4   : > { %v1847_v50 = vmul.f32 %v2955_v0, %v1846_v12  ;;  %v1860_v4 = vmul.f32 %v1859_v1, %v1837_v24 }
 0x8c6   : > { %v1848_v51 = vadd.f32 %v2955_v0, %v1847_v50  ;;  %v1861_v8 = vadd.f32 %v1860_v4, %v1778_v11 }
 0x8c8   : > { %v1852_v29 = vsel %vm1851_vm11, %v2955_v0, %v1848_v51  ;;  %2956 = vtanh.f32 %v1861_v8 }
 0x8c9   : > { %v1857_v31 = vsel %vm1854_vm12, %v1856_v28, %v1852_v29  ;;  %v1975_v29 = vpop.permute.xlu2 %1974 }
 0x8ca   : > { %v1863_v17 = vsub.f32 1.0, %v1857_v31  ;;  %v1865_v25 = vmul.f32 %v1857_v31, %v4004_v36  ;;  %vm1976_vm6 = vcmp.eq.s32.totalorder %v1975_v29, 1 }
 0x8ce   : > { %v2957_v46 = vpop.eup %2956 }
 0x8cf   : > { %v1864_v23 = vmul.f32 %v2957_v46, %v1863_v17 }
 0x8d1   : > { %v1866_v48 = vadd.f32 %v1865_v25, %v1864_v23 }
 0x8d3   : > { %v1873_v49 = vsel %vm1872_vm13, %v1866_v48, 0.0  ;;  %v4042_v37 = vsel %vm1872_vm13, %v1866_v48, %v4004_v36  ;;  %v2741_v48 = vld [vmem:[%s3082_s6 + $0x18] sm:$0xff] }
 0x8d4   : > { %2735 = vst [vmem:[%s3087_s9 + $0x20] sm:$0xff] %v1873_v49  ;;  %v1883_v55 = vpack.c.bf16 %v4042_v37, %v4042_v37  ;;  %v1985_v49 = vunpack.c.h.bf16 %v2741_v48 }
 0x8d6   : > { %1892 = vmatmul.bf16.vlgmr.msrb.gmra.mxu0 %v1883_v55  ;;  %1905 = vmatmul.bf16.vlgmr.msrb.gmra.mxu1 %v1883_v55 }
 0x8d7   : > { %1918 = vmatmul.bf16.vlgmr.msrb.gmra.mxu2 %v1883_v55  ;;  %2118 = vmatpush.bf16.msrb.mxu0 %v3749_v39 }
 0x8d8   : > { %2195 = vmatpush.bf16.msrb.mxu1 %v3731_v47  ;;  %2208 = vmatpush.bf16.msrb.mxu2 %v3735_v22  ;;  %v2736_v47 = vld [vmem:[%s3082_s6 + $0x24] sm:$0xff] }
 0x8d9   : > { %v1880_v22 = vunpack.c.l.bf16 %v2736_v47 }
 0x8db   : > { %2119 = vmatpush.bf16.msrb.mxu0 %v3755_v63 }
 0x8dc   : > { %2196 = vmatpush.bf16.msrb.mxu1 %v3741_v54  ;;  %2209 = vmatpush.bf16.msrb.mxu2 %v3745_v5  ;;  %v1881_v54 = vunpack.c.h.bf16 %v2736_v47 }
 0x8df   : > { %2120 = vmatpush.bf16.msrb.mxu0 %v3775_v26 }
 0x8e0   : > { %2197 = vmatpush.bf16.msrb.mxu1 %v3762_v33  ;;  %2210 = vmatpush.bf16.msrb.mxu2 %v3766_v6 }
 0x8e3   : > { %2121 = vmatpush.bf16.msrb.mxu0 %v3792_v32 }
 0x8e4   : > { %2198 = vmatpush.bf16.msrb.mxu1 %v3782_v62  ;;  %2211 = vmatpush.bf16.msrb.mxu2 %v3786_v40 }
 0x8e7   : > { %2122 = vmatpush.bf16.msrb.mxu0 %v3809_v44 }
 0x8e8   : > { %2199 = vmatpush.bf16.msrb.mxu1 %v3800_v19  ;;  %2212 = vmatpush.bf16.msrb.mxu2 %v3804_v16 }
 0x8eb   : > { %2123 = vmatpush.bf16.msrb.mxu0 %v3826_v58 }
 0x8ec   : > { %2200 = vmatpush.bf16.msrb.mxu1 %v3816_v35  ;;  %2213 = vmatpush.bf16.msrb.mxu2 %v3820_v13 }
 0x8ef   : > { %2124 = vmatpush.bf16.msrb.mxu0 %v3843_v7 }
 0x8f0   : > { %2201 = vmatpush.bf16.msrb.mxu1 %v3834_v21  ;;  %2214 = vmatpush.bf16.msrb.mxu2 %v3838_v56 }
 0x8f3   : > { %2125 = vmatpush.bf16.msrb.mxu0 %v3859_v27 }
 0x8f4   : > { %2202 = vmatpush.bf16.msrb.mxu1 %v3850_v61  ;;  %2215 = vmatpush.bf16.msrb.mxu2 %v3854_v45 }
 0x953   : > { %v1893_v5 = vpop.f32.mrf.mxu0  ;;  %v1906_v33 = vpop.f32.mrf.mxu1 }
 0x954   : > { %v1923_v6 = vadd.f32 %v1893_v5, %v1880_v22  ;;  %v1943_v62 = vadd.f32 %v1906_v33, %v1881_v54  ;;  %v1984_v22 = vunpack.c.l.bf16 %v2741_v48 }
 0x956   : > { %v2738_v40 = vmul.f32 -1.442695, %v1923_v6  ;;  %v2739_v19 = vmul.f32 -1.442695, %v1943_v62 }
 0x958   : > { %2958 = vpow2.f32 %v2738_v40 }
 0x959   : > { %2960 = vpow2.f32 %v2739_v19 }
 0x95a   : > { %v1919_v16 = vpop.f32.mrf.mxu2 }
 0x95b   : > { %v1895_v35 = vpop.f32.mrf.mxu0  ;;  %v1908_v13 = vpop.f32.mrf.mxu1  ;;  %v1963_v43 = vadd.f32 %v1919_v16, %v3927_v34 }
 0x95e   : > { %v2959_v21 = vpop.eup %2958 }
 0x95f   : > { %v2961_v56 = vpop.eup %2960  ;;  %v1927_v61 = vadd.f32 1.0, %v2959_v21 }
 0x960   : > { %v1947_v36 = vadd.f32 1.0, %v2961_v56 }
 0x961   : > { %2962 = vrcp.f32 %v1927_v61  ;;  %v1939_v10 = vand.u32 2147483648, %v1927_v61  ;;  %v1937_v3 = vand.u32 2147483647, %v1927_v61  ;;  %vm1933_vm15 = vweird.f32 %v1927_v61 }
 0x962   : > { %2964 = vrcp.f32 %v1947_v36  ;;  %v1921_v45 = vpop.f32.mrf.mxu2  ;;  %v1959_v24 = vand.u32 2147483648, %v1947_v36  ;;  %vm1953_vm3 = vweird.f32 %v1947_v36  ;;  %v1957_v50 = vand.u32 2147483647, %v1947_v36 }
 0x963   : > { %v1940_v15 = vor.u32 1.1754944e-38, %v1939_v10  ;;  %vm1938_vm1 = vcmp.eq.f32.partialorder %v1937_v3, 8.507059e+37 }
 0x964   : > { %v1960_v2 = vor.u32 1.1754944e-38, %v1959_v24  ;;  %vm1958_vm5 = vcmp.eq.f32.partialorder %v1957_v50, 8.507059e+37 }
 0x967   : > { %v2963_v52 = vpop.eup %2962 }
 0x968   : > { %v2965_v59 = vpop.eup %2964  ;;  %v1929_v60 = vmul.f32 %v2963_v52, %v1927_v61  ;;  %vm1934_vm14 = vweird.f32 %v2963_v52 }
 0x969   : > { %v1949_v9 = vmul.f32 %v2965_v59, %v1947_v36  ;;  %vm1935_vm0 = vmor %vm1933_vm15, %vm1934_vm14  ;;  %vm1954_vm2 = vweird.f32 %v2965_v59  ;;  %v2742_v36 = vld [vmem:[%s3082_s6 + $0x20] sm:$0xf] }
 0x96a   : > { %v1930_v42 = vsub.f32 1.0, %v1929_v60  ;;  %vm1955_vm4 = vmor %vm1953_vm3, %vm1954_vm2  ;;  %v1986_v60 = vunpack.c.l.bf16 %v2742_v36 }
 0x96b   : > { %v1950_v18 = vsub.f32 1.0, %v1949_v9 }
 0x96c   : > { %v1931_v41 = vmul.f32 %v2963_v52, %v1930_v42 }
 0x96d   : > { %v1951_v57 = vmul.f32 %v2965_v59, %v1950_v18 }
 0x96e   : > { %v1932_v0 = vadd.f32 %v2963_v52, %v1931_v41 }
 0x96f   : > { %v1952_v20 = vadd.f32 %v2965_v59, %v1951_v57 }
 0x970   : > { %v1936_v11 = vsel %vm1935_vm0, %v2963_v52, %v1932_v0 }
 0x971   : > { %v1941_v12 = vsel %vm1938_vm1, %v1940_v15, %v1936_v11  ;;  %v1956_v4 = vsel %vm1955_vm4, %v2965_v59, %v1952_v20 }
 0x972   : > { %v1964_v1 = vmul.f32 %v1963_v43, %v1941_v12  ;;  %v1961_v51 = vsel %vm1958_vm5, %v1960_v2, %v1956_v4  ;;  %v2079_v43 = vpop.permute.xlu2 %2078  ;;  %v2746_v4 = vld [vmem:[%s3082_s6 + $0xc] sm:$0xff] }
 0x973   : > { %v1967_v8 = vsub.f32 1.0, %v1961_v51  ;;  %v1969_v17 = vmul.f32 %v1961_v51, %v4042_v37  ;;  %vm2080_vm15 = vcmp.eq.s32.totalorder %v2079_v43, 1  ;;  %v2088_v51 = vunpack.c.l.bf16 %v2746_v4 }
 0x974   : > { %v1965_v30 = vadd.f32 %v1964_v1, %v1882_v14 }
 0x976   : > { %2966 = vtanh.f32 %v1965_v30 }
 0x97c   : > { %v2967_v28 = vpop.eup %2966 }
 0x97d   : > { %v1968_v31 = vmul.f32 %v2967_v28, %v1967_v8  ;;  %v2089_v8 = vunpack.c.h.bf16 %v2746_v4 }
 0x97f   : > { %v1970_v46 = vadd.f32 %v1969_v17, %v1968_v31 }
 0x981   : > { %v1977_v23 = vsel %vm1976_vm6, %v1970_v46, 0.0  ;;  %v4076_v25 = vsel %vm1976_vm6, %v1970_v46, %v4042_v37 }
 0x982   : > { %2740 = vst [vmem:[%s3087_s9 + $0x18] sm:$0xff] %v1977_v23  ;;  %v1987_v53 = vpack.c.bf16 %v4076_v25, %v4076_v25 }
 0x984   : > { %1996 = vmatmul.bf16.vlgmr.msrb.gmra.mxu3 %v1987_v53  ;;  %2009 = vmatmul.bf16.vlgmr.msra.gmra.mxu0 %v1987_v53 }
 0x985   : > { %2022 = vmatmul.bf16.vlgmr.msra.gmra.mxu1 %v1987_v53  ;;  %2221 = vmatpush.bf16.msrb.mxu3 %v3749_v39 }
 0x989   : > { %2222 = vmatpush.bf16.msrb.mxu3 %v3755_v63 }
 0x98d   : > { %2223 = vmatpush.bf16.msrb.mxu3 %v3775_v26 }
 0x991   : > { %2224 = vmatpush.bf16.msrb.mxu3 %v3792_v32 }
 0x995   : > { %2225 = vmatpush.bf16.msrb.mxu3 %v3809_v44 }
 0x999   : > { %2226 = vmatpush.bf16.msrb.mxu3 %v3826_v58 }
 0x99d   : > { %2227 = vmatpush.bf16.msrb.mxu3 %v3843_v7 }
 0x9a1   : > { %2228 = vmatpush.bf16.msrb.mxu3 %v3859_v27 }
 0xa01   : > { %v2010_v37 = vpop.f32.mrf.mxu0 }
 0xa02   : > { %v2047_v55 = vadd.f32 %v2010_v37, %v1985_v49  ;;  %v2023_v47 = vpop.f32.mrf.mxu1 }
 0xa03   : > { %v2067_v59 = vadd.f32 %v2023_v47, %v3927_v34 }
 0xa04   : > { %v2744_v39 = vmul.f32 -1.442695, %v2047_v55 }
 0xa06   : > { %2968 = vpow2.f32 %v2744_v39 }
 0xa07   : > { %v1997_v63 = vpop.f32.mrf.mxu3 }
 0xa08   : > { %v2027_v26 = vadd.f32 %v1997_v63, %v1984_v22 }
 0xa09   : > { %v2012_v54 = vpop.f32.mrf.mxu0 }
 0xa0a   : > { %v2743_v32 = vmul.f32 -1.442695, %v2027_v26  ;;  %v2025_v5 = vpop.f32.mrf.mxu1 }
 0xa0c   : > { %v2969_v44 = vpop.eup %2968  ;;  %2970 = vpow2.f32 %v2743_v32 }
 0xa0d   : > { %v2051_v58 = vadd.f32 1.0, %v2969_v44 }
 0xa0f   : > { %v1999_v33 = vpop.f32.mrf.mxu3  ;;  %2972 = vrcp.f32 %v2051_v58  ;;  %v2063_v10 = vand.u32 2147483648, %v2051_v58  ;;  %vm2057_vm12 = vweird.f32 %v2051_v58  ;;  %v2061_v3 = vand.u32 2147483647, %v2051_v58 }
 0xa10   : > { %v2747_v33 = vld [vmem:[%s3082_s6 + $0x14] sm:$0xf] }
 0xa11   : > { %v2064_v0 = vor.u32 1.1754944e-38, %v2063_v10  ;;  %vm2062_vm14 = vcmp.eq.f32.partialorder %v2061_v3, 8.507059e+37 }
 0xa12   : > { %v2971_v7 = vpop.eup %2970 }
 0xa13   : > { %v2031_v27 = vadd.f32 1.0, %v2971_v7 }
 0xa15   : > { %2974 = vrcp.f32 %v2031_v27  ;;  %v2973_v6 = vpop.eup %2972  ;;  %v2043_v13 = vand.u32 2147483648, %v2031_v27  ;;  %v2041_v56 = vand.u32 2147483647, %v2031_v27  ;;  %vm2037_vm8 = vweird.f32 %v2031_v27 }
 0xa16   : > { %v2053_v62 = vmul.f32 %v2973_v6, %v2051_v58  ;;  %vm2058_vm11 = vweird.f32 %v2973_v6 }
 0xa17   : > { %v2044_v52 = vor.u32 1.1754944e-38, %v2043_v13  ;;  %vm2042_vm10 = vcmp.eq.f32.partialorder %v2041_v56, 8.507059e+37  ;;  %vm2059_vm13 = vmor %vm2057_vm12, %vm2058_vm11 }
 0xa18   : > { %v2054_v16 = vsub.f32 1.0, %v2053_v62 }
 0xa1a   : > { %v2055_v61 = vmul.f32 %v2973_v6, %v2054_v16 }
 0xa1b   : > { %v2975_v40 = vpop.eup %2974 }
 0xa1c   : > { %v2033_v19 = vmul.f32 %v2975_v40, %v2031_v27  ;;  %vm2038_vm7 = vweird.f32 %v2975_v40  ;;  %v2056_v42 = vadd.f32 %v2973_v6, %v2055_v61 }
 0xa1d   : > { %vm2039_vm9 = vmor %vm2037_vm8, %vm2038_vm7 }
 0xa1e   : > { %v2034_v35 = vsub.f32 1.0, %v2033_v19  ;;  %v2060_v57 = vsel %vm2059_vm13, %v2973_v6, %v2056_v42 }
 0xa1f   : > { %v2065_v15 = vsel %vm2062_vm14, %v2064_v0, %v2060_v57  ;;  %v2189_v57 = vld [vmem:[%s3082_s6] sm:$0xff] }
 0xa20   : > { %v2035_v21 = vmul.f32 %v2975_v40, %v2034_v35  ;;  %v2071_v14 = vsub.f32 1.0, %v2065_v15  ;;  %v2073_v20 = vmul.f32 %v2065_v15, %v4076_v25  ;;  %v2191_v0 = vunpack.c.l.bf16 %v2189_v57 }
 0xa21   : > { %v2192_v43 = vunpack.c.h.bf16 %v2189_v57 }
 0xa22   : > { %v2036_v45 = vadd.f32 %v2975_v40, %v2035_v21 }
 0xa24   : > { %v2040_v9 = vsel %vm2039_vm9, %v2975_v40, %v2036_v45  ;;  %v2090_v40 = vunpack.c.l.bf16 %v2747_v33 }
 0xa25   : > { %v2045_v18 = vsel %vm2042_vm10, %v2044_v52, %v2040_v9  ;;  %v2183_v9 = vpop.permute.xlu0 %2182 }
 0xa26   : > { %v2068_v41 = vmul.f32 %v2067_v59, %v2045_v18  ;;  %vm2184_vm8 = vcmp.eq.s32.totalorder %v2183_v9, 1 }
 0xa28   : > { %v2069_v38 = vadd.f32 %v2068_v41, %v1986_v60 }
 0xa2a   : > { %2976 = vtanh.f32 %v2069_v38 }
 0xa30   : > { %v2977_v11 = vpop.eup %2976 }
 0xa31   : > { %v2072_v12 = vmul.f32 %v2977_v11, %v2071_v14 }
 0xa33   : > { %v2074_v1 = vadd.f32 %v2073_v20, %v2072_v12 }
 0xa35   : > { %v2081_v24 = vsel %vm2080_vm15, %v2074_v1, 0.0  ;;  %v4094_v50 = vsel %vm2080_vm15, %v2074_v1, %v4076_v25 }
 0xa36   : > { %2745 = vst [vmem:[%s3087_s9 + $0x10] sm:$0xff] %v2081_v24  ;;  %v2091_v30 = vpack.c.bf16 %v4094_v50, %v4094_v50 }
 0xa38   : > { %2100 = vmatmul.bf16.vlgmr.msra.gmra.mxu2 %v2091_v30  ;;  %2113 = vmatmul.bf16.vlgmr.msra.gmra.mxu3 %v2091_v30 }
 0xa39   : > { %2126 = vmatmul.bf16.vlgmr.msrb.gmra.mxu0 %v2091_v30 }
 0xab6   : > { %v2127_v2 = vpop.f32.mrf.mxu0 }
 0xab7   : > { %v2171_v62 = vadd.f32 %v2127_v2, %v3927_v34 }
 0xabb   : > { %v2101_v28 = vpop.f32.mrf.mxu2  ;;  %v2114_v29 = vpop.f32.mrf.mxu3 }
 0xabc   : > { %v2131_v31 = vadd.f32 %v2101_v28, %v2088_v51  ;;  %v2151_v17 = vadd.f32 %v2114_v29, %v2089_v8 }
 0xabe   : > { %v2748_v46 = vmul.f32 -1.442695, %v2131_v31  ;;  %v2749_v23 = vmul.f32 -1.442695, %v2151_v17  ;;  %v2129_v53 = vpop.f32.mrf.mxu0 }
 0xac0   : > { %2978 = vpow2.f32 %v2748_v46 }
 0xac1   : > { %2980 = vpow2.f32 %v2749_v23  ;;  %v2190_v23 = vld [vmem:[%s3082_s6 + $0x8] sm:$0xf] }
 0xac3   : > { %v2103_v25 = vpop.f32.mrf.mxu2  ;;  %v2116_v48 = vpop.f32.mrf.mxu3 }
 0xac6   : > { %v2979_v49 = vpop.eup %2978 }
 0xac7   : > { %v2981_v37 = vpop.eup %2980  ;;  %v2135_v55 = vadd.f32 1.0, %v2979_v49 }
 0xac8   : > { %v2155_v47 = vadd.f32 1.0, %v2981_v37 }
 0xac9   : > { %2982 = vrcp.f32 %v2135_v55  ;;  %v2147_v32 = vand.u32 2147483648, %v2135_v55  ;;  %v2145_v58 = vand.u32 2147483647, %v2135_v55  ;;  %vm2141_vm1 = vweird.f32 %v2135_v55 }
 0xaca   : > { %2984 = vrcp.f32 %v2155_v47  ;;  %v2167_v21 = vand.u32 2147483648, %v2155_v47  ;;  %vm2161_vm5 = vweird.f32 %v2155_v47  ;;  %v2165_v56 = vand.u32 2147483647, %v2155_v47 }
 0xacb   : > { %v2148_v6 = vor.u32 1.1754944e-38, %v2147_v32  ;;  %vm2146_vm3 = vcmp.eq.f32.partialorder %v2145_v58, 8.507059e+37 }
 0xacc   : > { %v2168_v45 = vor.u32 1.1754944e-38, %v2167_v21  ;;  %vm2166_vm7 = vcmp.eq.f32.partialorder %v2165_v56, 8.507059e+37 }
 0xacf   : > { %v2983_v39 = vpop.eup %2982 }
 0xad0   : > { %v2985_v22 = vpop.eup %2984  ;;  %v2137_v63 = vmul.f32 %v2983_v39, %v2135_v55  ;;  %vm2142_vm0 = vweird.f32 %v2983_v39  ;;  %v2193_v55 = vunpack.c.l.bf16 %v2190_v23 }
 0xad1   : > { %v2157_v26 = vmul.f32 %v2985_v22, %v2155_v47  ;;  %vm2143_vm2 = vmor %vm2141_vm1, %vm2142_vm0  ;;  %vm2162_vm4 = vweird.f32 %v2985_v22 }
 0xad2   : > { %v2138_v54 = vsub.f32 1.0, %v2137_v63  ;;  %vm2163_vm6 = vmor %vm2161_vm5, %vm2162_vm4 }
 0xad3   : > { %v2158_v5 = vsub.f32 1.0, %v2157_v26 }
 0xad4   : > { %v2139_v44 = vmul.f32 %v2983_v39, %v2138_v54 }
 0xad5   : > { %v2159_v7 = vmul.f32 %v2985_v22, %v2158_v5 }
 0xad6   : > { %v2140_v27 = vadd.f32 %v2983_v39, %v2139_v44 }
 0xad7   : > { %v2160_v35 = vadd.f32 %v2985_v22, %v2159_v7 }
 0xad8   : > { %v2144_v19 = vsel %vm2143_vm2, %v2983_v39, %v2140_v27 }
 0xad9   : > { %v2149_v16 = vsel %vm2146_vm3, %v2148_v6, %v2144_v19  ;;  %v2164_v36 = vsel %vm2163_vm6, %v2985_v22, %v2160_v35 }
 0xada   : > { %v2172_v13 = vmul.f32 %v2171_v62, %v2149_v16  ;;  %v2169_v52 = vsel %vm2166_vm7, %v2168_v45, %v2164_v36 }
 0xadb   : > { %v2175_v59 = vsub.f32 1.0, %v2169_v52  ;;  %v2177_v18 = vmul.f32 %v2169_v52, %v4094_v50 }
 0xadc   : > { %v2173_v61 = vadd.f32 %v2172_v13, %v2090_v40 }
 0xade   : > { %2986 = vtanh.f32 %v2173_v61 }
 0xae4   : > { %v2987_v60 = vpop.eup %2986 }
 0xae5   : > { %v2176_v42 = vmul.f32 %v2987_v60, %v2175_v59 }
 0xae7   : > { %v2178_v10 = vadd.f32 %v2177_v18, %v2176_v42 }
 0xae9   : > { %v2185_v41 = vsel %vm2184_vm8, %v2178_v10, 0.0  ;;  %v4104_v3 = vsel %vm2184_vm8, %v2178_v10, %v4094_v50 }
 0xaea   : > { %2750 = vst [vmem:[%s3087_s9 + $0x8] sm:$0xff] %v2185_v41  ;;  %v2194_v38 = vpack.c.bf16 %v4104_v3, %v4104_v3 }
 0xaec   : > { %2203 = vmatmul.bf16.vlgmr.msrb.gmra.mxu1 %v2194_v38  ;;  %2216 = vmatmul.bf16.vlgmr.msrb.gmra.mxu2 %v2194_v38 }
 0xaed   : > { %2229 = vmatmul.bf16.vlgmr.msrb.gmra.mxu3 %v2194_v38 }
 0xb69   : > { %v2204_v15 = vpop.f32.mrf.mxu1 }
 0xb6a   : > { %v2234_v14 = vadd.f32 %v2204_v15, %v2191_v0 }
 0xb6c   : > { %v2751_v11 = vmul.f32 -1.442695, %v2234_v14 }
 0xb6e   : > { %2988 = vpow2.f32 %v2751_v11 }
 0xb6f   : > { %v2217_v12 = vpop.f32.mrf.mxu2 }
 0xb70   : > { %v2254_v20 = vadd.f32 %v2217_v12, %v2192_v43  ;;  %v2230_v1 = vpop.f32.mrf.mxu3 }
 0xb71   : > { %v2206_v24 = vpop.f32.mrf.mxu1  ;;  %v2274_v63 = vadd.f32 %v2230_v1, %v3927_v34  ;;  %v2286_v34 = vpop.permute.xlu1 %2285 }
 0xb72   : > { %v2752_v50 = vmul.f32 -1.442695, %v2254_v20  ;;  %vm2287_vm1 = vcmp.eq.s32.totalorder %v2286_v34, 1 }
 0xb74   : > { %v2989_v30 = vpop.eup %2988  ;;  %2990 = vpow2.f32 %v2752_v50 }
 0xb75   : > { %v2238_v4 = vadd.f32 1.0, %v2989_v30 }
 0xb77   : > { %2992 = vrcp.f32 %v2238_v4  ;;  %v2219_v2 = vpop.f32.mrf.mxu2  ;;  %v2250_v46 = vand.u32 2147483648, %v2238_v4  ;;  %v2248_v25 = vand.u32 2147483647, %v2238_v4  ;;  %vm2244_vm10 = vweird.f32 %v2238_v4 }
 0xb78   : > { %v2232_v51 = vpop.f32.mrf.mxu3 }
 0xb79   : > { %v2251_v47 = vor.u32 1.1754944e-38, %v2250_v46  ;;  %vm2249_vm12 = vcmp.eq.f32.partialorder %v2248_v25, 8.507059e+37 }
 0xb7a   : > { %v2991_v8 = vpop.eup %2990 }
 0xb7b   : > { %v2258_v28 = vadd.f32 1.0, %v2991_v8 }
 0xb7d   : > { %v2993_v29 = vpop.eup %2992  ;;  %2994 = vrcp.f32 %v2258_v28  ;;  %v2270_v32 = vand.u32 2147483648, %v2258_v28  ;;  %v2268_v44 = vand.u32 2147483647, %v2258_v28  ;;  %vm2264_vm14 = vweird.f32 %v2258_v28 }
 0xb7e   : > { %v2240_v31 = vmul.f32 %v2993_v29, %v2238_v4  ;;  %vm2245_vm9 = vweird.f32 %v2993_v29 }
 0xb7f   : > { %vm2246_vm11 = vmor %vm2244_vm10, %vm2245_vm9  ;;  %v2271_v7 = vor.u32 1.1754944e-38, %v2270_v32  ;;  %vm2269_vm0 = vcmp.eq.f32.partialorder %v2268_v44, 8.507059e+37 }
 0xb80   : > { %v2241_v17 = vsub.f32 1.0, %v2240_v31 }
 0xb82   : > { %v2242_v53 = vmul.f32 %v2993_v29, %v2241_v17 }
 0xb83   : > { %v2995_v48 = vpop.eup %2994 }
 0xb84   : > { %v2260_v49 = vmul.f32 %v2995_v48, %v2258_v28  ;;  %v2243_v37 = vadd.f32 %v2993_v29, %v2242_v53  ;;  %vm2265_vm13 = vweird.f32 %v2995_v48 }
 0xb85   : > { %vm2266_vm15 = vmor %vm2264_vm14, %vm2265_vm13 }
 0xb86   : > { %v2261_v39 = vsub.f32 1.0, %v2260_v49  ;;  %v2247_v22 = vsel %vm2246_vm11, %v2993_v29, %v2243_v37 }
 0xb87   : > { %v2252_v26 = vsel %vm2249_vm12, %v2251_v47, %v2247_v22 }
 0xb88   : > { %v2262_v54 = vmul.f32 %v2995_v48, %v2261_v39  ;;  %v2275_v5 = vmul.f32 %v2274_v63, %v2252_v26 }
 0xb8a   : > { %v2263_v58 = vadd.f32 %v2995_v48, %v2262_v54  ;;  %v2276_v33 = vadd.f32 %v2275_v5, %v2193_v55 }
 0xb8c   : > { %v2267_v27 = vsel %vm2266_vm15, %v2995_v48, %v2263_v58  ;;  %2996 = vtanh.f32 %v2276_v33 }
 0xb8d   : > { %v2272_v6 = vsel %vm2269_vm0, %v2271_v7, %v2267_v27 }
 0xb8e   : > { %v2278_v62 = vsub.f32 1.0, %v2272_v6  ;;  %v2280_v16 = vmul.f32 %v2272_v6, %v4104_v3 }
 0xb92   : > { %v2997_v40 = vpop.eup %2996 }
 0xb93   : > { %v2279_v19 = vmul.f32 %v2997_v40, %v2278_v62 }
 0xb95   : > { %v2281_v35 = vadd.f32 %v2280_v16, %v2279_v19 }
 0xb97   : > { %v2288_v13 = vsel %vm2287_vm1, %v2281_v35, 0.0  ;;  %v2290_v21 = vsel %vm2287_vm1, %v2281_v35, %v4104_v3 }
 0xb98   : > { %2289 = vst [vmem:[%s3087_s9] sm:$0xff] %v2288_v13 }
 0xb99   : > { %2291 = vst [vmem:[%s3104_s23] sm:$0xff] %v2290_v21 }
 0xb9a PF: > { %s16_s20 = sadd.s32 1, %s3020_s20   ;;  %s4213_s18 = smov %s3016_s19 }
 0xb9b   : > { %p13_p7 = scmp.ge.s32.totalorder %s16_s20, 4   ;;  %s4214_s19 = smov %s4216_s21 }
 0xb9d   :  { %15 = sbr.rel (!%p13_p7) target bundleno = 2 (0x2), region = 123 }

// kernel: encoder_forward.2
= control target key start
LH: loop header
LB: loop body
LE: loop exit
PB: predicated region body
PF: predicated region fallthrough
CT: control target
= control target key end

     0   :  { %11 = vsyncpa [#allocation3], 0  ;;  %s4304_s0 = inlined_call_operand.vmem [shape: s32[8,1], index: 0, kind: input, shape index: {}]   ;;  %s4305_s1 = inlined_call_operand.vmem [shape: bf16[2,8,8,384], index: 1, kind: input, shape index: {}]   ;;  %s4306_s2 = inlined_call_operand.hbm [shape: bf16[2,128,384], index: 2, kind: input, shape index: {}]   ;;  %s4307_s3 = inlined_call_operand.vmem [shape: f32[2,1,128], index: 3, kind: input, shape index: {}]   ;;  %s4308_s4 = inlined_call_operand.vmem [shape: f32[2,8,8,128], index: 4, kind: output, shape index: {0}]   ;;  %s4309_s5 = inlined_call_operand.vmem [shape: f32[2,8,128], index: 5, kind: output, shape index: {1}]  }
   0x1   :  { %13 = vsyncpa [#allocation3 + $0x1], 0  ;;  %s3182_s18 = smov 0   ;;  %s3184_s19 = smov 0  }
   0x2   :  { %s3186_s20 = smov 0   ;;  %s3188_s21 = smov 0  }
   0x3   :  { %s3190_s22 = smov 0   ;;  %s3192_s23 = smov 0  }
   0x4 LB: > { %s2489_s24 = sadd.s32 4294967295, %s3146_s23   ;;  %s31_s25 = sadd.s32 1, %s3142_s22  ;;  %s3146_s23 = sphi %s3192_s23, %s19_s23   ;;  %s3142_s22 = sphi %s3190_s22, %s4397_s22   ;;  %s3138_s21 = sphi %s3188_s21, %s4396_s21   ;;  %s3134_s20 = sphi %s3186_s20, %s4395_s20   ;;  %s3130_s19 = sphi %s3184_s19, %s4394_s19   ;;  %s3126_s18 = sphi %s3182_s18, %s4393_s18  }
   0x5   : > { %p33_p0 = scmp.ge.s32.totalorder %s31_s25, 2  ;;  %s92_s26 = sadd.s32 1, %s3134_s20 }
   0x6   : > { %p99_p1 = scmp.ne.s32.totalorder %s3134_s20, %s3130_s19  ;;  %p100_p2 = scmp.eq.s32.totalorder %s3146_s23, 0 }
   0x7   : > { %s4399_s25 = smov (%p33_p0, %s31_s25), 0  ;;  %p105_p4 = scmp.ne.s32.totalorder %s3130_s19, %s3126_s18 }
   0x8   : > { %p101_p3 = por %p100_p2, %p99_p1  ;;  %s89_s27 = ssub.s32 %s3142_s22, %s4399_s25 }
   0x9   : > { %p106_p5 = scmp.eq.s32.totalorder %s2489_s24, 0  ;;  %p90_p6 = scmp.eq.s32.totalorder %s89_s27, 0 }
   0xa   : > { %p2847_p8 = scmp.lt.s32.totalorder %s3146_s23, 2  ;;  %s230_s30 = sand.u32 1, %s3134_s20  }
   0xb   : > { %p3221_p7 = por %p106_p5, %p105_p4  ;;  %s2838_s6 = smul.u32 192, %s3142_s22 }
   0xc   : > { %s3227_s29 = scalar_select %p90_p6, %s3134_s20, %s92_s26  }
   0xd   : > { %s2837_s7 = smul.u32 192, %s230_s30  ;;  %s239_s10 = scalar_lea.hbm %s4306_s2, %s2838_s6 }
   0xe   : > { %p2844_p9 = pnand %p2847_p8, %p101_p3  ;;  %s240_s11 = sshll.u32 %s239_s10, 4  ;;  %s241_s11 = int_to_ptr.hbm [resolvable:$true] %s240_s11 }
   0xf   : > { %s234_s12 = scalar_lea.vmem [#allocation2], %s2837_s7  ;;  %s231_s14 = scalar_lea.sflag [#allocation3], %s230_s30 }
  0x10   : > { %s242_s13 = sshll.u32 %s234_s12, 4  ;;  %s3148_s15 = smov 192   ;;  %s243_s13 = int_to_ptr.vmem [resolvable:$true] %s242_s13 }
  0x11   : > { %s3149_s16 = smov 12   ;;  %p2495_p10 = scmp.ge.s32.totalorder %s3146_s23, 1 }
  0x12   : > { %2846 = dma.hbm_to_vmem [thread:$0]  (!%p2844_p9), %s241_s11, 3072, %s243_s13, %s231_s14, %s3148_s15, %s3148_s15, %s3149_s16  }
  0x13   : > { %p256_p11 = scmp.lt.s32.totalorder %s3146_s23, 3 }
  0x15   : > { %p257_p12 = pnand %p2495_p10, %p256_p11 }
  0x17   : > { %260 = sbr.rel (%p257_p12) target bundleno = 2984 (0xba8), region = 36 }
  0x1c   : > { %s262_s17 = sand.u32 1, %s3130_s19  }
  0x1d   : > { %s2839_s18 = smul.u32 192, %s262_s17  ;;  %s263_s24 = scalar_lea.sflag [#allocation3], %s262_s17 }
  0x1f   : > { %s3237_s26 = scalar_lea.vmem [#allocation2], %s2839_s18 }
  0x20   : > { %3121 = dma.done.wait (%p3221_p7), %s263_s24, 3072  }
  0x21   : > { %3123 = vsyncadd (%p3221_p7), %s263_s24, 4294964224  ;;  %p324_p13 = scmp.lt.s32.totalorder %s3138_s21, 1  ;;  %v3266_v0 = vld [vmem:[%s3237_s26 + $0x4] sm:$0xf]  ;;  %v3269_v1 = vld [vmem:[%s3237_s26] sm:$0xf] }
  0x22   : > { %4311 = vst [vmem:[#allocation5_spill] sm:$0xff] %v3266_v0  ;;  %v3272_v2 = vld [vmem:[%s3237_s26 + $0x4] sm:$0xf]  ;;  %v3275_v3 = vld [vmem:[%s3237_s26] sm:$0xf]  ;;  %p2500_p0 = scmp.ne.s32.totalorder %s3138_s21, 0 }
  0x23   : > { %s3245_s27 = scalar_select %p324_p13, %s3138_s21, 1  ;;  %4312 = vst [vmem:[#allocation6_spill] sm:$0xff] %v3269_v1  ;;  %v3278_v4 = vld [vmem:[%s3237_s26 + $0x8] sm:$0xf]  ;;  %v3284_v6 = vld [vmem:[%s3237_s26 + $0xc] sm:$0xf0] }
  0x24   : > { %4313 = vst [vmem:[#allocation7_spill] sm:$0xff] %v3278_v4  ;;  %v3281_v5 = vld [vmem:[%s3237_s26 + $0x8] sm:$0xf]  ;;  %v3287_v7 = vld [vmem:[%s3237_s26 + $0x8] sm:$0xf0] }
  0x25   : > { %s2840_s28 = smul.u32 96, %s3245_s27  ;;  %s2788_s30 = sshll.u32 %s3245_s27, 6  ;;  %4314 = vst [vmem:[#allocation8_spill] sm:$0xff] %v3284_v6  ;;  %v3290_v8 = vld [vmem:[%s3237_s26 + $0xc] sm:$0xf0] }
  0x26   : > { %s2499_s6 = sshll.u32 %s3245_s27, 3  ;;  %s3258_s12 = scalar_lea.vmem %s4308_s4, %s2788_s30  ;;  %4315 = vst [vmem:[#allocation9_spill] sm:$0xff] %v3287_v7  ;;  %v3293_v9 = vld [vmem:[%s3237_s26 + $0x8] sm:$0xf0]  ;;  %v3296_v10 = vld [vmem:[%s3237_s26 + $0x10] sm:$0xf0] }
  0x27   : > { %s3253_s9 = scalar_lea.vmem %s4305_s1, %s2840_s28  ;;  %s3263_s15 = scalar_lea.vmem %s4309_s5, %s2499_s6  ;;  %4316 = vst [vmem:[#allocation10_spill] sm:$0xff] %v3296_v10  ;;  %v3299_v11 = vld [vmem:[%s3237_s26 + $0x10] sm:$0xf0]  ;;  %v3302_v12 = vld [vmem:[%s3237_s26 + $0x1c] sm:$0xf] }
  0x28   : > { %4317 = vst [vmem:[#allocation11_spill] sm:$0xff] %v3302_v12  ;;  %v3305_v13 = vld [vmem:[%s3237_s26 + $0x18] sm:$0xf]  ;;  %v3308_v14 = vld [vmem:[%s3237_s26 + $0x1c] sm:$0xf]  ;;  %s335_s18 = scalar_lea.vmem %s4307_s3, %s3245_s27 }
  0x29   : > { %4318 = vst [vmem:[#allocation12_spill] sm:$0xff] %v3305_v13  ;;  %v3311_v15 = vld [vmem:[%s3237_s26 + $0x18] sm:$0xf]  ;;  %v3314_v16 = vld [vmem:[%s3237_s26 + $0x20] sm:$0xf] }
  0x2a   : > { %4319 = vst [vmem:[#allocation13_spill] sm:$0xff] %v3314_v16  ;;  %v3317_v17 = vld [vmem:[%s3237_s26 + $0x20] sm:$0xf]  ;;  %v3320_v18 = vld [vmem:[%s3237_s26 + $0x24] sm:$0xf0] }
  0x2b   : > { %4320 = vst [vmem:[#allocation14_spill] sm:$0xff] %v3320_v18  ;;  %v3323_v19 = vld [vmem:[%s3237_s26 + $0x20] sm:$0xf0]  ;;  %v3326_v20 = vld [vmem:[%s3237_s26 + $0x24] sm:$0xf0] }
  0x2c   : > { %4321 = vst [vmem:[#allocation15_spill] sm:$0xff] %v3323_v19  ;;  %v3329_v21 = vld [vmem:[%s3237_s26 + $0x20] sm:$0xf0]  ;;  %v3332_v22 = vld [vmem:[%s3237_s26 + $0x28] sm:$0xf0] }
  0x2d   : > { %4322 = vst [vmem:[#allocation16_spill] sm:$0xff] %v3332_v22  ;;  %v3335_v23 = vld [vmem:[%s3237_s26 + $0x28] sm:$0xf0]  ;;  %v3338_v24 = vld [vmem:[%s3237_s26 + $0x34] sm:$0xf] }
  0x2e   : > { %4323 = vst [vmem:[#allocation17_spill] sm:$0xff] %v3338_v24  ;;  %v3341_v25 = vld [vmem:[%s3237_s26 + $0x30] sm:$0xf]  ;;  %v3344_v26 = vld [vmem:[%s3237_s26 + $0x34] sm:$0xf] }
  0x2f   : > { %4324 = vst [vmem:[#allocation18_spill] sm:$0xff] %v3341_v25  ;;  %v3347_v27 = vld [vmem:[%s3237_s26 + $0x30] sm:$0xf]  ;;  %v3350_v28 = vld [vmem:[%s3237_s26 + $0x38] sm:$0xf] }
  0x30   : > { %4325 = vst [vmem:[#allocation19_spill] sm:$0xff] %v3350_v28  ;;  %v3353_v29 = vld [vmem:[%s3237_s26 + $0x38] sm:$0xf]  ;;  %v3356_v30 = vld [vmem:[%s3237_s26 + $0x3c] sm:$0xf0] }
  0x31   : > { %4326 = vst [vmem:[#allocation20_spill] sm:$0xff] %v3356_v30  ;;  %v3359_v31 = vld [vmem:[%s3237_s26 + $0x38] sm:$0xf0]  ;;  %v3362_v32 = vld [vmem:[%s3237_s26 + $0x3c] sm:$0xf0] }
  0x32   : > { %4327 = vst [vmem:[#allocation21_spill] sm:$0xff] %v3359_v31  ;;  %v3365_v33 = vld [vmem:[%s3237_s26 + $0x38] sm:$0xf0]  ;;  %v3368_v34 = vld [vmem:[%s3237_s26 + $0x40] sm:$0xf0] }
  0x33   : > { %4328 = vst [vmem:[#allocation22_spill] sm:$0xff] %v3368_v34  ;;  %v3371_v35 = vld [vmem:[%s3237_s26 + $0x40] sm:$0xf0]  ;;  %v3374_v36 = vld [vmem:[%s3237_s26 + $0x4c] sm:$0xf] }
  0x34   : > { %4329 = vst [vmem:[#allocation23_spill] sm:$0xff] %v3374_v36  ;;  %v3377_v37 = vld [vmem:[%s3237_s26 + $0x48] sm:$0xf]  ;;  %v3380_v38 = vld [vmem:[%s3237_s26 + $0x4c] sm:$0xf] }
  0x35   : > { %4330 = vst [vmem:[#allocation24_spill] sm:$0xff] %v3377_v37  ;;  %v3383_v39 = vld [vmem:[%s3237_s26 + $0x48] sm:$0xf]  ;;  %v3386_v40 = vld [vmem:[%s3237_s26 + $0x50] sm:$0xf] }
  0x36   : > { %4331 = vst [vmem:[#allocation25_spill] sm:$0xff] %v3386_v40  ;;  %v3389_v41 = vld [vmem:[%s3237_s26 + $0x50] sm:$0xf]  ;;  %v3392_v42 = vld [vmem:[%s3237_s26 + $0x54] sm:$0xf0] }
  0x37   : > { %4332 = vst [vmem:[#allocation26_spill] sm:$0xff] %v3392_v42  ;;  %v3395_v43 = vld [vmem:[%s3237_s26 + $0x50] sm:$0xf0]  ;;  %v3398_v44 = vld [vmem:[%s3237_s26 + $0x54] sm:$0xf0] }
  0x38   : > { %4333 = vst [vmem:[#allocation27_spill] sm:$0xff] %v3395_v43  ;;  %v3401_v45 = vld [vmem:[%s3237_s26 + $0x50] sm:$0xf0]  ;;  %v3404_v46 = vld [vmem:[%s3237_s26 + $0x58] sm:$0xf0] }
  0x39   : > { %4334 = vst [vmem:[#allocation28_spill] sm:$0xff] %v3404_v46  ;;  %v3407_v47 = vld [vmem:[%s3237_s26 + $0x58] sm:$0xf0]  ;;  %v3410_v48 = vld [vmem:[%s3237_s26 + $0x64] sm:$0xf] }
  0x3a   : > { %4335 = vst [vmem:[#allocation29_spill] sm:$0xff] %v3410_v48  ;;  %v3413_v49 = vld [vmem:[%s3237_s26 + $0x60] sm:$0xf]  ;;  %v3416_v50 = vld [vmem:[%s3237_s26 + $0x64] sm:$0xf] }
  0x3b   : > { %4336 = vst [vmem:[#allocation30_spill] sm:$0xff] %v3413_v49  ;;  %v3419_v51 = vld [vmem:[%s3237_s26 + $0x60] sm:$0xf]  ;;  %v3422_v52 = vld [vmem:[%s3237_s26 + $0x68] sm:$0xf] }
  0x3c   : > { %4337 = vst [vmem:[#allocation31_spill] sm:$0xff] %v3422_v52  ;;  %v3425_v53 = vld [vmem:[%s3237_s26 + $0x68] sm:$0xf]  ;;  %v3428_v54 = vld [vmem:[%s3237_s26 + $0x6c] sm:$0xf0] }
  0x3d   : > { %4338 = vst [vmem:[#allocation32_spill] sm:$0xff] %v3428_v54  ;;  %v3431_v55 = vld [vmem:[%s3237_s26 + $0x68] sm:$0xf0]  ;;  %v3434_v56 = vld [vmem:[%s3237_s26 + $0x6c] sm:$0xf0] }
  0x3e   : > { %4339 = vst [vmem:[#allocation33_spill] sm:$0xff] %v3431_v55  ;;  %v3437_v57 = vld [vmem:[%s3237_s26 + $0x68] sm:$0xf0]  ;;  %v3440_v58 = vld [vmem:[%s3237_s26 + $0x70] sm:$0xf0] }
  0x3f   : > { %4340 = vst [vmem:[#allocation34_spill] sm:$0xff] %v3440_v58  ;;  %v3443_v59 = vld [vmem:[%s3237_s26 + $0x70] sm:$0xf0]  ;;  %v3446_v60 = vld [vmem:[%s3237_s26 + $0x7c] sm:$0xf] }
  0x40   : > { %4341 = vst [vmem:[#allocation35_spill] sm:$0xff] %v3446_v60  ;;  %v3449_v61 = vld [vmem:[%s3237_s26 + $0x78] sm:$0xf]  ;;  %v2820_v62 = vld [vmem:[%s3237_s26 + $0x7c] sm:$0xf] }
  0x41   : > { %4342 = vst [vmem:[#allocation36_spill] sm:$0xff] %v3449_v61  ;;  %v2563_v63 = vld [vmem:[%s3237_s26 + $0x78] sm:$0xf]  ;;  %v3454_v10 = vld [vmem:[%s3237_s26 + $0x80] sm:$0xf] }
  0x42   : > { %4343 = vst [vmem:[#allocation37_spill] sm:$0xff] %v3454_v10  ;;  %v2571_v4 = vld [vmem:[%s3237_s26 + $0x80] sm:$0xf]  ;;  %v3458_v0 = vld [vmem:[%s3237_s26 + $0x84] sm:$0xf0] }
  0x43   : > { %4344 = vst [vmem:[#allocation38_spill] sm:$0xff] %v3458_v0  ;;  %v3461_v6 = vld [vmem:[%s3237_s26 + $0x80] sm:$0xf0]  ;;  %v2565_v7 = vld [vmem:[%s3237_s26 + $0x84] sm:$0xf0] }
  0x44   : > { %4345 = vst [vmem:[#allocation39_spill] sm:$0xff] %v3461_v6  ;;  %v2822_v1 = vld [vmem:[%s3237_s26 + $0x80] sm:$0xf0]  ;;  %v3466_v22 = vld [vmem:[%s3237_s26 + $0x88] sm:$0xf0] }
  0x45   : > { %4346 = vst [vmem:[#allocation40_spill] sm:$0xff] %v3466_v22  ;;  %v2824_v16 = vld [vmem:[%s3237_s26 + $0x88] sm:$0xf0]  ;;  %v3470_v12 = vld [vmem:[%s3237_s26 + $0x94] sm:$0xf]  ;;  %v3526_v0 = vld [vmem:[%s4304_s0] sm:$0xff] }
  0x46   : > { %4347 = vst [vmem:[#allocation41_spill] sm:$0xff] %v3470_v12  ;;  %v3473_v18 = vld [vmem:[%s3237_s26 + $0x90] sm:$0xf]  ;;  %v2826_v19 = vld [vmem:[%s3237_s26 + $0x94] sm:$0xf] }
  0x47   : > { %v2575_v13 = vld [vmem:[%s3237_s26 + $0x90] sm:$0xf]  ;;  %v3478_v34 = vld [vmem:[%s3237_s26 + $0x98] sm:$0xf]  ;;  %v3482_v24 = vld [vmem:[%s3237_s26 + $0x9c] sm:$0xf0] }
  0x48   : > { %4348 = vst [vmem:[#allocation42_spill] sm:$0xff] %v3478_v34  ;;  %v2583_v28 = vld [vmem:[%s3237_s26 + $0x98] sm:$0xf]  ;;  %v3485_v30 = vld [vmem:[%s3237_s26 + $0x98] sm:$0xf0] }
  0x49   : > { %v2577_v31 = vld [vmem:[%s3237_s26 + $0x9c] sm:$0xf0]  ;;  %v2828_v25 = vld [vmem:[%s3237_s26 + $0x98] sm:$0xf0]  ;;  %v3490_v46 = vld [vmem:[%s3237_s26 + $0xa0] sm:$0xf0] }
  0x4a   : > { %4349 = vst [vmem:[#allocation43_spill] sm:$0xff] %v3490_v46  ;;  %v2830_v40 = vld [vmem:[%s3237_s26 + $0xa0] sm:$0xf0]  ;;  %v3494_v36 = vld [vmem:[%s3237_s26 + $0xac] sm:$0xf] }
  0x4b   : > { %v3497_v42 = vld [vmem:[%s3237_s26 + $0xa8] sm:$0xf]  ;;  %v2832_v43 = vld [vmem:[%s3237_s26 + $0xac] sm:$0xf]  ;;  %v3506_v58 = vld [vmem:[%s3237_s26 + $0xb0] sm:$0xf] }
  0x4c   : > { %v2587_v37 = vld [vmem:[%s3237_s26 + $0xa8] sm:$0xf]  ;;  %4350 = vst [vmem:[#allocation44_spill] sm:$0xff] %v3506_v58  ;;  %v2595_v52 = vld [vmem:[%s3237_s26 + $0xb0] sm:$0xf]  ;;  %389 = sbr.rel (%p2500_p0) target bundleno = 1529 (0x5f9), region = 44 }
  0x4d   : > { %v3510_v48 = vld [vmem:[%s3237_s26 + $0xb4] sm:$0xf0]  ;;  %v3513_v54 = vld [vmem:[%s3237_s26 + $0xb0] sm:$0xf0]  ;;  %v3518_v22 = vld [vmem:[%s3237_s26 + $0xb8] sm:$0xf0] }
  0x4e   : > { %v2589_v55 = vld [vmem:[%s3237_s26 + $0xb4] sm:$0xf0]  ;;  %v2834_v49 = vld [vmem:[%s3237_s26 + $0xb0] sm:$0xf0]  ;;  %4351 = vst [vmem:[#allocation45_spill] sm:$0xff] %v3518_v22 }
  0x4f   : > { %v2836_v10 = vld [vmem:[%s3237_s26 + $0xb8] sm:$0xf0]  ;;  %v3521_v60 = vld [vmem:[%s335_s18] sm:$0x1] }
  0x51   : > { %v3529_v6 = vor.u32 %v2834_v49, %v2587_v37  ;;  %v3531_v61 = vor.u32 %v2832_v43, %v2589_v55  ;;  %v3535_v46 = vor.u32 %v2828_v25, %v2575_v13  ;;  %v3537_v34 = vor.u32 %v2826_v19, %v2577_v31 }
  0x52   : > { %v3539_v22 = vor.u32 %v2836_v10, %v2595_v52  ;;  %v3150_v58 = vmov 0   ;;  %v3543_v12 = vor.u32 %v2830_v40, %v2583_v28  ;;  %v3548_v37 = vor.u32 %v2822_v1, %v2563_v63 }
  0x53   : > { %523 = vmatpush.bf16.msra.mxu0 %v3529_v6  ;;  %536 = vmatpush.bf16.msra.mxu1 %v3531_v61  ;;  %v3550_v13 = vor.u32 %v2820_v62, %v2565_v7  ;;  %vm613_vm0 = vcmp.gt.s32.totalorder %v3526_v0, 0  ;;  %v3557_v19 = vor.u32 %v2824_v16, %v2571_v4  ;;  %v3564_v1 = vor.u32 %v3437_v57, %v3419_v51 }
  0x54   : > { %2900 = vset.pattern.permute.xlu0 %v3150_v58  ;;  %549 = vmatpush.bf16.msra.mxu2 %v3539_v22  ;;  %v614_v10 = vsel %vm613_vm0, 1, %v3150_v58  ;;  %v3568_v7 = vor.u32 %v3416_v50, %v3434_v56  ;;  %vm715_vm1 = vcmp.gt.s32.totalorder %v3526_v0, 1  ;;  %v3574_v4 = vor.u32 %v3443_v59, %v3425_v53 }
  0x55   : > { %628 = vmatpush.bf16.msra.mxu3 %v3529_v6  ;;  %2901 = vset.pattern.permute.xlu1 %v3150_v58  ;;  %v716_v16 = vsel %vm715_vm1, 1, %v3150_v58  ;;  %v3582_v25 = vor.u32 %v3401_v45, %v3383_v39  ;;  %v3586_v28 = vor.u32 %v3380_v38, %v3398_v44  ;;  %v3591_v31 = vor.u32 %v3407_v47, %v3389_v41 }
  0x56   : > { %2902 = vset.pattern.permute.xlu2 %v3150_v58  ;;  %616 = vperm.xlu0 %2900, %v614_v10   ;;  %v3598_v39 = vor.u32 %v3365_v33, %v3347_v27  ;;  %v3602_v38 = vor.u32 %v3344_v26, %v3362_v32  ;;  %vm1235_vm2 = vcmp.gt.s32.totalorder %v3526_v0, 6  ;;  %v3608_v40 = vor.u32 %v3371_v35, %v3353_v29  ;;  %v391_v10 = vld [vmem:[%s3253_s9 + $0x8] sm:$0xf] }
  0x57   : > { %524 = vmatpush.bf16.msra.mxu0 %v3535_v46  ;;  %537 = vmatpush.bf16.msra.mxu1 %v3537_v34  ;;  %v1236_v41 = vsel %vm1235_vm2, 1, %v3150_v58  ;;  %v3616_v26 = vor.u32 %v3329_v21, %v3311_v15  ;;  %v3620_v27 = vor.u32 %v3308_v14, %v3326_v20  ;;  %v3625_v29 = vor.u32 %v3335_v23, %v3317_v17 }
  0x58   : > { %550 = vmatpush.bf16.msra.mxu2 %v3543_v12  ;;  %v3632_v15 = vor.u32 %v3293_v9, %v3275_v3  ;;  %v3636_v14 = vor.u32 %v3272_v2, %v3290_v8  ;;  %v3641_v17 = vor.u32 %v3299_v11, %v3281_v5  ;;  %v390_v2 = vld [vmem:[%s3253_s9] sm:$0xff]  ;;  %v3709_v56 = vperm.slane %v3521_v60, 0 }
  0x59   : > { %629 = vmatpush.bf16.msra.mxu3 %v3535_v46  ;;  %v392_v3 = vunpack.c.l.bf16 %v390_v2  ;;  %v393_v5 = vunpack.c.h.bf16 %v390_v2  ;;  %vm819_vm13 = vcmp.gt.s32.totalorder %v3526_v0, 2  ;;  %vm923_vm14 = vcmp.gt.s32.totalorder %v3526_v0, 3 }
  0x5b   : > { %525 = vmatpush.bf16.msra.mxu0 %v3548_v37  ;;  %538 = vmatpush.bf16.msra.mxu1 %v3550_v13 }
  0x5c   : > { %551 = vmatpush.bf16.msra.mxu2 %v3557_v19 }
  0x5d   : > { %630 = vmatpush.bf16.msra.mxu3 %v3548_v37 }
  0x5e   : > { %718 = vperm.xlu0 %2900, %v716_v16  }
  0x5f   : > { %526 = vmatpush.bf16.msra.mxu0 %v3564_v1  ;;  %539 = vmatpush.bf16.msra.mxu1 %v3568_v7 }
  0x60   : > { %552 = vmatpush.bf16.msra.mxu2 %v3574_v4 }
  0x61   : > { %631 = vmatpush.bf16.msra.mxu3 %v3564_v1 }
  0x63   : > { %527 = vmatpush.bf16.msra.mxu0 %v3582_v25  ;;  %540 = vmatpush.bf16.msra.mxu1 %v3586_v28 }
  0x64   : > { %553 = vmatpush.bf16.msra.mxu2 %v3591_v31 }
  0x65   : > { %632 = vmatpush.bf16.msra.mxu3 %v3582_v25 }
  0x66   : > { %1238 = vperm.xlu0 %2900, %v1236_v41  }
  0x67   : > { %528 = vmatpush.bf16.msra.mxu0 %v3598_v39  ;;  %541 = vmatpush.bf16.msra.mxu1 %v3602_v38 }
  0x68   : > { %554 = vmatpush.bf16.msra.mxu2 %v3608_v40 }
  0x69   : > { %633 = vmatpush.bf16.msra.mxu3 %v3598_v39 }
  0x6b   : > { %529 = vmatpush.bf16.msra.mxu0 %v3616_v26  ;;  %542 = vmatpush.bf16.msra.mxu1 %v3620_v27 }
  0x6c   : > { %555 = vmatpush.bf16.msra.mxu2 %v3625_v29 }
  0x6d   : > { %634 = vmatpush.bf16.msra.mxu3 %v3616_v26 }
  0x6f   : > { %530 = vmatpush.bf16.msra.mxu0 %v3632_v15  ;;  %543 = vmatpush.bf16.msra.mxu1 %v3636_v14 }
  0x70   : > { %556 = vmatpush.bf16.msra.mxu2 %v3641_v17 }
  0x71   : > { %635 = vmatpush.bf16.msra.mxu3 %v3632_v15 }
  0x72   : > { %531 = vmatmul.bf16.vlgmr.msra.gmra.mxu0 %v3150_v58  ;;  %544 = vmatmul.bf16.vlgmr.msra.gmra.mxu1 %v3150_v58 }
  0x73   : > { %641 = vmatpush.bf16.msrb.mxu0 %v3531_v61  ;;  %654 = vmatpush.bf16.msrb.mxu1 %v3539_v22 }
  0x74   : > { %732 = vmatpush.bf16.msrb.mxu2 %v3529_v6 }
  0x75   : > { %557 = vmatmul.bf16.vlgmr.msra.gmra.mxu2 %v3150_v58  ;;  %745 = vmatpush.bf16.msrb.mxu3 %v3531_v61 }
  0x77   : > { %642 = vmatpush.bf16.msrb.mxu0 %v3537_v34  ;;  %655 = vmatpush.bf16.msrb.mxu1 %v3543_v12 }
  0x78   : > { %733 = vmatpush.bf16.msrb.mxu2 %v3535_v46 }
  0x79   : > { %746 = vmatpush.bf16.msrb.mxu3 %v3537_v34 }
  0x7b   : > { %643 = vmatpush.bf16.msrb.mxu0 %v3550_v13  ;;  %656 = vmatpush.bf16.msrb.mxu1 %v3557_v19 }
  0x7c   : > { %734 = vmatpush.bf16.msrb.mxu2 %v3548_v37 }
  0x7d   : > { %747 = vmatpush.bf16.msrb.mxu3 %v3550_v13 }
  0x7f   : > { %644 = vmatpush.bf16.msrb.mxu0 %v3568_v7  ;;  %657 = vmatpush.bf16.msrb.mxu1 %v3574_v4 }
  0x80   : > { %735 = vmatpush.bf16.msrb.mxu2 %v3564_v1 }
  0x81   : > { %748 = vmatpush.bf16.msrb.mxu3 %v3568_v7 }
  0x83   : > { %645 = vmatpush.bf16.msrb.mxu0 %v3586_v28  ;;  %658 = vmatpush.bf16.msrb.mxu1 %v3591_v31 }
  0x84   : > { %736 = vmatpush.bf16.msrb.mxu2 %v3582_v25 }
  0x85   : > { %749 = vmatpush.bf16.msrb.mxu3 %v3586_v28 }
  0x87   : > { %646 = vmatpush.bf16.msrb.mxu0 %v3602_v38  ;;  %659 = vmatpush.bf16.msrb.mxu1 %v3608_v40 }
  0x88   : > { %737 = vmatpush.bf16.msrb.mxu2 %v3598_v39 }
  0x89   : > { %750 = vmatpush.bf16.msrb.mxu3 %v3602_v38 }
  0x8b   : > { %647 = vmatpush.bf16.msrb.mxu0 %v3620_v27  ;;  %660 = vmatpush.bf16.msrb.mxu1 %v3625_v29 }
  0x8c   : > { %738 = vmatpush.bf16.msrb.mxu2 %v3616_v26 }
  0x8d   : > { %751 = vmatpush.bf16.msrb.mxu3 %v3620_v27 }
  0x8f   : > { %648 = vmatpush.bf16.msrb.mxu0 %v3636_v14  ;;  %661 = vmatpush.bf16.msrb.mxu1 %v3641_v17 }
  0x90   : > { %739 = vmatpush.bf16.msrb.mxu2 %v3632_v15 }
  0x91   : > { %752 = vmatpush.bf16.msrb.mxu3 %v3636_v14 }
  0x93   : > { %758 = vmatpush.bf16.msra.mxu0 %v3539_v22  ;;  %836 = vmatpush.bf16.msra.mxu1 %v3529_v6 }
  0x94   : > { %849 = vmatpush.bf16.msra.mxu2 %v3531_v61 }
  0x97   : > { %759 = vmatpush.bf16.msra.mxu0 %v3543_v12  ;;  %837 = vmatpush.bf16.msra.mxu1 %v3535_v46 }
  0x98   : > { %850 = vmatpush.bf16.msra.mxu2 %v3537_v34 }
  0x9b   : > { %760 = vmatpush.bf16.msra.mxu0 %v3557_v19  ;;  %838 = vmatpush.bf16.msra.mxu1 %v3548_v37 }
  0x9c   : > { %851 = vmatpush.bf16.msra.mxu2 %v3550_v13 }
  0x9f   : > { %761 = vmatpush.bf16.msra.mxu0 %v3574_v4  ;;  %839 = vmatpush.bf16.msra.mxu1 %v3564_v1 }
  0xa0   : > { %852 = vmatpush.bf16.msra.mxu2 %v3568_v7 }
  0xa3   : > { %762 = vmatpush.bf16.msra.mxu0 %v3591_v31  ;;  %840 = vmatpush.bf16.msra.mxu1 %v3582_v25 }
  0xa4   : > { %853 = vmatpush.bf16.msra.mxu2 %v3586_v28 }
  0xa7   : > { %763 = vmatpush.bf16.msra.mxu0 %v3608_v40  ;;  %841 = vmatpush.bf16.msra.mxu1 %v3598_v39 }
  0xa8   : > { %854 = vmatpush.bf16.msra.mxu2 %v3602_v38 }
  0xab   : > { %764 = vmatpush.bf16.msra.mxu0 %v3625_v29  ;;  %842 = vmatpush.bf16.msra.mxu1 %v3616_v26 }
  0xac   : > { %855 = vmatpush.bf16.msra.mxu2 %v3620_v27 }
  0xaf   : > { %765 = vmatpush.bf16.msra.mxu0 %v3641_v17  ;;  %843 = vmatpush.bf16.msra.mxu1 %v3632_v15 }
  0xb0   : > { %856 = vmatpush.bf16.msra.mxu2 %v3636_v14 }
  0xef   : > { %v532_v8 = vpop.f32.mrf.mxu0  ;;  %v545_v9 = vpop.f32.mrf.mxu1 }
  0xf0   : > { %v562_v11 = vadd.f32 %v532_v8, %v392_v3  ;;  %v582_v20 = vadd.f32 %v545_v9, %v393_v5  ;;  %v394_v5 = vunpack.c.l.bf16 %v391_v10 }
  0xf2   : > { %v2597_v21 = vmul.f32 -1.442695, %v562_v11  ;;  %v2598_v23 = vmul.f32 -1.442695, %v582_v20 }
  0xf4   : > { %2903 = vpow2.f32 %v2597_v21 }
  0xf5   : > { %2905 = vpow2.f32 %v2598_v23 }
  0xf7   : > { %v534_v32 = vpop.f32.mrf.mxu0  ;;  %v547_v33 = vpop.f32.mrf.mxu1 }
  0xf8   : > { %v558_v35 = vpop.f32.mrf.mxu2 }
  0xf9   : > { %v605_v2 = vadd.f32 %v3709_v56, %v558_v35 }
  0xfa   : > { %v2904_v43 = vpop.eup %2903 }
  0xfb   : > { %v2906_v44 = vpop.eup %2905  ;;  %v566_v45 = vadd.f32 1.0, %v2904_v43 }
  0xfc   : > { %v586_v47 = vadd.f32 1.0, %v2906_v44 }
  0xfd   : > { %2907 = vrcp.f32 %v566_v45  ;;  %v578_v59 = vand.u32 2147483648, %v566_v45  ;;  %v576_v63 = vand.u32 2147483647, %v566_v45  ;;  %vm572_vm4 = vweird.f32 %v566_v45 }
  0xfe   : > { %2909 = vrcp.f32 %v586_v47  ;;  %vm592_vm7 = vweird.f32 %v586_v47  ;;  %v598_v21 = vand.u32 2147483648, %v586_v47  ;;  %v596_v23 = vand.u32 2147483647, %v586_v47 }
  0xff   : > { %v579_v3 = vor.u32 1.1754944e-38, %v578_v59  ;;  %vm577_vm6 = vcmp.eq.f32.partialorder %v576_v63, 8.507059e+37 }
 0x100   : > { %v560_v49 = vpop.f32.mrf.mxu2  ;;  %v599_v43 = vor.u32 1.1754944e-38, %v598_v21  ;;  %vm597_vm10 = vcmp.eq.f32.partialorder %v596_v23, 8.507059e+37 }
 0x101   : > { %v617_v49 = vpop.permute.xlu0 %616 }
 0x102   : > { %vm618_vm11 = vcmp.eq.s32.totalorder %v617_v49, 1 }
 0x103   : > { %v2908_v50 = vpop.eup %2907  ;;  %vm2601_vm12 = vmpackc.low %vm618_vm11, %vm618_vm11 }
 0x104   : > { %v2910_v51 = vpop.eup %2909  ;;  %v568_v52 = vmul.f32 %v2908_v50, %v566_v45  ;;  %vm573_vm3 = vweird.f32 %v2908_v50 }
 0x105   : > { %v588_v53 = vmul.f32 %v2910_v51, %v586_v47  ;;  %vm574_vm5 = vmor %vm572_vm4, %vm573_vm3  ;;  %vm593_vm8 = vweird.f32 %v2910_v51  ;;  %v2599_v47 = vld [vmem:[%s3253_s9 + $0xc] sm:$0xff]  ;;  %vm1339_vm4 = vcmp.gt.s32.totalorder %v3526_v0, 7 }
 0x106   : > { %v569_v55 = vsub.f32 1.0, %v568_v52  ;;  %vm594_vm9 = vmor %vm592_vm7, %vm593_vm8 }
 0x107   : > { %v589_v57 = vsub.f32 1.0, %v588_v53 }
 0x108   : > { %v570_v62 = vmul.f32 %v2908_v50, %v569_v55 }
 0x109   : > { %v590_v16 = vmul.f32 %v2910_v51, %v589_v57 }
 0x10a   : > { %v571_v41 = vadd.f32 %v2908_v50, %v570_v62 }
 0x10b   : > { %v591_v11 = vadd.f32 %v2910_v51, %v590_v16  ;;  %v624_v16 = vunpack.c.l.bf16 %v2599_v47 }
 0x10c   : > { %v575_v8 = vsel %vm574_vm5, %v2908_v50, %v571_v41 }
 0x10d   : > { %v580_v9 = vsel %vm577_vm6, %v579_v3, %v575_v8  ;;  %v595_v33 = vsel %vm594_vm9, %v2910_v51, %v591_v11  ;;  %v625_v51 = vunpack.c.h.bf16 %v2599_v47 }
 0x10e   : > { %v606_v20 = vmul.f32 %v605_v2, %v580_v9  ;;  %v600_v35 = vsel %vm597_vm10, %v599_v43, %v595_v33  ;;  %v820_v43 = vsel %vm819_vm13, 1, %v3150_v58 }
 0x10f   : > { %v609_v44 = vsub.f32 1.0, %v600_v35  ;;  %v611_v52 = vmul.f32 0.0, %v600_v35  ;;  %822 = vperm.xlu1 %2901, %v820_v43  }
 0x110   : > { %v607_v32 = vadd.f32 %v606_v20, %v394_v5 }
 0x112   : > { %2911 = vtanh.f32 %v607_v32 }
 0x118   : > { %v2912_v45 = vpop.eup %2911 }
 0x119   : > { %v610_v50 = vmul.f32 %v2912_v45, %v609_v44 }
 0x11b   : > { %v612_v53 = vadd.f32 %v611_v52, %v610_v50 }
 0x11d   : > { %v3713_v55 = vsel %vm618_vm11, %v612_v53, 0.0  ;;  %v2602_v57 = vpack.c.bf16 %v612_v53, %v612_v53 }
 0x11e   : > { %620 = vst [vmem:[%s3258_s12] sm:$0xff] %v3713_v55 }
 0x11f   : > { %2603 = vmatmul.msk.bf16.vlgmr.msra.gmra.mxu3 %vm2601_vm12, %v2602_v57  ;;  %2606 = vmatmul.msk.bf16.vlgmr.msrb.gmra.mxu0 %vm2601_vm12, %v2602_v57 }
 0x120   : > { %2609 = vmatmul.msk.bf16.vlgmr.msrb.gmra.mxu1 %vm2601_vm12, %v2602_v57  ;;  %862 = vmatpush.bf16.msra.mxu3 %v3539_v22  ;;  %v924_v57 = vsel %vm923_vm14, 1, %v3150_v58 }
 0x121   : > { %940 = vmatpush.bf16.msrb.mxu0 %v3529_v6  ;;  %953 = vmatpush.bf16.msrb.mxu1 %v3531_v61 }
 0x122   : > { %926 = vperm.xlu1 %2901, %v924_v57  }
 0x124   : > { %863 = vmatpush.bf16.msra.mxu3 %v3543_v12 }
 0x125   : > { %941 = vmatpush.bf16.msrb.mxu0 %v3535_v46  ;;  %954 = vmatpush.bf16.msrb.mxu1 %v3537_v34 }
 0x128   : > { %864 = vmatpush.bf16.msra.mxu3 %v3557_v19 }
 0x129   : > { %942 = vmatpush.bf16.msrb.mxu0 %v3548_v37  ;;  %955 = vmatpush.bf16.msrb.mxu1 %v3550_v13 }
 0x12c   : > { %865 = vmatpush.bf16.msra.mxu3 %v3574_v4 }
 0x12d   : > { %943 = vmatpush.bf16.msrb.mxu0 %v3564_v1  ;;  %956 = vmatpush.bf16.msrb.mxu1 %v3568_v7 }
 0x130   : > { %866 = vmatpush.bf16.msra.mxu3 %v3591_v31 }
 0x131   : > { %944 = vmatpush.bf16.msrb.mxu0 %v3582_v25  ;;  %957 = vmatpush.bf16.msrb.mxu1 %v3586_v28 }
 0x134   : > { %867 = vmatpush.bf16.msra.mxu3 %v3608_v40 }
 0x135   : > { %945 = vmatpush.bf16.msrb.mxu0 %v3598_v39  ;;  %958 = vmatpush.bf16.msrb.mxu1 %v3602_v38 }
 0x138   : > { %868 = vmatpush.bf16.msra.mxu3 %v3625_v29 }
 0x139   : > { %946 = vmatpush.bf16.msrb.mxu0 %v3616_v26  ;;  %959 = vmatpush.bf16.msrb.mxu1 %v3620_v27 }
 0x13c   : > { %869 = vmatpush.bf16.msra.mxu3 %v3641_v17 }
 0x13d   : > { %947 = vmatpush.bf16.msrb.mxu0 %v3632_v15  ;;  %960 = vmatpush.bf16.msrb.mxu1 %v3636_v14 }
 0x19c   : > { %v650_v59 = vpop.f32.mrf.mxu0 }
 0x19d   : > { %v687_v62 = vadd.f32 %v650_v59, %v625_v51  ;;  %v663_v63 = vpop.f32.mrf.mxu1  ;;  %v2600_v51 = vld [vmem:[%s3253_s9 + $0x14] sm:$0xf] }
 0x19f   : > { %v2611_v10 = vmul.f32 -1.442695, %v687_v62 }
 0x1a1   : > { %2913 = vpow2.f32 %v2611_v10  ;;  %v707_v10 = vadd.f32 %v663_v63, %v3709_v56 }
 0x1a2   : > { %v637_v41 = vpop.f32.mrf.mxu3 }
 0x1a3   : > { %v667_v2 = vadd.f32 %v637_v41, %v624_v16  ;;  %v626_v41 = vunpack.c.l.bf16 %v2600_v51 }
 0x1a4   : > { %v652_v3 = vpop.f32.mrf.mxu0 }
 0x1a5   : > { %v2610_v5 = vmul.f32 -1.442695, %v667_v2  ;;  %v665_v8 = vpop.f32.mrf.mxu1 }
 0x1a7   : > { %v2914_v9 = vpop.eup %2913  ;;  %2915 = vpow2.f32 %v2610_v5 }
 0x1a8   : > { %v691_v11 = vadd.f32 1.0, %v2914_v9 }
 0x1aa   : > { %v639_v20 = vpop.f32.mrf.mxu3  ;;  %2917 = vrcp.f32 %v691_v11  ;;  %v703_v5 = vand.u32 2147483648, %v691_v11  ;;  %vm697_vm5 = vweird.f32 %v691_v11  ;;  %v701_v9 = vand.u32 2147483647, %v691_v11 }
 0x1ac   : > { %vm702_vm7 = vcmp.eq.f32.partialorder %v701_v9, 8.507059e+37 }
 0x1ad   : > { %v2916_v21 = vpop.eup %2915 }
 0x1ae   : > { %v671_v23 = vadd.f32 1.0, %v2916_v21  ;;  %v1340_v21 = vsel %vm1339_vm4, 1, %v3150_v58 }
 0x1af   : > { %1342 = vperm.xlu1 %2901, %v1340_v21  }
 0x1b0   : > { %2919 = vrcp.f32 %v671_v23  ;;  %v2918_v32 = vpop.eup %2917  ;;  %v683_v50 = vand.u32 2147483648, %v671_v23  ;;  %v681_v53 = vand.u32 2147483647, %v671_v23  ;;  %vm677_vm0 = vweird.f32 %v671_v23 }
 0x1b1   : > { %v693_v33 = vmul.f32 %v2918_v32, %v691_v11  ;;  %vm698_vm3 = vweird.f32 %v2918_v32 }
 0x1b2   : > { %v684_v62 = vor.u32 1.1754944e-38, %v683_v50  ;;  %vm682_vm2 = vcmp.eq.f32.partialorder %v681_v53, 8.507059e+37  ;;  %vm699_vm6 = vmor %vm697_vm5, %vm698_vm3  ;;  %vm1131_vm3 = vcmp.gt.s32.totalorder %v3526_v0, 5 }
 0x1b3   : > { %v694_v45 = vsub.f32 1.0, %v693_v33  ;;  %v704_v33 = vor.u32 1.1754944e-38, %v703_v5 }
 0x1b5   : > { %v695_v47 = vmul.f32 %v2918_v32, %v694_v45 }
 0x1b6   : > { %v2920_v35 = vpop.eup %2919 }
 0x1b7   : > { %v673_v44 = vmul.f32 %v2920_v35, %v671_v23  ;;  %vm678_vm15 = vweird.f32 %v2920_v35  ;;  %v696_v2 = vadd.f32 %v2918_v32, %v695_v47 }
 0x1b8   : > { %vm679_vm1 = vmor %vm677_vm0, %vm678_vm15 }
 0x1b9   : > { %v674_v49 = vsub.f32 1.0, %v673_v44  ;;  %v700_v23 = vsel %vm699_vm6, %v2918_v32, %v696_v2 }
 0x1ba   : > { %v705_v63 = vsel %vm702_vm7, %v704_v33, %v700_v23 }
 0x1bb   : > { %v675_v52 = vmul.f32 %v2920_v35, %v674_v49  ;;  %v711_v43 = vsub.f32 1.0, %v705_v63  ;;  %v713_v45 = vmul.f32 %v705_v63, %v3713_v55  ;;  %v719_v49 = vpop.permute.xlu0 %718 }
 0x1bc   : > { %vm720_vm8 = vcmp.eq.s32.totalorder %v719_v49, 1 }
 0x1bd   : > { %v676_v59 = vadd.f32 %v2920_v35, %v675_v52 }
 0x1bf   : > { %v680_v16 = vsel %vm679_vm1, %v2920_v35, %v676_v59 }
 0x1c0   : > { %v685_v3 = vsel %vm682_vm2, %v684_v62, %v680_v16  ;;  %vm1027_vm2 = vcmp.gt.s32.totalorder %v3526_v0, 4 }
 0x1c1   : > { %v708_v8 = vmul.f32 %v707_v10, %v685_v3 }
 0x1c3   : > { %v709_v20 = vadd.f32 %v708_v8, %v626_v41 }
 0x1c5   : > { %2921 = vtanh.f32 %v709_v20 }
 0x1cb   : > { %v2922_v35 = vpop.eup %2921 }
 0x1cc   : > { %v712_v44 = vmul.f32 %v2922_v35, %v711_v43 }
 0x1ce   : > { %v714_v50 = vadd.f32 %v713_v45, %v712_v44 }
 0x1d0   : > { %v721_v11 = vsel %vm720_vm8, %v714_v50, 0.0  ;;  %v3752_v52 = vsel %vm720_vm8, %v714_v50, %v3713_v55  ;;  %v2613_v55 = vld [vmem:[%s3253_s9 + $0x18] sm:$0xff] }
 0x1d1   : > { %2612 = vst [vmem:[%s3258_s12 + $0x8] sm:$0xff] %v721_v11  ;;  %v731_v32 = vpack.c.bf16 %v3752_v52, %v3752_v52  ;;  %v728_v57 = vunpack.c.l.bf16 %v2613_v55  ;;  %v729_v47 = vunpack.c.h.bf16 %v2613_v55  ;;  %v2614_v11 = vld [vmem:[%s3253_s9 + $0x20] sm:$0xf] }
 0x1d3   : > { %740 = vmatmul.bf16.vlgmr.msrb.gmra.mxu2 %v731_v32  ;;  %753 = vmatmul.bf16.vlgmr.msrb.gmra.mxu3 %v731_v32 }
 0x1d4   : > { %766 = vmatmul.bf16.vlgmr.msra.gmra.mxu0 %v731_v32  ;;  %966 = vmatpush.bf16.msrb.mxu2 %v3539_v22 }
 0x1d5   : > { %1044 = vmatpush.bf16.msrb.mxu3 %v3529_v6  ;;  %1057 = vmatpush.bf16.msra.mxu0 %v3531_v61 }
 0x1d8   : > { %967 = vmatpush.bf16.msrb.mxu2 %v3543_v12 }
 0x1d9   : > { %1045 = vmatpush.bf16.msrb.mxu3 %v3535_v46  ;;  %1058 = vmatpush.bf16.msra.mxu0 %v3537_v34 }
 0x1dc   : > { %968 = vmatpush.bf16.msrb.mxu2 %v3557_v19 }
 0x1dd   : > { %1046 = vmatpush.bf16.msrb.mxu3 %v3548_v37  ;;  %1059 = vmatpush.bf16.msra.mxu0 %v3550_v13 }
 0x1e0   : > { %969 = vmatpush.bf16.msrb.mxu2 %v3574_v4 }
 0x1e1   : > { %1047 = vmatpush.bf16.msrb.mxu3 %v3564_v1  ;;  %1060 = vmatpush.bf16.msra.mxu0 %v3568_v7 }
 0x1e4   : > { %970 = vmatpush.bf16.msrb.mxu2 %v3591_v31 }
 0x1e5   : > { %1048 = vmatpush.bf16.msrb.mxu3 %v3582_v25  ;;  %1061 = vmatpush.bf16.msra.mxu0 %v3586_v28 }
 0x1e8   : > { %971 = vmatpush.bf16.msrb.mxu2 %v3608_v40 }
 0x1e9   : > { %1049 = vmatpush.bf16.msrb.mxu3 %v3598_v39  ;;  %1062 = vmatpush.bf16.msra.mxu0 %v3602_v38 }
 0x1ec   : > { %972 = vmatpush.bf16.msrb.mxu2 %v3625_v29 }
 0x1ed   : > { %1050 = vmatpush.bf16.msrb.mxu3 %v3616_v26  ;;  %1063 = vmatpush.bf16.msra.mxu0 %v3620_v27 }
 0x1f0   : > { %973 = vmatpush.bf16.msrb.mxu2 %v3641_v17 }
 0x1f1   : > { %1051 = vmatpush.bf16.msrb.mxu3 %v3632_v15  ;;  %1064 = vmatpush.bf16.msra.mxu0 %v3636_v14 }
 0x251   : > { %v767_v53 = vpop.f32.mrf.mxu0 }
 0x256   : > { %v741_v51 = vpop.f32.mrf.mxu2  ;;  %v754_v59 = vpop.f32.mrf.mxu3 }
 0x257   : > { %v771_v62 = vadd.f32 %v741_v51, %v728_v57  ;;  %v791_v10 = vadd.f32 %v754_v59, %v729_v47  ;;  %v811_v47 = vadd.f32 %v767_v53, %v3709_v56  ;;  %v730_v51 = vunpack.c.l.bf16 %v2614_v11 }
 0x259   : > { %v2615_v16 = vmul.f32 -1.442695, %v771_v62  ;;  %v2616_v41 = vmul.f32 -1.442695, %v791_v10  ;;  %v769_v2 = vpop.f32.mrf.mxu0 }
 0x25b   : > { %2923 = vpow2.f32 %v2615_v16 }
 0x25c   : > { %2925 = vpow2.f32 %v2616_v41 }
 0x25e   : > { %v743_v3 = vpop.f32.mrf.mxu2  ;;  %v756_v5 = vpop.f32.mrf.mxu3 }
 0x261   : > { %v2924_v8 = vpop.eup %2923 }
 0x262   : > { %v2926_v9 = vpop.eup %2925  ;;  %v775_v20 = vadd.f32 1.0, %v2924_v8 }
 0x263   : > { %v795_v21 = vadd.f32 1.0, %v2926_v9 }
 0x264   : > { %2927 = vrcp.f32 %v775_v20  ;;  %v787_v44 = vand.u32 2147483648, %v775_v20  ;;  %v785_v50 = vand.u32 2147483647, %v775_v20  ;;  %vm781_vm10 = vweird.f32 %v775_v20 }
 0x265   : > { %2929 = vrcp.f32 %v795_v21  ;;  %v807_v16 = vand.u32 2147483648, %v795_v21  ;;  %vm801_vm14 = vweird.f32 %v795_v21  ;;  %v805_v2 = vand.u32 2147483647, %v795_v21 }
 0x266   : > { %v788_v57 = vor.u32 1.1754944e-38, %v787_v44  ;;  %vm786_vm12 = vcmp.eq.f32.partialorder %v785_v50, 8.507059e+37 }
 0x267   : > { %v808_v8 = vor.u32 1.1754944e-38, %v807_v16  ;;  %vm806_vm0 = vcmp.eq.f32.partialorder %v805_v2, 8.507059e+37 }
 0x26a   : > { %v2928_v23 = vpop.eup %2927 }
 0x26b   : > { %v2930_v33 = vpop.eup %2929  ;;  %v777_v63 = vmul.f32 %v2928_v23, %v775_v20  ;;  %vm782_vm9 = vweird.f32 %v2928_v23 }
 0x26c   : > { %v797_v43 = vmul.f32 %v2930_v33, %v795_v21  ;;  %vm783_vm11 = vmor %vm781_vm10, %vm782_vm9  ;;  %vm802_vm13 = vweird.f32 %v2930_v33 }
 0x26d   : > { %v778_v35 = vsub.f32 1.0, %v777_v63  ;;  %vm803_vm15 = vmor %vm801_vm14, %vm802_vm13  ;;  %v823_v63 = vpop.permute.xlu1 %822 }
 0x26e   : > { %v798_v45 = vsub.f32 1.0, %v797_v43  ;;  %vm824_vm1 = vcmp.eq.s32.totalorder %v823_v63, 1  ;;  %v2619_v63 = vld [vmem:[%s3253_s9 + $0x2c] sm:$0xf] }
 0x26f   : > { %v779_v49 = vmul.f32 %v2928_v23, %v778_v35 }
 0x270   : > { %v799_v32 = vmul.f32 %v2930_v33, %v798_v45 }
 0x271   : > { %v780_v55 = vadd.f32 %v2928_v23, %v779_v49 }
 0x272   : > { %v800_v10 = vadd.f32 %v2930_v33, %v799_v32 }
 0x273   : > { %v784_v59 = vsel %vm783_vm11, %v2928_v23, %v780_v55 }
 0x274   : > { %v789_v62 = vsel %vm786_vm12, %v788_v57, %v784_v59  ;;  %v804_v5 = vsel %vm803_vm15, %v2930_v33, %v800_v10 }
 0x275   : > { %v812_v41 = vmul.f32 %v811_v47, %v789_v62  ;;  %v809_v9 = vsel %vm806_vm0, %v808_v8, %v804_v5  ;;  %v1028_v5 = vsel %vm1027_vm2, 1, %v3150_v58 }
 0x276   : > { %v815_v20 = vsub.f32 1.0, %v809_v9  ;;  %v817_v23 = vmul.f32 %v809_v9, %v3752_v52  ;;  %1030 = vperm.xlu2 %2902, %v1028_v5  }
 0x277   : > { %v813_v3 = vadd.f32 %v812_v41, %v730_v51 }
 0x279   : > { %2931 = vtanh.f32 %v813_v3 }
 0x27f   : > { %v2932_v53 = vpop.eup %2931 }
 0x280   : > { %v816_v43 = vmul.f32 %v2932_v53, %v815_v20 }
 0x282   : > { %v818_v35 = vadd.f32 %v817_v23, %v816_v43 }
 0x284   : > { %v825_v44 = vsel %vm824_vm1, %v818_v35, 0.0  ;;  %v3786_v45 = vsel %vm824_vm1, %v818_v35, %v3752_v52  ;;  %v2618_v52 = vld [vmem:[%s3253_s9 + $0x24] sm:$0xff]  ;;  %v1132_v35 = vsel %vm1131_vm3, 1, %v3150_v58 }
 0x285   : > { %2617 = vst [vmem:[%s3258_s12 + $0x10] sm:$0xff] %v825_v44  ;;  %v835_v21 = vpack.c.bf16 %v3786_v45, %v3786_v45  ;;  %v832_v33 = vunpack.c.l.bf16 %v2618_v52  ;;  %v833_v32 = vunpack.c.h.bf16 %v2618_v52  ;;  %1134 = vperm.xlu2 %2902, %v1132_v35  }
 0x287   : > { %844 = vmatmul.bf16.vlgmr.msra.gmra.mxu1 %v835_v21  ;;  %857 = vmatmul.bf16.vlgmr.msra.gmra.mxu2 %v835_v21 }
 0x288   : > { %870 = vmatmul.bf16.vlgmr.msra.gmra.mxu3 %v835_v21  ;;  %1070 = vmatpush.bf16.msra.mxu1 %v3539_v22 }
 0x289   : > { %1148 = vmatpush.bf16.msra.mxu2 %v3529_v6  ;;  %1161 = vmatpush.bf16.msra.mxu3 %v3531_v61 }
 0x28c   : > { %1071 = vmatpush.bf16.msra.mxu1 %v3543_v12 }
 0x28d   : > { %1149 = vmatpush.bf16.msra.mxu2 %v3535_v46  ;;  %1162 = vmatpush.bf16.msra.mxu3 %v3537_v34 }
 0x290   : > { %1072 = vmatpush.bf16.msra.mxu1 %v3557_v19 }
 0x291   : > { %1150 = vmatpush.bf16.msra.mxu2 %v3548_v37  ;;  %1163 = vmatpush.bf16.msra.mxu3 %v3550_v13 }
 0x294   : > { %1073 = vmatpush.bf16.msra.mxu1 %v3574_v4 }
 0x295   : > { %1151 = vmatpush.bf16.msra.mxu2 %v3564_v1  ;;  %1164 = vmatpush.bf16.msra.mxu3 %v3568_v7 }
 0x298   : > { %1074 = vmatpush.bf16.msra.mxu1 %v3591_v31 }
 0x299   : > { %1152 = vmatpush.bf16.msra.mxu2 %v3582_v25  ;;  %1165 = vmatpush.bf16.msra.mxu3 %v3586_v28 }
 0x29c   : > { %1075 = vmatpush.bf16.msra.mxu1 %v3608_v40 }
 0x29d   : > { %1153 = vmatpush.bf16.msra.mxu2 %v3598_v39  ;;  %1166 = vmatpush.bf16.msra.mxu3 %v3602_v38 }
 0x2a0   : > { %1076 = vmatpush.bf16.msra.mxu1 %v3625_v29 }
 0x2a1   : > { %1154 = vmatpush.bf16.msra.mxu2 %v3616_v26  ;;  %1167 = vmatpush.bf16.msra.mxu3 %v3620_v27 }
 0x2a4   : > { %1077 = vmatpush.bf16.msra.mxu1 %v3641_v17 }
 0x2a5   : > { %1155 = vmatpush.bf16.msra.mxu2 %v3632_v15  ;;  %1168 = vmatpush.bf16.msra.mxu3 %v3636_v14 }
 0x304   : > { %v845_v49 = vpop.f32.mrf.mxu1 }
 0x305   : > { %v875_v50 = vadd.f32 %v845_v49, %v832_v33  ;;  %v834_v33 = vunpack.c.l.bf16 %v2619_v63 }
 0x307   : > { %v2620_v11 = vmul.f32 -1.442695, %v875_v50 }
 0x309   : > { %2933 = vpow2.f32 %v2620_v11 }
 0x30a   : > { %v858_v55 = vpop.f32.mrf.mxu2 }
 0x30b   : > { %v895_v57 = vadd.f32 %v858_v55, %v833_v32  ;;  %v871_v47 = vpop.f32.mrf.mxu3 }
 0x30c   : > { %v847_v51 = vpop.f32.mrf.mxu1  ;;  %v915_v32 = vadd.f32 %v871_v47, %v3709_v56 }
 0x30d   : > { %v2621_v59 = vmul.f32 -1.442695, %v895_v57 }
 0x30f   : > { %v2934_v62 = vpop.eup %2933  ;;  %2935 = vpow2.f32 %v2621_v59 }
 0x310   : > { %v879_v10 = vadd.f32 1.0, %v2934_v62 }
 0x312   : > { %2937 = vrcp.f32 %v879_v10  ;;  %v860_v16 = vpop.f32.mrf.mxu2  ;;  %v891_v53 = vand.u32 2147483648, %v879_v10  ;;  %v889_v23 = vand.u32 2147483647, %v879_v10  ;;  %vm885_vm5 = vweird.f32 %v879_v10 }
 0x313   : > { %v873_v41 = vpop.f32.mrf.mxu3 }
 0x314   : > { %v892_v49 = vor.u32 1.1754944e-38, %v891_v53  ;;  %vm890_vm7 = vcmp.eq.f32.partialorder %v889_v23, 8.507059e+37 }
 0x315   : > { %v2936_v2 = vpop.eup %2935 }
 0x316   : > { %v899_v3 = vadd.f32 1.0, %v2936_v2 }
 0x318   : > { %v2938_v8 = vpop.eup %2937  ;;  %2939 = vrcp.f32 %v899_v3  ;;  %v911_v51 = vand.u32 2147483648, %v899_v3  ;;  %v909_v62 = vand.u32 2147483647, %v899_v3  ;;  %vm905_vm9 = vweird.f32 %v899_v3 }
 0x319   : > { %v881_v9 = vmul.f32 %v2938_v8, %v879_v10  ;;  %vm886_vm4 = vweird.f32 %v2938_v8 }
 0x31a   : > { %vm887_vm6 = vmor %vm885_vm5, %vm886_vm4  ;;  %v912_v10 = vor.u32 1.1754944e-38, %v911_v51  ;;  %vm910_vm11 = vcmp.eq.f32.partialorder %v909_v62, 8.507059e+37 }
 0x31b   : > { %v882_v20 = vsub.f32 1.0, %v881_v9 }
 0x31d   : > { %v883_v43 = vmul.f32 %v2938_v8, %v882_v20  ;;  %v927_v20 = vpop.permute.xlu1 %926 }
 0x31e   : > { %v2940_v44 = vpop.eup %2939  ;;  %vm928_vm12 = vcmp.eq.s32.totalorder %v927_v20, 1 }
 0x31f   : > { %v901_v21 = vmul.f32 %v2940_v44, %v899_v3  ;;  %v884_v52 = vadd.f32 %v2938_v8, %v883_v43  ;;  %vm906_vm8 = vweird.f32 %v2940_v44 }
 0x320   : > { %vm907_vm10 = vmor %vm905_vm9, %vm906_vm8 }
 0x321   : > { %v902_v50 = vsub.f32 1.0, %v901_v21  ;;  %v888_v11 = vsel %vm887_vm6, %v2938_v8, %v884_v52 }
 0x322   : > { %v893_v55 = vsel %vm890_vm7, %v892_v49, %v888_v11 }
 0x323   : > { %v903_v57 = vmul.f32 %v2940_v44, %v902_v50  ;;  %v916_v59 = vmul.f32 %v915_v32, %v893_v55  ;;  %v2624_v32 = vld [vmem:[%s3253_s9 + $0x38] sm:$0xf] }
 0x325   : > { %v904_v58 = vadd.f32 %v2940_v44, %v903_v57  ;;  %v917_v16 = vadd.f32 %v916_v59, %v834_v33  ;;  %v938_v59 = vunpack.c.l.bf16 %v2624_v32 }
 0x327   : > { %v908_v41 = vsel %vm907_vm10, %v2940_v44, %v904_v58  ;;  %2941 = vtanh.f32 %v917_v16 }
 0x328   : > { %v913_v2 = vsel %vm910_vm11, %v912_v10, %v908_v41 }
 0x329   : > { %v919_v5 = vsub.f32 1.0, %v913_v2  ;;  %v921_v47 = vmul.f32 %v913_v2, %v3786_v45 }
 0x32d   : > { %v2942_v8 = vpop.eup %2941 }
 0x32e   : > { %v920_v9 = vmul.f32 %v2942_v8, %v919_v5 }
 0x330   : > { %v922_v53 = vadd.f32 %v921_v47, %v920_v9 }
 0x332   : > { %v929_v63 = vsel %vm928_vm12, %v922_v53, 0.0  ;;  %v3824_v43 = vsel %vm928_vm12, %v922_v53, %v3786_v45 }
 0x333   : > { %2622 = vst [vmem:[%s3258_s12 + $0x18] sm:$0xff] %v929_v63  ;;  %v939_v3 = vpack.c.bf16 %v3824_v43, %v3824_v43 }
 0x335   : > { %948 = vmatmul.bf16.vlgmr.msrb.gmra.mxu0 %v939_v3  ;;  %961 = vmatmul.bf16.vlgmr.msrb.gmra.mxu1 %v939_v3 }
 0x336   : > { %974 = vmatmul.bf16.vlgmr.msrb.gmra.mxu2 %v939_v3  ;;  %1174 = vmatpush.bf16.msrb.mxu0 %v3539_v22  ;;  %v1031_v3 = vpop.permute.xlu2 %1030 }
 0x337   : > { %1252 = vmatpush.bf16.msrb.mxu1 %v3529_v6  ;;  %1265 = vmatpush.bf16.msrb.mxu2 %v3531_v61  ;;  %v2623_v6 = vld [vmem:[%s3253_s9 + $0x30] sm:$0xff]  ;;  %vm1032_vm5 = vcmp.eq.s32.totalorder %v1031_v3, 1 }
 0x33a   : > { %1175 = vmatpush.bf16.msrb.mxu0 %v3543_v12 }
 0x33b   : > { %1253 = vmatpush.bf16.msrb.mxu1 %v3535_v46  ;;  %1266 = vmatpush.bf16.msrb.mxu2 %v3537_v34  ;;  %v936_v34 = vunpack.c.l.bf16 %v2623_v6  ;;  %v937_v46 = vunpack.c.h.bf16 %v2623_v6 }
 0x33e   : > { %1176 = vmatpush.bf16.msrb.mxu0 %v3557_v19 }
 0x33f   : > { %1254 = vmatpush.bf16.msrb.mxu1 %v3548_v37  ;;  %1267 = vmatpush.bf16.msrb.mxu2 %v3550_v13 }
 0x342   : > { %1177 = vmatpush.bf16.msrb.mxu0 %v3574_v4 }
 0x343   : > { %1255 = vmatpush.bf16.msrb.mxu1 %v3564_v1  ;;  %1268 = vmatpush.bf16.msrb.mxu2 %v3568_v7 }
 0x346   : > { %1178 = vmatpush.bf16.msrb.mxu0 %v3591_v31 }
 0x347   : > { %1256 = vmatpush.bf16.msrb.mxu1 %v3582_v25  ;;  %1269 = vmatpush.bf16.msrb.mxu2 %v3586_v28 }
 0x34a   : > { %1179 = vmatpush.bf16.msrb.mxu0 %v3608_v40 }
 0x34b   : > { %1257 = vmatpush.bf16.msrb.mxu1 %v3598_v39  ;;  %1270 = vmatpush.bf16.msrb.mxu2 %v3602_v38 }
 0x34e   : > { %1180 = vmatpush.bf16.msrb.mxu0 %v3625_v29 }
 0x34f   : > { %1258 = vmatpush.bf16.msrb.mxu1 %v3616_v26  ;;  %1271 = vmatpush.bf16.msrb.mxu2 %v3620_v27 }
 0x352   : > { %1181 = vmatpush.bf16.msrb.mxu0 %v3641_v17 }
 0x353   : > { %1259 = vmatpush.bf16.msrb.mxu1 %v3632_v15  ;;  %1272 = vmatpush.bf16.msrb.mxu2 %v3636_v14 }
 0x3b2   : > { %v949_v61 = vpop.f32.mrf.mxu0  ;;  %v962_v37 = vpop.f32.mrf.mxu1 }
 0x3b3   : > { %v979_v13 = vadd.f32 %v949_v61, %v936_v34  ;;  %v999_v1 = vadd.f32 %v962_v37, %v937_v46 }
 0x3b5   : > { %v2625_v7 = vmul.f32 -1.442695, %v979_v13  ;;  %v2626_v25 = vmul.f32 -1.442695, %v999_v1 }
 0x3b7   : > { %2943 = vpow2.f32 %v2625_v7 }
 0x3b8   : > { %2945 = vpow2.f32 %v2626_v25 }
 0x3b9   : > { %v975_v28 = vpop.f32.mrf.mxu2 }
 0x3ba   : > { %v951_v39 = vpop.f32.mrf.mxu0  ;;  %v964_v38 = vpop.f32.mrf.mxu1  ;;  %v1019_v58 = vadd.f32 %v975_v28, %v3709_v56 }
 0x3bd   : > { %v2944_v26 = vpop.eup %2943 }
 0x3be   : > { %v2946_v27 = vpop.eup %2945  ;;  %v983_v15 = vadd.f32 1.0, %v2944_v26 }
 0x3bf   : > { %v1003_v45 = vadd.f32 1.0, %v2946_v27 }
 0x3c0   : > { %2947 = vrcp.f32 %v983_v15  ;;  %v995_v49 = vand.u32 2147483648, %v983_v15  ;;  %v993_v11 = vand.u32 2147483647, %v983_v15  ;;  %vm989_vm14 = vweird.f32 %v983_v15 }
 0x3c1   : > { %2949 = vrcp.f32 %v1003_v45  ;;  %v977_v14 = vpop.f32.mrf.mxu2  ;;  %v1015_v2 = vand.u32 2147483648, %v1003_v45  ;;  %vm1009_vm2 = vweird.f32 %v1003_v45  ;;  %v1013_v5 = vand.u32 2147483647, %v1003_v45 }
 0x3c2   : > { %v996_v51 = vor.u32 1.1754944e-38, %v995_v49  ;;  %vm994_vm0 = vcmp.eq.f32.partialorder %v993_v11, 8.507059e+37 }
 0x3c3   : > { %v1016_v47 = vor.u32 1.1754944e-38, %v1015_v2  ;;  %vm1014_vm4 = vcmp.eq.f32.partialorder %v1013_v5, 8.507059e+37 }
 0x3c6   : > { %v2948_v23 = vpop.eup %2947 }
 0x3c7   : > { %v2950_v35 = vpop.eup %2949  ;;  %v985_v44 = vmul.f32 %v2948_v23, %v983_v15  ;;  %vm990_vm13 = vweird.f32 %v2948_v23 }
 0x3c8   : > { %v1005_v21 = vmul.f32 %v2950_v35, %v1003_v45  ;;  %vm991_vm15 = vmor %vm989_vm14, %vm990_vm13  ;;  %vm1010_vm1 = vweird.f32 %v2950_v35 }
 0x3c9   : > { %v986_v52 = vsub.f32 1.0, %v985_v44  ;;  %vm1011_vm3 = vmor %vm1009_vm2, %vm1010_vm1 }
 0x3ca   : > { %v1006_v33 = vsub.f32 1.0, %v1005_v21 }
 0x3cb   : > { %v987_v50 = vmul.f32 %v2948_v23, %v986_v52 }
 0x3cc   : > { %v1007_v55 = vmul.f32 %v2950_v35, %v1006_v33 }
 0x3cd   : > { %v988_v57 = vadd.f32 %v2948_v23, %v987_v50  ;;  %v2629_v50 = vld [vmem:[%s3253_s9 + $0x44] sm:$0xf] }
 0x3ce   : > { %v1008_v10 = vadd.f32 %v2950_v35, %v1007_v55 }
 0x3cf   : > { %v992_v62 = vsel %vm991_vm15, %v2948_v23, %v988_v57  ;;  %v1042_v57 = vunpack.c.l.bf16 %v2629_v50 }
 0x3d0   : > { %v997_v16 = vsel %vm994_vm0, %v996_v51, %v992_v62  ;;  %v1012_v9 = vsel %vm1011_vm3, %v2950_v35, %v1008_v10 }
 0x3d1   : > { %v1020_v41 = vmul.f32 %v1019_v58, %v997_v16  ;;  %v1017_v20 = vsel %vm1014_vm4, %v1016_v47, %v1012_v9 }
 0x3d2   : > { %v1023_v53 = vsub.f32 1.0, %v1017_v20  ;;  %v1025_v34 = vmul.f32 %v1017_v20, %v3824_v43  ;;  %v1135_v20 = vpop.permute.xlu2 %1134 }
 0x3d3   : > { %v1021_v8 = vadd.f32 %v1020_v41, %v938_v59  ;;  %vm1136_vm14 = vcmp.eq.s32.totalorder %v1135_v20, 1 }
 0x3d5   : > { %2951 = vtanh.f32 %v1021_v8 }
 0x3db   : > { %v2952_v63 = vpop.eup %2951 }
 0x3dc   : > { %v1024_v6 = vmul.f32 %v2952_v63, %v1023_v53 }
 0x3de   : > { %v1026_v46 = vadd.f32 %v1025_v34, %v1024_v6 }
 0x3e0   : > { %v1033_v61 = vsel %vm1032_vm5, %v1026_v46, 0.0  ;;  %v3858_v37 = vsel %vm1032_vm5, %v1026_v46, %v3824_v43  ;;  %v2628_v43 = vld [vmem:[%s3253_s9 + $0x3c] sm:$0xff] }
 0x3e1   : > { %2627 = vst [vmem:[%s3258_s12 + $0x20] sm:$0xff] %v1033_v61  ;;  %v1043_v13 = vpack.c.bf16 %v3858_v37, %v3858_v37  ;;  %v1041_v1 = vunpack.c.h.bf16 %v2628_v43  ;;  %v1040_v39 = vunpack.c.l.bf16 %v2628_v43  ;;  %v2633_v61 = vld [vmem:[%s3253_s9 + $0x48] sm:$0xff] }
 0x3e2   : > { %v1144_v43 = vunpack.c.l.bf16 %v2633_v61 }
 0x3e3   : > { %1052 = vmatmul.bf16.vlgmr.msrb.gmra.mxu3 %v1043_v13  ;;  %1065 = vmatmul.bf16.vlgmr.msra.gmra.mxu0 %v1043_v13 }
 0x3e4   : > { %1078 = vmatmul.bf16.vlgmr.msra.gmra.mxu1 %v1043_v13  ;;  %1278 = vmatpush.bf16.msrb.mxu3 %v3539_v22 }
 0x3e8   : > { %1279 = vmatpush.bf16.msrb.mxu3 %v3543_v12 }
 0x3ec   : > { %1280 = vmatpush.bf16.msrb.mxu3 %v3557_v19 }
 0x3f0   : > { %1281 = vmatpush.bf16.msrb.mxu3 %v3574_v4 }
 0x3f4   : > { %1282 = vmatpush.bf16.msrb.mxu3 %v3591_v31 }
 0x3f8   : > { %1283 = vmatpush.bf16.msrb.mxu3 %v3608_v40 }
 0x3fc   : > { %1284 = vmatpush.bf16.msrb.mxu3 %v3625_v29 }
 0x400   : > { %1285 = vmatpush.bf16.msrb.mxu3 %v3641_v17 }
 0x460   : > { %v1066_v7 = vpop.f32.mrf.mxu0 }
 0x461   : > { %v1103_v25 = vadd.f32 %v1066_v7, %v1041_v1  ;;  %v1079_v28 = vpop.f32.mrf.mxu1  ;;  %v1145_v1 = vunpack.c.h.bf16 %v2633_v61 }
 0x462   : > { %v1123_v55 = vadd.f32 %v1079_v28, %v3709_v56 }
 0x463   : > { %v2631_v22 = vmul.f32 -1.442695, %v1103_v25 }
 0x465   : > { %2953 = vpow2.f32 %v2631_v22 }
 0x466   : > { %v1053_v12 = vpop.f32.mrf.mxu3 }
 0x467   : > { %v1083_v19 = vadd.f32 %v1053_v12, %v1040_v39 }
 0x468   : > { %v1068_v38 = vpop.f32.mrf.mxu0 }
 0x469   : > { %v2630_v4 = vmul.f32 -1.442695, %v1083_v19  ;;  %v1081_v26 = vpop.f32.mrf.mxu1 }
 0x46b   : > { %v2954_v31 = vpop.eup %2953  ;;  %2955 = vpow2.f32 %v2630_v4 }
 0x46c   : > { %v1107_v40 = vadd.f32 1.0, %v2954_v31 }
 0x46e   : > { %v1055_v27 = vpop.f32.mrf.mxu3  ;;  %2957 = vrcp.f32 %v1107_v40  ;;  %v1119_v58 = vand.u32 2147483648, %v1107_v40  ;;  %vm1113_vm11 = vweird.f32 %v1107_v40  ;;  %v1117_v10 = vand.u32 2147483647, %v1107_v40 }
 0x470   : > { %v1120_v5 = vor.u32 1.1754944e-38, %v1119_v58  ;;  %vm1118_vm13 = vcmp.eq.f32.partialorder %v1117_v10, 8.507059e+37 }
 0x471   : > { %v2956_v29 = vpop.eup %2955 }
 0x472   : > { %v1087_v17 = vadd.f32 1.0, %v2956_v29 }
 0x474   : > { %2959 = vrcp.f32 %v1087_v17  ;;  %v2958_v15 = vpop.eup %2957  ;;  %v1099_v21 = vand.u32 2147483648, %v1087_v17  ;;  %v1097_v33 = vand.u32 2147483647, %v1087_v17  ;;  %vm1093_vm7 = vweird.f32 %v1087_v17 }
 0x475   : > { %v1109_v45 = vmul.f32 %v2958_v15, %v1107_v40  ;;  %vm1114_vm10 = vweird.f32 %v2958_v15 }
 0x476   : > { %v1100_v32 = vor.u32 1.1754944e-38, %v1099_v21  ;;  %vm1098_vm9 = vcmp.eq.f32.partialorder %v1097_v33, 8.507059e+37  ;;  %vm1115_vm12 = vmor %vm1113_vm11, %vm1114_vm10  ;;  %v2634_v21 = vld [vmem:[%s3253_s9 + $0x50] sm:$0xf] }
 0x477   : > { %v1110_v35 = vsub.f32 1.0, %v1109_v45 }
 0x479   : > { %v1111_v49 = vmul.f32 %v2958_v15, %v1110_v35 }
 0x47a   : > { %v2960_v14 = vpop.eup %2959 }
 0x47b   : > { %v1089_v23 = vmul.f32 %v2960_v14, %v1087_v17  ;;  %vm1094_vm6 = vweird.f32 %v2960_v14  ;;  %v1112_v59 = vadd.f32 %v2958_v15, %v1111_v49 }
 0x47c   : > { %vm1095_vm8 = vmor %vm1093_vm7, %vm1094_vm6 }
 0x47d   : > { %v1090_v44 = vsub.f32 1.0, %v1089_v23  ;;  %v1116_v2 = vsel %vm1115_vm12, %v2958_v15, %v1112_v59 }
 0x47e   : > { %v1121_v8 = vsel %vm1118_vm13, %v1120_v5, %v1116_v2 }
 0x47f   : > { %v1091_v52 = vmul.f32 %v2960_v14, %v1090_v44  ;;  %v1127_v9 = vsub.f32 1.0, %v1121_v8  ;;  %v1129_v63 = vmul.f32 %v1121_v8, %v3858_v37  ;;  %v1239_v8 = vpop.permute.xlu0 %1238 }
 0x480   : > { %vm1240_vm7 = vcmp.eq.s32.totalorder %v1239_v8, 1 }
 0x481   : > { %v1092_v11 = vadd.f32 %v2960_v14, %v1091_v52 }
 0x483   : > { %v1096_v51 = vsel %vm1095_vm8, %v2960_v14, %v1092_v11  ;;  %v1146_v11 = vunpack.c.l.bf16 %v2634_v21 }
 0x484   : > { %v1101_v62 = vsel %vm1098_vm9, %v1100_v32, %v1096_v51 }
 0x485   : > { %v1124_v16 = vmul.f32 %v1123_v55, %v1101_v62 }
 0x487   : > { %v1125_v41 = vadd.f32 %v1124_v16, %v1042_v57 }
 0x489   : > { %2961 = vtanh.f32 %v1125_v41 }
 0x48f   : > { %v2962_v47 = vpop.eup %2961 }
 0x490   : > { %v1128_v53 = vmul.f32 %v2962_v47, %v1127_v9 }
 0x492   : > { %v1130_v3 = vadd.f32 %v1129_v63, %v1128_v53 }
 0x494   : > { %v1137_v6 = vsel %vm1136_vm14, %v1130_v3, 0.0  ;;  %v3876_v34 = vsel %vm1136_vm14, %v1130_v3, %v3858_v37 }
 0x495   : > { %2632 = vst [vmem:[%s3258_s12 + $0x28] sm:$0xff] %v1137_v6  ;;  %v1147_v46 = vpack.c.bf16 %v3876_v34, %v3876_v34  ;;  %v2638_v6 = vld [vmem:[%s3253_s9 + $0x54] sm:$0xff] }
 0x497   : > { %1156 = vmatmul.bf16.vlgmr.msra.gmra.mxu2 %v1147_v46  ;;  %1169 = vmatmul.bf16.vlgmr.msra.gmra.mxu3 %v1147_v46 }
 0x498   : > { %1182 = vmatmul.bf16.vlgmr.msrb.gmra.mxu0 %v1147_v46  ;;  %v1248_v46 = vunpack.c.l.bf16 %v2638_v6 }
 0x515   : > { %v1183_v13 = vpop.f32.mrf.mxu0 }
 0x516   : > { %v1227_v50 = vadd.f32 %v1183_v13, %v3709_v56 }
 0x51a   : > { %v1157_v7 = vpop.f32.mrf.mxu2  ;;  %v1170_v25 = vpop.f32.mrf.mxu3 }
 0x51b   : > { %v1187_v28 = vadd.f32 %v1157_v7, %v1144_v43  ;;  %v1207_v22 = vadd.f32 %v1170_v25, %v1145_v1  ;;  %v1249_v1 = vunpack.c.h.bf16 %v2638_v6 }
 0x51d   : > { %v2635_v39 = vmul.f32 -1.442695, %v1187_v28  ;;  %v2636_v12 = vmul.f32 -1.442695, %v1207_v22  ;;  %v1185_v19 = vpop.f32.mrf.mxu0 }
 0x51f   : > { %2963 = vpow2.f32 %v2635_v39 }
 0x520   : > { %2965 = vpow2.f32 %v2636_v12 }
 0x522   : > { %v1159_v37 = vpop.f32.mrf.mxu2  ;;  %v1172_v38 = vpop.f32.mrf.mxu3 }
 0x525   : > { %v2964_v4 = vpop.eup %2963 }
 0x526   : > { %v2966_v26 = vpop.eup %2965  ;;  %v1191_v31 = vadd.f32 1.0, %v2964_v4 }
 0x527   : > { %v1211_v40 = vadd.f32 1.0, %v2966_v26 }
 0x528   : > { %2967 = vrcp.f32 %v1191_v31  ;;  %v1203_v14 = vand.u32 2147483648, %v1191_v31  ;;  %v1201_v44 = vand.u32 2147483647, %v1191_v31  ;;  %vm1197_vm0 = vweird.f32 %v1191_v31 }
 0x529   : > { %2969 = vrcp.f32 %v1211_v40  ;;  %v1223_v59 = vand.u32 2147483648, %v1211_v40  ;;  %vm1217_vm4 = vweird.f32 %v1211_v40  ;;  %v1221_v62 = vand.u32 2147483647, %v1211_v40 }
 0x52a   : > { %v1204_v49 = vor.u32 1.1754944e-38, %v1203_v14  ;;  %vm1202_vm2 = vcmp.eq.f32.partialorder %v1201_v44, 8.507059e+37 }
 0x52b   : > { %v1224_v10 = vor.u32 1.1754944e-38, %v1223_v59  ;;  %vm1222_vm6 = vcmp.eq.f32.partialorder %v1221_v62, 8.507059e+37 }
 0x52e   : > { %v2968_v27 = vpop.eup %2967 }
 0x52f   : > { %v2970_v29 = vpop.eup %2969  ;;  %v1193_v17 = vmul.f32 %v2968_v27, %v1191_v31  ;;  %vm1198_vm15 = vweird.f32 %v2968_v27 }
 0x530   : > { %v1213_v15 = vmul.f32 %v2970_v29, %v1211_v40  ;;  %vm1199_vm1 = vmor %vm1197_vm0, %vm1198_vm15  ;;  %vm1218_vm3 = vweird.f32 %v2970_v29 }
 0x531   : > { %v1194_v45 = vsub.f32 1.0, %v1193_v17  ;;  %vm1219_vm5 = vmor %vm1217_vm4, %vm1218_vm3 }
 0x532   : > { %v1214_v23 = vsub.f32 1.0, %v1213_v15 }
 0x533   : > { %v1195_v35 = vmul.f32 %v2968_v27, %v1194_v45 }
 0x534   : > { %v1215_v52 = vmul.f32 %v2970_v29, %v1214_v23 }
 0x535   : > { %v1196_v33 = vadd.f32 %v2968_v27, %v1195_v35 }
 0x536   : > { %v1216_v57 = vadd.f32 %v2970_v29, %v1215_v52 }
 0x537   : > { %v1200_v32 = vsel %vm1199_vm1, %v2968_v27, %v1196_v33 }
 0x538   : > { %v1205_v55 = vsel %vm1202_vm2, %v1204_v49, %v1200_v32  ;;  %v1220_v16 = vsel %vm1219_vm5, %v2970_v29, %v1216_v57  ;;  %v2639_v29 = vld [vmem:[%s3253_s9 + $0x5c] sm:$0xf] }
 0x539   : > { %v1228_v51 = vmul.f32 %v1227_v50, %v1205_v55  ;;  %v1225_v41 = vsel %vm1222_vm6, %v1224_v10, %v1220_v16  ;;  %v1250_v35 = vunpack.c.l.bf16 %v2639_v29 }
 0x53a   : > { %v1231_v2 = vsub.f32 1.0, %v1225_v41  ;;  %v1233_v47 = vmul.f32 %v1225_v41, %v3876_v34 }
 0x53b   : > { %v1229_v58 = vadd.f32 %v1228_v51, %v1146_v11 }
 0x53d   : > { %2971 = vtanh.f32 %v1229_v58 }
 0x543   : > { %v2972_v5 = vpop.eup %2971 }
 0x544   : > { %v1232_v9 = vmul.f32 %v2972_v5, %v1231_v2 }
 0x546   : > { %v1234_v20 = vadd.f32 %v1233_v47, %v1232_v9 }
 0x548   : > { %v1241_v53 = vsel %vm1240_vm7, %v1234_v20, 0.0  ;;  %v3886_v63 = vsel %vm1240_vm7, %v1234_v20, %v3876_v34 }
 0x549   : > { %2637 = vst [vmem:[%s3258_s12 + $0x30] sm:$0xff] %v1241_v53  ;;  %v1251_v3 = vpack.c.bf16 %v3886_v63, %v3886_v63 }
 0x54b   : > { %1260 = vmatmul.bf16.vlgmr.msrb.gmra.mxu1 %v1251_v3  ;;  %1273 = vmatmul.bf16.vlgmr.msrb.gmra.mxu2 %v1251_v3 }
 0x54c   : > { %1286 = vmatmul.bf16.vlgmr.msrb.gmra.mxu3 %v1251_v3 }
 0x5c8   : > { %v1261_v61 = vpop.f32.mrf.mxu1 }
 0x5c9   : > { %v1291_v13 = vadd.f32 %v1261_v61, %v1248_v46 }
 0x5cb   : > { %v2640_v43 = vmul.f32 -1.442695, %v1291_v13 }
 0x5cd   : > { %2973 = vpow2.f32 %v2640_v43 }
 0x5ce   : > { %v1274_v7 = vpop.f32.mrf.mxu2 }
 0x5cf   : > { %v1311_v25 = vadd.f32 %v1274_v7, %v1249_v1  ;;  %v1287_v28 = vpop.f32.mrf.mxu3 }
 0x5d0   : > { %v1263_v34 = vpop.f32.mrf.mxu1  ;;  %v1331_v33 = vadd.f32 %v1287_v28, %v3709_v56  ;;  %v1343_v56 = vpop.permute.xlu1 %1342 }
 0x5d1   : > { %v2641_v22 = vmul.f32 -1.442695, %v1311_v25  ;;  %vm1344_vm0 = vcmp.eq.s32.totalorder %v1343_v56, 1 }
 0x5d3   : > { %v2974_v39 = vpop.eup %2973  ;;  %2975 = vpow2.f32 %v2641_v22 }
 0x5d4   : > { %v1295_v12 = vadd.f32 1.0, %v2974_v39 }
 0x5d6   : > { %2977 = vrcp.f32 %v1295_v12  ;;  %v1276_v19 = vpop.f32.mrf.mxu2  ;;  %v1307_v27 = vand.u32 2147483648, %v1295_v12  ;;  %v1305_v15 = vand.u32 2147483647, %v1295_v12  ;;  %vm1301_vm9 = vweird.f32 %v1295_v12 }
 0x5d7   : > { %v1289_v37 = vpop.f32.mrf.mxu3 }
 0x5d8   : > { %v1308_v44 = vor.u32 1.1754944e-38, %v1307_v27  ;;  %vm1306_vm11 = vcmp.eq.f32.partialorder %v1305_v15, 8.507059e+37 }
 0x5d9   : > { %v2976_v38 = vpop.eup %2975 }
 0x5da   : > { %v1315_v4 = vadd.f32 1.0, %v2976_v38 }
 0x5dc   : > { %v2978_v26 = vpop.eup %2977  ;;  %2979 = vrcp.f32 %v1315_v4  ;;  %v1327_v11 = vand.u32 2147483648, %v1315_v4  ;;  %v1325_v55 = vand.u32 2147483647, %v1315_v4  ;;  %vm1321_vm13 = vweird.f32 %v1315_v4 }
 0x5dd   : > { %v1297_v31 = vmul.f32 %v2978_v26, %v1295_v12  ;;  %vm1302_vm8 = vweird.f32 %v2978_v26 }
 0x5de   : > { %vm1303_vm10 = vmor %vm1301_vm9, %vm1302_vm8  ;;  %v1328_v59 = vor.u32 1.1754944e-38, %v1327_v11  ;;  %vm1326_vm15 = vcmp.eq.f32.partialorder %v1325_v55, 8.507059e+37 }
 0x5df   : > { %v1298_v40 = vsub.f32 1.0, %v1297_v31 }
 0x5e1   : > { %v1299_v17 = vmul.f32 %v2978_v26, %v1298_v40 }
 0x5e2   : > { %v2980_v45 = vpop.eup %2979 }
 0x5e3   : > { %v1317_v14 = vmul.f32 %v2980_v45, %v1315_v4  ;;  %v1300_v23 = vadd.f32 %v2978_v26, %v1299_v17  ;;  %vm1322_vm12 = vweird.f32 %v2980_v45 }
 0x5e4   : > { %vm1323_vm14 = vmor %vm1321_vm13, %vm1322_vm12 }
 0x5e5   : > { %v1318_v21 = vsub.f32 1.0, %v1317_v14  ;;  %v1304_v52 = vsel %vm1303_vm10, %v2978_v26, %v1300_v23 }
 0x5e6   : > { %v1309_v49 = vsel %vm1306_vm11, %v1308_v44, %v1304_v52 }
 0x5e7   : > { %v1319_v50 = vmul.f32 %v2980_v45, %v1318_v21  ;;  %v1332_v32 = vmul.f32 %v1331_v33, %v1309_v49 }
 0x5e9   : > { %v1320_v57 = vadd.f32 %v2980_v45, %v1319_v50  ;;  %v1333_v51 = vadd.f32 %v1332_v32, %v1250_v35 }
 0x5eb   : > { %v1324_v62 = vsel %vm1323_vm14, %v2980_v45, %v1320_v57  ;;  %2981 = vtanh.f32 %v1333_v51 }
 0x5ec   : > { %v1329_v58 = vsel %vm1326_vm15, %v1328_v59, %v1324_v62 }
 0x5ed   : > { %v1335_v16 = vsub.f32 1.0, %v1329_v58  ;;  %v1337_v2 = vmul.f32 %v1329_v58, %v3886_v63 }
 0x5f1   : > { %v2982_v10 = vpop.eup %2981 }
 0x5f2   : > { %v1336_v41 = vmul.f32 %v2982_v10, %v1335_v16 }
 0x5f4   : > { %v1338_v5 = vadd.f32 %v1337_v2, %v1336_v41 }
 0x5f6   : > { %v1345_v8 = vsel %vm1344_vm0, %v1338_v5, 0.0  ;;  %v1348_v9 = vsel %vm1344_vm0, %v1338_v5, %v3886_v63 }
 0x5f7   : > { %2642 = vst [vmem:[%s3258_s12 + $0x38] sm:$0xff] %v1345_v8 }
 0x5f8   : > { %1349 = vst [vmem:[%s3263_s15] sm:$0xff] %v1348_v9 }
 0x5f9 PF: > { %p2643_p1 = scmp.ne.s32.totalorder %s3138_s21, 1 }
 0x5fb   : > { %1353 = sbr.rel (%p2643_p1) target bundleno = 2984 (0xba8), region = 48 }
 0x600   : > { %v3901_v47 = vor.u32 %v3513_v54, %v3497_v42  ;;  %v3905_v20 = vor.u32 %v3494_v36, %v3510_v48  ;;  %v3911_v53 = vor.u32 %v3485_v30, %v3473_v18  ;;  %v4352_v63 = vld [vmem:[#allocation41_spill] sm:$0xff]  ;;  %v4353_v6 = vld [vmem:[#allocation44_spill] sm:$0xff]  ;;  %v3151_v54 = vmov 0   ;;  %v4355_v36 = vld [vmem:[#allocation42_spill] sm:$0xff] }
 0x601   : > { %v3915_v3 = vor.u32 %v4352_v63, %v3482_v24  ;;  %v4354_v46 = vld [vmem:[#allocation45_spill] sm:$0xff]  ;;  %2983 = vset.pattern.permute.xlu0 %v3151_v54  ;;  %v4356_v48 = vld [vmem:[#allocation43_spill] sm:$0xff]  ;;  %v4357_v18 = vld [vmem:[#allocation36_spill] sm:$0xff]  ;;  %vm1578_vm1 = vcmp.gt.s32.totalorder %v3526_v0, 7  ;;  %2984 = vset.pattern.permute.xlu1 %v3151_v54  ;;  %vm1681_vm2 = vcmp.gt.s32.totalorder %v3526_v0, 6  ;;  %vm2201_vm3 = vcmp.gt.s32.totalorder %v3526_v0, 1 }
 0x602   : > { %1488 = vmatpush.bf16.msra.mxu0 %v3901_v47  ;;  %1501 = vmatpush.bf16.msra.mxu1 %v3905_v20  ;;  %v3919_v42 = vor.u32 %v4354_v46, %v4353_v6  ;;  %v3925_v61 = vor.u32 %v4356_v48, %v4355_v36  ;;  %v4358_v24 = vld [vmem:[#allocation39_spill] sm:$0xff]  ;;  %v4359_v13 = vld [vmem:[#allocation38_spill] sm:$0xff]  ;;  %v1579_v7 = vsel %vm1578_vm1, 1, %v3151_v54  ;;  %v4361_v25 = vld [vmem:[#allocation37_spill] sm:$0xff]  ;;  %v1682_v40 = vsel %vm1681_vm2, 1, %v3151_v54 }
 0x603   : > { %1594 = vmatpush.bf16.msra.mxu3 %v3901_v47  ;;  %v3932_v30 = vor.u32 %v4358_v24, %v4357_v18  ;;  %v4360_v43 = vld [vmem:[#allocation35_spill] sm:$0xff]  ;;  %2985 = vset.pattern.permute.xlu2 %v3151_v54  ;;  %v4362_v28 = vld [vmem:[#allocation40_spill] sm:$0xff]  ;;  %v4363_v22 = vld [vmem:[#allocation30_spill] sm:$0xff]  ;;  %v2202_v51 = vsel %vm2201_vm3, 1, %v3151_v54  ;;  %vm1785_vm14 = vcmp.gt.s32.totalorder %v3526_v0, 5  ;;  %vm1889_vm15 = vcmp.gt.s32.totalorder %v3526_v0, 4 }
 0x604   : > { %1514 = vmatpush.bf16.msra.mxu2 %v3919_v42  ;;  %v3936_v1 = vor.u32 %v4360_v43, %v4359_v13  ;;  %v3945_v34 = vor.u32 %v4362_v28, %v4361_v25  ;;  %1581 = vperm.xlu0 %2983, %v1579_v7   ;;  %v4364_v39 = vld [vmem:[#allocation33_spill] sm:$0xff]  ;;  %v4365_v19 = vld [vmem:[#allocation32_spill] sm:$0xff]  ;;  %v4367_v4 = vld [vmem:[#allocation31_spill] sm:$0xff] }
 0x605   : > { %v3952_v12 = vor.u32 %v4364_v39, %v4363_v22  ;;  %v4366_v37 = vld [vmem:[#allocation29_spill] sm:$0xff]  ;;  %v4368_v26 = vld [vmem:[#allocation34_spill] sm:$0xff]  ;;  %v4369_v27 = vld [vmem:[#allocation24_spill] sm:$0xff] }
 0x606   : > { %1489 = vmatpush.bf16.msra.mxu0 %v3911_v53  ;;  %1502 = vmatpush.bf16.msra.mxu1 %v3915_v3  ;;  %v3956_v38 = vor.u32 %v4366_v37, %v4365_v19  ;;  %v3962_v31 = vor.u32 %v4368_v26, %v4367_v4  ;;  %v4370_v29 = vld [vmem:[#allocation27_spill] sm:$0xff]  ;;  %v4371_v15 = vld [vmem:[#allocation26_spill] sm:$0xff]  ;;  %v4373_v23 = vld [vmem:[#allocation25_spill] sm:$0xff] }
 0x607   : > { %1595 = vmatpush.bf16.msra.mxu3 %v3911_v53  ;;  %v3970_v17 = vor.u32 %v4370_v29, %v4369_v27  ;;  %v4372_v45 = vld [vmem:[#allocation23_spill] sm:$0xff]  ;;  %v4374_v35 = vld [vmem:[#allocation28_spill] sm:$0xff]  ;;  %v4375_v21 = vld [vmem:[#allocation18_spill] sm:$0xff] }
 0x608   : > { %1515 = vmatpush.bf16.msra.mxu2 %v3925_v61  ;;  %v3974_v14 = vor.u32 %v4372_v45, %v4371_v15  ;;  %v3979_v44 = vor.u32 %v4374_v35, %v4373_v23  ;;  %v4376_v52 = vld [vmem:[#allocation21_spill] sm:$0xff]  ;;  %v4377_v49 = vld [vmem:[#allocation20_spill] sm:$0xff]  ;;  %v4379_v32 = vld [vmem:[#allocation19_spill] sm:$0xff] }
 0x609   : > { %v3986_v33 = vor.u32 %v4376_v52, %v4375_v21  ;;  %v4378_v50 = vld [vmem:[#allocation17_spill] sm:$0xff]  ;;  %v4380_v55 = vld [vmem:[#allocation22_spill] sm:$0xff]  ;;  %v4381_v59 = vld [vmem:[#allocation12_spill] sm:$0xff] }
 0x60a   : > { %1490 = vmatpush.bf16.msra.mxu0 %v3932_v30  ;;  %1503 = vmatpush.bf16.msra.mxu1 %v3936_v1  ;;  %v3990_v11 = vor.u32 %v4378_v50, %v4377_v49  ;;  %v3996_v57 = vor.u32 %v4380_v55, %v4379_v32  ;;  %v4382_v62 = vld [vmem:[#allocation15_spill] sm:$0xff]  ;;  %v4383_v16 = vld [vmem:[#allocation14_spill] sm:$0xff]  ;;  %v4385_v41 = vld [vmem:[#allocation13_spill] sm:$0xff]  ;;  %v4097_v32 = vperm.slane %v3521_v60, 0 }
 0x60b   : > { %1596 = vmatpush.bf16.msra.mxu3 %v3932_v30  ;;  %v4004_v58 = vor.u32 %v4382_v62, %v4381_v59  ;;  %v4384_v10 = vld [vmem:[#allocation11_spill] sm:$0xff]  ;;  %v4386_v2 = vld [vmem:[#allocation16_spill] sm:$0xff]  ;;  %v4387_v8 = vld [vmem:[#allocation6_spill] sm:$0xff] }
 0x60c   : > { %1516 = vmatpush.bf16.msra.mxu2 %v3945_v34  ;;  %1684 = vperm.xlu0 %2983, %v1682_v40   ;;  %v4008_v56 = vor.u32 %v4384_v10, %v4383_v16  ;;  %v4013_v5 = vor.u32 %v4386_v2, %v4385_v41  ;;  %v4388_v9 = vld [vmem:[#allocation9_spill] sm:$0xff]  ;;  %v4389_v6 = vld [vmem:[#allocation8_spill] sm:$0xff]  ;;  %v4391_v48 = vld [vmem:[#allocation7_spill] sm:$0xff] }
 0x60d   : > { %v4020_v63 = vor.u32 %v4388_v9, %v4387_v8  ;;  %v4390_v46 = vld [vmem:[#allocation5_spill] sm:$0xff]  ;;  %v4392_v18 = vld [vmem:[#allocation10_spill] sm:$0xff]  ;;  %v2644_v13 = vld [vmem:[%s3253_s9 + $0x54] sm:$0xff] }
 0x60e   : > { %1491 = vmatpush.bf16.msra.mxu0 %v3952_v12  ;;  %1504 = vmatpush.bf16.msra.mxu1 %v3956_v38  ;;  %v4024_v36 = vor.u32 %v4390_v46, %v4389_v6  ;;  %v4029_v24 = vor.u32 %v4392_v18, %v4391_v48  ;;  %v1357_v43 = vunpack.c.l.bf16 %v2644_v13  ;;  %v1358_v7 = vunpack.c.h.bf16 %v2644_v13  ;;  %v2645_v16 = vld [vmem:[%s3253_s9 + $0x5c] sm:$0xf] }
 0x60f   : > { %1597 = vmatpush.bf16.msra.mxu3 %v3952_v12  ;;  %v1359_v9 = vunpack.c.l.bf16 %v2645_v16 }
 0x610   : > { %1517 = vmatpush.bf16.msra.mxu2 %v3962_v31 }
 0x612   : > { %1492 = vmatpush.bf16.msra.mxu0 %v3970_v17  ;;  %1505 = vmatpush.bf16.msra.mxu1 %v3974_v14 }
 0x613   : > { %1598 = vmatpush.bf16.msra.mxu3 %v3970_v17 }
 0x614   : > { %1518 = vmatpush.bf16.msra.mxu2 %v3979_v44  ;;  %2204 = vperm.xlu0 %2983, %v2202_v51  }
 0x616   : > { %1493 = vmatpush.bf16.msra.mxu0 %v3986_v33  ;;  %1506 = vmatpush.bf16.msra.mxu1 %v3990_v11 }
 0x617   : > { %1599 = vmatpush.bf16.msra.mxu3 %v3986_v33 }
 0x618   : > { %1519 = vmatpush.bf16.msra.mxu2 %v3996_v57 }
 0x61a   : > { %1494 = vmatpush.bf16.msra.mxu0 %v4004_v58  ;;  %1507 = vmatpush.bf16.msra.mxu1 %v4008_v56 }
 0x61b   : > { %1600 = vmatpush.bf16.msra.mxu3 %v4004_v58 }
 0x61c   : > { %1520 = vmatpush.bf16.msra.mxu2 %v4013_v5 }
 0x61e   : > { %1495 = vmatpush.bf16.msra.mxu0 %v4020_v63  ;;  %1508 = vmatpush.bf16.msra.mxu1 %v4024_v36 }
 0x61f   : > { %1601 = vmatpush.bf16.msra.mxu3 %v4020_v63 }
 0x620   : > { %1521 = vmatpush.bf16.msra.mxu2 %v4029_v24 }
 0x621   : > { %1496 = vmatmul.bf16.vlgmr.msra.gmra.mxu0 %v3151_v54  ;;  %1509 = vmatmul.bf16.vlgmr.msra.gmra.mxu1 %v3151_v54 }
 0x622   : > { %1607 = vmatpush.bf16.msrb.mxu0 %v3905_v20  ;;  %1620 = vmatpush.bf16.msrb.mxu1 %v3919_v42 }
 0x623   : > { %1522 = vmatmul.bf16.vlgmr.msra.gmra.mxu2 %v3151_v54  ;;  %1711 = vmatpush.bf16.msrb.mxu3 %v3905_v20 }
 0x624   : > { %1698 = vmatpush.bf16.msrb.mxu2 %v3901_v47 }
 0x626   : > { %1608 = vmatpush.bf16.msrb.mxu0 %v3915_v3  ;;  %1621 = vmatpush.bf16.msrb.mxu1 %v3925_v61 }
 0x627   : > { %1712 = vmatpush.bf16.msrb.mxu3 %v3915_v3 }
 0x628   : > { %1699 = vmatpush.bf16.msrb.mxu2 %v3911_v53 }
 0x62a   : > { %1609 = vmatpush.bf16.msrb.mxu0 %v3936_v1  ;;  %1622 = vmatpush.bf16.msrb.mxu1 %v3945_v34 }
 0x62b   : > { %1713 = vmatpush.bf16.msrb.mxu3 %v3936_v1 }
 0x62c   : > { %1700 = vmatpush.bf16.msrb.mxu2 %v3932_v30 }
 0x62e   : > { %1610 = vmatpush.bf16.msrb.mxu0 %v3956_v38  ;;  %1623 = vmatpush.bf16.msrb.mxu1 %v3962_v31 }
 0x62f   : > { %1714 = vmatpush.bf16.msrb.mxu3 %v3956_v38 }
 0x630   : > { %1701 = vmatpush.bf16.msrb.mxu2 %v3952_v12 }
 0x632   : > { %1611 = vmatpush.bf16.msrb.mxu0 %v3974_v14  ;;  %1624 = vmatpush.bf16.msrb.mxu1 %v3979_v44 }
 0x633   : > { %1715 = vmatpush.bf16.msrb.mxu3 %v3974_v14 }
 0x634   : > { %1702 = vmatpush.bf16.msrb.mxu2 %v3970_v17 }
 0x636   : > { %1612 = vmatpush.bf16.msrb.mxu0 %v3990_v11  ;;  %1625 = vmatpush.bf16.msrb.mxu1 %v3996_v57 }
 0x637   : > { %1716 = vmatpush.bf16.msrb.mxu3 %v3990_v11 }
 0x638   : > { %1703 = vmatpush.bf16.msrb.mxu2 %v3986_v33 }
 0x63a   : > { %1613 = vmatpush.bf16.msrb.mxu0 %v4008_v56  ;;  %1626 = vmatpush.bf16.msrb.mxu1 %v4013_v5 }
 0x63b   : > { %1717 = vmatpush.bf16.msrb.mxu3 %v4008_v56 }
 0x63c   : > { %1704 = vmatpush.bf16.msrb.mxu2 %v4004_v58 }
 0x63e   : > { %1614 = vmatpush.bf16.msrb.mxu0 %v4024_v36  ;;  %1627 = vmatpush.bf16.msrb.mxu1 %v4029_v24 }
 0x63f   : > { %1718 = vmatpush.bf16.msrb.mxu3 %v4024_v36 }
 0x640   : > { %1705 = vmatpush.bf16.msrb.mxu2 %v4020_v63 }
 0x642   : > { %1724 = vmatpush.bf16.msra.mxu0 %v3919_v42  ;;  %1802 = vmatpush.bf16.msra.mxu1 %v3901_v47 }
 0x644   : > { %1815 = vmatpush.bf16.msra.mxu2 %v3905_v20 }
 0x646   : > { %1725 = vmatpush.bf16.msra.mxu0 %v3925_v61  ;;  %1803 = vmatpush.bf16.msra.mxu1 %v3911_v53 }
 0x648   : > { %1816 = vmatpush.bf16.msra.mxu2 %v3915_v3 }
 0x64a   : > { %1726 = vmatpush.bf16.msra.mxu0 %v3945_v34  ;;  %1804 = vmatpush.bf16.msra.mxu1 %v3932_v30 }
 0x64c   : > { %1817 = vmatpush.bf16.msra.mxu2 %v3936_v1 }
 0x64e   : > { %1727 = vmatpush.bf16.msra.mxu0 %v3962_v31  ;;  %1805 = vmatpush.bf16.msra.mxu1 %v3952_v12 }
 0x650   : > { %1818 = vmatpush.bf16.msra.mxu2 %v3956_v38 }
 0x652   : > { %1728 = vmatpush.bf16.msra.mxu0 %v3979_v44  ;;  %1806 = vmatpush.bf16.msra.mxu1 %v3970_v17 }
 0x654   : > { %1819 = vmatpush.bf16.msra.mxu2 %v3974_v14 }
 0x656   : > { %1729 = vmatpush.bf16.msra.mxu0 %v3996_v57  ;;  %1807 = vmatpush.bf16.msra.mxu1 %v3986_v33 }
 0x658   : > { %1820 = vmatpush.bf16.msra.mxu2 %v3990_v11 }
 0x65a   : > { %1730 = vmatpush.bf16.msra.mxu0 %v4013_v5  ;;  %1808 = vmatpush.bf16.msra.mxu1 %v4004_v58 }
 0x65c   : > { %1821 = vmatpush.bf16.msra.mxu2 %v4008_v56 }
 0x65e   : > { %1731 = vmatpush.bf16.msra.mxu0 %v4029_v24  ;;  %1809 = vmatpush.bf16.msra.mxu1 %v4020_v63 }
 0x660   : > { %1822 = vmatpush.bf16.msra.mxu2 %v4024_v36 }
 0x69e   : > { %v1497_v25 = vpop.f32.mrf.mxu0  ;;  %v1510_v28 = vpop.f32.mrf.mxu1 }
 0x69f   : > { %v1527_v22 = vadd.f32 %v1497_v25, %v1357_v43  ;;  %v1547_v39 = vadd.f32 %v1510_v28, %v1358_v7 }
 0x6a1   : > { %v2742_v19 = vmul.f32 -1.442695, %v1527_v22  ;;  %v2743_v37 = vmul.f32 -1.442695, %v1547_v39 }
 0x6a3   : > { %2986 = vpow2.f32 %v2742_v19  ;;  %v1582_v19 = vpop.permute.xlu0 %1581 }
 0x6a4   : > { %2988 = vpow2.f32 %v2743_v37  ;;  %vm1583_vm12 = vcmp.eq.s32.totalorder %v1582_v19, 1 }
 0x6a5   : > { %vm2747_vm13 = vmpackc.low %vm1583_vm12, %vm1583_vm12 }
 0x6a6   : > { %v1499_v4 = vpop.f32.mrf.mxu0  ;;  %v1512_v26 = vpop.f32.mrf.mxu1 }
 0x6a7   : > { %v1523_v40 = vpop.f32.mrf.mxu2 }
 0x6a8   : > { %v1570_v2 = vadd.f32 %v4097_v32, %v1523_v40 }
 0x6a9   : > { %v2987_v27 = vpop.eup %2986 }
 0x6aa   : > { %v2989_v29 = vpop.eup %2988  ;;  %v1531_v15 = vadd.f32 1.0, %v2987_v27 }
 0x6ab   : > { %v1551_v45 = vadd.f32 1.0, %v2989_v29  ;;  %v2745_v29 = vld [vmem:[%s3253_s9 + $0x48] sm:$0xff] }
 0x6ac   : > { %2990 = vrcp.f32 %v1531_v15  ;;  %v1543_v51 = vand.u32 2147483648, %v1531_v15  ;;  %v1541_v62 = vand.u32 2147483647, %v1531_v15  ;;  %vm1537_vm5 = vweird.f32 %v1531_v15 }
 0x6ad   : > { %2992 = vrcp.f32 %v1551_v45  ;;  %vm1557_vm8 = vweird.f32 %v1551_v45  ;;  %v1563_v18 = vand.u32 2147483648, %v1551_v45  ;;  %v1561_v13 = vand.u32 2147483647, %v1551_v45 }
 0x6ae   : > { %v1544_v8 = vor.u32 1.1754944e-38, %v1543_v51  ;;  %vm1542_vm7 = vcmp.eq.f32.partialorder %v1541_v62, 8.507059e+37 }
 0x6af   : > { %v1525_v23 = vpop.f32.mrf.mxu2  ;;  %v1564_v25 = vor.u32 1.1754944e-38, %v1563_v18  ;;  %vm1562_vm11 = vcmp.eq.f32.partialorder %v1561_v13, 8.507059e+37 }
 0x6b2   : > { %v2991_v35 = vpop.eup %2990 }
 0x6b3   : > { %v2993_v21 = vpop.eup %2992  ;;  %v1533_v52 = vmul.f32 %v2991_v35, %v1531_v15  ;;  %vm1538_vm4 = vweird.f32 %v2991_v35  ;;  %v1591_v15 = vunpack.c.h.bf16 %v2745_v29 }
 0x6b4   : > { %v1553_v49 = vmul.f32 %v2993_v21, %v1551_v45  ;;  %vm1539_vm6 = vmor %vm1537_vm5, %vm1538_vm4  ;;  %vm1558_vm9 = vweird.f32 %v2993_v21  ;;  %vm2304_vm5 = vcmp.gt.s32.totalorder %v3526_v0, 0 }
 0x6b5   : > { %v1534_v50 = vsub.f32 1.0, %v1533_v52  ;;  %vm1559_vm10 = vmor %vm1557_vm8, %vm1558_vm9  ;;  %v1590_v52 = vunpack.c.l.bf16 %v2745_v29 }
 0x6b6   : > { %v1554_v55 = vsub.f32 1.0, %v1553_v49 }
 0x6b7   : > { %v1535_v59 = vmul.f32 %v2991_v35, %v1534_v50 }
 0x6b8   : > { %v1555_v10 = vmul.f32 %v2993_v21, %v1554_v55 }
 0x6b9   : > { %v1536_v41 = vadd.f32 %v2991_v35, %v1535_v59 }
 0x6ba   : > { %v1556_v48 = vadd.f32 %v2993_v21, %v1555_v10 }
 0x6bb   : > { %v1540_v6 = vsel %vm1539_vm6, %v2991_v35, %v1536_v41 }
 0x6bc   : > { %v1545_v46 = vsel %vm1542_vm7, %v1544_v8, %v1540_v6  ;;  %v1560_v7 = vsel %vm1559_vm10, %v2993_v21, %v1556_v48  ;;  %v1786_v6 = vsel %vm1785_vm14, 1, %v3151_v54 }
 0x6bd   : > { %v1571_v60 = vmul.f32 %v1570_v2, %v1545_v46  ;;  %v1565_v28 = vsel %vm1562_vm11, %v1564_v25, %v1560_v7  ;;  %1788 = vperm.xlu1 %2984, %v1786_v6   ;;  %v1890_v25 = vsel %vm1889_vm15, 1, %v3151_v54 }
 0x6be   : > { %v1574_v22 = vsub.f32 1.0, %v1565_v28  ;;  %v1576_v4 = vmul.f32 0.0, %v1565_v28 }
 0x6bf   : > { %v1572_v43 = vadd.f32 %v1571_v60, %v1359_v9 }
 0x6c1   : > { %2994 = vtanh.f32 %v1572_v43 }
 0x6c5   : > { %1892 = vperm.xlu1 %2984, %v1890_v25  }
 0x6c7   : > { %v2995_v39 = vpop.eup %2994 }
 0x6c8   : > { %v1575_v37 = vmul.f32 %v2995_v39, %v1574_v22  ;;  %v2746_v22 = vld [vmem:[%s3253_s9 + $0x50] sm:$0xf] }
 0x6ca   : > { %v1577_v26 = vadd.f32 %v1576_v4, %v1575_v37 }
 0x6cc   : > { %v4101_v40 = vsel %vm1583_vm12, %v1577_v26, 0.0  ;;  %v2748_v27 = vpack.c.bf16 %v1577_v26, %v1577_v26  ;;  %v1592_v26 = vunpack.c.l.bf16 %v2746_v22 }
 0x6cd   : > { %2744 = vst [vmem:[%s3258_s12 + $0x38] sm:$0xff] %v4101_v40 }
 0x6ce   : > { %2749 = vmatmul.msk.bf16.vlgmr.msra.gmra.mxu3 %vm2747_vm13, %v2748_v27  ;;  %2752 = vmatmul.msk.bf16.vlgmr.msrb.gmra.mxu0 %vm2747_vm13, %v2748_v27 }
 0x6cf   : > { %2755 = vmatmul.msk.bf16.vlgmr.msrb.gmra.mxu1 %vm2747_vm13, %v2748_v27  ;;  %1828 = vmatpush.bf16.msra.mxu3 %v3919_v42 }
 0x6d0   : > { %1906 = vmatpush.bf16.msrb.mxu0 %v3901_v47  ;;  %1919 = vmatpush.bf16.msrb.mxu1 %v3905_v20 }
 0x6d3   : > { %1829 = vmatpush.bf16.msra.mxu3 %v3925_v61 }
 0x6d4   : > { %1907 = vmatpush.bf16.msrb.mxu0 %v3911_v53  ;;  %1920 = vmatpush.bf16.msrb.mxu1 %v3915_v3 }
 0x6d7   : > { %1830 = vmatpush.bf16.msra.mxu3 %v3945_v34 }
 0x6d8   : > { %1908 = vmatpush.bf16.msrb.mxu0 %v3932_v30  ;;  %1921 = vmatpush.bf16.msrb.mxu1 %v3936_v1 }
 0x6db   : > { %1831 = vmatpush.bf16.msra.mxu3 %v3962_v31 }
 0x6dc   : > { %1909 = vmatpush.bf16.msrb.mxu0 %v3952_v12  ;;  %1922 = vmatpush.bf16.msrb.mxu1 %v3956_v38 }
 0x6df   : > { %1832 = vmatpush.bf16.msra.mxu3 %v3979_v44 }
 0x6e0   : > { %1910 = vmatpush.bf16.msrb.mxu0 %v3970_v17  ;;  %1923 = vmatpush.bf16.msrb.mxu1 %v3974_v14 }
 0x6e3   : > { %1833 = vmatpush.bf16.msra.mxu3 %v3996_v57 }
 0x6e4   : > { %1911 = vmatpush.bf16.msrb.mxu0 %v3986_v33  ;;  %1924 = vmatpush.bf16.msrb.mxu1 %v3990_v11 }
 0x6e7   : > { %1834 = vmatpush.bf16.msra.mxu3 %v4013_v5 }
 0x6e8   : > { %1912 = vmatpush.bf16.msrb.mxu0 %v4004_v58  ;;  %1925 = vmatpush.bf16.msrb.mxu1 %v4008_v56 }
 0x6eb   : > { %1835 = vmatpush.bf16.msra.mxu3 %v4029_v24 }
 0x6ec   : > { %1913 = vmatpush.bf16.msrb.mxu0 %v4020_v63  ;;  %1926 = vmatpush.bf16.msrb.mxu1 %v4024_v36 }
 0x74b   : > { %v1616_v45 = vpop.f32.mrf.mxu0 }
 0x74c   : > { %v1653_v23 = vadd.f32 %v1616_v45, %v1591_v15  ;;  %v1629_v35 = vpop.f32.mrf.mxu1 }
 0x74d   : > { %v1673_v37 = vadd.f32 %v1629_v35, %v4097_v32 }
 0x74e   : > { %v2757_v21 = vmul.f32 -1.442695, %v1653_v23 }
 0x750   : > { %2996 = vpow2.f32 %v2757_v21 }
 0x751   : > { %v1603_v49 = vpop.f32.mrf.mxu3 }
 0x752   : > { %v1633_v50 = vadd.f32 %v1603_v49, %v1590_v52  ;;  %v2305_v52 = vsel %vm2304_vm5, 1, %v3151_v54 }
 0x753   : > { %v1618_v55 = vpop.f32.mrf.mxu0  ;;  %2307 = vperm.xlu1 %2984, %v2305_v52  }
 0x754   : > { %v2756_v51 = vmul.f32 -1.442695, %v1633_v50  ;;  %v1631_v59 = vpop.f32.mrf.mxu1 }
 0x756   : > { %v2997_v62 = vpop.eup %2996  ;;  %2998 = vpow2.f32 %v2756_v51 }
 0x757   : > { %v1657_v16 = vadd.f32 1.0, %v2997_v62 }
 0x759   : > { %v1605_v10 = vpop.f32.mrf.mxu3  ;;  %3000 = vrcp.f32 %v1657_v16  ;;  %v1669_v15 = vand.u32 2147483648, %v1657_v16  ;;  %vm1663_vm6 = vweird.f32 %v1657_v16  ;;  %v1667_v23 = vand.u32 2147483647, %v1657_v16 }
 0x75a   : > { %v1685_v10 = vpop.permute.xlu0 %1684 }
 0x75b   : > { %v1670_v50 = vor.u32 1.1754944e-38, %v1669_v15  ;;  %vm1668_vm8 = vcmp.eq.f32.partialorder %v1667_v23, 8.507059e+37  ;;  %vm1686_vm9 = vcmp.eq.s32.totalorder %v1685_v10, 1 }
 0x75c   : > { %v2999_v41 = vpop.eup %2998 }
 0x75d   : > { %v1637_v2 = vadd.f32 1.0, %v2999_v41 }
 0x75f   : > { %3002 = vrcp.f32 %v1637_v2  ;;  %v3001_v8 = vpop.eup %3000  ;;  %v1649_v13 = vand.u32 2147483648, %v1637_v2  ;;  %v1647_v7 = vand.u32 2147483647, %v1637_v2  ;;  %vm1643_vm1 = vweird.f32 %v1637_v2 }
 0x760   : > { %v1659_v9 = vmul.f32 %v3001_v8, %v1657_v16  ;;  %vm1664_vm4 = vweird.f32 %v3001_v8 }
 0x761   : > { %v1650_v19 = vor.u32 1.1754944e-38, %v1649_v13  ;;  %vm1648_vm3 = vcmp.eq.f32.partialorder %v1647_v7, 8.507059e+37  ;;  %vm1665_vm7 = vmor %vm1663_vm6, %vm1664_vm4  ;;  %vm2097_vm4 = vcmp.gt.s32.totalorder %v3526_v0, 2 }
 0x762   : > { %v1660_v60 = vsub.f32 1.0, %v1659_v9 }
 0x764   : > { %v1661_v28 = vmul.f32 %v3001_v8, %v1660_v60 }
 0x765   : > { %v3003_v46 = vpop.eup %3002 }
 0x766   : > { %v1639_v48 = vmul.f32 %v3003_v46, %v1637_v2  ;;  %vm1644_vm0 = vweird.f32 %v3003_v46  ;;  %v1662_v27 = vadd.f32 %v3001_v8, %v1661_v28 }
 0x767   : > { %vm1645_vm2 = vmor %vm1643_vm1, %vm1644_vm0 }
 0x768   : > { %v1640_v18 = vsub.f32 1.0, %v1639_v48  ;;  %v1666_v49 = vsel %vm1665_vm7, %v3001_v8, %v1662_v27 }
 0x769   : > { %v1671_v35 = vsel %vm1668_vm8, %v1670_v50, %v1666_v49  ;;  %v2760_v50 = vld [vmem:[%s3253_s9 + $0x44] sm:$0xf] }
 0x76a   : > { %v1641_v43 = vmul.f32 %v3003_v46, %v1640_v18  ;;  %v1677_v55 = vsub.f32 1.0, %v1671_v35  ;;  %v1679_v62 = vmul.f32 %v1671_v35, %v4101_v40 }
 0x76c   : > { %v1642_v39 = vadd.f32 %v3003_v46, %v1641_v43 }
 0x76e   : > { %v1646_v4 = vsel %vm1645_vm2, %v3003_v46, %v1642_v39 }
 0x76f   : > { %v1651_v29 = vsel %vm1648_vm3, %v1650_v19, %v1646_v4  ;;  %vm1993_vm3 = vcmp.gt.s32.totalorder %v3526_v0, 3 }
 0x770   : > { %v1674_v45 = vmul.f32 %v1673_v37, %v1651_v29 }
 0x772   : > { %v1675_v21 = vadd.f32 %v1674_v45, %v1592_v26 }
 0x774   : > { %3004 = vtanh.f32 %v1675_v21 }
 0x77a   : > { %v3005_v51 = vpop.eup %3004 }
 0x77b   : > { %v1678_v59 = vmul.f32 %v3005_v51, %v1677_v55 }
 0x77d   : > { %v1680_v41 = vadd.f32 %v1679_v62, %v1678_v59  ;;  %v1696_v62 = vunpack.c.l.bf16 %v2760_v50 }
 0x77f   : > { %v1687_v16 = vsel %vm1686_vm9, %v1680_v41, 0.0  ;;  %v4140_v2 = vsel %vm1686_vm9, %v1680_v41, %v4101_v40  ;;  %v2759_v40 = vld [vmem:[%s3253_s9 + $0x3c] sm:$0xff] }
 0x780   : > { %2758 = vst [vmem:[%s3258_s12 + $0x30] sm:$0xff] %v1687_v16  ;;  %v1697_v8 = vpack.c.bf16 %v4140_v2, %v4140_v2  ;;  %v1694_v6 = vunpack.c.l.bf16 %v2759_v40  ;;  %v1695_v46 = vunpack.c.h.bf16 %v2759_v40 }
 0x782   : > { %1706 = vmatmul.bf16.vlgmr.msrb.gmra.mxu2 %v1697_v8  ;;  %1719 = vmatmul.bf16.vlgmr.msrb.gmra.mxu3 %v1697_v8 }
 0x783   : > { %1732 = vmatmul.bf16.vlgmr.msra.gmra.mxu0 %v1697_v8  ;;  %1932 = vmatpush.bf16.msrb.mxu2 %v3919_v42 }
 0x784   : > { %2010 = vmatpush.bf16.msrb.mxu3 %v3901_v47  ;;  %2023 = vmatpush.bf16.msra.mxu0 %v3905_v20 }
 0x787   : > { %1933 = vmatpush.bf16.msrb.mxu2 %v3925_v61 }
 0x788   : > { %2011 = vmatpush.bf16.msrb.mxu3 %v3911_v53  ;;  %2024 = vmatpush.bf16.msra.mxu0 %v3915_v3 }
 0x78b   : > { %1934 = vmatpush.bf16.msrb.mxu2 %v3945_v34 }
 0x78c   : > { %2012 = vmatpush.bf16.msrb.mxu3 %v3932_v30  ;;  %2025 = vmatpush.bf16.msra.mxu0 %v3936_v1 }
 0x78f   : > { %1935 = vmatpush.bf16.msrb.mxu2 %v3962_v31 }
 0x790   : > { %2013 = vmatpush.bf16.msrb.mxu3 %v3952_v12  ;;  %2026 = vmatpush.bf16.msra.mxu0 %v3956_v38 }
 0x793   : > { %1936 = vmatpush.bf16.msrb.mxu2 %v3979_v44 }
 0x794   : > { %2014 = vmatpush.bf16.msrb.mxu3 %v3970_v17  ;;  %2027 = vmatpush.bf16.msra.mxu0 %v3974_v14 }
 0x797   : > { %1937 = vmatpush.bf16.msrb.mxu2 %v3996_v57 }
 0x798   : > { %2015 = vmatpush.bf16.msrb.mxu3 %v3986_v33  ;;  %2028 = vmatpush.bf16.msra.mxu0 %v3990_v11 }
 0x79b   : > { %1938 = vmatpush.bf16.msrb.mxu2 %v4013_v5 }
 0x79c   : > { %2016 = vmatpush.bf16.msrb.mxu3 %v4004_v58  ;;  %2029 = vmatpush.bf16.msra.mxu0 %v4008_v56 }
 0x79f   : > { %1939 = vmatpush.bf16.msrb.mxu2 %v4029_v24 }
 0x7a0   : > { %2017 = vmatpush.bf16.msrb.mxu3 %v4020_v63  ;;  %2030 = vmatpush.bf16.msra.mxu0 %v4024_v36 }
 0x800   : > { %v1733_v9 = vpop.f32.mrf.mxu0 }
 0x801   : > { %v1777_v59 = vadd.f32 %v1733_v9, %v4097_v32 }
 0x805   : > { %v1707_v48 = vpop.f32.mrf.mxu2  ;;  %v1720_v60 = vpop.f32.mrf.mxu3 }
 0x806   : > { %v1737_v18 = vadd.f32 %v1707_v48, %v1694_v6  ;;  %v1757_v13 = vadd.f32 %v1720_v60, %v1695_v46 }
 0x808   : > { %v2761_v43 = vmul.f32 -1.442695, %v1737_v18  ;;  %v2762_v7 = vmul.f32 -1.442695, %v1757_v13  ;;  %v1735_v25 = vpop.f32.mrf.mxu0 }
 0x80a   : > { %3006 = vpow2.f32 %v2761_v43  ;;  %v1789_v43 = vpop.permute.xlu1 %1788 }
 0x80b   : > { %3008 = vpow2.f32 %v2762_v7  ;;  %vm1790_vm2 = vcmp.eq.s32.totalorder %v1789_v43, 1 }
 0x80d   : > { %v1709_v28 = vpop.f32.mrf.mxu2  ;;  %v1722_v22 = vpop.f32.mrf.mxu3 }
 0x810   : > { %v3007_v39 = vpop.eup %3006 }
 0x811   : > { %v3009_v19 = vpop.eup %3008  ;;  %v1741_v37 = vadd.f32 1.0, %v3007_v39 }
 0x812   : > { %v1761_v4 = vadd.f32 1.0, %v3009_v19 }
 0x813   : > { %3010 = vrcp.f32 %v1741_v37  ;;  %v1753_v23 = vand.u32 2147483648, %v1741_v37  ;;  %v1751_v49 = vand.u32 2147483647, %v1741_v37  ;;  %vm1747_vm11 = vweird.f32 %v1741_v37 }
 0x814   : > { %3012 = vrcp.f32 %v1761_v4  ;;  %v1773_v8 = vand.u32 2147483648, %v1761_v4  ;;  %vm1767_vm15 = vweird.f32 %v1761_v4  ;;  %v1771_v6 = vand.u32 2147483647, %v1761_v4 }
 0x815   : > { %v1754_v51 = vor.u32 1.1754944e-38, %v1753_v23  ;;  %vm1752_vm13 = vcmp.eq.f32.partialorder %v1751_v49, 8.507059e+37 }
 0x816   : > { %v1774_v60 = vor.u32 1.1754944e-38, %v1773_v8  ;;  %vm1772_vm1 = vcmp.eq.f32.partialorder %v1771_v6, 8.507059e+37 }
 0x819   : > { %v3011_v26 = vpop.eup %3010 }
 0x81a   : > { %v3013_v27 = vpop.eup %3012  ;;  %v1743_v29 = vmul.f32 %v3011_v26, %v1741_v37  ;;  %vm1748_vm10 = vweird.f32 %v3011_v26 }
 0x81b   : > { %v1763_v15 = vmul.f32 %v3013_v27, %v1761_v4  ;;  %vm1749_vm12 = vmor %vm1747_vm11, %vm1748_vm10  ;;  %vm1768_vm14 = vweird.f32 %v3013_v27 }
 0x81c   : > { %v1744_v45 = vsub.f32 1.0, %v1743_v29  ;;  %vm1769_vm0 = vmor %vm1767_vm15, %vm1768_vm14 }
 0x81d   : > { %v1764_v21 = vsub.f32 1.0, %v1763_v15 }
 0x81e   : > { %v1745_v52 = vmul.f32 %v3011_v26, %v1744_v45 }
 0x81f   : > { %v1765_v35 = vmul.f32 %v3013_v27, %v1764_v21 }
 0x820   : > { %v1746_v55 = vadd.f32 %v3011_v26, %v1745_v52 }
 0x821   : > { %v1766_v16 = vadd.f32 %v3013_v27, %v1765_v35 }
 0x822   : > { %v1750_v10 = vsel %vm1749_vm12, %v3011_v26, %v1746_v55 }
 0x823   : > { %v1755_v41 = vsel %vm1752_vm13, %v1754_v51, %v1750_v10  ;;  %v1770_v48 = vsel %vm1769_vm0, %v3013_v27, %v1766_v16 }
 0x824   : > { %v1778_v40 = vmul.f32 %v1777_v59, %v1755_v41  ;;  %v1775_v18 = vsel %vm1772_vm1, %v1774_v60, %v1770_v48  ;;  %v2098_v48 = vsel %vm2097_vm4, 1, %v3151_v54 }
 0x825   : > { %v1781_v13 = vsub.f32 1.0, %v1775_v18  ;;  %v1783_v25 = vmul.f32 %v1775_v18, %v4140_v2 }
 0x826   : > { %v1779_v46 = vadd.f32 %v1778_v40, %v1696_v62  ;;  %v1994_v62 = vsel %vm1993_vm3, 1, %v3151_v54  ;;  %v2765_v40 = vld [vmem:[%s3253_s9 + $0x38] sm:$0xf] }
 0x827   : > { %1996 = vperm.xlu2 %2985, %v1994_v62  }
 0x828   : > { %3014 = vtanh.f32 %v1779_v46 }
 0x82e   : > { %v3015_v9 = vpop.eup %3014 }
 0x82f   : > { %v1782_v7 = vmul.f32 %v3015_v9, %v1781_v13  ;;  %v1800_v9 = vunpack.c.l.bf16 %v2765_v40  ;;  %2100 = vperm.xlu2 %2985, %v2098_v48  }
 0x831   : > { %v1784_v28 = vadd.f32 %v1783_v25, %v1782_v7 }
 0x833   : > { %v1791_v22 = vsel %vm1790_vm2, %v1784_v28, 0.0  ;;  %v4174_v39 = vsel %vm1790_vm2, %v1784_v28, %v4140_v2  ;;  %v2764_v2 = vld [vmem:[%s3253_s9 + $0x30] sm:$0xff] }
 0x834   : > { %2763 = vst [vmem:[%s3258_s12 + $0x28] sm:$0xff] %v1791_v22  ;;  %v1801_v19 = vpack.c.bf16 %v4174_v39, %v4174_v39  ;;  %v1798_v37 = vunpack.c.l.bf16 %v2764_v2  ;;  %v1799_v29 = vunpack.c.h.bf16 %v2764_v2 }
 0x836   : > { %1810 = vmatmul.bf16.vlgmr.msra.gmra.mxu1 %v1801_v19  ;;  %1823 = vmatmul.bf16.vlgmr.msra.gmra.mxu2 %v1801_v19 }
 0x837   : > { %1836 = vmatmul.bf16.vlgmr.msra.gmra.mxu3 %v1801_v19  ;;  %2036 = vmatpush.bf16.msra.mxu1 %v3919_v42 }
 0x838   : > { %2114 = vmatpush.bf16.msra.mxu2 %v3901_v47  ;;  %2127 = vmatpush.bf16.msra.mxu3 %v3905_v20 }
 0x83b   : > { %2037 = vmatpush.bf16.msra.mxu1 %v3925_v61 }
 0x83c   : > { %2115 = vmatpush.bf16.msra.mxu2 %v3911_v53  ;;  %2128 = vmatpush.bf16.msra.mxu3 %v3915_v3 }
 0x83f   : > { %2038 = vmatpush.bf16.msra.mxu1 %v3945_v34 }
 0x840   : > { %2116 = vmatpush.bf16.msra.mxu2 %v3932_v30  ;;  %2129 = vmatpush.bf16.msra.mxu3 %v3936_v1 }
 0x843   : > { %2039 = vmatpush.bf16.msra.mxu1 %v3962_v31 }
 0x844   : > { %2117 = vmatpush.bf16.msra.mxu2 %v3952_v12  ;;  %2130 = vmatpush.bf16.msra.mxu3 %v3956_v38 }
 0x847   : > { %2040 = vmatpush.bf16.msra.mxu1 %v3979_v44 }
 0x848   : > { %2118 = vmatpush.bf16.msra.mxu2 %v3970_v17  ;;  %2131 = vmatpush.bf16.msra.mxu3 %v3974_v14 }
 0x84b   : > { %2041 = vmatpush.bf16.msra.mxu1 %v3996_v57 }
 0x84c   : > { %2119 = vmatpush.bf16.msra.mxu2 %v3986_v33  ;;  %2132 = vmatpush.bf16.msra.mxu3 %v3990_v11 }
 0x84f   : > { %2042 = vmatpush.bf16.msra.mxu1 %v4013_v5 }
 0x850   : > { %2120 = vmatpush.bf16.msra.mxu2 %v4004_v58  ;;  %2133 = vmatpush.bf16.msra.mxu3 %v4008_v56 }
 0x853   : > { %2043 = vmatpush.bf16.msra.mxu1 %v4029_v24 }
 0x854   : > { %2121 = vmatpush.bf16.msra.mxu2 %v4020_v63  ;;  %2134 = vmatpush.bf16.msra.mxu3 %v4024_v36 }
 0x8b3   : > { %v1811_v4 = vpop.f32.mrf.mxu1 }
 0x8b4   : > { %v1841_v26 = vadd.f32 %v1811_v4, %v1798_v37 }
 0x8b6   : > { %v2766_v27 = vmul.f32 -1.442695, %v1841_v26 }
 0x8b8   : > { %3016 = vpow2.f32 %v2766_v27 }
 0x8b9   : > { %v1824_v15 = vpop.f32.mrf.mxu2 }
 0x8ba   : > { %v1861_v45 = vadd.f32 %v1824_v15, %v1799_v29  ;;  %v1837_v23 = vpop.f32.mrf.mxu3 }
 0x8bb   : > { %v1813_v21 = vpop.f32.mrf.mxu1  ;;  %v1881_v0 = vadd.f32 %v1837_v23, %v4097_v32 }
 0x8bc   : > { %v2767_v52 = vmul.f32 -1.442695, %v1861_v45 }
 0x8be   : > { %v3017_v49 = vpop.eup %3016  ;;  %3018 = vpow2.f32 %v2767_v52  ;;  %v1893_v52 = vpop.permute.xlu1 %1892 }
 0x8bf   : > { %v1845_v50 = vadd.f32 1.0, %v3017_v49  ;;  %vm1894_vm13 = vcmp.eq.s32.totalorder %v1893_v52, 1 }
 0x8c1   : > { %3020 = vrcp.f32 %v1845_v50  ;;  %v1826_v35 = vpop.f32.mrf.mxu2  ;;  %v1857_v8 = vand.u32 2147483648, %v1845_v50  ;;  %v1855_v46 = vand.u32 2147483647, %v1845_v50  ;;  %vm1851_vm6 = vweird.f32 %v1845_v50 }
 0x8c2   : > { %v1839_v55 = vpop.f32.mrf.mxu3 }
 0x8c3   : > { %v1858_v43 = vor.u32 1.1754944e-38, %v1857_v8  ;;  %vm1856_vm8 = vcmp.eq.f32.partialorder %v1855_v46, 8.507059e+37  ;;  %v2770_v46 = vld [vmem:[%s3253_s9 + $0x2c] sm:$0xf] }
 0x8c4   : > { %v3019_v51 = vpop.eup %3018 }
 0x8c5   : > { %v1865_v59 = vadd.f32 1.0, %v3019_v51 }
 0x8c7   : > { %v3021_v10 = vpop.eup %3020  ;;  %3022 = vrcp.f32 %v1865_v59  ;;  %v1877_v19 = vand.u32 2147483648, %v1865_v59  ;;  %v1875_v37 = vand.u32 2147483647, %v1865_v59  ;;  %vm1871_vm10 = vweird.f32 %v1865_v59 }
 0x8c8   : > { %v1847_v41 = vmul.f32 %v3021_v10, %v1845_v50  ;;  %vm1852_vm5 = vweird.f32 %v3021_v10 }
 0x8c9   : > { %vm1853_vm7 = vmor %vm1851_vm6, %vm1852_vm5  ;;  %v1878_v26 = vor.u32 1.1754944e-38, %v1877_v19  ;;  %vm1876_vm12 = vcmp.eq.f32.partialorder %v1875_v37, 8.507059e+37 }
 0x8ca   : > { %v1848_v16 = vsub.f32 1.0, %v1847_v41 }
 0x8cc   : > { %v1849_v6 = vmul.f32 %v3021_v10, %v1848_v16 }
 0x8cd   : > { %v3023_v60 = vpop.eup %3022 }
 0x8ce   : > { %v1867_v18 = vmul.f32 %v3023_v60, %v1865_v59  ;;  %v1850_v13 = vadd.f32 %v3021_v10, %v1849_v6  ;;  %vm1872_vm9 = vweird.f32 %v3023_v60 }
 0x8cf   : > { %vm1873_vm11 = vmor %vm1871_vm10, %vm1872_vm9 }
 0x8d0   : > { %v1868_v7 = vsub.f32 1.0, %v1867_v18  ;;  %v1854_v25 = vsel %vm1853_vm7, %v3021_v10, %v1850_v13  ;;  %v1904_v13 = vunpack.c.l.bf16 %v2770_v46 }
 0x8d1   : > { %v1859_v28 = vsel %vm1856_vm8, %v1858_v43, %v1854_v25 }
 0x8d2   : > { %v1869_v22 = vmul.f32 %v3023_v60, %v1868_v7  ;;  %v1882_v2 = vmul.f32 %v1881_v0, %v1859_v28 }
 0x8d4   : > { %v1870_v54 = vadd.f32 %v3023_v60, %v1869_v22  ;;  %v1883_v4 = vadd.f32 %v1882_v2, %v1800_v9 }
 0x8d6   : > { %v1874_v27 = vsel %vm1873_vm11, %v3023_v60, %v1870_v54  ;;  %3024 = vtanh.f32 %v1883_v4 }
 0x8d7   : > { %v1879_v29 = vsel %vm1876_vm12, %v1878_v26, %v1874_v27  ;;  %v1997_v27 = vpop.permute.xlu2 %1996 }
 0x8d8   : > { %v1885_v15 = vsub.f32 1.0, %v1879_v29  ;;  %v1887_v23 = vmul.f32 %v1879_v29, %v4174_v39  ;;  %vm1998_vm6 = vcmp.eq.s32.totalorder %v1997_v27, 1 }
 0x8dc   : > { %v3025_v45 = vpop.eup %3024 }
 0x8dd   : > { %v1886_v21 = vmul.f32 %v3025_v45, %v1885_v15 }
 0x8df   : > { %v1888_v49 = vadd.f32 %v1887_v23, %v1886_v21 }
 0x8e1   : > { %v1895_v50 = vsel %vm1894_vm13, %v1888_v49, 0.0  ;;  %v4212_v35 = vsel %vm1894_vm13, %v1888_v49, %v4174_v39  ;;  %v2774_v49 = vld [vmem:[%s3253_s9 + $0x18] sm:$0xff] }
 0x8e2   : > { %2768 = vst [vmem:[%s3258_s12 + $0x20] sm:$0xff] %v1895_v50  ;;  %v1905_v55 = vpack.c.bf16 %v4212_v35, %v4212_v35  ;;  %v2007_v50 = vunpack.c.h.bf16 %v2774_v49 }
 0x8e4   : > { %1914 = vmatmul.bf16.vlgmr.msrb.gmra.mxu0 %v1905_v55  ;;  %1927 = vmatmul.bf16.vlgmr.msrb.gmra.mxu1 %v1905_v55 }
 0x8e5   : > { %1940 = vmatmul.bf16.vlgmr.msrb.gmra.mxu2 %v1905_v55  ;;  %2140 = vmatpush.bf16.msrb.mxu0 %v3919_v42 }
 0x8e6   : > { %2217 = vmatpush.bf16.msrb.mxu1 %v3901_v47  ;;  %2230 = vmatpush.bf16.msrb.mxu2 %v3905_v20  ;;  %v2769_v47 = vld [vmem:[%s3253_s9 + $0x24] sm:$0xff] }
 0x8e7   : > { %v1902_v20 = vunpack.c.l.bf16 %v2769_v47 }
 0x8e9   : > { %2141 = vmatpush.bf16.msrb.mxu0 %v3925_v61 }
 0x8ea   : > { %2218 = vmatpush.bf16.msrb.mxu1 %v3911_v53  ;;  %2231 = vmatpush.bf16.msrb.mxu2 %v3915_v3  ;;  %v1903_v53 = vunpack.c.h.bf16 %v2769_v47 }
 0x8ed   : > { %2142 = vmatpush.bf16.msrb.mxu0 %v3945_v34 }
 0x8ee   : > { %2219 = vmatpush.bf16.msrb.mxu1 %v3932_v30  ;;  %2232 = vmatpush.bf16.msrb.mxu2 %v3936_v1 }
 0x8f1   : > { %2143 = vmatpush.bf16.msrb.mxu0 %v3962_v31 }
 0x8f2   : > { %2220 = vmatpush.bf16.msrb.mxu1 %v3952_v12  ;;  %2233 = vmatpush.bf16.msrb.mxu2 %v3956_v38 }
 0x8f5   : > { %2144 = vmatpush.bf16.msrb.mxu0 %v3979_v44 }
 0x8f6   : > { %2221 = vmatpush.bf16.msrb.mxu1 %v3970_v17  ;;  %2234 = vmatpush.bf16.msrb.mxu2 %v3974_v14 }
 0x8f9   : > { %2145 = vmatpush.bf16.msrb.mxu0 %v3996_v57 }
 0x8fa   : > { %2222 = vmatpush.bf16.msrb.mxu1 %v3986_v33  ;;  %2235 = vmatpush.bf16.msrb.mxu2 %v3990_v11 }
 0x8fd   : > { %2146 = vmatpush.bf16.msrb.mxu0 %v4013_v5 }
 0x8fe   : > { %2223 = vmatpush.bf16.msrb.mxu1 %v4004_v58  ;;  %2236 = vmatpush.bf16.msrb.mxu2 %v4008_v56 }
 0x901   : > { %2147 = vmatpush.bf16.msrb.mxu0 %v4029_v24 }
 0x902   : > { %2224 = vmatpush.bf16.msrb.mxu1 %v4020_v63  ;;  %2237 = vmatpush.bf16.msrb.mxu2 %v4024_v36 }
 0x961   : > { %v1915_v3 = vpop.f32.mrf.mxu0  ;;  %v1928_v30 = vpop.f32.mrf.mxu1 }
 0x962   : > { %v1945_v1 = vadd.f32 %v1915_v3, %v1902_v20  ;;  %v1965_v12 = vadd.f32 %v1928_v30, %v1903_v53  ;;  %v2006_v20 = vunpack.c.l.bf16 %v2774_v49 }
 0x964   : > { %v2771_v38 = vmul.f32 -1.442695, %v1945_v1  ;;  %v2772_v17 = vmul.f32 -1.442695, %v1965_v12 }
 0x966   : > { %3026 = vpow2.f32 %v2771_v38 }
 0x967   : > { %3028 = vpow2.f32 %v2772_v17 }
 0x968   : > { %v1941_v14 = vpop.f32.mrf.mxu2 }
 0x969   : > { %v1917_v33 = vpop.f32.mrf.mxu0  ;;  %v1930_v11 = vpop.f32.mrf.mxu1  ;;  %v1985_v43 = vadd.f32 %v1941_v14, %v4097_v32 }
 0x96c   : > { %v3027_v58 = vpop.eup %3026 }
 0x96d   : > { %v3029_v56 = vpop.eup %3028  ;;  %v1949_v63 = vadd.f32 1.0, %v3027_v58 }
 0x96e   : > { %v1969_v39 = vadd.f32 1.0, %v3029_v56 }
 0x96f   : > { %3030 = vrcp.f32 %v1949_v63  ;;  %v1961_v8 = vand.u32 2147483648, %v1949_v63  ;;  %v1959_v6 = vand.u32 2147483647, %v1949_v63  ;;  %vm1955_vm15 = vweird.f32 %v1949_v63 }
 0x970   : > { %3032 = vrcp.f32 %v1969_v39  ;;  %v1943_v36 = vpop.f32.mrf.mxu2  ;;  %v1981_v28 = vand.u32 2147483648, %v1969_v39  ;;  %vm1975_vm3 = vweird.f32 %v1969_v39  ;;  %v1979_v22 = vand.u32 2147483647, %v1969_v39 }
 0x971   : > { %v1962_v18 = vor.u32 1.1754944e-38, %v1961_v8  ;;  %vm1960_vm1 = vcmp.eq.f32.partialorder %v1959_v6, 8.507059e+37 }
 0x972   : > { %v1982_v37 = vor.u32 1.1754944e-38, %v1981_v28  ;;  %vm1980_vm5 = vcmp.eq.f32.partialorder %v1979_v22, 8.507059e+37 }
 0x975   : > { %v3031_v51 = vpop.eup %3030 }
 0x976   : > { %v3033_v59 = vpop.eup %3032  ;;  %v1951_v62 = vmul.f32 %v3031_v51, %v1949_v63  ;;  %vm1956_vm14 = vweird.f32 %v3031_v51 }
 0x977   : > { %v1971_v10 = vmul.f32 %v3033_v59, %v1969_v39  ;;  %vm1957_vm0 = vmor %vm1955_vm15, %vm1956_vm14  ;;  %vm1976_vm2 = vweird.f32 %v3033_v59  ;;  %v2775_v39 = vld [vmem:[%s3253_s9 + $0x20] sm:$0xf] }
 0x978   : > { %v1952_v41 = vsub.f32 1.0, %v1951_v62  ;;  %vm1977_vm4 = vmor %vm1975_vm3, %vm1976_vm2  ;;  %v2008_v62 = vunpack.c.l.bf16 %v2775_v39 }
 0x979   : > { %v1972_v16 = vsub.f32 1.0, %v1971_v10 }
 0x97a   : > { %v1953_v40 = vmul.f32 %v3031_v51, %v1952_v41 }
 0x97b   : > { %v1973_v48 = vmul.f32 %v3033_v59, %v1972_v16 }
 0x97c   : > { %v1954_v60 = vadd.f32 %v3031_v51, %v1953_v40 }
 0x97d   : > { %v1974_v25 = vadd.f32 %v3033_v59, %v1973_v48 }
 0x97e   : > { %v1958_v9 = vsel %vm1957_vm0, %v3031_v51, %v1954_v60 }
 0x97f   : > { %v1963_v7 = vsel %vm1960_vm1, %v1962_v18, %v1958_v9  ;;  %v1978_v2 = vsel %vm1977_vm4, %v3033_v59, %v1974_v25 }
 0x980   : > { %v1986_v0 = vmul.f32 %v1985_v43, %v1963_v7  ;;  %v1983_v54 = vsel %vm1980_vm5, %v1982_v37, %v1978_v2  ;;  %v2101_v43 = vpop.permute.xlu2 %2100  ;;  %v2779_v2 = vld [vmem:[%s3253_s9 + $0xc] sm:$0xff] }
 0x981   : > { %v1989_v4 = vsub.f32 1.0, %v1983_v54  ;;  %v1991_v15 = vmul.f32 %v1983_v54, %v4212_v35  ;;  %vm2102_vm15 = vcmp.eq.s32.totalorder %v2101_v43, 1  ;;  %v2110_v54 = vunpack.c.l.bf16 %v2779_v2 }
 0x982   : > { %v1987_v19 = vadd.f32 %v1986_v0, %v1904_v13 }
 0x984   : > { %3034 = vtanh.f32 %v1987_v19 }
 0x98a   : > { %v3035_v26 = vpop.eup %3034 }
 0x98b   : > { %v1990_v29 = vmul.f32 %v3035_v26, %v1989_v4  ;;  %v2111_v4 = vunpack.c.h.bf16 %v2779_v2 }
 0x98d   : > { %v1992_v45 = vadd.f32 %v1991_v15, %v1990_v29 }
 0x98f   : > { %v1999_v21 = vsel %vm1998_vm6, %v1992_v45, 0.0  ;;  %v4246_v23 = vsel %vm1998_vm6, %v1992_v45, %v4212_v35 }
 0x990   : > { %2773 = vst [vmem:[%s3258_s12 + $0x18] sm:$0xff] %v1999_v21  ;;  %v2009_v52 = vpack.c.bf16 %v4246_v23, %v4246_v23 }
 0x992   : > { %2018 = vmatmul.bf16.vlgmr.msrb.gmra.mxu3 %v2009_v52  ;;  %2031 = vmatmul.bf16.vlgmr.msra.gmra.mxu0 %v2009_v52 }
 0x993   : > { %2044 = vmatmul.bf16.vlgmr.msra.gmra.mxu1 %v2009_v52  ;;  %2243 = vmatpush.bf16.msrb.mxu3 %v3919_v42 }
 0x997   : > { %2244 = vmatpush.bf16.msrb.mxu3 %v3925_v61 }
 0x99b   : > { %2245 = vmatpush.bf16.msrb.mxu3 %v3945_v34 }
 0x99f   : > { %2246 = vmatpush.bf16.msrb.mxu3 %v3962_v31 }
 0x9a3   : > { %2247 = vmatpush.bf16.msrb.mxu3 %v3979_v44 }
 0x9a7   : > { %2248 = vmatpush.bf16.msrb.mxu3 %v3996_v57 }
 0x9ab   : > { %2249 = vmatpush.bf16.msrb.mxu3 %v4013_v5 }
 0x9af   : > { %2250 = vmatpush.bf16.msrb.mxu3 %v4029_v24 }
 0xa0f   : > { %v2032_v35 = vpop.f32.mrf.mxu0 }
 0xa10   : > { %v2069_v55 = vadd.f32 %v2032_v35, %v2007_v50  ;;  %v2045_v47 = vpop.f32.mrf.mxu1 }
 0xa11   : > { %v2089_v59 = vadd.f32 %v2045_v47, %v4097_v32 }
 0xa12   : > { %v2777_v42 = vmul.f32 -1.442695, %v2069_v55 }
 0xa14   : > { %3036 = vpow2.f32 %v2777_v42 }
 0xa15   : > { %v2019_v61 = vpop.f32.mrf.mxu3 }
 0xa16   : > { %v2049_v34 = vadd.f32 %v2019_v61, %v2006_v20 }
 0xa17   : > { %v2034_v53 = vpop.f32.mrf.mxu0 }
 0xa18   : > { %v2776_v31 = vmul.f32 -1.442695, %v2049_v34  ;;  %v2047_v3 = vpop.f32.mrf.mxu1 }
 0xa1a   : > { %v3037_v44 = vpop.eup %3036  ;;  %3038 = vpow2.f32 %v2776_v31 }
 0xa1b   : > { %v2073_v57 = vadd.f32 1.0, %v3037_v44 }
 0xa1d   : > { %v2021_v30 = vpop.f32.mrf.mxu3  ;;  %3040 = vrcp.f32 %v2073_v57  ;;  %v2085_v8 = vand.u32 2147483648, %v2073_v57  ;;  %vm2079_vm12 = vweird.f32 %v2073_v57  ;;  %v2083_v6 = vand.u32 2147483647, %v2073_v57 }
 0xa1e   : > { %v2780_v30 = vld [vmem:[%s3253_s9 + $0x14] sm:$0xf] }
 0xa1f   : > { %v2086_v60 = vor.u32 1.1754944e-38, %v2085_v8  ;;  %vm2084_vm14 = vcmp.eq.f32.partialorder %v2083_v6, 8.507059e+37 }
 0xa20   : > { %v3039_v5 = vpop.eup %3038 }
 0xa21   : > { %v2053_v24 = vadd.f32 1.0, %v3039_v5 }
 0xa23   : > { %3042 = vrcp.f32 %v2053_v24  ;;  %v3041_v1 = vpop.eup %3040  ;;  %v2065_v11 = vand.u32 2147483648, %v2053_v24  ;;  %v2063_v56 = vand.u32 2147483647, %v2053_v24  ;;  %vm2059_vm8 = vweird.f32 %v2053_v24 }
 0xa24   : > { %v2075_v12 = vmul.f32 %v3041_v1, %v2073_v57  ;;  %vm2080_vm11 = vweird.f32 %v3041_v1 }
 0xa25   : > { %v2066_v51 = vor.u32 1.1754944e-38, %v2065_v11  ;;  %vm2064_vm10 = vcmp.eq.f32.partialorder %v2063_v56, 8.507059e+37  ;;  %vm2081_vm13 = vmor %vm2079_vm12, %vm2080_vm11 }
 0xa26   : > { %v2076_v14 = vsub.f32 1.0, %v2075_v12 }
 0xa28   : > { %v2077_v63 = vmul.f32 %v3041_v1, %v2076_v14 }
 0xa29   : > { %v3043_v38 = vpop.eup %3042 }
 0xa2a   : > { %v2055_v17 = vmul.f32 %v3043_v38, %v2053_v24  ;;  %vm2060_vm7 = vweird.f32 %v3043_v38  ;;  %v2078_v41 = vadd.f32 %v3041_v1, %v2077_v63 }
 0xa2b   : > { %vm2061_vm9 = vmor %vm2059_vm8, %vm2060_vm7 }
 0xa2c   : > { %v2056_v33 = vsub.f32 1.0, %v2055_v17  ;;  %v2082_v48 = vsel %vm2081_vm13, %v3041_v1, %v2078_v41 }
 0xa2d   : > { %v2087_v18 = vsel %vm2084_vm14, %v2086_v60, %v2082_v48  ;;  %v2211_v48 = vld [vmem:[%s3253_s9] sm:$0xff] }
 0xa2e   : > { %v2057_v58 = vmul.f32 %v3043_v38, %v2056_v33  ;;  %v2093_v13 = vsub.f32 1.0, %v2087_v18  ;;  %v2095_v25 = vmul.f32 %v2087_v18, %v4246_v23  ;;  %v2213_v60 = vunpack.c.l.bf16 %v2211_v48 }
 0xa2f   : > { %v2214_v43 = vunpack.c.h.bf16 %v2211_v48 }
 0xa30   : > { %v2058_v36 = vadd.f32 %v3043_v38, %v2057_v58 }
 0xa32   : > { %v2062_v10 = vsel %vm2061_vm9, %v3043_v38, %v2058_v36  ;;  %v2112_v38 = vunpack.c.l.bf16 %v2780_v30 }
 0xa33   : > { %v2067_v16 = vsel %vm2064_vm10, %v2066_v51, %v2062_v10  ;;  %v2205_v10 = vpop.permute.xlu0 %2204 }
 0xa34   : > { %v2090_v40 = vmul.f32 %v2089_v59, %v2067_v16  ;;  %vm2206_vm8 = vcmp.eq.s32.totalorder %v2205_v10, 1 }
 0xa36   : > { %v2091_v46 = vadd.f32 %v2090_v40, %v2008_v62 }
 0xa38   : > { %3044 = vtanh.f32 %v2091_v46 }
 0xa3e   : > { %v3045_v9 = vpop.eup %3044 }
 0xa3f   : > { %v2094_v7 = vmul.f32 %v3045_v9, %v2093_v13 }
 0xa41   : > { %v2096_v0 = vadd.f32 %v2095_v25, %v2094_v7 }
 0xa43   : > { %v2103_v28 = vsel %vm2102_vm15, %v2096_v0, 0.0  ;;  %v4264_v22 = vsel %vm2102_vm15, %v2096_v0, %v4246_v23 }
 0xa44   : > { %2778 = vst [vmem:[%s3258_s12 + $0x10] sm:$0xff] %v2103_v28  ;;  %v2113_v19 = vpack.c.bf16 %v4264_v22, %v4264_v22 }
 0xa46   : > { %2122 = vmatmul.bf16.vlgmr.msra.gmra.mxu2 %v2113_v19  ;;  %2135 = vmatmul.bf16.vlgmr.msra.gmra.mxu3 %v2113_v19 }
 0xa47   : > { %2148 = vmatmul.bf16.vlgmr.msrb.gmra.mxu0 %v2113_v19 }
 0xac4   : > { %v2149_v37 = vpop.f32.mrf.mxu0 }
 0xac5   : > { %v2193_v12 = vadd.f32 %v2149_v37, %v4097_v32 }
 0xac9   : > { %v2123_v26 = vpop.f32.mrf.mxu2  ;;  %v2136_v27 = vpop.f32.mrf.mxu3 }
 0xaca   : > { %v2153_v29 = vadd.f32 %v2123_v26, %v2110_v54  ;;  %v2173_v15 = vadd.f32 %v2136_v27, %v2111_v4 }
 0xacc   : > { %v2781_v45 = vmul.f32 -1.442695, %v2153_v29  ;;  %v2782_v21 = vmul.f32 -1.442695, %v2173_v15  ;;  %v2151_v52 = vpop.f32.mrf.mxu0 }
 0xace   : > { %3046 = vpow2.f32 %v2781_v45 }
 0xacf   : > { %3048 = vpow2.f32 %v2782_v21  ;;  %v2212_v21 = vld [vmem:[%s3253_s9 + $0x8] sm:$0xf] }
 0xad1   : > { %v2125_v23 = vpop.f32.mrf.mxu2  ;;  %v2138_v49 = vpop.f32.mrf.mxu3 }
 0xad4   : > { %v3047_v50 = vpop.eup %3046 }
 0xad5   : > { %v3049_v35 = vpop.eup %3048  ;;  %v2157_v55 = vadd.f32 1.0, %v3047_v50 }
 0xad6   : > { %v2177_v47 = vadd.f32 1.0, %v3049_v35 }
 0xad7   : > { %3050 = vrcp.f32 %v2157_v55  ;;  %v2169_v31 = vand.u32 2147483648, %v2157_v55  ;;  %v2167_v57 = vand.u32 2147483647, %v2157_v55  ;;  %vm2163_vm1 = vweird.f32 %v2157_v55 }
 0xad8   : > { %3052 = vrcp.f32 %v2177_v47  ;;  %v2189_v58 = vand.u32 2147483648, %v2177_v47  ;;  %vm2183_vm5 = vweird.f32 %v2177_v47  ;;  %v2187_v56 = vand.u32 2147483647, %v2177_v47 }
 0xad9   : > { %v2170_v1 = vor.u32 1.1754944e-38, %v2169_v31  ;;  %vm2168_vm3 = vcmp.eq.f32.partialorder %v2167_v57, 8.507059e+37 }
 0xada   : > { %v2190_v36 = vor.u32 1.1754944e-38, %v2189_v58  ;;  %vm2188_vm7 = vcmp.eq.f32.partialorder %v2187_v56, 8.507059e+37 }
 0xadd   : > { %v3051_v42 = vpop.eup %3050 }
 0xade   : > { %v3053_v20 = vpop.eup %3052  ;;  %v2159_v61 = vmul.f32 %v3051_v42, %v2157_v55  ;;  %vm2164_vm0 = vweird.f32 %v3051_v42  ;;  %v2215_v55 = vunpack.c.l.bf16 %v2212_v21 }
 0xadf   : > { %v2179_v34 = vmul.f32 %v3053_v20, %v2177_v47  ;;  %vm2165_vm2 = vmor %vm2163_vm1, %vm2164_vm0  ;;  %vm2184_vm4 = vweird.f32 %v3053_v20 }
 0xae0   : > { %v2160_v53 = vsub.f32 1.0, %v2159_v61  ;;  %vm2185_vm6 = vmor %vm2183_vm5, %vm2184_vm4 }
 0xae1   : > { %v2180_v3 = vsub.f32 1.0, %v2179_v34 }
 0xae2   : > { %v2161_v44 = vmul.f32 %v3051_v42, %v2160_v53 }
 0xae3   : > { %v2181_v5 = vmul.f32 %v3053_v20, %v2180_v3 }
 0xae4   : > { %v2162_v24 = vadd.f32 %v3051_v42, %v2161_v44 }
 0xae5   : > { %v2182_v33 = vadd.f32 %v3053_v20, %v2181_v5 }
 0xae6   : > { %v2166_v17 = vsel %vm2165_vm2, %v3051_v42, %v2162_v24 }
 0xae7   : > { %v2171_v14 = vsel %vm2168_vm3, %v2170_v1, %v2166_v17  ;;  %v2186_v39 = vsel %vm2185_vm6, %v3053_v20, %v2182_v33 }
 0xae8   : > { %v2194_v11 = vmul.f32 %v2193_v12, %v2171_v14  ;;  %v2191_v51 = vsel %vm2188_vm7, %v2190_v36, %v2186_v39 }
 0xae9   : > { %v2197_v59 = vsub.f32 1.0, %v2191_v51  ;;  %v2199_v16 = vmul.f32 %v2191_v51, %v4264_v22 }
 0xaea   : > { %v2195_v63 = vadd.f32 %v2194_v11, %v2112_v38 }
 0xaec   : > { %3054 = vtanh.f32 %v2195_v63 }
 0xaf2   : > { %v3055_v62 = vpop.eup %3054 }
 0xaf3   : > { %v2198_v41 = vmul.f32 %v3055_v62, %v2197_v59 }
 0xaf5   : > { %v2200_v8 = vadd.f32 %v2199_v16, %v2198_v41 }
 0xaf7   : > { %v2207_v40 = vsel %vm2206_vm8, %v2200_v8, 0.0  ;;  %v4274_v6 = vsel %vm2206_vm8, %v2200_v8, %v4264_v22 }
 0xaf8   : > { %2783 = vst [vmem:[%s3258_s12 + $0x8] sm:$0xff] %v2207_v40  ;;  %v2216_v46 = vpack.c.bf16 %v4274_v6, %v4274_v6 }
 0xafa   : > { %2225 = vmatmul.bf16.vlgmr.msrb.gmra.mxu1 %v2216_v46  ;;  %2238 = vmatmul.bf16.vlgmr.msrb.gmra.mxu2 %v2216_v46 }
 0xafb   : > { %2251 = vmatmul.bf16.vlgmr.msrb.gmra.mxu3 %v2216_v46 }
 0xb77   : > { %v2226_v18 = vpop.f32.mrf.mxu1 }
 0xb78   : > { %v2256_v13 = vadd.f32 %v2226_v18, %v2213_v60 }
 0xb7a   : > { %v2784_v9 = vmul.f32 -1.442695, %v2256_v13 }
 0xb7c   : > { %3056 = vpow2.f32 %v2784_v9 }
 0xb7d   : > { %v2239_v7 = vpop.f32.mrf.mxu2 }
 0xb7e   : > { %v2276_v25 = vadd.f32 %v2239_v7, %v2214_v43  ;;  %v2252_v0 = vpop.f32.mrf.mxu3 }
 0xb7f   : > { %v2228_v28 = vpop.f32.mrf.mxu1  ;;  %v2296_v61 = vadd.f32 %v2252_v0, %v4097_v32  ;;  %v2308_v32 = vpop.permute.xlu1 %2307 }
 0xb80   : > { %v2785_v22 = vmul.f32 -1.442695, %v2276_v25  ;;  %vm2309_vm1 = vcmp.eq.s32.totalorder %v2308_v32, 1 }
 0xb82   : > { %v3057_v19 = vpop.eup %3056  ;;  %3058 = vpow2.f32 %v2785_v22 }
 0xb83   : > { %v2260_v2 = vadd.f32 1.0, %v3057_v19 }
 0xb85   : > { %3060 = vrcp.f32 %v2260_v2  ;;  %v2241_v37 = vpop.f32.mrf.mxu2  ;;  %v2272_v45 = vand.u32 2147483648, %v2260_v2  ;;  %v2270_v23 = vand.u32 2147483647, %v2260_v2  ;;  %vm2266_vm10 = vweird.f32 %v2260_v2 }
 0xb86   : > { %v2254_v54 = vpop.f32.mrf.mxu3 }
 0xb87   : > { %v2273_v47 = vor.u32 1.1754944e-38, %v2272_v45  ;;  %vm2271_vm12 = vcmp.eq.f32.partialorder %v2270_v23, 8.507059e+37 }
 0xb88   : > { %v3059_v4 = vpop.eup %3058 }
 0xb89   : > { %v2280_v26 = vadd.f32 1.0, %v3059_v4 }
 0xb8b   : > { %v3061_v27 = vpop.eup %3060  ;;  %3062 = vrcp.f32 %v2280_v26  ;;  %v2292_v31 = vand.u32 2147483648, %v2280_v26  ;;  %v2290_v44 = vand.u32 2147483647, %v2280_v26  ;;  %vm2286_vm14 = vweird.f32 %v2280_v26 }
 0xb8c   : > { %v2262_v29 = vmul.f32 %v3061_v27, %v2260_v2  ;;  %vm2267_vm9 = vweird.f32 %v3061_v27 }
 0xb8d   : > { %vm2268_vm11 = vmor %vm2266_vm10, %vm2267_vm9  ;;  %v2293_v5 = vor.u32 1.1754944e-38, %v2292_v31  ;;  %vm2291_vm0 = vcmp.eq.f32.partialorder %v2290_v44, 8.507059e+37 }
 0xb8e   : > { %v2263_v15 = vsub.f32 1.0, %v2262_v29 }
 0xb90   : > { %v2264_v52 = vmul.f32 %v3061_v27, %v2263_v15 }
 0xb91   : > { %v3063_v49 = vpop.eup %3062 }
 0xb92   : > { %v2282_v50 = vmul.f32 %v3063_v49, %v2280_v26  ;;  %v2265_v35 = vadd.f32 %v3061_v27, %v2264_v52  ;;  %vm2287_vm13 = vweird.f32 %v3063_v49 }
 0xb93   : > { %vm2288_vm15 = vmor %vm2286_vm14, %vm2287_vm13 }
 0xb94   : > { %v2283_v42 = vsub.f32 1.0, %v2282_v50  ;;  %v2269_v20 = vsel %vm2268_vm11, %v3061_v27, %v2265_v35 }
 0xb95   : > { %v2274_v34 = vsel %vm2271_vm12, %v2273_v47, %v2269_v20 }
 0xb96   : > { %v2284_v53 = vmul.f32 %v3063_v49, %v2283_v42  ;;  %v2297_v3 = vmul.f32 %v2296_v61, %v2274_v34 }
 0xb98   : > { %v2285_v57 = vadd.f32 %v3063_v49, %v2284_v53  ;;  %v2298_v30 = vadd.f32 %v2297_v3, %v2215_v55 }
 0xb9a   : > { %v2289_v24 = vsel %vm2288_vm15, %v3063_v49, %v2285_v57  ;;  %3064 = vtanh.f32 %v2298_v30 }
 0xb9b   : > { %v2294_v1 = vsel %vm2291_vm0, %v2293_v5, %v2289_v24 }
 0xb9c   : > { %v2300_v12 = vsub.f32 1.0, %v2294_v1  ;;  %v2302_v14 = vmul.f32 %v2294_v1, %v4274_v6 }
 0xba0   : > { %v3065_v38 = vpop.eup %3064 }
 0xba1   : > { %v2301_v17 = vmul.f32 %v3065_v38, %v2300_v12 }
 0xba3   : > { %v2303_v33 = vadd.f32 %v2302_v14, %v2301_v17 }
 0xba5   : > { %v2310_v11 = vsel %vm2309_vm1, %v2303_v33, 0.0  ;;  %v2312_v58 = vsel %vm2309_vm1, %v2303_v33, %v4274_v6 }
 0xba6   : > { %2311 = vst [vmem:[%s3258_s12] sm:$0xff] %v2310_v11 }
 0xba7   : > { %2313 = vst [vmem:[%s3263_s15] sm:$0xff] %v2312_v58 }
 0xba8 PF: > { %s19_s23 = sadd.s32 1, %s3146_s23   ;;  %s4393_s18 = smov %s3130_s19 }
 0xba9   : > { %p16_p2 = scmp.ge.s32.totalorder %s19_s23, 4   ;;  %s4394_s19 = smov %s3134_s20 }
 0xbaa   : > { %s4395_s20 = smov %s3227_s29  ;;  %s4396_s21 = smov %s3142_s22 }
 0xbab   : > { %s4397_s22 = smov %s4399_s25  ;;  %18 = sbr.rel (!%p16_p2) target bundleno = 4 (0x4), region = 133 }
 0xbb0   :  { %2361 = vsyncpa [#allocation3], 1 }
 0xbb1   :  { %2363 = vsyncpa [#allocation3 + $0x1], 1 }

</bundles_post_ra>
